<compile_context>
chip_gen: v7x
topology: tpu7x:2x2x1
jax: 0.10.0
libtpu: 0.0.40
codegen_flags: <defaults>
</compile_context>

<pallas_src>
import math
import functools

import jax
import jax.numpy as jnp
import numpy as np
from jax.experimental import pallas as pl
from jax.experimental.pallas import tpu as pltpu


def _vmem_limit_bytes():
    """Per-generation VMEM scoped limit (v5e/v6e have 128 MiB physical)."""
    kind = ""
    try:
        kind = jax.devices()[0].device_kind.lower()
    except Exception:
        pass
    if "v5" in kind or "v6" in kind:
        return 96 * 1024 * 1024
    return 32 * 1024 * 1024   # conservative default (v7x has 64 MiB per TC)


VMEM_LIMIT = _vmem_limit_bytes()


def _cparams(*sem):
    return pltpu.CompilerParams(
        dimension_semantics=sem, vmem_limit_bytes=VMEM_LIMIT
    )


def _row_tile(M, cap=1024):
    """Largest multiple-of-8 divisor of M that is <= cap; falls back to M."""
    if M <= 16:
        return M
    best = M
    for t in range(8, min(M - 1, cap) + 1, 8):
        if M % t == 0:
            best = t
    return best


def _rms(x, g, eps):
    var = jnp.mean(x * x, axis=-1, keepdims=True)
    return (x * jax.lax.rsqrt(var + eps)) * g


def _softmax_last(s):
    s = s - jnp.max(s, axis=-1, keepdims=True)
    p = jnp.exp(s)
    return p * pl.reciprocal(jnp.sum(p, axis=-1, keepdims=True), approx=True)


# ----------------------------------------------------------------------------
# Fused USM layer kernel (one batch element per grid step)
#   activation layout: [C, R, D]  (column-major over the MSA grid)
# ----------------------------------------------------------------------------
def _usm_layer_kernel(m_ref, mask_ref, rowkb_ref, norms_ref,
                      col_wqkv_ref, col_wo_ref, row_wqkv_ref, row_wo_ref,
                      w13_ref, w2_ref, o_ref, *,
                      eps, num_heads, col_kv, row_kv, head_dim, ffn_dim):
    C, R, D = m_ref.shape[1], m_ref.shape[2], m_ref.shape[3]
    L = C * R
    H, Dh, F = num_heads, head_dim, ffn_dim

    m = m_ref[0].astype(jnp.float32)                        # [C, R, D]
    mask = mask_ref[0].astype(jnp.float32)                  # [C, R] (1 = valid)
    col_bias = ((mask - 1.0) * 1e9)[:, None, :]             # [C, 1, R] key pad

    # ---- 1) pre-norm column attention (attend across MSA rows) + residual ----
    x = m.reshape(L, D)
    xn = _rms(x, norms_ref[0:1, :].astype(jnp.float32), eps).astype(
        col_wqkv_ref.dtype)
    qkv = jnp.dot(xn, col_wqkv_ref[...], preferred_element_type=jnp.float32)
    dq, dkv = H * Dh, col_kv * Dh
    rep = H // col_kv
    heads = []
    for h in range(H):                          # 1/sqrt(Dh) pre-folded into Wq
        g = h // rep                            # GQA: static kv-group selection
        qh = qkv[:, h * Dh:(h + 1) * Dh].reshape(C, R, Dh)
        kh = qkv[:, dq + g * Dh: dq + (g + 1) * Dh].reshape(C, R, Dh)
        vh = qkv[:, dq + dkv + g * Dh: dq + dkv + (g + 1) * Dh].reshape(C, R, Dh)
        s = jax.lax.dot_general(qh, kh, (((2,), (2,)), ((0,), (0,))),
                                preferred_element_type=jnp.float32)  # [C,R,R]
        p = _softmax_last(s + col_bias)
        heads.append(jax.lax.dot_general(p, vh, (((2,), (1,)), ((0,), (0,))),
                                         preferred_element_type=jnp.float32))
    o_cat = jnp.concatenate(heads, axis=-1).reshape(L, D)   # [L, H*Dh = D]
    x1 = x + jnp.dot(o_cat.astype(col_wo_ref.dtype), col_wo_ref[...],
                     preferred_element_type=jnp.float32)

    # ---- 2) masked mean over rows + pre-norm row attention on summary ----
    m1 = x1.reshape(C, R, D)
    cnt = jnp.sum(mask, axis=1, keepdims=True)               # [C, 1]
    sm = jnp.sum(m1 * mask[:, :, None], axis=1) / (cnt + 1e-10)   # [C, D]
    xn2 = _rms(sm, norms_ref[1:2, :].astype(jnp.float32), eps).astype(
        row_wqkv_ref.dtype)
    qkv2 = jnp.dot(xn2, row_wqkv_ref[...], preferred_element_type=jnp.float32)
    dq2, dkv2 = H * Dh, row_kv * Dh
    rep2 = H // row_kv
    rowkb = rowkb_ref[0].astype(jnp.float32)                 # [1, C]
    heads2 = []
    for h in range(H):
        g = h // rep2
        qh = qkv2[:, h * Dh:(h + 1) * Dh]
        kh = qkv2[:, dq2 + g * Dh: dq2 + (g + 1) * Dh]
        vh = qkv2[:, dq2 + dkv2 + g * Dh: dq2 + dkv2 + (g + 1) * Dh]
        s = jax.lax.dot_general(qh, kh, (((1,), (1,)), ((), ())),
                                preferred_element_type=jnp.float32)   # [C, C]
        p = _softmax_last(s + rowkb)
        heads2.append(jnp.dot(p, vh, preferred_element_type=jnp.float32))
    h2 = jnp.dot(jnp.concatenate(heads2, axis=-1).astype(row_wo_ref.dtype),
                 row_wo_ref[...], preferred_element_type=jnp.float32)  # [C, D]
    x2 = (m1 + h2[:, None, :]).reshape(L, D)    # broadcast residual over rows

    # ---- 3) pre-norm SwiGLU MLP + residual ----
    xn3 = _rms(x2, norms_ref[2:3, :].astype(jnp.float32), eps).astype(
        w13_ref.dtype)
    a = jnp.dot(xn3, w13_ref[...], preferred_element_type=jnp.float32)  # [L,2F]
    a1 = a[:, :F]
    a3 = a[:, F:]
    gact = (a1 * jax.nn.sigmoid(a1) * a3).astype(w2_ref.dtype)   # SiLU(a1)*a3
    y = jnp.dot(gact, w2_ref[...], preferred_element_type=jnp.float32)
    o_ref[0] = (x2 + y).reshape(C, R, D).astype(o_ref.dtype)


def usm_layer(m, maskf, row_key_bias, p, cfg):
    bs, C, R, D = m.shape
    H = cfg["num_heads"]
    Dh = D // H
    col_kv = cfg["num_col_kv_heads"] or H
    row_kv = cfg["num_row_kv_heads"] or H
    F = cfg["ffn_dim"]
    Fc = p["col_wqkv"].shape[1]
    Fr = p["row_wqkv"].shape[1]
    kernel = functools.partial(
        _usm_layer_kernel, eps=cfg["eps"], num_heads=H, col_kv=col_kv,
        row_kv=row_kv, head_dim=Dh, ffn_dim=F)
    return pl.pallas_call(
        kernel,
        out_shape=jax.ShapeDtypeStruct((bs, C, R, D), m.dtype),
        grid=(bs,),
        in_specs=[
            pl.BlockSpec((1, C, R, D), lambda b: (b, 0, 0, 0)),
            pl.BlockSpec((1, C, R), lambda b: (b, 0, 0)),
            pl.BlockSpec((1, 1, C), lambda b: (b, 0, 0)),
            pl.BlockSpec((3, D), lambda b: (0, 0)),
            pl.BlockSpec((D, Fc), lambda b: (0, 0)),
            pl.BlockSpec((D, D), lambda b: (0, 0)),
            pl.BlockSpec((D, Fr), lambda b: (0, 0)),
            pl.BlockSpec((D, D), lambda b: (0, 0)),
            pl.BlockSpec((D, 2 * F), lambda b: (0, 0)),
            pl.BlockSpec((F, D), lambda b: (0, 0)),
        ],
        out_specs=pl.BlockSpec((1, C, R, D), lambda b: (b, 0, 0, 0)),
        compiler_params=_cparams("parallel"),
    )(m, maskf, row_key_bias, p["norms"], p["col_wqkv"], p["col_wo"],
      p["row_wqkv"], p["row_wo"], p["w13"], p["w2"])


# ----------------------------------------------------------------------------
# Head: fused norm_final + lm_head (vocab padded to 128 lanes)
# ----------------------------------------------------------------------------
def _norm_matmul_kernel(x_ref, g_ref, w_ref, o_ref, *, eps):
    x = x_ref[...].astype(jnp.float32)
    xn = _rms(x, g_ref[...].astype(jnp.float32), eps).astype(w_ref.dtype)
    o_ref[...] = jnp.dot(
        xn, w_ref[...], preferred_element_type=jnp.float32).astype(o_ref.dtype)


def norm_matmul(x2d, g, w, eps):
    M, D = x2d.shape
    N = w.shape[1]
    tm = _row_tile(M)
    return pl.pallas_call(
        functools.partial(_norm_matmul_kernel, eps=eps),
        out_shape=jax.ShapeDtypeStruct((M, N), jnp.float32),
        grid=(pl.cdiv(M, tm),),
        in_specs=[
            pl.BlockSpec((tm, D), lambda i: (i, 0)),
            pl.BlockSpec((1, D), lambda i: (0, 0)),
            pl.BlockSpec((D, N), lambda i: (0, 0)),
        ],
        out_specs=pl.BlockSpec((tm, N), lambda i: (i, 0)),
        compiler_params=_cparams("parallel"),
    )(x2d, g, w)


# ----------------------------------------------------------------------------
# Model glue
# ----------------------------------------------------------------------------
def usm_forward(params, token_ids, *, cfg, use_mask):
    """token_ids: [bs, num_seq, seq_len] int32 -> logits [bs, num_seq, seq_len, V]."""
    D = cfg["dim"]
    V = cfg["vocab_size"]
    bs, R, C = token_ids.shape
    # activations live in [bs, C, R, D] so per-column attention needs no
    # in-kernel transposes (batch dim = column).
    tok_t = jnp.swapaxes(token_ids, 1, 2)                       # [bs, C, R]
    # TODO(synk): embedding gather stays in plain JAX (data-dependent gather).
    x = jnp.take(params["embedding"], tok_t, axis=0).astype(jnp.bfloat16)
    if use_mask:
        maskf = (tok_t != cfg["padding_idx"]).astype(jnp.float32)   # [bs, C, R]
    else:
        maskf = jnp.ones((bs, C, R), jnp.float32)
    row_key_bias = jnp.where(
        jnp.sum(maskf, axis=2) > 0, 0.0, -1e9)[:, None, :]          # [bs, 1, C]

    for lp in params["layers"]:
        x = usm_layer(x, maskf, row_key_bias, lp, cfg)

    logits_p = norm_matmul(x.reshape(-1, D), params["norm_final"],
                           params["lm_head_padded"], cfg["eps"])
    logits = logits_p[:, :V].reshape(bs, C, R, V)
    return jnp.swapaxes(logits, 1, 2)                           # [bs, R, C, V]


# ----------------------------------------------------------------------------
# Deterministic parameter initialisation (bf16 weights for the MXU fast path)
# ----------------------------------------------------------------------------
def init_params(key, cfg):
    D = cfg["dim"]
    H = cfg["num_heads"]
    Dh = D // H
    F = cfg["ffn_dim"]
    V = cfg["vocab_size"]
    Vp = ((V + 127) // 128) * 128
    std = 0.02 / math.sqrt(2 * cfg["num_layers"])
    wdt = jnp.bfloat16
    col_kv = cfg["num_col_kv_heads"] or H
    row_kv = cfg["num_row_kv_heads"] or H
    q_scale = 1.0 / math.sqrt(Dh)

    def normal(k, shape):
        return std * jax.random.normal(k, shape, jnp.float32)

    keys = iter(jax.random.split(key, 2 + 6 * cfg["num_layers"]))

    emb = normal(next(keys), (V, D))
    if cfg["padding_idx"] is not None:
        emb = emb.at[cfg["padding_idx"]].set(0.0)    # nn.Embedding(padding_idx)
    lm_head = jnp.zeros((D, Vp), jnp.float32).at[:, :V].set(
        normal(next(keys), (D, V)))

    params = {
        "embedding": emb.astype(wdt),
        "norm_final": jnp.ones((1, D), jnp.float32),
        "lm_head_padded": lm_head.astype(wdt),
        "layers": [],
    }
    for _ in range(cfg["num_layers"]):
        col_wqkv = normal(next(keys), (D, (H + 2 * col_kv) * Dh))
        col_wqkv = col_wqkv.at[:, :H * Dh].multiply(q_scale)  # fold 1/sqrt(Dh)
        row_wqkv = normal(next(keys), (D, (H + 2 * row_kv) * Dh))
        row_wqkv = row_wqkv.at[:, :H * Dh].multiply(q_scale)
        lp = {
            "col_wqkv": col_wqkv.astype(wdt),
            "col_wo": normal(next(keys), (H * Dh, D)).astype(wdt),
            "row_wqkv": row_wqkv.astype(wdt),
            "row_wo": normal(next(keys), (H * Dh, D)).astype(wdt),
            "w13": normal(next(keys), (D, 2 * F)).astype(wdt),   # [w1 | w3]
            "w2": normal(next(keys), (F, D)).astype(wdt),
            "norms": jnp.ones((3, D), jnp.float32),              # norm_1/2/3
        }
        params["layers"].append(lp)
    return params


# ----------------------------------------------------------------------------
# Main
# ----------------------------------------------------------------------------
if __name__ == "__main__":
    D = 128
    # TODO(synk): SwiGLU hidden-dim formula of the original repo is not shown;
    # using LLaMA-style int(8*dim/3) rounded up to a multiple of 128.
    ffn_dim = 128 * ((int(8 * D / 3) + 127) // 128)  # 384
    cfg = dict(
        vocab_size=32,
        dim=D,
        num_heads=4,
        num_row_kv_heads=None,   # None -> num_heads (module default)
        num_col_kv_heads=2,      # exercises the GQA path
        num_layers=2,
        ffn_dim=ffn_dim,
        eps=1e-5,
        padding_idx=0,
    )

    key = jax.random.PRNGKey(0)
    params = init_params(key, cfg)

    bs, num_seq, seq_len = 2, 4, 8
    tkey = jax.random.fold_in(key, 123)
    token_ids = jax.random.randint(
        tkey, (bs, num_seq, seq_len), 1, cfg["vocab_size"], dtype=jnp.int32
    )
    # inject padding at the tail of a couple of rows to exercise masked paths
    token_ids = token_ids.at[0, 1, -2:].set(cfg["padding_idx"])
    token_ids = token_ids.at[1, 3, -3:].set(cfg["padding_idx"])

    # mirror torch's data-dependent "mask=None if no padding" decision in Python
    use_mask = bool(np.any(np.asarray(token_ids) == cfg["padding_idx"]))

    fwd = jax.jit(functools.partial(usm_forward, cfg=cfg, use_mask=use_mask))
    logits = fwd(params, token_ids)
    jax.block_until_ready(logits)

    assert logits.shape == (bs, num_seq, seq_len, cfg["vocab_size"])
    assert bool(jnp.all(jnp.isfinite(logits)))
    print("KERNEL_OK")
</pallas_src>

<mosaic_0001>
module attributes {stable_mosaic.version = 11 : i64} {
  func.func @_norm_matmul_kernel(%arg0: i32, %arg1: memref<32x128xbf16, #tpu.memory_space<vmem>>, %arg2: memref<1x128xf32, #tpu.memory_space<vmem>>, %arg3: memref<128x128xbf16, #tpu.memory_space<vmem>>, %arg4: memref<32x128xf32, #tpu.memory_space<vmem>>) attributes {dimension_semantics = [#tpu.dimension_semantics<parallel>], iteration_bounds = array<i64: 2>, scalar_prefetch = 0 : i64, scratch_operands = 0 : i64, tpu.core_type = #tpu.core_type<tc>, window_params = [{transform_indices = @transform_0, window_bounds = array<i64: 32, 128>}, {pipeline_mode = #tpu.pipeline_mode<synchronous>, transform_indices = @transform_1, window_bounds = array<i64: 1, 128>}, {pipeline_mode = #tpu.pipeline_mode<synchronous>, transform_indices = @transform_2, window_bounds = array<i64: 128, 128>}, {transform_indices = @transform_3, window_bounds = array<i64: 32, 128>}]} {
    %c0 = arith.constant 0 : index
    %c0_0 = arith.constant 0 : index
    %0 = vector.load %arg1[%c0, %c0_0] : memref<32x128xbf16, #tpu.memory_space<vmem>>, vector<32x128xbf16>
    %1 = arith.extf %0 : vector<32x128xbf16> to vector<32x128xf32>
    %c0_1 = arith.constant 0 : index
    %c0_2 = arith.constant 0 : index
    %2 = vector.load %arg2[%c0_1, %c0_2] : memref<1x128xf32, #tpu.memory_space<vmem>>, vector<1x128xf32>
    %3 = arith.mulf %1, %1 : vector<32x128xf32>
    %cst = arith.constant dense<0.000000e+00> : vector<32xf32>
    %4 = vector.multi_reduction <add>, %3, %cst [1] : vector<32x128xf32> to vector<32xf32>
    %5 = vector.shape_cast %4 : vector<32xf32> to vector<32x1xf32>
    %cst_3 = arith.constant 1.280000e+02 : f32
    %6 = vector.broadcast %cst_3 : f32 to vector<32x1xf32>
    %7 = arith.divf %5, %6 : vector<32x1xf32>
    %cst_4 = arith.constant 9.99999974E-6 : f32
    %8 = vector.broadcast %cst_4 : f32 to vector<32x1xf32>
    %9 = arith.addf %7, %8 : vector<32x1xf32>
    %10 = math.rsqrt %9 : vector<32x1xf32>
    %11 = vector.broadcast %10 : vector<32x1xf32> to vector<32x128xf32>
    %12 = arith.mulf %1, %11 : vector<32x128xf32>
    %13 = vector.broadcast %2 : vector<1x128xf32> to vector<32x128xf32>
    %14 = arith.mulf %12, %13 : vector<32x128xf32>
    %15 = arith.truncf %14 : vector<32x128xf32> to vector<32x128xbf16>
    %c0_5 = arith.constant 0 : index
    %c0_6 = arith.constant 0 : index
    %16 = vector.load %arg3[%c0_5, %c0_6] : memref<128x128xbf16, #tpu.memory_space<vmem>>, vector<128x128xbf16>
    %cst_7 = arith.constant dense<0.000000e+00> : vector<32x128xf32>
    %17 = tpu.matmul %15, %16, %cst_7 {dimension_numbers = #tpu.dot_dimension_numbers<[1], [0], [0], [1], [0, 0, 1, 1], [], []>} : vector<32x128xbf16>, vector<128x128xbf16>, vector<32x128xf32> -> vector<32x128xf32>
    %c0_8 = arith.constant 0 : index
    %c0_9 = arith.constant 0 : index
    %18 = vector.load %arg4[%c0_8, %c0_9] : memref<32x128xf32, #tpu.memory_space<vmem>>, vector<32x128xf32>
    tpu.vector_store %arg4[%c0_8, %c0_9], %17 {strides = array<i32>} : memref<32x128xf32, #tpu.memory_space<vmem>>, vector<32x128xf32>,
    return
  }
  func.func @transform_0(%arg0: i32) -> (i32, i32) {
    %c0_i32 = arith.constant 0 : i32
    %c0_i32_0 = arith.constant 0 : i32
    return %arg0, %c0_i32 : i32, i32
  }
  func.func @transform_1(%arg0: i32) -> (i32, i32) {
    %c0_i32 = arith.constant 0 : i32
    %c0_i32_0 = arith.constant 0 : i32
    %c0_i32_1 = arith.constant 0 : i32
    return %c0_i32, %c0_i32_0 : i32, i32
  }
  func.func @transform_2(%arg0: i32) -> (i32, i32) {
    %c0_i32 = arith.constant 0 : i32
    %c0_i32_0 = arith.constant 0 : i32
    %c0_i32_1 = arith.constant 0 : i32
    return %c0_i32, %c0_i32_0 : i32, i32
  }
  func.func @transform_3(%arg0: i32) -> (i32, i32) {
    %c0_i32 = arith.constant 0 : i32
    %c0_i32_0 = arith.constant 0 : i32
    return %arg0, %c0_i32 : i32, i32
  }
}

module attributes {stable_mosaic.version = 11 : i64} {
  func.func @_usm_layer_kernel(%arg0: i32, %arg1: memref<1x8x4x128xbf16, #tpu.memory_space<vmem>>, %arg2: memref<1x8x4xf32, #tpu.memory_space<vmem>>, %arg3: memref<1x1x8xf32, #tpu.memory_space<vmem>>, %arg4: memref<3x128xf32, #tpu.memory_space<vmem>>, %arg5: memref<128x256xbf16, #tpu.memory_space<vmem>>, %arg6: memref<128x128xbf16, #tpu.memory_space<vmem>>, %arg7: memref<128x384xbf16, #tpu.memory_space<vmem>>, %arg8: memref<128x128xbf16, #tpu.memory_space<vmem>>, %arg9: memref<128x768xbf16, #tpu.memory_space<vmem>>, %arg10: memref<384x128xbf16, #tpu.memory_space<vmem>>, %arg11: memref<1x8x4x128xbf16, #tpu.memory_space<vmem>>) attributes {dimension_semantics = [#tpu.dimension_semantics<parallel>], iteration_bounds = array<i64: 2>, scalar_prefetch = 0 : i64, scratch_operands = 0 : i64, tpu.core_type = #tpu.core_type<tc>, window_params = [{transform_indices = @transform_0, window_bounds = array<i64: 1, 8, 4, 128>}, {transform_indices = @transform_1, window_bounds = array<i64: 1, 8, 4>}, {transform_indices = @transform_2, window_bounds = array<i64: 1, 1, 8>}, {pipeline_mode = #tpu.pipeline_mode<synchronous>, transform_indices = @transform_3, window_bounds = array<i64: 3, 128>}, {pipeline_mode = #tpu.pipeline_mode<synchronous>, transform_indices = @transform_4, window_bounds = array<i64: 128, 256>}, {pipeline_mode = #tpu.pipeline_mode<synchronous>, transform_indices = @transform_5, window_bounds = array<i64: 128, 128>}, {pipeline_mode = #tpu.pipeline_mode<synchronous>, transform_indices = @transform_6, window_bounds = array<i64: 128, 384>}, {pipeline_mode = #tpu.pipeline_mode<synchronous>, transform_indices = @transform_7, window_bounds = array<i64: 128, 128>}, {pipeline_mode = #tpu.pipeline_mode<synchronous>, transform_indices = @transform_8, window_bounds = array<i64: 128, 768>}, {pipeline_mode = #tpu.pipeline_mode<synchronous>, transform_indices = @transform_9, window_bounds = array<i64: 384, 128>}, {transform_indices = @transform_10, window_bounds = array<i64: 1, 8, 4, 128>}]} {
    %c0 = arith.constant 0 : index
    %c0_0 = arith.constant 0 : index
    %c0_1 = arith.constant 0 : index
    %c0_2 = arith.constant 0 : index
    %0 = vector.load %arg1[%c0, %c0_0, %c0_1, %c0_2] : memref<1x8x4x128xbf16, #tpu.memory_space<vmem>>, vector<1x8x4x128xbf16>
    %1 = vector.shape_cast %0 : vector<1x8x4x128xbf16> to vector<8x4x128xbf16>
    %2 = arith.extf %1 : vector<8x4x128xbf16> to vector<8x4x128xf32>
    %c0_3 = arith.constant 0 : index
    %c0_4 = arith.constant 0 : index
    %c0_5 = arith.constant 0 : index
    %3 = vector.load %arg2[%c0_3, %c0_4, %c0_5] : memref<1x8x4xf32, #tpu.memory_space<vmem>>, vector<1x8x4xf32>
    %4 = vector.shape_cast %3 : vector<1x8x4xf32> to vector<8x4xf32>
    %cst = arith.constant 1.000000e+00 : f32
    %5 = vector.broadcast %cst : f32 to vector<8x4xf32>
    %6 = arith.subf %4, %5 : vector<8x4xf32>
    %cst_6 = arith.constant 1.000000e+09 : f32
    %7 = vector.broadcast %cst_6 : f32 to vector<8x4xf32>
    %8 = arith.mulf %6, %7 : vector<8x4xf32>
    %9 = vector.shape_cast %8 : vector<8x4xf32> to vector<8x1x4xf32>
    %10 = vector.shape_cast %2 : vector<8x4x128xf32> to vector<32x128xf32>
    %c0_7 = arith.constant 0 : index
    %c0_8 = arith.constant 0 : index
    %11 = vector.load %arg4[%c0_7, %c0_8] : memref<3x128xf32, #tpu.memory_space<vmem>>, vector<1x128xf32>
    %12 = arith.mulf %10, %10 : vector<32x128xf32>
    %cst_9 = arith.constant dense<0.000000e+00> : vector<32xf32>
    %13 = vector.multi_reduction <add>, %12, %cst_9 [1] : vector<32x128xf32> to vector<32xf32>
    %14 = vector.shape_cast %13 : vector<32xf32> to vector<32x1xf32>
    %cst_10 = arith.constant 1.280000e+02 : f32
    %15 = vector.broadcast %cst_10 : f32 to vector<32x1xf32>
    %16 = arith.divf %14, %15 : vector<32x1xf32>
    %cst_11 = arith.constant 9.99999974E-6 : f32
    %17 = vector.broadcast %cst_11 : f32 to vector<32x1xf32>
    %18 = arith.addf %16, %17 : vector<32x1xf32>
    %19 = math.rsqrt %18 : vector<32x1xf32>
    %20 = vector.broadcast %19 : vector<32x1xf32> to vector<32x128xf32>
    %21 = arith.mulf %10, %20 : vector<32x128xf32>
    %22 = vector.broadcast %11 : vector<1x128xf32> to vector<32x128xf32>
    %23 = arith.mulf %21, %22 : vector<32x128xf32>
    %24 = arith.truncf %23 : vector<32x128xf32> to vector<32x128xbf16>
    %c0_12 = arith.constant 0 : index
    %c0_13 = arith.constant 0 : index
    %25 = vector.load %arg5[%c0_12, %c0_13] : memref<128x256xbf16, #tpu.memory_space<vmem>>, vector<128x256xbf16>
    %cst_14 = arith.constant dense<0.000000e+00> : vector<32x256xf32>
    %26 = tpu.matmul %24, %25, %cst_14 {dimension_numbers = #tpu.dot_dimension_numbers<[1], [0], [0], [1], [0, 0, 1, 1], [], []>} : vector<32x128xbf16>, vector<128x256xbf16>, vector<32x256xf32> -> vector<32x256xf32>
    %27 = vector.extract_strided_slice %26 {offsets = [0, 0], sizes = [32, 32], strides = [1, 1]} : vector<32x256xf32> to vector<32x32xf32>
    %28 = vector.shape_cast %27 : vector<32x32xf32> to vector<8x4x32xf32>
    %29 = vector.extract_strided_slice %26 {offsets = [0, 128], sizes = [32, 32], strides = [1, 1]} : vector<32x256xf32> to vector<32x32xf32>
    %30 = vector.shape_cast %29 : vector<32x32xf32> to vector<8x4x32xf32>
    %31 = vector.extract_strided_slice %26 {offsets = [0, 192], sizes = [32, 32], strides = [1, 1]} : vector<32x256xf32> to vector<32x32xf32>
    %32 = vector.shape_cast %31 : vector<32x32xf32> to vector<8x4x32xf32>
    %cst_15 = arith.constant dense<0.000000e+00> : vector<8x4x4xf32>
    %33 = tpu.matmul %28, %30, %cst_15 {dimension_numbers = #tpu.dot_dimension_numbers<[2], [2], [1], [1], [0, 0, 0, 1, 1, 1], [0], [0]>} : vector<8x4x32xf32>, vector<8x4x32xf32>, vector<8x4x4xf32> -> vector<8x4x4xf32>
    %34 = vector.broadcast %9 : vector<8x1x4xf32> to vector<8x4x4xf32>
    %35 = arith.addf %33, %34 : vector<8x4x4xf32>
    %cst_16 = arith.constant dense<0xFF800000> : vector<8x4xf32>
    %36 = vector.multi_reduction <maximumf>, %35, %cst_16 [2] : vector<8x4x4xf32> to vector<8x4xf32>
    %37 = vector.shape_cast %36 : vector<8x4xf32> to vector<8x4x1xf32>
    %38 = vector.broadcast %37 : vector<8x4x1xf32> to vector<8x4x4xf32>
    %39 = arith.subf %35, %38 : vector<8x4x4xf32>
    %40 = math.exp %39 : vector<8x4x4xf32>
    %cst_17 = arith.constant dense<0.000000e+00> : vector<8x4xf32>
    %41 = vector.multi_reduction <add>, %40, %cst_17 [2] : vector<8x4x4xf32> to vector<8x4xf32>
    %42 = vector.shape_cast %41 : vector<8x4xf32> to vector<8x4x1xf32>
    %43 = tpu.reciprocal %42 {approx = true} : vector<8x4x1xf32> -> vector<8x4x1xf32>
    %44 = vector.broadcast %43 : vector<8x4x1xf32> to vector<8x4x4xf32>
    %45 = arith.mulf %40, %44 : vector<8x4x4xf32>
    %cst_18 = arith.constant dense<0.000000e+00> : vector<8x4x32xf32>
    %46 = tpu.matmul %45, %32, %cst_18 {dimension_numbers = #tpu.dot_dimension_numbers<[2], [1], [1], [2], [0, 0, 0, 1, 1, 2], [0], [0]>} : vector<8x4x4xf32>, vector<8x4x32xf32>, vector<8x4x32xf32> -> vector<8x4x32xf32>
    %47 = vector.extract_strided_slice %26 {offsets = [0, 32], sizes = [32, 32], strides = [1, 1]} : vector<32x256xf32> to vector<32x32xf32>
    %48 = vector.shape_cast %47 : vector<32x32xf32> to vector<8x4x32xf32>
    %49 = vector.extract_strided_slice %26 {offsets = [0, 128], sizes = [32, 32], strides = [1, 1]} : vector<32x256xf32> to vector<32x32xf32>
    %50 = vector.shape_cast %49 : vector<32x32xf32> to vector<8x4x32xf32>
    %51 = vector.extract_strided_slice %26 {offsets = [0, 192], sizes = [32, 32], strides = [1, 1]} : vector<32x256xf32> to vector<32x32xf32>
    %52 = vector.shape_cast %51 : vector<32x32xf32> to vector<8x4x32xf32>
    %cst_19 = arith.constant dense<0.000000e+00> : vector<8x4x4xf32>
    %53 = tpu.matmul %48, %50, %cst_19 {dimension_numbers = #tpu.dot_dimension_numbers<[2], [2], [1], [1], [0, 0, 0, 1, 1, 1], [0], [0]>} : vector<8x4x32xf32>, vector<8x4x32xf32>, vector<8x4x4xf32> -> vector<8x4x4xf32>
    %54 = vector.broadcast %9 : vector<8x1x4xf32> to vector<8x4x4xf32>
    %55 = arith.addf %53, %54 : vector<8x4x4xf32>
    %cst_20 = arith.constant dense<0xFF800000> : vector<8x4xf32>
    %56 = vector.multi_reduction <maximumf>, %55, %cst_20 [2] : vector<8x4x4xf32> to vector<8x4xf32>
    %57 = vector.shape_cast %56 : vector<8x4xf32> to vector<8x4x1xf32>
    %58 = vector.broadcast %57 : vector<8x4x1xf32> to vector<8x4x4xf32>
    %59 = arith.subf %55, %58 : vector<8x4x4xf32>
    %60 = math.exp %59 : vector<8x4x4xf32>
    %cst_21 = arith.constant dense<0.000000e+00> : vector<8x4xf32>
    %61 = vector.multi_reduction <add>, %60, %cst_21 [2] : vector<8x4x4xf32> to vector<8x4xf32>
    %62 = vector.shape_cast %61 : vector<8x4xf32> to vector<8x4x1xf32>
    %63 = tpu.reciprocal %62 {approx = true} : vector<8x4x1xf32> -> vector<8x4x1xf32>
    %64 = vector.broadcast %63 : vector<8x4x1xf32> to vector<8x4x4xf32>
    %65 = arith.mulf %60, %64 : vector<8x4x4xf32>
    %cst_22 = arith.constant dense<0.000000e+00> : vector<8x4x32xf32>
    %66 = tpu.matmul %65, %52, %cst_22 {dimension_numbers = #tpu.dot_dimension_numbers<[2], [1], [1], [2], [0, 0, 0, 1, 1, 2], [0], [0]>} : vector<8x4x4xf32>, vector<8x4x32xf32>, vector<8x4x32xf32> -> vector<8x4x32xf32>
    %67 = vector.extract_strided_slice %26 {offsets = [0, 64], sizes = [32, 32], strides = [1, 1]} : vector<32x256xf32> to vector<32x32xf32>
    %68 = vector.shape_cast %67 : vector<32x32xf32> to vector<8x4x32xf32>
    %69 = vector.extract_strided_slice %26 {offsets = [0, 160], sizes = [32, 32], strides = [1, 1]} : vector<32x256xf32> to vector<32x32xf32>
    %70 = vector.shape_cast %69 : vector<32x32xf32> to vector<8x4x32xf32>
    %71 = vector.extract_strided_slice %26 {offsets = [0, 224], sizes = [32, 32], strides = [1, 1]} : vector<32x256xf32> to vector<32x32xf32>
    %72 = vector.shape_cast %71 : vector<32x32xf32> to vector<8x4x32xf32>
    %cst_23 = arith.constant dense<0.000000e+00> : vector<8x4x4xf32>
    %73 = tpu.matmul %68, %70, %cst_23 {dimension_numbers = #tpu.dot_dimension_numbers<[2], [2], [1], [1], [0, 0, 0, 1, 1, 1], [0], [0]>} : vector<8x4x32xf32>, vector<8x4x32xf32>, vector<8x4x4xf32> -> vector<8x4x4xf32>
    %74 = vector.broadcast %9 : vector<8x1x4xf32> to vector<8x4x4xf32>
    %75 = arith.addf %73, %74 : vector<8x4x4xf32>
    %cst_24 = arith.constant dense<0xFF800000> : vector<8x4xf32>
    %76 = vector.multi_reduction <maximumf>, %75, %cst_24 [2] : vector<8x4x4xf32> to vector<8x4xf32>
    %77 = vector.shape_cast %76 : vector<8x4xf32> to vector<8x4x1xf32>
    %78 = vector.broadcast %77 : vector<8x4x1xf32> to vector<8x4x4xf32>
    %79 = arith.subf %75, %78 : vector<8x4x4xf32>
    %80 = math.exp %79 : vector<8x4x4xf32>
    %cst_25 = arith.constant dense<0.000000e+00> : vector<8x4xf32>
    %81 = vector.multi_reduction <add>, %80, %cst_25 [2] : vector<8x4x4xf32> to vector<8x4xf32>
    %82 = vector.shape_cast %81 : vector<8x4xf32> to vector<8x4x1xf32>
    %83 = tpu.reciprocal %82 {approx = true} : vector<8x4x1xf32> -> vector<8x4x1xf32>
    %84 = vector.broadcast %83 : vector<8x4x1xf32> to vector<8x4x4xf32>
    %85 = arith.mulf %80, %84 : vector<8x4x4xf32>
    %cst_26 = arith.constant dense<0.000000e+00> : vector<8x4x32xf32>
    %86 = tpu.matmul %85, %72, %cst_26 {dimension_numbers = #tpu.dot_dimension_numbers<[2], [1], [1], [2], [0, 0, 0, 1, 1, 2], [0], [0]>} : vector<8x4x4xf32>, vector<8x4x32xf32>, vector<8x4x32xf32> -> vector<8x4x32xf32>
    %87 = vector.extract_strided_slice %26 {offsets = [0, 96], sizes = [32, 32], strides = [1, 1]} : vector<32x256xf32> to vector<32x32xf32>
    %88 = vector.shape_cast %87 : vector<32x32xf32> to vector<8x4x32xf32>
    %89 = vector.extract_strided_slice %26 {offsets = [0, 160], sizes = [32, 32], strides = [1, 1]} : vector<32x256xf32> to vector<32x32xf32>
    %90 = vector.shape_cast %89 : vector<32x32xf32> to vector<8x4x32xf32>
    %91 = vector.extract_strided_slice %26 {offsets = [0, 224], sizes = [32, 32], strides = [1, 1]} : vector<32x256xf32> to vector<32x32xf32>
    %92 = vector.shape_cast %91 : vector<32x32xf32> to vector<8x4x32xf32>
    %cst_27 = arith.constant dense<0.000000e+00> : vector<8x4x4xf32>
    %93 = tpu.matmul %88, %90, %cst_27 {dimension_numbers = #tpu.dot_dimension_numbers<[2], [2], [1], [1], [0, 0, 0, 1, 1, 1], [0], [0]>} : vector<8x4x32xf32>, vector<8x4x32xf32>, vector<8x4x4xf32> -> vector<8x4x4xf32>
    %94 = vector.broadcast %9 : vector<8x1x4xf32> to vector<8x4x4xf32>
    %95 = arith.addf %93, %94 : vector<8x4x4xf32>
    %cst_28 = arith.constant dense<0xFF800000> : vector<8x4xf32>
    %96 = vector.multi_reduction <maximumf>, %95, %cst_28 [2] : vector<8x4x4xf32> to vector<8x4xf32>
    %97 = vector.shape_cast %96 : vector<8x4xf32> to vector<8x4x1xf32>
    %98 = vector.broadcast %97 : vector<8x4x1xf32> to vector<8x4x4xf32>
    %99 = arith.subf %95, %98 : vector<8x4x4xf32>
    %100 = math.exp %99 : vector<8x4x4xf32>
    %cst_29 = arith.constant dense<0.000000e+00> : vector<8x4xf32>
    %101 = vector.multi_reduction <add>, %100, %cst_29 [2] : vector<8x4x4xf32> to vector<8x4xf32>
    %102 = vector.shape_cast %101 : vector<8x4xf32> to vector<8x4x1xf32>
    %103 = tpu.reciprocal %102 {approx = true} : vector<8x4x1xf32> -> vector<8x4x1xf32>
    %104 = vector.broadcast %103 : vector<8x4x1xf32> to vector<8x4x4xf32>
    %105 = arith.mulf %100, %104 : vector<8x4x4xf32>
    %cst_30 = arith.constant dense<0.000000e+00> : vector<8x4x32xf32>
    %106 = tpu.matmul %105, %92, %cst_30 {dimension_numbers = #tpu.dot_dimension_numbers<[2], [1], [1], [2], [0, 0, 0, 1, 1, 2], [0], [0]>} : vector<8x4x4xf32>, vector<8x4x32xf32>, vector<8x4x32xf32> -> vector<8x4x32xf32>
    %107 = tpu.concatenate %46, %66, %86, %106 in 2 : vector<8x4x32xf32>, vector<8x4x32xf32>, vector<8x4x32xf32>, vector<8x4x32xf32> -> vector<8x4x128xf32>
    %108 = vector.shape_cast %107 : vector<8x4x128xf32> to vector<32x128xf32>
    %109 = arith.truncf %108 : vector<32x128xf32> to vector<32x128xbf16>
    %c0_31 = arith.constant 0 : index
    %c0_32 = arith.constant 0 : index
    %110 = vector.load %arg6[%c0_31, %c0_32] : memref<128x128xbf16, #tpu.memory_space<vmem>>, vector<128x128xbf16>
    %cst_33 = arith.constant dense<0.000000e+00> : vector<32x128xf32>
    %111 = tpu.matmul %109, %110, %cst_33 {dimension_numbers = #tpu.dot_dimension_numbers<[1], [0], [0], [1], [0, 0, 1, 1], [], []>} : vector<32x128xbf16>, vector<128x128xbf16>, vector<32x128xf32> -> vector<32x128xf32>
    %112 = arith.addf %10, %111 : vector<32x128xf32>
    %113 = vector.shape_cast %112 : vector<32x128xf32> to vector<8x4x128xf32>
    %cst_34 = arith.constant dense<0.000000e+00> : vector<8xf32>
    %114 = vector.multi_reduction <add>, %4, %cst_34 [1] : vector<8x4xf32> to vector<8xf32>
    %115 = vector.shape_cast %114 : vector<8xf32> to vector<8x1xf32>
    %116 = vector.shape_cast %4 : vector<8x4xf32> to vector<8x4x1xf32>
    %117 = vector.broadcast %116 : vector<8x4x1xf32> to vector<8x4x128xf32>
    %118 = arith.mulf %113, %117 : vector<8x4x128xf32>
    %cst_35 = arith.constant dense<0.000000e+00> : vector<8x128xf32>
    %119 = vector.multi_reduction <add>, %118, %cst_35 [1] : vector<8x4x128xf32> to vector<8x128xf32>
    %cst_36 = arith.constant 1.000000e-10 : f32
    %120 = vector.broadcast %cst_36 : f32 to vector<8x1xf32>
    %121 = arith.addf %115, %120 : vector<8x1xf32>
    %122 = vector.broadcast %121 : vector<8x1xf32> to vector<8x128xf32>
    %123 = arith.divf %119, %122 : vector<8x128xf32>
    %c1 = arith.constant 1 : index
    %c0_37 = arith.constant 0 : index
    %124 = vector.load %arg4[%c1, %c0_37] : memref<3x128xf32, #tpu.memory_space<vmem>>, vector<1x128xf32>
    %125 = arith.mulf %123, %123 : vector<8x128xf32>
    %cst_38 = arith.constant dense<0.000000e+00> : vector<8xf32>
    %126 = vector.multi_reduction <add>, %125, %cst_38 [1] : vector<8x128xf32> to vector<8xf32>
    %127 = vector.shape_cast %126 : vector<8xf32> to vector<8x1xf32>
    %cst_39 = arith.constant 1.280000e+02 : f32
    %128 = vector.broadcast %cst_39 : f32 to vector<8x1xf32>
    %129 = arith.divf %127, %128 : vector<8x1xf32>
    %cst_40 = arith.constant 9.99999974E-6 : f32
    %130 = vector.broadcast %cst_40 : f32 to vector<8x1xf32>
    %131 = arith.addf %129, %130 : vector<8x1xf32>
    %132 = math.rsqrt %131 : vector<8x1xf32>
    %133 = vector.broadcast %132 : vector<8x1xf32> to vector<8x128xf32>
    %134 = arith.mulf %123, %133 : vector<8x128xf32>
    %135 = vector.broadcast %124 : vector<1x128xf32> to vector<8x128xf32>
    %136 = arith.mulf %134, %135 : vector<8x128xf32>
    %137 = arith.truncf %136 : vector<8x128xf32> to vector<8x128xbf16>
    %c0_41 = arith.constant 0 : index
    %c0_42 = arith.constant 0 : index
    %138 = vector.load %arg7[%c0_41, %c0_42] : memref<128x384xbf16, #tpu.memory_space<vmem>>, vector<128x384xbf16>
    %cst_43 = arith.constant dense<0.000000e+00> : vector<8x384xf32>
    %139 = tpu.matmul %137, %138, %cst_43 {dimension_numbers = #tpu.dot_dimension_numbers<[1], [0], [0], [1], [0, 0, 1, 1], [], []>} : vector<8x128xbf16>, vector<128x384xbf16>, vector<8x384xf32> -> vector<8x384xf32>
    %c0_44 = arith.constant 0 : index
    %c0_45 = arith.constant 0 : index
    %c0_46 = arith.constant 0 : index
    %140 = vector.load %arg3[%c0_44, %c0_45, %c0_46] : memref<1x1x8xf32, #tpu.memory_space<vmem>>, vector<1x1x8xf32>
    %141 = vector.shape_cast %140 : vector<1x1x8xf32> to vector<1x8xf32>
    %142 = vector.extract_strided_slice %139 {offsets = [0, 0], sizes = [8, 32], strides = [1, 1]} : vector<8x384xf32> to vector<8x32xf32>
    %143 = vector.extract_strided_slice %139 {offsets = [0, 128], sizes = [8, 32], strides = [1, 1]} : vector<8x384xf32> to vector<8x32xf32>
    %144 = vector.extract_strided_slice %139 {offsets = [0, 256], sizes = [8, 32], strides = [1, 1]} : vector<8x384xf32> to vector<8x32xf32>
    %cst_47 = arith.constant dense<0.000000e+00> : vector<8x8xf32>
    %145 = tpu.matmul %142, %143, %cst_47 {dimension_numbers = #tpu.dot_dimension_numbers<[1], [1], [0], [0], [0, 0, 1, 0], [], []>} : vector<8x32xf32>, vector<8x32xf32>, vector<8x8xf32> -> vector<8x8xf32>
    %146 = vector.broadcast %141 : vector<1x8xf32> to vector<8x8xf32>
    %147 = arith.addf %145, %146 : vector<8x8xf32>
    %cst_48 = arith.constant dense<0xFF800000> : vector<8xf32>
    %148 = vector.multi_reduction <maximumf>, %147, %cst_48 [1] : vector<8x8xf32> to vector<8xf32>
    %149 = vector.shape_cast %148 : vector<8xf32> to vector<8x1xf32>
    %150 = vector.broadcast %149 : vector<8x1xf32> to vector<8x8xf32>
    %151 = arith.subf %147, %150 : vector<8x8xf32>
    %152 = math.exp %151 : vector<8x8xf32>
    %cst_49 = arith.constant dense<0.000000e+00> : vector<8xf32>
    %153 = vector.multi_reduction <add>, %152, %cst_49 [1] : vector<8x8xf32> to vector<8xf32>
    %154 = vector.shape_cast %153 : vector<8xf32> to vector<8x1xf32>
    %155 = tpu.reciprocal %154 {approx = true} : vector<8x1xf32> -> vector<8x1xf32>
    %156 = vector.broadcast %155 : vector<8x1xf32> to vector<8x8xf32>
    %157 = arith.mulf %152, %156 : vector<8x8xf32>
    %cst_50 = arith.constant dense<0.000000e+00> : vector<8x32xf32>
    %158 = tpu.matmul %157, %144, %cst_50 {dimension_numbers = #tpu.dot_dimension_numbers<[1], [0], [0], [1], [0, 0, 1, 1], [], []>} : vector<8x8xf32>, vector<8x32xf32>, vector<8x32xf32> -> vector<8x32xf32>
    %159 = vector.extract_strided_slice %139 {offsets = [0, 32], sizes = [8, 32], strides = [1, 1]} : vector<8x384xf32> to vector<8x32xf32>
    %160 = vector.extract_strided_slice %139 {offsets = [0, 160], sizes = [8, 32], strides = [1, 1]} : vector<8x384xf32> to vector<8x32xf32>
    %161 = vector.extract_strided_slice %139 {offsets = [0, 288], sizes = [8, 32], strides = [1, 1]} : vector<8x384xf32> to vector<8x32xf32>
    %cst_51 = arith.constant dense<0.000000e+00> : vector<8x8xf32>
    %162 = tpu.matmul %159, %160, %cst_51 {dimension_numbers = #tpu.dot_dimension_numbers<[1], [1], [0], [0], [0, 0, 1, 0], [], []>} : vector<8x32xf32>, vector<8x32xf32>, vector<8x8xf32> -> vector<8x8xf32>
    %163 = vector.broadcast %141 : vector<1x8xf32> to vector<8x8xf32>
    %164 = arith.addf %162, %163 : vector<8x8xf32>
    %cst_52 = arith.constant dense<0xFF800000> : vector<8xf32>
    %165 = vector.multi_reduction <maximumf>, %164, %cst_52 [1] : vector<8x8xf32> to vector<8xf32>
    %166 = vector.shape_cast %165 : vector<8xf32> to vector<8x1xf32>
    %167 = vector.broadcast %166 : vector<8x1xf32> to vector<8x8xf32>
    %168 = arith.subf %164, %167 : vector<8x8xf32>
    %169 = math.exp %168 : vector<8x8xf32>
    %cst_53 = arith.constant dense<0.000000e+00> : vector<8xf32>
    %170 = vector.multi_reduction <add>, %169, %cst_53 [1] : vector<8x8xf32> to vector<8xf32>
    %171 = vector.shape_cast %170 : vector<8xf32> to vector<8x1xf32>
    %172 = tpu.reciprocal %171 {approx = true} : vector<8x1xf32> -> vector<8x1xf32>
    %173 = vector.broadcast %172 : vector<8x1xf32> to vector<8x8xf32>
    %174 = arith.mulf %169, %173 : vector<8x8xf32>
    %cst_54 = arith.constant dense<0.000000e+00> : vector<8x32xf32>
    %175 = tpu.matmul %174, %161, %cst_54 {dimension_numbers = #tpu.dot_dimension_numbers<[1], [0], [0], [1], [0, 0, 1, 1], [], []>} : vector<8x8xf32>, vector<8x32xf32>, vector<8x32xf32> -> vector<8x32xf32>
    %176 = vector.extract_strided_slice %139 {offsets = [0, 64], sizes = [8, 32], strides = [1, 1]} : vector<8x384xf32> to vector<8x32xf32>
    %177 = vector.extract_strided_slice %139 {offsets = [0, 192], sizes = [8, 32], strides = [1, 1]} : vector<8x384xf32> to vector<8x32xf32>
    %178 = vector.extract_strided_slice %139 {offsets = [0, 320], sizes = [8, 32], strides = [1, 1]} : vector<8x384xf32> to vector<8x32xf32>
    %cst_55 = arith.constant dense<0.000000e+00> : vector<8x8xf32>
    %179 = tpu.matmul %176, %177, %cst_55 {dimension_numbers = #tpu.dot_dimension_numbers<[1], [1], [0], [0], [0, 0, 1, 0], [], []>} : vector<8x32xf32>, vector<8x32xf32>, vector<8x8xf32> -> vector<8x8xf32>
    %180 = vector.broadcast %141 : vector<1x8xf32> to vector<8x8xf32>
    %181 = arith.addf %179, %180 : vector<8x8xf32>
    %cst_56 = arith.constant dense<0xFF800000> : vector<8xf32>
    %182 = vector.multi_reduction <maximumf>, %181, %cst_56 [1] : vector<8x8xf32> to vector<8xf32>
    %183 = vector.shape_cast %182 : vector<8xf32> to vector<8x1xf32>
    %184 = vector.broadcast %183 : vector<8x1xf32> to vector<8x8xf32>
    %185 = arith.subf %181, %184 : vector<8x8xf32>
    %186 = math.exp %185 : vector<8x8xf32>
    %cst_57 = arith.constant dense<0.000000e+00> : vector<8xf32>
    %187 = vector.multi_reduction <add>, %186, %cst_57 [1] : vector<8x8xf32> to vector<8xf32>
    %188 = vector.shape_cast %187 : vector<8xf32> to vector<8x1xf32>
    %189 = tpu.reciprocal %188 {approx = true} : vector<8x1xf32> -> vector<8x1xf32>
    %190 = vector.broadcast %189 : vector<8x1xf32> to vector<8x8xf32>
    %191 = arith.mulf %186, %190 : vector<8x8xf32>
    %cst_58 = arith.constant dense<0.000000e+00> : vector<8x32xf32>
    %192 = tpu.matmul %191, %178, %cst_58 {dimension_numbers = #tpu.dot_dimension_numbers<[1], [0], [0], [1], [0, 0, 1, 1], [], []>} : vector<8x8xf32>, vector<8x32xf32>, vector<8x32xf32> -> vector<8x32xf32>
    %193 = vector.extract_strided_slice %139 {offsets = [0, 96], sizes = [8, 32], strides = [1, 1]} : vector<8x384xf32> to vector<8x32xf32>
    %194 = vector.extract_strided_slice %139 {offsets = [0, 224], sizes = [8, 32], strides = [1, 1]} : vector<8x384xf32> to vector<8x32xf32>
    %195 = vector.extract_strided_slice %139 {offsets = [0, 352], sizes = [8, 32], strides = [1, 1]} : vector<8x384xf32> to vector<8x32xf32>
    %cst_59 = arith.constant dense<0.000000e+00> : vector<8x8xf32>
    %196 = tpu.matmul %193, %194, %cst_59 {dimension_numbers = #tpu.dot_dimension_numbers<[1], [1], [0], [0], [0, 0, 1, 0], [], []>} : vector<8x32xf32>, vector<8x32xf32>, vector<8x8xf32> -> vector<8x8xf32>
    %197 = vector.broadcast %141 : vector<1x8xf32> to vector<8x8xf32>
    %198 = arith.addf %196, %197 : vector<8x8xf32>
    %cst_60 = arith.constant dense<0xFF800000> : vector<8xf32>
    %199 = vector.multi_reduction <maximumf>, %198, %cst_60 [1] : vector<8x8xf32> to vector<8xf32>
    %200 = vector.shape_cast %199 : vector<8xf32> to vector<8x1xf32>
    %201 = vector.broadcast %200 : vector<8x1xf32> to vector<8x8xf32>
    %202 = arith.subf %198, %201 : vector<8x8xf32>
    %203 = math.exp %202 : vector<8x8xf32>
    %cst_61 = arith.constant dense<0.000000e+00> : vector<8xf32>
    %204 = vector.multi_reduction <add>, %203, %cst_61 [1] : vector<8x8xf32> to vector<8xf32>
    %205 = vector.shape_cast %204 : vector<8xf32> to vector<8x1xf32>
    %206 = tpu.reciprocal %205 {approx = true} : vector<8x1xf32> -> vector<8x1xf32>
    %207 = vector.broadcast %206 : vector<8x1xf32> to vector<8x8xf32>
    %208 = arith.mulf %203, %207 : vector<8x8xf32>
    %cst_62 = arith.constant dense<0.000000e+00> : vector<8x32xf32>
    %209 = tpu.matmul %208, %195, %cst_62 {dimension_numbers = #tpu.dot_dimension_numbers<[1], [0], [0], [1], [0, 0, 1, 1], [], []>} : vector<8x8xf32>, vector<8x32xf32>, vector<8x32xf32> -> vector<8x32xf32>
    %210 = tpu.concatenate %158, %175, %192, %209 in 1 : vector<8x32xf32>, vector<8x32xf32>, vector<8x32xf32>, vector<8x32xf32> -> vector<8x128xf32>
    %211 = arith.truncf %210 : vector<8x128xf32> to vector<8x128xbf16>
    %c0_63 = arith.constant 0 : index
    %c0_64 = arith.constant 0 : index
    %212 = vector.load %arg8[%c0_63, %c0_64] : memref<128x128xbf16, #tpu.memory_space<vmem>>, vector<128x128xbf16>
    %cst_65 = arith.constant dense<0.000000e+00> : vector<8x128xf32>
    %213 = tpu.matmul %211, %212, %cst_65 {dimension_numbers = #tpu.dot_dimension_numbers<[1], [0], [0], [1], [0, 0, 1, 1], [], []>} : vector<8x128xbf16>, vector<128x128xbf16>, vector<8x128xf32> -> vector<8x128xf32>
    %214 = vector.shape_cast %213 : vector<8x128xf32> to vector<8x1x128xf32>
    %215 = vector.broadcast %214 : vector<8x1x128xf32> to vector<8x4x128xf32>
    %216 = arith.addf %113, %215 : vector<8x4x128xf32>
    %217 = vector.shape_cast %216 : vector<8x4x128xf32> to vector<32x128xf32>
    %c2 = arith.constant 2 : index
    %c0_66 = arith.constant 0 : index
    %218 = vector.load %arg4[%c2, %c0_66] : memref<3x128xf32, #tpu.memory_space<vmem>>, vector<1x128xf32>
    %219 = arith.mulf %217, %217 : vector<32x128xf32>
    %cst_67 = arith.constant dense<0.000000e+00> : vector<32xf32>
    %220 = vector.multi_reduction <add>, %219, %cst_67 [1] : vector<32x128xf32> to vector<32xf32>
    %221 = vector.shape_cast %220 : vector<32xf32> to vector<32x1xf32>
    %cst_68 = arith.constant 1.280000e+02 : f32
    %222 = vector.broadcast %cst_68 : f32 to vector<32x1xf32>
    %223 = arith.divf %221, %222 : vector<32x1xf32>
    %cst_69 = arith.constant 9.99999974E-6 : f32
    %224 = vector.broadcast %cst_69 : f32 to vector<32x1xf32>
    %225 = arith.addf %223, %224 : vector<32x1xf32>
    %226 = math.rsqrt %225 : vector<32x1xf32>
    %227 = vector.broadcast %226 : vector<32x1xf32> to vector<32x128xf32>
    %228 = arith.mulf %217, %227 : vector<32x128xf32>
    %229 = vector.broadcast %218 : vector<1x128xf32> to vector<32x128xf32>
    %230 = arith.mulf %228, %229 : vector<32x128xf32>
    %231 = arith.truncf %230 : vector<32x128xf32> to vector<32x128xbf16>
    %c0_70 = arith.constant 0 : index
    %c0_71 = arith.constant 0 : index
    %232 = vector.load %arg9[%c0_70, %c0_71] : memref<128x768xbf16, #tpu.memory_space<vmem>>, vector<128x768xbf16>
    %cst_72 = arith.constant dense<0.000000e+00> : vector<32x768xf32>
    %233 = tpu.matmul %231, %232, %cst_72 {dimension_numbers = #tpu.dot_dimension_numbers<[1], [0], [0], [1], [0, 0, 1, 1], [], []>} : vector<32x128xbf16>, vector<128x768xbf16>, vector<32x768xf32> -> vector<32x768xf32>
    %234 = vector.extract_strided_slice %233 {offsets = [0, 0], sizes = [32, 384], strides = [1, 1]} : vector<32x768xf32> to vector<32x384xf32>
    %235 = vector.extract_strided_slice %233 {offsets = [0, 384], sizes = [32, 384], strides = [1, 1]} : vector<32x768xf32> to vector<32x384xf32>
    %236 = arith.negf %234 : vector<32x384xf32>
    %237 = math.exp %236 : vector<32x384xf32>
    %cst_73 = arith.constant 1.000000e+00 : f32
    %238 = vector.broadcast %cst_73 : f32 to vector<32x384xf32>
    %239 = arith.addf %238, %237 : vector<32x384xf32>
    %240 = arith.divf %238, %239 : vector<32x384xf32>
    %241 = arith.mulf %234, %240 : vector<32x384xf32>
    %242 = arith.mulf %241, %235 : vector<32x384xf32>
    %243 = arith.truncf %242 : vector<32x384xf32> to vector<32x384xbf16>
    %c0_74 = arith.constant 0 : index
    %c0_75 = arith.constant 0 : index
    %244 = vector.load %arg10[%c0_74, %c0_75] : memref<384x128xbf16, #tpu.memory_space<vmem>>, vector<384x128xbf16>
    %cst_76 = arith.constant dense<0.000000e+00> : vector<32x128xf32>
    %245 = tpu.matmul %243, %244, %cst_76 {dimension_numbers = #tpu.dot_dimension_numbers<[1], [0], [0], [1], [0, 0, 1, 1], [], []>} : vector<32x384xbf16>, vector<384x128xbf16>, vector<32x128xf32> -> vector<32x128xf32>
    %246 = arith.addf %217, %245 : vector<32x128xf32>
    %247 = vector.shape_cast %246 : vector<32x128xf32> to vector<8x4x128xf32>
    %248 = arith.truncf %247 : vector<8x4x128xf32> to vector<8x4x128xbf16>
    %c0_77 = arith.constant 0 : index
    %c0_78 = arith.constant 0 : index
    %c0_79 = arith.constant 0 : index
    %c0_80 = arith.constant 0 : index
    %249 = vector.load %arg11[%c0_77, %c0_78, %c0_79, %c0_80] : memref<1x8x4x128xbf16, #tpu.memory_space<vmem>>, vector<1x8x4x128xbf16>
    %250 = vector.shape_cast %249 : vector<1x8x4x128xbf16> to vector<8x4x128xbf16>
    %251 = vector.shape_cast %248 : vector<8x4x128xbf16> to vector<1x8x4x128xbf16>
    tpu.vector_store %arg11[%c0_77, %c0_78, %c0_79, %c0_80], %251 {strides = array<i32>} : memref<1x8x4x128xbf16, #tpu.memory_space<vmem>>, vector<1x8x4x128xbf16>,
    return
  }
  func.func @transform_0(%arg0: i32) -> (i32, i32, i32, i32) {
    %c0_i32 = arith.constant 0 : i32
    %c0_i32_0 = arith.constant 0 : i32
    %c0_i32_1 = arith.constant 0 : i32
    %c0_i32_2 = arith.constant 0 : i32
    return %arg0, %c0_i32, %c0_i32_0, %c0_i32_1 : i32, i32, i32, i32
  }
  func.func @transform_1(%arg0: i32) -> (i32, i32, i32) {
    %c0_i32 = arith.constant 0 : i32
    %c0_i32_0 = arith.constant 0 : i32
    %c0_i32_1 = arith.constant 0 : i32
    return %arg0, %c0_i32, %c0_i32_0 : i32, i32, i32
  }
  func.func @transform_2(%arg0: i32) -> (i32, i32, i32) {
    %c0_i32 = arith.constant 0 : i32
    %c0_i32_0 = arith.constant 0 : i32
    %c0_i32_1 = arith.constant 0 : i32
    return %arg0, %c0_i32, %c0_i32_0 : i32, i32, i32
  }
  func.func @transform_3(%arg0: i32) -> (i32, i32) {
    %c0_i32 = arith.constant 0 : i32
    %c0_i32_0 = arith.constant 0 : i32
    %c0_i32_1 = arith.constant 0 : i32
    return %c0_i32, %c0_i32_0 : i32, i32
  }
  func.func @transform_4(%arg0: i32) -> (i32, i32) {
    %c0_i32 = arith.constant 0 : i32
    %c0_i32_0 = arith.constant 0 : i32
    %c0_i32_1 = arith.constant 0 : i32
    return %c0_i32, %c0_i32_0 : i32, i32
  }
  func.func @transform_5(%arg0: i32) -> (i32, i32) {
    %c0_i32 = arith.constant 0 : i32
    %c0_i32_0 = arith.constant 0 : i32
    %c0_i32_1 = arith.constant 0 : i32
    return %c0_i32, %c0_i32_0 : i32, i32
  }
  func.func @transform_6(%arg0: i32) -> (i32, i32) {
    %c0_i32 = arith.constant 0 : i32
    %c0_i32_0 = arith.constant 0 : i32
    %c0_i32_1 = arith.constant 0 : i32
    return %c0_i32, %c0_i32_0 : i32, i32
  }
  func.func @transform_7(%arg0: i32) -> (i32, i32) {
    %c0_i32 = arith.constant 0 : i32
    %c0_i32_0 = arith.constant 0 : i32
    %c0_i32_1 = arith.constant 0 : i32
    return %c0_i32, %c0_i32_0 : i32, i32
  }
  func.func @transform_8(%arg0: i32) -> (i32, i32) {
    %c0_i32 = arith.constant 0 : i32
    %c0_i32_0 = arith.constant 0 : i32
    %c0_i32_1 = arith.constant 0 : i32
    return %c0_i32, %c0_i32_0 : i32, i32
  }
  func.func @transform_9(%arg0: i32) -> (i32, i32) {
    %c0_i32 = arith.constant 0 : i32
    %c0_i32_0 = arith.constant 0 : i32
    %c0_i32_1 = arith.constant 0 : i32
    return %c0_i32, %c0_i32_0 : i32, i32
  }
  func.func @transform_10(%arg0: i32) -> (i32, i32, i32, i32) {
    %c0_i32 = arith.constant 0 : i32
    %c0_i32_0 = arith.constant 0 : i32
    %c0_i32_1 = arith.constant 0 : i32
    %c0_i32_2 = arith.constant 0 : i32
    return %arg0, %c0_i32, %c0_i32_0, %c0_i32_1 : i32, i32, i32, i32
  }
}

module attributes {stable_mosaic.version = 11 : i64} {
  func.func @_usm_layer_kernel(%arg0: i32, %arg1: memref<1x8x4x128xbf16, #tpu.memory_space<vmem>>, %arg2: memref<1x8x4xf32, #tpu.memory_space<vmem>>, %arg3: memref<1x1x8xf32, #tpu.memory_space<vmem>>, %arg4: memref<3x128xf32, #tpu.memory_space<vmem>>, %arg5: memref<128x256xbf16, #tpu.memory_space<vmem>>, %arg6: memref<128x128xbf16, #tpu.memory_space<vmem>>, %arg7: memref<128x384xbf16, #tpu.memory_space<vmem>>, %arg8: memref<128x128xbf16, #tpu.memory_space<vmem>>, %arg9: memref<128x768xbf16, #tpu.memory_space<vmem>>, %arg10: memref<384x128xbf16, #tpu.memory_space<vmem>>, %arg11: memref<1x8x4x128xbf16, #tpu.memory_space<vmem>>) attributes {dimension_semantics = [#tpu.dimension_semantics<parallel>], iteration_bounds = array<i64: 2>, scalar_prefetch = 0 : i64, scratch_operands = 0 : i64, tpu.core_type = #tpu.core_type<tc>, window_params = [{transform_indices = @transform_0, window_bounds = array<i64: 1, 8, 4, 128>}, {transform_indices = @transform_1, window_bounds = array<i64: 1, 8, 4>}, {transform_indices = @transform_2, window_bounds = array<i64: 1, 1, 8>}, {pipeline_mode = #tpu.pipeline_mode<synchronous>, transform_indices = @transform_3, window_bounds = array<i64: 3, 128>}, {pipeline_mode = #tpu.pipeline_mode<synchronous>, transform_indices = @transform_4, window_bounds = array<i64: 128, 256>}, {pipeline_mode = #tpu.pipeline_mode<synchronous>, transform_indices = @transform_5, window_bounds = array<i64: 128, 128>}, {pipeline_mode = #tpu.pipeline_mode<synchronous>, transform_indices = @transform_6, window_bounds = array<i64: 128, 384>}, {pipeline_mode = #tpu.pipeline_mode<synchronous>, transform_indices = @transform_7, window_bounds = array<i64: 128, 128>}, {pipeline_mode = #tpu.pipeline_mode<synchronous>, transform_indices = @transform_8, window_bounds = array<i64: 128, 768>}, {pipeline_mode = #tpu.pipeline_mode<synchronous>, transform_indices = @transform_9, window_bounds = array<i64: 384, 128>}, {transform_indices = @transform_10, window_bounds = array<i64: 1, 8, 4, 128>}]} {
    %c0 = arith.constant 0 : index
    %c0_0 = arith.constant 0 : index
    %c0_1 = arith.constant 0 : index
    %c0_2 = arith.constant 0 : index
    %0 = vector.load %arg1[%c0, %c0_0, %c0_1, %c0_2] : memref<1x8x4x128xbf16, #tpu.memory_space<vmem>>, vector<1x8x4x128xbf16>
    %1 = vector.shape_cast %0 : vector<1x8x4x128xbf16> to vector<8x4x128xbf16>
    %2 = arith.extf %1 : vector<8x4x128xbf16> to vector<8x4x128xf32>
    %c0_3 = arith.constant 0 : index
    %c0_4 = arith.constant 0 : index
    %c0_5 = arith.constant 0 : index
    %3 = vector.load %arg2[%c0_3, %c0_4, %c0_5] : memref<1x8x4xf32, #tpu.memory_space<vmem>>, vector<1x8x4xf32>
    %4 = vector.shape_cast %3 : vector<1x8x4xf32> to vector<8x4xf32>
    %cst = arith.constant 1.000000e+00 : f32
    %5 = vector.broadcast %cst : f32 to vector<8x4xf32>
    %6 = arith.subf %4, %5 : vector<8x4xf32>
    %cst_6 = arith.constant 1.000000e+09 : f32
    %7 = vector.broadcast %cst_6 : f32 to vector<8x4xf32>
    %8 = arith.mulf %6, %7 : vector<8x4xf32>
    %9 = vector.shape_cast %8 : vector<8x4xf32> to vector<8x1x4xf32>
    %10 = vector.shape_cast %2 : vector<8x4x128xf32> to vector<32x128xf32>
    %c0_7 = arith.constant 0 : index
    %c0_8 = arith.constant 0 : index
    %11 = vector.load %arg4[%c0_7, %c0_8] : memref<3x128xf32, #tpu.memory_space<vmem>>, vector<1x128xf32>
    %12 = arith.mulf %10, %10 : vector<32x128xf32>
    %cst_9 = arith.constant dense<0.000000e+00> : vector<32xf32>
    %13 = vector.multi_reduction <add>, %12, %cst_9 [1] : vector<32x128xf32> to vector<32xf32>
    %14 = vector.shape_cast %13 : vector<32xf32> to vector<32x1xf32>
    %cst_10 = arith.constant 1.280000e+02 : f32
    %15 = vector.broadcast %cst_10 : f32 to vector<32x1xf32>
    %16 = arith.divf %14, %15 : vector<32x1xf32>
    %cst_11 = arith.constant 9.99999974E-6 : f32
    %17 = vector.broadcast %cst_11 : f32 to vector<32x1xf32>
    %18 = arith.addf %16, %17 : vector<32x1xf32>
    %19 = math.rsqrt %18 : vector<32x1xf32>
    %20 = vector.broadcast %19 : vector<32x1xf32> to vector<32x128xf32>
    %21 = arith.mulf %10, %20 : vector<32x128xf32>
    %22 = vector.broadcast %11 : vector<1x128xf32> to vector<32x128xf32>
    %23 = arith.mulf %21, %22 : vector<32x128xf32>
    %24 = arith.truncf %23 : vector<32x128xf32> to vector<32x128xbf16>
    %c0_12 = arith.constant 0 : index
    %c0_13 = arith.constant 0 : index
    %25 = vector.load %arg5[%c0_12, %c0_13] : memref<128x256xbf16, #tpu.memory_space<vmem>>, vector<128x256xbf16>
    %cst_14 = arith.constant dense<0.000000e+00> : vector<32x256xf32>
    %26 = tpu.matmul %24, %25, %cst_14 {dimension_numbers = #tpu.dot_dimension_numbers<[1], [0], [0], [1], [0, 0, 1, 1], [], []>} : vector<32x128xbf16>, vector<128x256xbf16>, vector<32x256xf32> -> vector<32x256xf32>
    %27 = vector.extract_strided_slice %26 {offsets = [0, 0], sizes = [32, 32], strides = [1, 1]} : vector<32x256xf32> to vector<32x32xf32>
    %28 = vector.shape_cast %27 : vector<32x32xf32> to vector<8x4x32xf32>
    %29 = vector.extract_strided_slice %26 {offsets = [0, 128], sizes = [32, 32], strides = [1, 1]} : vector<32x256xf32> to vector<32x32xf32>
    %30 = vector.shape_cast %29 : vector<32x32xf32> to vector<8x4x32xf32>
    %31 = vector.extract_strided_slice %26 {offsets = [0, 192], sizes = [32, 32], strides = [1, 1]} : vector<32x256xf32> to vector<32x32xf32>
    %32 = vector.shape_cast %31 : vector<32x32xf32> to vector<8x4x32xf32>
    %cst_15 = arith.constant dense<0.000000e+00> : vector<8x4x4xf32>
    %33 = tpu.matmul %28, %30, %cst_15 {dimension_numbers = #tpu.dot_dimension_numbers<[2], [2], [1], [1], [0, 0, 0, 1, 1, 1], [0], [0]>} : vector<8x4x32xf32>, vector<8x4x32xf32>, vector<8x4x4xf32> -> vector<8x4x4xf32>
    %34 = vector.broadcast %9 : vector<8x1x4xf32> to vector<8x4x4xf32>
    %35 = arith.addf %33, %34 : vector<8x4x4xf32>
    %cst_16 = arith.constant dense<0xFF800000> : vector<8x4xf32>
    %36 = vector.multi_reduction <maximumf>, %35, %cst_16 [2] : vector<8x4x4xf32> to vector<8x4xf32>
    %37 = vector.shape_cast %36 : vector<8x4xf32> to vector<8x4x1xf32>
    %38 = vector.broadcast %37 : vector<8x4x1xf32> to vector<8x4x4xf32>
    %39 = arith.subf %35, %38 : vector<8x4x4xf32>
    %40 = math.exp %39 : vector<8x4x4xf32>
    %cst_17 = arith.constant dense<0.000000e+00> : vector<8x4xf32>
    %41 = vector.multi_reduction <add>, %40, %cst_17 [2] : vector<8x4x4xf32> to vector<8x4xf32>
    %42 = vector.shape_cast %41 : vector<8x4xf32> to vector<8x4x1xf32>
    %43 = tpu.reciprocal %42 {approx = true} : vector<8x4x1xf32> -> vector<8x4x1xf32>
    %44 = vector.broadcast %43 : vector<8x4x1xf32> to vector<8x4x4xf32>
    %45 = arith.mulf %40, %44 : vector<8x4x4xf32>
    %cst_18 = arith.constant dense<0.000000e+00> : vector<8x4x32xf32>
    %46 = tpu.matmul %45, %32, %cst_18 {dimension_numbers = #tpu.dot_dimension_numbers<[2], [1], [1], [2], [0, 0, 0, 1, 1, 2], [0], [0]>} : vector<8x4x4xf32>, vector<8x4x32xf32>, vector<8x4x32xf32> -> vector<8x4x32xf32>
    %47 = vector.extract_strided_slice %26 {offsets = [0, 32], sizes = [32, 32], strides = [1, 1]} : vector<32x256xf32> to vector<32x32xf32>
    %48 = vector.shape_cast %47 : vector<32x32xf32> to vector<8x4x32xf32>
    %49 = vector.extract_strided_slice %26 {offsets = [0, 128], sizes = [32, 32], strides = [1, 1]} : vector<32x256xf32> to vector<32x32xf32>
    %50 = vector.shape_cast %49 : vector<32x32xf32> to vector<8x4x32xf32>
    %51 = vector.extract_strided_slice %26 {offsets = [0, 192], sizes = [32, 32], strides = [1, 1]} : vector<32x256xf32> to vector<32x32xf32>
    %52 = vector.shape_cast %51 : vector<32x32xf32> to vector<8x4x32xf32>
    %cst_19 = arith.constant dense<0.000000e+00> : vector<8x4x4xf32>
    %53 = tpu.matmul %48, %50, %cst_19 {dimension_numbers = #tpu.dot_dimension_numbers<[2], [2], [1], [1], [0, 0, 0, 1, 1, 1], [0], [0]>} : vector<8x4x32xf32>, vector<8x4x32xf32>, vector<8x4x4xf32> -> vector<8x4x4xf32>
    %54 = vector.broadcast %9 : vector<8x1x4xf32> to vector<8x4x4xf32>
    %55 = arith.addf %53, %54 : vector<8x4x4xf32>
    %cst_20 = arith.constant dense<0xFF800000> : vector<8x4xf32>
    %56 = vector.multi_reduction <maximumf>, %55, %cst_20 [2] : vector<8x4x4xf32> to vector<8x4xf32>
    %57 = vector.shape_cast %56 : vector<8x4xf32> to vector<8x4x1xf32>
    %58 = vector.broadcast %57 : vector<8x4x1xf32> to vector<8x4x4xf32>
    %59 = arith.subf %55, %58 : vector<8x4x4xf32>
    %60 = math.exp %59 : vector<8x4x4xf32>
    %cst_21 = arith.constant dense<0.000000e+00> : vector<8x4xf32>
    %61 = vector.multi_reduction <add>, %60, %cst_21 [2] : vector<8x4x4xf32> to vector<8x4xf32>
    %62 = vector.shape_cast %61 : vector<8x4xf32> to vector<8x4x1xf32>
    %63 = tpu.reciprocal %62 {approx = true} : vector<8x4x1xf32> -> vector<8x4x1xf32>
    %64 = vector.broadcast %63 : vector<8x4x1xf32> to vector<8x4x4xf32>
    %65 = arith.mulf %60, %64 : vector<8x4x4xf32>
    %cst_22 = arith.constant dense<0.000000e+00> : vector<8x4x32xf32>
    %66 = tpu.matmul %65, %52, %cst_22 {dimension_numbers = #tpu.dot_dimension_numbers<[2], [1], [1], [2], [0, 0, 0, 1, 1, 2], [0], [0]>} : vector<8x4x4xf32>, vector<8x4x32xf32>, vector<8x4x32xf32> -> vector<8x4x32xf32>
    %67 = vector.extract_strided_slice %26 {offsets = [0, 64], sizes = [32, 32], strides = [1, 1]} : vector<32x256xf32> to vector<32x32xf32>
    %68 = vector.shape_cast %67 : vector<32x32xf32> to vector<8x4x32xf32>
    %69 = vector.extract_strided_slice %26 {offsets = [0, 160], sizes = [32, 32], strides = [1, 1]} : vector<32x256xf32> to vector<32x32xf32>
    %70 = vector.shape_cast %69 : vector<32x32xf32> to vector<8x4x32xf32>
    %71 = vector.extract_strided_slice %26 {offsets = [0, 224], sizes = [32, 32], strides = [1, 1]} : vector<32x256xf32> to vector<32x32xf32>
    %72 = vector.shape_cast %71 : vector<32x32xf32> to vector<8x4x32xf32>
    %cst_23 = arith.constant dense<0.000000e+00> : vector<8x4x4xf32>
    %73 = tpu.matmul %68, %70, %cst_23 {dimension_numbers = #tpu.dot_dimension_numbers<[2], [2], [1], [1], [0, 0, 0, 1, 1, 1], [0], [0]>} : vector<8x4x32xf32>, vector<8x4x32xf32>, vector<8x4x4xf32> -> vector<8x4x4xf32>
    %74 = vector.broadcast %9 : vector<8x1x4xf32> to vector<8x4x4xf32>
    %75 = arith.addf %73, %74 : vector<8x4x4xf32>
    %cst_24 = arith.constant dense<0xFF800000> : vector<8x4xf32>
    %76 = vector.multi_reduction <maximumf>, %75, %cst_24 [2] : vector<8x4x4xf32> to vector<8x4xf32>
    %77 = vector.shape_cast %76 : vector<8x4xf32> to vector<8x4x1xf32>
    %78 = vector.broadcast %77 : vector<8x4x1xf32> to vector<8x4x4xf32>
    %79 = arith.subf %75, %78 : vector<8x4x4xf32>
    %80 = math.exp %79 : vector<8x4x4xf32>
    %cst_25 = arith.constant dense<0.000000e+00> : vector<8x4xf32>
    %81 = vector.multi_reduction <add>, %80, %cst_25 [2] : vector<8x4x4xf32> to vector<8x4xf32>
    %82 = vector.shape_cast %81 : vector<8x4xf32> to vector<8x4x1xf32>
    %83 = tpu.reciprocal %82 {approx = true} : vector<8x4x1xf32> -> vector<8x4x1xf32>
    %84 = vector.broadcast %83 : vector<8x4x1xf32> to vector<8x4x4xf32>
    %85 = arith.mulf %80, %84 : vector<8x4x4xf32>
    %cst_26 = arith.constant dense<0.000000e+00> : vector<8x4x32xf32>
    %86 = tpu.matmul %85, %72, %cst_26 {dimension_numbers = #tpu.dot_dimension_numbers<[2], [1], [1], [2], [0, 0, 0, 1, 1, 2], [0], [0]>} : vector<8x4x4xf32>, vector<8x4x32xf32>, vector<8x4x32xf32> -> vector<8x4x32xf32>
    %87 = vector.extract_strided_slice %26 {offsets = [0, 96], sizes = [32, 32], strides = [1, 1]} : vector<32x256xf32> to vector<32x32xf32>
    %88 = vector.shape_cast %87 : vector<32x32xf32> to vector<8x4x32xf32>
    %89 = vector.extract_strided_slice %26 {offsets = [0, 160], sizes = [32, 32], strides = [1, 1]} : vector<32x256xf32> to vector<32x32xf32>
    %90 = vector.shape_cast %89 : vector<32x32xf32> to vector<8x4x32xf32>
    %91 = vector.extract_strided_slice %26 {offsets = [0, 224], sizes = [32, 32], strides = [1, 1]} : vector<32x256xf32> to vector<32x32xf32>
    %92 = vector.shape_cast %91 : vector<32x32xf32> to vector<8x4x32xf32>
    %cst_27 = arith.constant dense<0.000000e+00> : vector<8x4x4xf32>
    %93 = tpu.matmul %88, %90, %cst_27 {dimension_numbers = #tpu.dot_dimension_numbers<[2], [2], [1], [1], [0, 0, 0, 1, 1, 1], [0], [0]>} : vector<8x4x32xf32>, vector<8x4x32xf32>, vector<8x4x4xf32> -> vector<8x4x4xf32>
    %94 = vector.broadcast %9 : vector<8x1x4xf32> to vector<8x4x4xf32>
    %95 = arith.addf %93, %94 : vector<8x4x4xf32>
    %cst_28 = arith.constant dense<0xFF800000> : vector<8x4xf32>
    %96 = vector.multi_reduction <maximumf>, %95, %cst_28 [2] : vector<8x4x4xf32> to vector<8x4xf32>
    %97 = vector.shape_cast %96 : vector<8x4xf32> to vector<8x4x1xf32>
    %98 = vector.broadcast %97 : vector<8x4x1xf32> to vector<8x4x4xf32>
    %99 = arith.subf %95, %98 : vector<8x4x4xf32>
    %100 = math.exp %99 : vector<8x4x4xf32>
    %cst_29 = arith.constant dense<0.000000e+00> : vector<8x4xf32>
    %101 = vector.multi_reduction <add>, %100, %cst_29 [2] : vector<8x4x4xf32> to vector<8x4xf32>
    %102 = vector.shape_cast %101 : vector<8x4xf32> to vector<8x4x1xf32>
    %103 = tpu.reciprocal %102 {approx = true} : vector<8x4x1xf32> -> vector<8x4x1xf32>
    %104 = vector.broadcast %103 : vector<8x4x1xf32> to vector<8x4x4xf32>
    %105 = arith.mulf %100, %104 : vector<8x4x4xf32>
    %cst_30 = arith.constant dense<0.000000e+00> : vector<8x4x32xf32>
    %106 = tpu.matmul %105, %92, %cst_30 {dimension_numbers = #tpu.dot_dimension_numbers<[2], [1], [1], [2], [0, 0, 0, 1, 1, 2], [0], [0]>} : vector<8x4x4xf32>, vector<8x4x32xf32>, vector<8x4x32xf32> -> vector<8x4x32xf32>
    %107 = tpu.concatenate %46, %66, %86, %106 in 2 : vector<8x4x32xf32>, vector<8x4x32xf32>, vector<8x4x32xf32>, vector<8x4x32xf32> -> vector<8x4x128xf32>
    %108 = vector.shape_cast %107 : vector<8x4x128xf32> to vector<32x128xf32>
    %109 = arith.truncf %108 : vector<32x128xf32> to vector<32x128xbf16>
    %c0_31 = arith.constant 0 : index
    %c0_32 = arith.constant 0 : index
    %110 = vector.load %arg6[%c0_31, %c0_32] : memref<128x128xbf16, #tpu.memory_space<vmem>>, vector<128x128xbf16>
    %cst_33 = arith.constant dense<0.000000e+00> : vector<32x128xf32>
    %111 = tpu.matmul %109, %110, %cst_33 {dimension_numbers = #tpu.dot_dimension_numbers<[1], [0], [0], [1], [0, 0, 1, 1], [], []>} : vector<32x128xbf16>, vector<128x128xbf16>, vector<32x128xf32> -> vector<32x128xf32>
    %112 = arith.addf %10, %111 : vector<32x128xf32>
    %113 = vector.shape_cast %112 : vector<32x128xf32> to vector<8x4x128xf32>
    %cst_34 = arith.constant dense<0.000000e+00> : vector<8xf32>
    %114 = vector.multi_reduction <add>, %4, %cst_34 [1] : vector<8x4xf32> to vector<8xf32>
    %115 = vector.shape_cast %114 : vector<8xf32> to vector<8x1xf32>
    %116 = vector.shape_cast %4 : vector<8x4xf32> to vector<8x4x1xf32>
    %117 = vector.broadcast %116 : vector<8x4x1xf32> to vector<8x4x128xf32>
    %118 = arith.mulf %113, %117 : vector<8x4x128xf32>
    %cst_35 = arith.constant dense<0.000000e+00> : vector<8x128xf32>
    %119 = vector.multi_reduction <add>, %118, %cst_35 [1] : vector<8x4x128xf32> to vector<8x128xf32>
    %cst_36 = arith.constant 1.000000e-10 : f32
    %120 = vector.broadcast %cst_36 : f32 to vector<8x1xf32>
    %121 = arith.addf %115, %120 : vector<8x1xf32>
    %122 = vector.broadcast %121 : vector<8x1xf32> to vector<8x128xf32>
    %123 = arith.divf %119, %122 : vector<8x128xf32>
    %c1 = arith.constant 1 : index
    %c0_37 = arith.constant 0 : index
    %124 = vector.load %arg4[%c1, %c0_37] : memref<3x128xf32, #tpu.memory_space<vmem>>, vector<1x128xf32>
    %125 = arith.mulf %123, %123 : vector<8x128xf32>
    %cst_38 = arith.constant dense<0.000000e+00> : vector<8xf32>
    %126 = vector.multi_reduction <add>, %125, %cst_38 [1] : vector<8x128xf32> to vector<8xf32>
    %127 = vector.shape_cast %126 : vector<8xf32> to vector<8x1xf32>
    %cst_39 = arith.constant 1.280000e+02 : f32
    %128 = vector.broadcast %cst_39 : f32 to vector<8x1xf32>
    %129 = arith.divf %127, %128 : vector<8x1xf32>
    %cst_40 = arith.constant 9.99999974E-6 : f32
    %130 = vector.broadcast %cst_40 : f32 to vector<8x1xf32>
    %131 = arith.addf %129, %130 : vector<8x1xf32>
    %132 = math.rsqrt %131 : vector<8x1xf32>
    %133 = vector.broadcast %132 : vector<8x1xf32> to vector<8x128xf32>
    %134 = arith.mulf %123, %133 : vector<8x128xf32>
    %135 = vector.broadcast %124 : vector<1x128xf32> to vector<8x128xf32>
    %136 = arith.mulf %134, %135 : vector<8x128xf32>
    %137 = arith.truncf %136 : vector<8x128xf32> to vector<8x128xbf16>
    %c0_41 = arith.constant 0 : index
    %c0_42 = arith.constant 0 : index
    %138 = vector.load %arg7[%c0_41, %c0_42] : memref<128x384xbf16, #tpu.memory_space<vmem>>, vector<128x384xbf16>
    %cst_43 = arith.constant dense<0.000000e+00> : vector<8x384xf32>
    %139 = tpu.matmul %137, %138, %cst_43 {dimension_numbers = #tpu.dot_dimension_numbers<[1], [0], [0], [1], [0, 0, 1, 1], [], []>} : vector<8x128xbf16>, vector<128x384xbf16>, vector<8x384xf32> -> vector<8x384xf32>
    %c0_44 = arith.constant 0 : index
    %c0_45 = arith.constant 0 : index
    %c0_46 = arith.constant 0 : index
    %140 = vector.load %arg3[%c0_44, %c0_45, %c0_46] : memref<1x1x8xf32, #tpu.memory_space<vmem>>, vector<1x1x8xf32>
    %141 = vector.shape_cast %140 : vector<1x1x8xf32> to vector<1x8xf32>
    %142 = vector.extract_strided_slice %139 {offsets = [0, 0], sizes = [8, 32], strides = [1, 1]} : vector<8x384xf32> to vector<8x32xf32>
    %143 = vector.extract_strided_slice %139 {offsets = [0, 128], sizes = [8, 32], strides = [1, 1]} : vector<8x384xf32> to vector<8x32xf32>
    %144 = vector.extract_strided_slice %139 {offsets = [0, 256], sizes = [8, 32], strides = [1, 1]} : vector<8x384xf32> to vector<8x32xf32>
    %cst_47 = arith.constant dense<0.000000e+00> : vector<8x8xf32>
    %145 = tpu.matmul %142, %143, %cst_47 {dimension_numbers = #tpu.dot_dimension_numbers<[1], [1], [0], [0], [0, 0, 1, 0], [], []>} : vector<8x32xf32>, vector<8x32xf32>, vector<8x8xf32> -> vector<8x8xf32>
    %146 = vector.broadcast %141 : vector<1x8xf32> to vector<8x8xf32>
    %147 = arith.addf %145, %146 : vector<8x8xf32>
    %cst_48 = arith.constant dense<0xFF800000> : vector<8xf32>
    %148 = vector.multi_reduction <maximumf>, %147, %cst_48 [1] : vector<8x8xf32> to vector<8xf32>
    %149 = vector.shape_cast %148 : vector<8xf32> to vector<8x1xf32>
    %150 = vector.broadcast %149 : vector<8x1xf32> to vector<8x8xf32>
    %151 = arith.subf %147, %150 : vector<8x8xf32>
    %152 = math.exp %151 : vector<8x8xf32>
    %cst_49 = arith.constant dense<0.000000e+00> : vector<8xf32>
    %153 = vector.multi_reduction <add>, %152, %cst_49 [1] : vector<8x8xf32> to vector<8xf32>
    %154 = vector.shape_cast %153 : vector<8xf32> to vector<8x1xf32>
    %155 = tpu.reciprocal %154 {approx = true} : vector<8x1xf32> -> vector<8x1xf32>
    %156 = vector.broadcast %155 : vector<8x1xf32> to vector<8x8xf32>
    %157 = arith.mulf %152, %156 : vector<8x8xf32>
    %cst_50 = arith.constant dense<0.000000e+00> : vector<8x32xf32>
    %158 = tpu.matmul %157, %144, %cst_50 {dimension_numbers = #tpu.dot_dimension_numbers<[1], [0], [0], [1], [0, 0, 1, 1], [], []>} : vector<8x8xf32>, vector<8x32xf32>, vector<8x32xf32> -> vector<8x32xf32>
    %159 = vector.extract_strided_slice %139 {offsets = [0, 32], sizes = [8, 32], strides = [1, 1]} : vector<8x384xf32> to vector<8x32xf32>
    %160 = vector.extract_strided_slice %139 {offsets = [0, 160], sizes = [8, 32], strides = [1, 1]} : vector<8x384xf32> to vector<8x32xf32>
    %161 = vector.extract_strided_slice %139 {offsets = [0, 288], sizes = [8, 32], strides = [1, 1]} : vector<8x384xf32> to vector<8x32xf32>
    %cst_51 = arith.constant dense<0.000000e+00> : vector<8x8xf32>
    %162 = tpu.matmul %159, %160, %cst_51 {dimension_numbers = #tpu.dot_dimension_numbers<[1], [1], [0], [0], [0, 0, 1, 0], [], []>} : vector<8x32xf32>, vector<8x32xf32>, vector<8x8xf32> -> vector<8x8xf32>
    %163 = vector.broadcast %141 : vector<1x8xf32> to vector<8x8xf32>
    %164 = arith.addf %162, %163 : vector<8x8xf32>
    %cst_52 = arith.constant dense<0xFF800000> : vector<8xf32>
    %165 = vector.multi_reduction <maximumf>, %164, %cst_52 [1] : vector<8x8xf32> to vector<8xf32>
    %166 = vector.shape_cast %165 : vector<8xf32> to vector<8x1xf32>
    %167 = vector.broadcast %166 : vector<8x1xf32> to vector<8x8xf32>
    %168 = arith.subf %164, %167 : vector<8x8xf32>
    %169 = math.exp %168 : vector<8x8xf32>
    %cst_53 = arith.constant dense<0.000000e+00> : vector<8xf32>
    %170 = vector.multi_reduction <add>, %169, %cst_53 [1] : vector<8x8xf32> to vector<8xf32>
    %171 = vector.shape_cast %170 : vector<8xf32> to vector<8x1xf32>
    %172 = tpu.reciprocal %171 {approx = true} : vector<8x1xf32> -> vector<8x1xf32>
    %173 = vector.broadcast %172 : vector<8x1xf32> to vector<8x8xf32>
    %174 = arith.mulf %169, %173 : vector<8x8xf32>
    %cst_54 = arith.constant dense<0.000000e+00> : vector<8x32xf32>
    %175 = tpu.matmul %174, %161, %cst_54 {dimension_numbers = #tpu.dot_dimension_numbers<[1], [0], [0], [1], [0, 0, 1, 1], [], []>} : vector<8x8xf32>, vector<8x32xf32>, vector<8x32xf32> -> vector<8x32xf32>
    %176 = vector.extract_strided_slice %139 {offsets = [0, 64], sizes = [8, 32], strides = [1, 1]} : vector<8x384xf32> to vector<8x32xf32>
    %177 = vector.extract_strided_slice %139 {offsets = [0, 192], sizes = [8, 32], strides = [1, 1]} : vector<8x384xf32> to vector<8x32xf32>
    %178 = vector.extract_strided_slice %139 {offsets = [0, 320], sizes = [8, 32], strides = [1, 1]} : vector<8x384xf32> to vector<8x32xf32>
    %cst_55 = arith.constant dense<0.000000e+00> : vector<8x8xf32>
    %179 = tpu.matmul %176, %177, %cst_55 {dimension_numbers = #tpu.dot_dimension_numbers<[1], [1], [0], [0], [0, 0, 1, 0], [], []>} : vector<8x32xf32>, vector<8x32xf32>, vector<8x8xf32> -> vector<8x8xf32>
    %180 = vector.broadcast %141 : vector<1x8xf32> to vector<8x8xf32>
    %181 = arith.addf %179, %180 : vector<8x8xf32>
    %cst_56 = arith.constant dense<0xFF800000> : vector<8xf32>
    %182 = vector.multi_reduction <maximumf>, %181, %cst_56 [1] : vector<8x8xf32> to vector<8xf32>
    %183 = vector.shape_cast %182 : vector<8xf32> to vector<8x1xf32>
    %184 = vector.broadcast %183 : vector<8x1xf32> to vector<8x8xf32>
    %185 = arith.subf %181, %184 : vector<8x8xf32>
    %186 = math.exp %185 : vector<8x8xf32>
    %cst_57 = arith.constant dense<0.000000e+00> : vector<8xf32>
    %187 = vector.multi_reduction <add>, %186, %cst_57 [1] : vector<8x8xf32> to vector<8xf32>
    %188 = vector.shape_cast %187 : vector<8xf32> to vector<8x1xf32>
    %189 = tpu.reciprocal %188 {approx = true} : vector<8x1xf32> -> vector<8x1xf32>
    %190 = vector.broadcast %189 : vector<8x1xf32> to vector<8x8xf32>
    %191 = arith.mulf %186, %190 : vector<8x8xf32>
    %cst_58 = arith.constant dense<0.000000e+00> : vector<8x32xf32>
    %192 = tpu.matmul %191, %178, %cst_58 {dimension_numbers = #tpu.dot_dimension_numbers<[1], [0], [0], [1], [0, 0, 1, 1], [], []>} : vector<8x8xf32>, vector<8x32xf32>, vector<8x32xf32> -> vector<8x32xf32>
    %193 = vector.extract_strided_slice %139 {offsets = [0, 96], sizes = [8, 32], strides = [1, 1]} : vector<8x384xf32> to vector<8x32xf32>
    %194 = vector.extract_strided_slice %139 {offsets = [0, 224], sizes = [8, 32], strides = [1, 1]} : vector<8x384xf32> to vector<8x32xf32>
    %195 = vector.extract_strided_slice %139 {offsets = [0, 352], sizes = [8, 32], strides = [1, 1]} : vector<8x384xf32> to vector<8x32xf32>
    %cst_59 = arith.constant dense<0.000000e+00> : vector<8x8xf32>
    %196 = tpu.matmul %193, %194, %cst_59 {dimension_numbers = #tpu.dot_dimension_numbers<[1], [1], [0], [0], [0, 0, 1, 0], [], []>} : vector<8x32xf32>, vector<8x32xf32>, vector<8x8xf32> -> vector<8x8xf32>
    %197 = vector.broadcast %141 : vector<1x8xf32> to vector<8x8xf32>
    %198 = arith.addf %196, %197 : vector<8x8xf32>
    %cst_60 = arith.constant dense<0xFF800000> : vector<8xf32>
    %199 = vector.multi_reduction <maximumf>, %198, %cst_60 [1] : vector<8x8xf32> to vector<8xf32>
    %200 = vector.shape_cast %199 : vector<8xf32> to vector<8x1xf32>
    %201 = vector.broadcast %200 : vector<8x1xf32> to vector<8x8xf32>
    %202 = arith.subf %198, %201 : vector<8x8xf32>
    %203 = math.exp %202 : vector<8x8xf32>
    %cst_61 = arith.constant dense<0.000000e+00> : vector<8xf32>
    %204 = vector.multi_reduction <add>, %203, %cst_61 [1] : vector<8x8xf32> to vector<8xf32>
    %205 = vector.shape_cast %204 : vector<8xf32> to vector<8x1xf32>
    %206 = tpu.reciprocal %205 {approx = true} : vector<8x1xf32> -> vector<8x1xf32>
    %207 = vector.broadcast %206 : vector<8x1xf32> to vector<8x8xf32>
    %208 = arith.mulf %203, %207 : vector<8x8xf32>
    %cst_62 = arith.constant dense<0.000000e+00> : vector<8x32xf32>
    %209 = tpu.matmul %208, %195, %cst_62 {dimension_numbers = #tpu.dot_dimension_numbers<[1], [0], [0], [1], [0, 0, 1, 1], [], []>} : vector<8x8xf32>, vector<8x32xf32>, vector<8x32xf32> -> vector<8x32xf32>
    %210 = tpu.concatenate %158, %175, %192, %209 in 1 : vector<8x32xf32>, vector<8x32xf32>, vector<8x32xf32>, vector<8x32xf32> -> vector<8x128xf32>
    %211 = arith.truncf %210 : vector<8x128xf32> to vector<8x128xbf16>
    %c0_63 = arith.constant 0 : index
    %c0_64 = arith.constant 0 : index
    %212 = vector.load %arg8[%c0_63, %c0_64] : memref<128x128xbf16, #tpu.memory_space<vmem>>, vector<128x128xbf16>
    %cst_65 = arith.constant dense<0.000000e+00> : vector<8x128xf32>
    %213 = tpu.matmul %211, %212, %cst_65 {dimension_numbers = #tpu.dot_dimension_numbers<[1], [0], [0], [1], [0, 0, 1, 1], [], []>} : vector<8x128xbf16>, vector<128x128xbf16>, vector<8x128xf32> -> vector<8x128xf32>
    %214 = vector.shape_cast %213 : vector<8x128xf32> to vector<8x1x128xf32>
    %215 = vector.broadcast %214 : vector<8x1x128xf32> to vector<8x4x128xf32>
    %216 = arith.addf %113, %215 : vector<8x4x128xf32>
    %217 = vector.shape_cast %216 : vector<8x4x128xf32> to vector<32x128xf32>
    %c2 = arith.constant 2 : index
    %c0_66 = arith.constant 0 : index
    %218 = vector.load %arg4[%c2, %c0_66] : memref<3x128xf32, #tpu.memory_space<vmem>>, vector<1x128xf32>
    %219 = arith.mulf %217, %217 : vector<32x128xf32>
    %cst_67 = arith.constant dense<0.000000e+00> : vector<32xf32>
    %220 = vector.multi_reduction <add>, %219, %cst_67 [1] : vector<32x128xf32> to vector<32xf32>
    %221 = vector.shape_cast %220 : vector<32xf32> to vector<32x1xf32>
    %cst_68 = arith.constant 1.280000e+02 : f32
    %222 = vector.broadcast %cst_68 : f32 to vector<32x1xf32>
    %223 = arith.divf %221, %222 : vector<32x1xf32>
    %cst_69 = arith.constant 9.99999974E-6 : f32
    %224 = vector.broadcast %cst_69 : f32 to vector<32x1xf32>
    %225 = arith.addf %223, %224 : vector<32x1xf32>
    %226 = math.rsqrt %225 : vector<32x1xf32>
    %227 = vector.broadcast %226 : vector<32x1xf32> to vector<32x128xf32>
    %228 = arith.mulf %217, %227 : vector<32x128xf32>
    %229 = vector.broadcast %218 : vector<1x128xf32> to vector<32x128xf32>
    %230 = arith.mulf %228, %229 : vector<32x128xf32>
    %231 = arith.truncf %230 : vector<32x128xf32> to vector<32x128xbf16>
    %c0_70 = arith.constant 0 : index
    %c0_71 = arith.constant 0 : index
    %232 = vector.load %arg9[%c0_70, %c0_71] : memref<128x768xbf16, #tpu.memory_space<vmem>>, vector<128x768xbf16>
    %cst_72 = arith.constant dense<0.000000e+00> : vector<32x768xf32>
    %233 = tpu.matmul %231, %232, %cst_72 {dimension_numbers = #tpu.dot_dimension_numbers<[1], [0], [0], [1], [0, 0, 1, 1], [], []>} : vector<32x128xbf16>, vector<128x768xbf16>, vector<32x768xf32> -> vector<32x768xf32>
    %234 = vector.extract_strided_slice %233 {offsets = [0, 0], sizes = [32, 384], strides = [1, 1]} : vector<32x768xf32> to vector<32x384xf32>
    %235 = vector.extract_strided_slice %233 {offsets = [0, 384], sizes = [32, 384], strides = [1, 1]} : vector<32x768xf32> to vector<32x384xf32>
    %236 = arith.negf %234 : vector<32x384xf32>
    %237 = math.exp %236 : vector<32x384xf32>
    %cst_73 = arith.constant 1.000000e+00 : f32
    %238 = vector.broadcast %cst_73 : f32 to vector<32x384xf32>
    %239 = arith.addf %238, %237 : vector<32x384xf32>
    %240 = arith.divf %238, %239 : vector<32x384xf32>
    %241 = arith.mulf %234, %240 : vector<32x384xf32>
    %242 = arith.mulf %241, %235 : vector<32x384xf32>
    %243 = arith.truncf %242 : vector<32x384xf32> to vector<32x384xbf16>
    %c0_74 = arith.constant 0 : index
    %c0_75 = arith.constant 0 : index
    %244 = vector.load %arg10[%c0_74, %c0_75] : memref<384x128xbf16, #tpu.memory_space<vmem>>, vector<384x128xbf16>
    %cst_76 = arith.constant dense<0.000000e+00> : vector<32x128xf32>
    %245 = tpu.matmul %243, %244, %cst_76 {dimension_numbers = #tpu.dot_dimension_numbers<[1], [0], [0], [1], [0, 0, 1, 1], [], []>} : vector<32x384xbf16>, vector<384x128xbf16>, vector<32x128xf32> -> vector<32x128xf32>
    %246 = arith.addf %217, %245 : vector<32x128xf32>
    %247 = vector.shape_cast %246 : vector<32x128xf32> to vector<8x4x128xf32>
    %248 = arith.truncf %247 : vector<8x4x128xf32> to vector<8x4x128xbf16>
    %c0_77 = arith.constant 0 : index
    %c0_78 = arith.constant 0 : index
    %c0_79 = arith.constant 0 : index
    %c0_80 = arith.constant 0 : index
    %249 = vector.load %arg11[%c0_77, %c0_78, %c0_79, %c0_80] : memref<1x8x4x128xbf16, #tpu.memory_space<vmem>>, vector<1x8x4x128xbf16>
    %250 = vector.shape_cast %249 : vector<1x8x4x128xbf16> to vector<8x4x128xbf16>
    %251 = vector.shape_cast %248 : vector<8x4x128xbf16> to vector<1x8x4x128xbf16>
    tpu.vector_store %arg11[%c0_77, %c0_78, %c0_79, %c0_80], %251 {strides = array<i32>} : memref<1x8x4x128xbf16, #tpu.memory_space<vmem>>, vector<1x8x4x128xbf16>,
    return
  }
  func.func @transform_0(%arg0: i32) -> (i32, i32, i32, i32) {
    %c0_i32 = arith.constant 0 : i32
    %c0_i32_0 = arith.constant 0 : i32
    %c0_i32_1 = arith.constant 0 : i32
    %c0_i32_2 = arith.constant 0 : i32
    return %arg0, %c0_i32, %c0_i32_0, %c0_i32_1 : i32, i32, i32, i32
  }
  func.func @transform_1(%arg0: i32) -> (i32, i32, i32) {
    %c0_i32 = arith.constant 0 : i32
    %c0_i32_0 = arith.constant 0 : i32
    %c0_i32_1 = arith.constant 0 : i32
    return %arg0, %c0_i32, %c0_i32_0 : i32, i32, i32
  }
  func.func @transform_2(%arg0: i32) -> (i32, i32, i32) {
    %c0_i32 = arith.constant 0 : i32
    %c0_i32_0 = arith.constant 0 : i32
    %c0_i32_1 = arith.constant 0 : i32
    return %arg0, %c0_i32, %c0_i32_0 : i32, i32, i32
  }
  func.func @transform_3(%arg0: i32) -> (i32, i32) {
    %c0_i32 = arith.constant 0 : i32
    %c0_i32_0 = arith.constant 0 : i32
    %c0_i32_1 = arith.constant 0 : i32
    return %c0_i32, %c0_i32_0 : i32, i32
  }
  func.func @transform_4(%arg0: i32) -> (i32, i32) {
    %c0_i32 = arith.constant 0 : i32
    %c0_i32_0 = arith.constant 0 : i32
    %c0_i32_1 = arith.constant 0 : i32
    return %c0_i32, %c0_i32_0 : i32, i32
  }
  func.func @transform_5(%arg0: i32) -> (i32, i32) {
    %c0_i32 = arith.constant 0 : i32
    %c0_i32_0 = arith.constant 0 : i32
    %c0_i32_1 = arith.constant 0 : i32
    return %c0_i32, %c0_i32_0 : i32, i32
  }
  func.func @transform_6(%arg0: i32) -> (i32, i32) {
    %c0_i32 = arith.constant 0 : i32
    %c0_i32_0 = arith.constant 0 : i32
    %c0_i32_1 = arith.constant 0 : i32
    return %c0_i32, %c0_i32_0 : i32, i32
  }
  func.func @transform_7(%arg0: i32) -> (i32, i32) {
    %c0_i32 = arith.constant 0 : i32
    %c0_i32_0 = arith.constant 0 : i32
    %c0_i32_1 = arith.constant 0 : i32
    return %c0_i32, %c0_i32_0 : i32, i32
  }
  func.func @transform_8(%arg0: i32) -> (i32, i32) {
    %c0_i32 = arith.constant 0 : i32
    %c0_i32_0 = arith.constant 0 : i32
    %c0_i32_1 = arith.constant 0 : i32
    return %c0_i32, %c0_i32_0 : i32, i32
  }
  func.func @transform_9(%arg0: i32) -> (i32, i32) {
    %c0_i32 = arith.constant 0 : i32
    %c0_i32_0 = arith.constant 0 : i32
    %c0_i32_1 = arith.constant 0 : i32
    return %c0_i32, %c0_i32_0 : i32, i32
  }
  func.func @transform_10(%arg0: i32) -> (i32, i32, i32, i32) {
    %c0_i32 = arith.constant 0 : i32
    %c0_i32_0 = arith.constant 0 : i32
    %c0_i32_1 = arith.constant 0 : i32
    %c0_i32_2 = arith.constant 0 : i32
    return %arg0, %c0_i32, %c0_i32_0, %c0_i32_1 : i32, i32, i32, i32
  }
}

</mosaic_0001>

<bundles_post_ra>
// kernel: usm_forward.5
= control target key start
LH: loop header
LB: loop body
LE: loop exit
PB: predicated region body
PF: predicated region fallthrough
CT: control target
= control target key end

     0   :  { %s509_s12 = smov 0   ;;  %s557_s0 = inlined_call_operand.vmem [shape: bf16[64,128], index: 0, kind: input, shape index: {}]   ;;  %s558_s1 = inlined_call_operand.vmem [shape: f32[1,128], index: 1, kind: input, shape index: {}]   ;;  %s559_s2 = inlined_call_operand.vmem [shape: bf16[128,128], index: 2, kind: input, shape index: {}]   ;;  %s560_s3 = inlined_call_operand.vmem [shape: f32[64,128], index: 3, kind: output, shape index: {}]  }
   0x1 LB: > { %s398_s13 = sadd.s32 4294967295, %s487_s12   ;;  %p402_p0 = scmp.ge.s32.totalorder %s487_s12, 1  ;;  %s487_s12 = sphi %s509_s12, %s13_s12  }
   0x2   : > { %p138_p1 = scmp.lt.s32.totalorder %s487_s12, 3 }
   0x4   : > { %p139_p2 = pnand %p402_p0, %p138_p1 }
   0x5   : > { %s403_s14 = sshll.u32 (!%p139_p2), %s398_s13, 2  ;;  %v465_v0 = vld [vmem:[%s559_s2] sm:$0xff] (!%p139_p2)   ;;  %v466_v1 = vld [vmem:[%s559_s2 + $0x8] sm:$0xff] (!%p139_p2)   ;;  %v467_v12 = vld [vmem:[%s559_s2 + $0x10] sm:$0xff] (!%p139_p2)  }
   0x6   : > { %142 = sbr.rel (%p139_p2) target bundleno = 406 (0x196), region = 32  ;;  %p163_p3 = scmp.lt.s32.totalorder (!%p139_p2), %s403_s14, 7  ;;  %437 = vmatprep.subr.bf16.mxu0 (!%p139_p2), %v465_v0  ;;  %v468_v13 = vld [vmem:[%s559_s2 + $0x18] sm:$0xff] (!%p139_p2)   ;;  %v469_v14 = vld [vmem:[%s559_s2 + $0x20] sm:$0xff] (!%p139_p2)   ;;  %v470_v15 = vld [vmem:[%s559_s2 + $0x28] sm:$0xff] (!%p139_p2)  }
   0x7   : > { %438 = vmatpush3.bf16.msra.mxu0 (!%p139_p2), %v465_v0  ;;  %v471_v16 = vld [vmem:[%s559_s2 + $0x30] sm:$0xff] (!%p139_p2)   ;;  %v472_v17 = vld [vmem:[%s559_s2 + $0x38] sm:$0xff] (!%p139_p2)   ;;  %v407_v34 = vld [vmem:[%s558_s1] ss:$0 sm:$0xff] (!%p139_p2) }
   0x8   : > { %439 = vmatprep.subr.bf16.mxu0 (!%p139_p2), %v466_v1 }
   0xb   : > { %440 = vmatpush3.bf16.msra.mxu0 (!%p139_p2), %v466_v1 }
   0xc   : > { %441 = vmatprep.subr.bf16.mxu0 (!%p139_p2), %v467_v12 }
   0xd   : > { %s562_s14 = smov (!%p163_p3, %s403_s14), 7 }
   0xe   : > { %s404_s19 = sshll.u32 %s562_s14, 2  ;;  %s406_s10 = sshll.u32 %s562_s14, 3 }
   0xf   : > { %s166_s22 = scalar_lea.vmem %s557_s0, %s404_s19  ;;  %442 = vmatpush3.bf16.msra.mxu0 %v467_v12  ;;  %s172_s15 = scalar_lea.vmem %s560_s3, %s406_s10 }
  0x10   : > { %v426_v2 = vld [vmem:[%s166_s22 + $0x8] sm:$0xff]   ;;  %v419_v3 = vld [vmem:[%s166_s22] sm:$0xff]   ;;  %443 = vmatprep.subr.bf16.mxu0 %v468_v13 }
  0x11   : > { %v424_v4 = vunpack.c.l.bf16 %v426_v2  ;;  %v420_v5 = vunpack.c.l.bf16 %v419_v3  ;;  %v425_v6 = vunpack.c.h.bf16 %v426_v2  ;;  %v421_v7 = vunpack.c.h.bf16 %v419_v3 }
  0x13   : > { %v186_v8 = vmul.f32 %v424_v4, %v424_v4  ;;  %v184_v9 = vmul.f32 %v420_v5, %v420_v5  ;;  %v187_v10 = vmul.f32 %v425_v6, %v425_v6  ;;  %v185_v11 = vmul.f32 %v421_v7, %v421_v7  ;;  %444 = vmatpush3.bf16.msra.mxu0 %v468_v13 }
  0x14   : > { %445 = vmatprep.subr.bf16.mxu0 %v469_v14 }
  0x15   : > { %192 = vadd.xlane.f32.xlu1 %v186_v8  ;;  %188 = vadd.xlane.f32.xlu0 %v184_v9 }
  0x17   : > { %446 = vmatpush3.bf16.msra.mxu0 %v469_v14 }
  0x18   : > { %447 = vmatprep.subr.bf16.mxu0 %v470_v15 }
  0x19   : > { %194 = vadd.xlane.f32.xlu1 %v187_v10  ;;  %190 = vadd.xlane.f32.xlu0 %v185_v11 }
  0x1b   : > { %448 = vmatpush3.bf16.msra.mxu0 %v470_v15 }
  0x1c   : > { %449 = vmatprep.subr.bf16.mxu0 %v471_v16 }
  0x1f   : > { %450 = vmatpush3.bf16.msra.mxu0 %v471_v16 }
  0x20   : > { %451 = vmatprep.subr.bf16.mxu0 %v472_v17 }
  0x23   : > { %452 = vmatpush3.bf16.msra.mxu0 %v472_v17 }
  0xa2   : > { %v193_v18 = vpop.xlane.xlu1 %192  ;;  %v189_v19 = vpop.xlane.xlu0 %188 }
  0xa3   : > { %v199_v20 = vmul.f32 0.0078125, %v193_v18  ;;  %v197_v21 = vmul.f32 0.0078125, %v189_v19 }
  0xa5   : > { %v203_v22 = vadd.f32 1e-05, %v199_v20  ;;  %v201_v23 = vadd.f32 1e-05, %v197_v21 }
  0xa6   : > { %v195_v24 = vpop.xlane.xlu1 %194  ;;  %v191_v25 = vpop.xlane.xlu0 %190 }
  0xa7   : > { %473 = vrsqrt.f32 %v203_v22  ;;  %v200_v26 = vmul.f32 0.0078125, %v195_v24  ;;  %v198_v27 = vmul.f32 0.0078125, %v191_v25 }
  0xa8   : > { %475 = vrsqrt.f32 %v201_v23 }
  0xa9   : > { %v204_v28 = vadd.f32 1e-05, %v200_v26  ;;  %v202_v29 = vadd.f32 1e-05, %v198_v27 }
  0xab   : > { %477 = vrsqrt.f32 %v204_v28 }
  0xac   : > { %479 = vrsqrt.f32 %v202_v29 }
  0xb1   : > { %v474_v30 = vpop.eup %473 }
  0xb2   : > { %v476_v31 = vpop.eup %475  ;;  %v211_v32 = vmul.f32 %v474_v30, %v424_v4 }
  0xb3   : > { %v209_v35 = vmul.f32 %v476_v31, %v420_v5 }
  0xb4   : > { %v221_v39 = vmul.f32 %v407_v34, %v211_v32 }
  0xb5   : > { %v478_v33 = vpop.eup %477  ;;  %v219_v41 = vmul.f32 %v407_v34, %v209_v35 }
  0xb6   : > { %v480_v36 = vpop.eup %479  ;;  %v212_v37 = vmul.f32 %v478_v33, %v425_v6 }
  0xb7   : > { %v210_v38 = vmul.f32 %v480_v36, %v421_v7 }
  0xb8   : > { %v222_v40 = vmul.f32 %v407_v34, %v212_v37 }
  0xb9   : > { %v220_v42 = vmul.f32 %v407_v34, %v210_v38 }
  0xba   : > { %v224_v43 = vpack.c.bf16 %v222_v40, %v221_v39 }
  0xbb   : > { %v223_v44 = vpack.c.bf16 %v220_v42, %v219_v41 }
  0xbd   : > { %453 = vmatprep.mubr.bf16.mxu0 %v223_v44 }
  0xbe   : > { %454 = vmatmul.mubr.bf16.vlgmr.msra.gmra.mrb[0].mxu0 %v224_v43 }
 0x191   : > { %v455_v45 = vpop.f32.mrb[0].mxu0 }
 0x192   : > { %v323_v46 = vpop.f32.mrb[1].mxu0  ;;  %340 = vst [vmem:[%s172_s15 + $0x10] sm:$0xff] %v455_v45 }
 0x193   : > { %338 = vst [vmem:[%s172_s15] sm:$0xff] %v323_v46  ;;  %v456_v47 = vpop.f32.mrb[2].mxu0 }
 0x194   : > { %v326_v48 = vpop.f32.mrb[3].mxu0  ;;  %341 = vst [vmem:[%s172_s15 + $0x18] sm:$0xff] %v456_v47 }
 0x195   : > { %339 = vst [vmem:[%s172_s15 + $0x8] sm:$0xff] %v326_v48 }
 0x196 PF: > { %s13_s12 = sadd.s32 1, %s487_s12  }
 0x197   : > { %p10_p4 = scmp.ge.s32.totalorder %s13_s12, 4  }
 0x199   :  { %12 = sbr.rel (!%p10_p4) target bundleno = 1 (0x1), region = 62 }

// kernel: usm_forward.4
= control target key start
LH: loop header
LB: loop body
LE: loop exit
PB: predicated region body
PF: predicated region fallthrough
CT: control target
= control target key end

     0   :  { %s10187_s13 = smov 0   ;;  %s12018_s0 = inlined_call_operand.vmem [shape: bf16[2,8,4,128], index: 0, kind: input, shape index: {}]   ;;  %s12019_s1 = inlined_call_operand.vmem [shape: f32[2,8,4], index: 1, kind: input, shape index: {}]   ;;  %s12020_s2 = inlined_call_operand.vmem [shape: f32[2,1,8], index: 2, kind: input, shape index: {}]   ;;  %s12021_s3 = inlined_call_operand.vmem [shape: f32[3,128], index: 3, kind: input, shape index: {}]   ;;  %s12022_s4 = inlined_call_operand.vmem [shape: bf16[128,256], index: 4, kind: input, shape index: {}]   ;;  %s12023_s5 = inlined_call_operand.vmem [shape: bf16[128,128], index: 5, kind: input, shape index: {}]   ;;  %s12024_s6 = inlined_call_operand.vmem [shape: bf16[128,384], index: 6, kind: input, shape index: {}]   ;;  %s12025_s7 = inlined_call_operand.vmem [shape: bf16[128,128], index: 7, kind: input, shape index: {}]   ;;  %s12026_s8 = inlined_call_operand.vmem [shape: bf16[128,768], index: 8, kind: input, shape index: {}]   ;;  %s12027_s9 = inlined_call_operand.vmem [shape: bf16[384,128], index: 9, kind: input, shape index: {}]   ;;  %s12028_s10 = inlined_call_operand.vmem [shape: bf16[2,8,4,128], index: 10, kind: output, shape index: {}]  }
   0x1 LB: > { %s8754_s14 = sadd.s32 4294967295, %s10121_s13   ;;  %p8758_p0 = scmp.ge.s32.totalorder %s10121_s13, 1  ;;  %s10121_s13 = sphi %s10187_s13, %s20_s13  }
   0x2   : > { %p329_p1 = scmp.lt.s32.totalorder %s10121_s13, 3 }
   0x4   : > { %p330_p2 = pnand %p8758_p0, %p329_p1 }
   0x6   : > { %333 = sbr.rel (%p330_p2) target bundleno = 7157 (0x1bf5), region = 60 }
   0xd   : > { %p374_p3 = scmp.lt.s32.totalorder %s8754_s14, 1  ;;  %v9720_v0 = vld [vmem:[%s12022_s4 + $0x4] ss:$8 sps:$4 sm:$0xff]   ;;  %v9722_v1 = vld [vmem:[%s12022_s4] ss:$8 sps:$4 sm:$0xff]   ;;  %v12029_v40 = vmov 0   ;;  %v416_v51 = vlaneseq }
   0xe   : > { %712 = vmatprep.subr.bf16.mxu0 %v9720_v0  ;;  %v9723_v30 = vld [vmem:[%s12022_s4 + $0x14] ss:$8 sps:$4 sm:$0xff]   ;;  %v9725_v31 = vld [vmem:[%s12022_s4 + $0x10] ss:$8 sps:$4 sm:$0xff]   ;;  %v9726_v32 = vld [vmem:[%s12022_s4 + $0x24] ss:$8 sps:$4 sm:$0xff]   ;;  %744 = vmatprep.mubr.bf16.mxu0 %v12029_v40 }
   0xf   : > { %s12082_s14 = smov (!%p374_p3, %s8754_s14), 1  ;;  %713 = vmatpush1.bf16.msra.mxu0 %v9722_v1  ;;  %v9728_v33 = vld [vmem:[%s12022_s4 + $0x20] ss:$8 sps:$4 sm:$0xff]   ;;  %v9729_v34 = vld [vmem:[%s12022_s4 + $0x34] ss:$8 sps:$4 sm:$0xff]   ;;  %v10284_v61 = vshrl.u32 %v416_v51, 7 }
  0x10   : > { %s9051_s19 = sshll.u32 %s12082_s14, 4  ;;  %714 = vmatprep.subr.bf16.mxu0 %v9723_v30  ;;  %v9731_v35 = vld [vmem:[%s12022_s4 + $0x30] ss:$8 sps:$4 sm:$0xff]   ;;  %v9732_v36 = vld [vmem:[%s12022_s4 + $0x44] ss:$8 sps:$4 sm:$0xff]   ;;  %vm10127_vm0 = vmmov 0  }
  0x11   : > { %s378_s22 = scalar_lea.vmem %s12018_s0, %s9051_s19  ;;  %v9734_v37 = vld [vmem:[%s12022_s4 + $0x40] ss:$8 sps:$4 sm:$0xff]   ;;  %v9735_v38 = vld [vmem:[%s12022_s4 + $0x54] ss:$8 sps:$4 sm:$0xff]   ;;  %v9737_v39 = vld [vmem:[%s12022_s4 + $0x50] ss:$8 sps:$4 sm:$0xff]   ;;  %s11998_s16 = scalar_lea.vmem %s12028_s10, %s9051_s19 }
  0x12   : > { %v392_v2 = vld [vmem:[%s378_s22] sm:$0x3]  ;;  %v393_v3 = vld [vmem:[%s378_s22 + $0x2] sm:$0x3]  ;;  %v394_v6 = vld [vmem:[%s378_s22 + $0x4] sm:$0x3] }
  0x13   : > { %v10209_v4 = vunpack.c.l.bf16 %v392_v2  ;;  %v10211_v5 = vunpack.c.l.bf16 %v393_v3  ;;  %v395_v7 = vld [vmem:[%s378_s22 + $0x6] sm:$0x3]  ;;  %v396_v8 = vld [vmem:[%s378_s22 + $0x8] sm:$0x3]  ;;  %v10213_v9 = vunpack.c.l.bf16 %v394_v6  ;;  %v397_v11 = vld [vmem:[%s378_s22 + $0xa] sm:$0x3]  ;;  %715 = vmatpush1.bf16.msra.mxu0 %v9725_v31 }
  0x14   : > { %v10215_v10 = vunpack.c.l.bf16 %v395_v7  ;;  %v10217_v12 = vunpack.c.l.bf16 %v396_v8  ;;  %v398_v13 = vld [vmem:[%s378_s22 + $0xc] sm:$0x3]  ;;  %v399_v14 = vld [vmem:[%s378_s22 + $0xe] sm:$0x3]  ;;  %v10223_v17 = vunpack.c.l.bf16 %v397_v11  ;;  %716 = vmatprep.subr.bf16.mxu0 %v9726_v32  ;;  %v9740_v42 = vld [vmem:[%s12022_s4 + $0x60] ss:$8 sps:$4 sm:$0xff]   ;;  %s385_s22 = scalar_lea.vmem %s12020_s2, %s12082_s14 }
  0x15   : > { %12047 = vst [vmem:[#allocation2_spill] sm:$0xff] %v10209_v4  ;;  %12048 = vst [vmem:[#allocation3_spill] sm:$0xff] %v10211_v5  ;;  %v462_v15 = vmul.f32 %v10209_v4, %v10209_v4  ;;  %v463_v16 = vmul.f32 %v10211_v5, %v10211_v5  ;;  %v10225_v18 = vunpack.c.l.bf16 %v398_v13  ;;  %v464_v19 = vmul.f32 %v10213_v9, %v10213_v9  ;;  %v9738_v41 = vld [vmem:[%s12022_s4 + $0x64] ss:$8 sps:$4 sm:$0xff]   ;;  %v9741_v43 = vld [vmem:[%s12022_s4 + $0x74] ss:$8 sps:$4 sm:$0xff]  }
  0x16   : > { %12049 = vst [vmem:[#allocation4_spill] sm:$0xff] %v10213_v9  ;;  %12050 = vst [vmem:[#allocation5_spill] sm:$0xff] %v10215_v10  ;;  %v465_v20 = vmul.f32 %v10215_v10, %v10215_v10  ;;  %v466_v21 = vmul.f32 %v10217_v12, %v10217_v12  ;;  %v10233_v22 = vunpack.c.l.bf16 %v399_v14  ;;  %v467_v24 = vmul.f32 %v10223_v17, %v10223_v17  ;;  %v9743_v44 = vld [vmem:[%s12022_s4 + $0x70] ss:$8 sps:$4 sm:$0xff]   ;;  %v8765_v3 = vld [vmem:[%s12021_s3] ss:$0 sm:$0xff] }
  0x17   : > { %12051 = vst [vmem:[#allocation6_spill] sm:$0xff] %v10217_v12  ;;  %12052 = vst [vmem:[#allocation7_spill] sm:$0xff] %v10223_v17  ;;  %v478_v23 = vcombine.low %v462_v15, %v463_v16  ;;  %v468_v25 = vmul.f32 %v10225_v18, %v10225_v18  ;;  %717 = vmatpush1.bf16.msra.mxu0 %v9728_v33  ;;  %v10124_v52 = vmov 839922192   ;;  %v10125_v54 = vmov 1985246804  }
  0x18   : > { %12053 = vst [vmem:[#allocation8_spill] sm:$0xff] %v10225_v18  ;;  %12054 = vst [vmem:[#allocation9_spill] sm:$0xff] %v10233_v22  ;;  %v469_v26 = vmul.f32 %v10233_v22, %v10233_v22  ;;  %v479_v27 = vcombine.low %v464_v19, %v465_v20  ;;  %v480_v28 = vcombine.low %v466_v21, %v467_v24  ;;  %718 = vmatprep.subr.bf16.mxu0 %v9729_v34  ;;  %vm821_vm1 = vcmask 261120   ;;  %s10128_s18 = smov 64   ;;  %s8761_s20 = sshll.u32 %s12082_s14, 3 }
  0x19   : > { %486 = vadd.xlane.f32.xlu0 %v478_v23  ;;  %v512_v53 = vunpack.c.l.s4 %v10124_v52  ;;  %v519_v55 = vunpack.c.l.s4 %v10125_v54  ;;  %v588_v13 = vcombine.high %v8765_v3, %v8765_v3  ;;  %vm1509_vm2 = vcmask 1043456   ;;  %s10448_s23 = scalar_lea.vmem %s12019_s1, %s8761_s20  ;;  %s10130_s24 = smov 96  }
  0x1a   : > { %490 = vadd.xlane.f32.xlu1 %v480_v28  ;;  %v481_v29 = vcombine.low %v468_v25, %v469_v26  ;;  %vm1414_vm3 = vcmask 27648   ;;  %vm1505_vm4 = vcmask 31744   ;;  %s10131_s25 = smov 32   ;;  %vm6081_vm5 = vcmask 523264  }
  0x1b   : > { %719 = vmatpush1.bf16.msra.mxu0 %v9731_v35  ;;  %v513_v62 = vunpack.c.0.s8 %v512_v53  ;;  %v520_v63 = vunpack.c.0.s8 %v519_v55  ;;  %vm6090_vm6 = vcmask 785408   ;;  %vm6424_vm7 = vcmask 1041409  }
  0x1c   : > { %720 = vmatprep.subr.bf16.mxu0 %v9732_v36  ;;  %vm6427_vm8 = vcmask 1042434   ;;  %vm6430_vm9 = vcmask 1043459   ;;  %vm6433_vm10 = vcmask 1044484   ;;  %vm6436_vm11 = vcmask 1045509  }
  0x1d   : > { %488 = vadd.xlane.f32.xlu0 %v479_v27  ;;  %v10287_v1 = vsub.s32 %v513_v62, %v10284_v61  ;;  %v10290_v2 = vsub.s32 %v520_v63, %v10284_v61  ;;  %vm6439_vm12 = vcmask 1046534   ;;  %vm6442_vm13 = vcmask 1047559  }
  0x1e   : > { %492 = vadd.xlane.f32.xlu1 %v481_v29  ;;  %vm6850_vm14 = vcmask 64512  }
  0x1f   : > { %721 = vmatpush1.bf16.msra.mxu0 %v9734_v37  ;;  %12055 = vst [vmem:[#allocation10_spill] sm:$0xff] %v10287_v1  ;;  %12056 = vst [vmem:[#allocation11_spill] sm:$0xff] %v10290_v2 }
  0x20   : > { %722 = vmatprep.subr.bf16.mxu0 %v9735_v38 }
  0x23   : > { %723 = vmatpush1.bf16.msra.mxu0 %v9737_v39 }
  0x24   : > { %724 = vmatprep.subr.bf16.mxu0 %v9738_v41 }
  0x27   : > { %725 = vmatpush1.bf16.msra.mxu0 %v9740_v42 }
  0x28   : > { %726 = vmatprep.subr.bf16.mxu0 %v9741_v43 }
  0x2b   : > { %727 = vmatpush1.bf16.msra.mxu0 %v9743_v44 }
  0xa6   : > { %v487_v45 = vpop.xlane.xlu0 %486 }
  0xa7   : > { %v495_v46 = vmul.f32 0.0078125, %v487_v45  ;;  %v491_v47 = vpop.xlane.xlu1 %490 }
  0xa8   : > { %v497_v49 = vmul.f32 0.0078125, %v491_v47 }
  0xa9   : > { %v499_v48 = vadd.f32 1e-05, %v495_v46 }
  0xaa   : > { %v489_v50 = vpop.xlane.xlu0 %488  ;;  %v501_v57 = vadd.f32 1e-05, %v497_v49 }
  0xab   : > { %9888 = vrsqrt.f32 %v499_v48  ;;  %v496_v56 = vmul.f32 0.0078125, %v489_v50  ;;  %v493_v58 = vpop.xlane.xlu1 %492  ;;  %v12031_v48 = vmov 0.0  }
  0xac   : > { %9890 = vrsqrt.f32 %v501_v57  ;;  %v498_v60 = vmul.f32 0.0078125, %v493_v58  ;;  %9263 = vmatprep.subr.mxu1 %v12031_v48  ;;  %9318 = vmatprep.subr.mxu0 %v12031_v48 }
  0xad   : > { %v500_v59 = vadd.f32 1e-05, %v496_v56  ;;  %9265 = vmatprep.mubr.msk.f32.mxu1 %vm10127_vm0, %v12031_v48 }
  0xae   : > { %v502_v0 = vadd.f32 1e-05, %v498_v60 }
  0xaf   : > { %9892 = vrsqrt.f32 %v500_v59 }
  0xb0   : > { %9894 = vrsqrt.f32 %v502_v0 }
  0xb5   : > { %v9889_v6 = vpop.eup %9888 }
  0xb6   : > { %v517_v7 = vrot.slane %v9889_v6, %v10287_v1  ;;  %v524_v8 = vrot.slane %v9889_v6, %v10290_v2  ;;  %v9891_v11 = vpop.eup %9890 }
  0xb7   : > { %v545_v16 = vrot.slane %v9891_v11, %v10287_v1  ;;  %v552_v19 = vrot.slane %v9891_v11, %v10290_v2 }
  0xb8   : > { %v575_v14 = vmul.f32 %v517_v7, %v10209_v4  ;;  %v576_v15 = vmul.f32 %v524_v8, %v10211_v5 }
  0xb9   : > { %v9893_v20 = vpop.eup %9892  ;;  %v579_v27 = vmul.f32 %v545_v16, %v10217_v12  ;;  %v580_v31 = vmul.f32 %v552_v19, %v10223_v17 }
  0xba   : > { %v531_v21 = vrot.slane %v9893_v20, %v10287_v1  ;;  %v538_v23 = vrot.slane %v9893_v20, %v10290_v2  ;;  %v9895_v24 = vpop.eup %9894  ;;  %v590_v25 = vmul.f32 %v8765_v3, %v575_v14  ;;  %v591_v26 = vmul.f32 %v588_v13, %v576_v15  ;;  %v408_v15 = vld [vmem:[%s10448_s23] sm:$0xff] }
  0xbb   : > { %v559_v30 = vrot.slane %v9895_v24, %v10287_v1  ;;  %v566_v32 = vrot.slane %v9895_v24, %v10290_v2  ;;  %v594_v39 = vmul.f32 %v8765_v3, %v579_v27  ;;  %v595_v41 = vmul.f32 %v588_v13, %v580_v31 }
  0xbc   : > { %v577_v28 = vmul.f32 %v531_v21, %v10213_v9  ;;  %v578_v29 = vmul.f32 %v538_v23, %v10215_v10  ;;  %v606_v36 = vcombine.low %v590_v25, %v591_v26  ;;  %v8764_v16 = vadd.f32 -1.0, %v408_v15 }
  0xbd   : > { %v581_v35 = vmul.f32 %v559_v30, %v10225_v18  ;;  %v582_v37 = vmul.f32 %v566_v32, %v10233_v22  ;;  %v608_v45 = vcombine.low %v594_v39, %v595_v41  ;;  %v10457_v25 = vsub.s32 0, %v10284_v61 }
  0xbe   : > { %v592_v33 = vmul.f32 %v8765_v3, %v577_v28  ;;  %v593_v34 = vmul.f32 %v588_v13, %v578_v29  ;;  %v410_v20 = vmul.f32 1e+09, %v8764_v16 }
  0xbf   : > { %v596_v42 = vmul.f32 %v8765_v3, %v581_v35  ;;  %v597_v43 = vmul.f32 %v588_v13, %v582_v37  ;;  %v10129_v13 = vmov 1966171168  }
  0xc0   : > { %v607_v38 = vcombine.low %v592_v33, %v593_v34  ;;  %v414_v14 = vunpack.c.l.s4 %v10129_v13  ;;  %v412_v34 = vcombine.high %v410_v20, %v410_v20 }
  0xc1   : > { %v609_v46 = vcombine.low %v596_v42, %v597_v43 }
  0xc2   : > { %v614_v44 = vpack.c.bf16 %v607_v38, %v606_v36  ;;  %v415_v19 = vunpack.c.0.s8 %v414_v14 }
  0xc3   : > { %v615_v47 = vpack.c.bf16 %v609_v46, %v608_v45 }
  0xc4   : > { %745 = vmatmul.mubr.bf16.vlgmr.msra.gmra.mrb[0].mxu0 %v614_v44  ;;  %v10452_v21 = vsub.s32 %v415_v19, %v10284_v61 }
  0xc5   : > { %754 = vmatprep.mubr.bf16.mxu0 %v12029_v40 }
  0xc6   : > { %12057 = vst [vmem:[#allocation12_spill] sm:$0xff] %v10452_v21  ;;  %v419_v23 = vrot.slane %v410_v20, %v10452_v21  ;;  %v426_v42 = vrot.slane %v412_v34, %v10452_v21 }
  0xc8   : > { %v435_v24 = vrot.slane %v419_v23, %v10452_v21  ;;  %v427_v26 = vcombine.high %v419_v23, %v419_v23  ;;  %v442_v13 = vrot.slane %v426_v42, %v10452_v21  ;;  %v428_v14 = vcombine.high %v426_v42, %v426_v42 }
  0xca   : > { %v10460_v27 = vrot.slane %v435_v24, %v10457_v25  ;;  %v449_v28 = vrot.slane %v427_v26, %v10452_v21  ;;  %v457_v33 = vcombine.high %v435_v24, %v435_v24  ;;  %v10482_v23 = vrot.slane %v442_v13, %v10457_v25 }
  0xcb   : > { %v456_v24 = vrot.slane %v428_v14, %v10452_v21  ;;  %v458_v34 = vcombine.high %v442_v13, %v442_v13 }
  0xcc   : > { %755 = vmatmul.mubr.bf16.gmra.mrb[4].mxu0 %v615_v47  ;;  %v10465_v32 = vrot.slane %v449_v28, %v10457_v25  ;;  %v10470_v39 = vrot.slane %v457_v33, %v10457_v25  ;;  %v459_v41 = vcombine.high %v449_v28, %v449_v28 }
  0xcd   : > { %9320 = vmatprep.mubr.msk.f32.mxu0 %vm10127_vm0, %v12031_v48  ;;  %v10488_v33 = vrot.slane %v456_v24, %v10457_v25  ;;  %v10493_v42 = vrot.slane %v458_v34, %v10457_v25 }
  0xce   : > { %v10476_v47 = vrot.slane %v459_v41, %v10457_v25 }
 0x197   : > { %v10318_v49 = vpop.f32.mrb[0].mxu0 }
 0x198   : > { %v10320_v50 = vpop.f32.mrb[1].mxu0  ;;  %v10345_v54 = vcombine.high %v10318_v49, %v10318_v49 }
 0x199   : > { %v10324_v51 = vcombine.high %v10320_v50, %v10320_v50  ;;  %1503 = vrot.lane.b32.xlu0 %v10320_v50, %s10128_s18  ;;  %v10328_v52 = vpop.f32.mrb[2].mxu0  ;;  %9264 = vmatpush3.xpose.msk.msra.mxu1 %vm821_vm1, %v10320_v50 }
 0x19a   : > { %v10332_v53 = vpop.f32.mrb[3].mxu0  ;;  %9268 = vmatprep.subr.mxu1 %v12031_v48  ;;  %v10379_v60 = vcombine.high %v10328_v52, %v10328_v52 }
 0x19b   : > { %1582 = vrot.lane.b32.xlu1 %v10324_v51, %s10128_s18  ;;  %v10358_v57 = vcombine.high %v10332_v53, %v10332_v53 }
 0x19c   : > { %9266 = vmatmul.mubr.msk.f32.vlgmr.msra.gmra.mrb[0].mxu1 %vm821_vm1, %v10318_v49 }
 0x19d   : > { %9269 = vmatpush3.xpose.msk.msra.mxu1 %vm821_vm1, %v10324_v51  ;;  %9270 = vmatprep.mubr.msk.f32.mxu1 %vm10127_vm0, %v12031_v48 }
 0x19e   : > { %9273 = vmatprep.subr.mxu1 %v12031_v48 }
 0x19f   : > { %1659 = vrot.lane.b32.xlu1 %v10332_v53, %s10128_s18  ;;  %v10350_v55 = vpop.f32.mrb[4].mxu0 }
 0x1a0   : > { %9271 = vmatmul.mubr.msk.f32.vlgmr.msra.gmra.mrb[2].mxu1 %vm821_vm1, %v10345_v54  ;;  %v10354_v56 = vpop.f32.mrb[5].mxu0  ;;  %v10395_v63 = vcombine.high %v10350_v55, %v10350_v55 }
 0x1a1   : > { %9274 = vmatpush3.xpose.msk.msra.mxu1 %vm821_vm1, %v10332_v53  ;;  %9275 = vmatprep.mubr.msk.f32.mxu1 %vm10127_vm0, %v12031_v48  ;;  %v10364_v58 = vpop.f32.mrb[6].mxu0  ;;  %v10386_v62 = vcombine.high %v10354_v56, %v10354_v56 }
 0x1a2   : > { %9278 = vmatprep.subr.mxu1 %v12031_v48  ;;  %v10367_v59 = vpop.f32.mrb[7].mxu0  ;;  %v10417_v3 = vcombine.high %v10364_v58, %v10364_v58 }
 0x1a3   : > { %1736 = vrot.lane.b32.xlu1 %v10358_v57, %s10128_s18  ;;  %v10408_v0 = vcombine.high %v10367_v59, %v10367_v59 }
 0x1a4   : > { %9276 = vmatmul.mubr.msk.f32.vlgmr.msra.gmra.mrb[4].mxu1 %vm821_vm1, %v10328_v52 }
 0x1a5   : > { %9279 = vmatpush3.xpose.msk.msra.mxu1 %vm821_vm1, %v10358_v57  ;;  %9280 = vmatprep.mubr.msk.f32.mxu1 %vm10127_vm0, %v12031_v48 }
 0x1a6   : > { %9283 = vmatprep.subr.mxu1 %v12031_v48 }
 0x1a8   : > { %9281 = vmatmul.mubr.msk.f32.vlgmr.msra.gmra.mrb[6].mxu1 %vm821_vm1, %v10379_v60 }
 0x1a9   : > { %9284 = vmatpush3.xpose.msk.msra.mxu1 %vm821_vm1, %v10354_v56  ;;  %9285 = vmatprep.mubr.msk.f32.mxu1 %vm10127_vm0, %v12031_v48 }
 0x1aa   : > { %9288 = vmatprep.subr.mxu1 %v12031_v48 }
 0x1ac   : > { %9286 = vmatmul.mubr.msk.f32.vlgmr.msra.gmra.mrb[8].mxu1 %vm821_vm1, %v10350_v55 }
 0x1ad   : > { %9289 = vmatpush3.xpose.msk.msra.mxu1 %vm821_vm1, %v10386_v62  ;;  %9290 = vmatprep.mubr.msk.f32.mxu1 %vm10127_vm0, %v12031_v48 }
 0x1ae   : > { %9293 = vmatprep.subr.mxu1 %v12031_v48 }
 0x1b0   : > { %9291 = vmatmul.mubr.msk.f32.vlgmr.msra.gmra.mrb[10].mxu1 %vm821_vm1, %v10395_v63 }
 0x1b1   : > { %9294 = vmatpush3.xpose.msk.msra.mxu1 %vm821_vm1, %v10367_v59  ;;  %9295 = vmatprep.mubr.msk.f32.mxu1 %vm10127_vm0, %v12031_v48 }
 0x1b2   : > { %9298 = vmatprep.subr.mxu1 %v12031_v48 }
 0x1b4   : > { %9296 = vmatmul.mubr.msk.f32.vlgmr.msra.gmra.mrb[12].mxu1 %vm821_vm1, %v10364_v58 }
 0x1b5   : > { %9299 = vmatpush3.xpose.msk.msra.mxu1 %vm821_vm1, %v10408_v0  ;;  %9300 = vmatprep.mubr.msk.f32.mxu1 %vm10127_vm0, %v12031_v48 }
 0x1b6   : > { %9303 = vmatprep.subr.mxu1 %v12031_v48 }
 0x1b8   : > { %9301 = vmatmul.mubr.msk.f32.vlgmr.msra.gmra.mrb[14].mxu1 %vm821_vm1, %v10417_v3 }
 0x1b9   : > { %9305 = vmatprep.mubr.msk.f32.mxu1 %vm10127_vm0, %v12031_v48 }
 0x20b   : > { %v10430_v6 = vpop.permute.xlu0 %1503 }
 0x20c   : > { %9304 = vmatpush3.msk.msra.mxu1 %vm1509_vm2, %v10430_v6 }
 0x20d   : > { %v10434_v7 = vpop.permute.xlu1 %1582  ;;  %9308 = vmatprep.subr.mxu1 %v12031_v48 }
 0x211   : > { %v10437_v8 = vpop.permute.xlu1 %1659 }
 0x215   : > { %v10439_v11 = vpop.permute.xlu1 %1736 }
 0x216   : > { %9319 = vmatpush3.msk.msra.mxu0 %vm1509_vm2, %v10439_v11 }
 0x217   : > { %9328 = vmatprep.subr.mxu0 %v12031_v48 }
 0x26f   : > { %v892_v29 = vpop.f32.mrb[0].mxu1 }
 0x270   : > { %v893_v30 = vadd.f32 %v892_v29, %v10460_v27  ;;  %v9267_v31 = vpop.f32.mrb[1].mxu1 }
 0x272   : > { %v1415_v35 = vsel %vm1414_vm3, %v893_v30, -inf }
 0x273   : > { %1416 = vmax.xlane.f32.xlu0 %v1415_v35  ;;  %v966_v36 = vpop.f32.mrb[2].mxu1 }
 0x274   : > { %v967_v37 = vadd.f32 %v966_v36, %v10465_v32  ;;  %v9272_v38 = vpop.f32.mrb[3].mxu1 }
 0x276   : > { %v1418_v43 = vsel %vm1414_vm3, %v967_v37, -inf }
 0x277   : > { %v1040_v44 = vpop.f32.mrb[4].mxu1  ;;  %1419 = vmax.xlane.f32.xlu1 %v1418_v43 }
 0x278   : > { %v1041_v45 = vadd.f32 %v1040_v44, %v10470_v39  ;;  %v9277_v46 = vpop.f32.mrb[5].mxu1 }
 0x27a   : > { %v1421_v15 = vsel %vm1414_vm3, %v1041_v45, -inf }
 0x27b   : > { %1422 = vmax.xlane.f32.xlu0 %v1421_v15  ;;  %v1114_v16 = vpop.f32.mrb[6].mxu1 }
 0x27c   : > { %v1115_v19 = vadd.f32 %v1114_v16, %v10476_v47  ;;  %v9282_v20 = vpop.f32.mrb[7].mxu1 }
 0x27d   : > { %v460_v20 = vcombine.high %v456_v24, %v456_v24 }
 0x27e   : > { %v1424_v26 = vsel %vm1414_vm3, %v1115_v19, -inf }
 0x27f   : > { %1425 = vmax.xlane.f32.xlu1 %v1424_v26  ;;  %v1188_v28 = vpop.f32.mrb[8].mxu1  ;;  %v10503_v26 = vrot.slane %v460_v20, %v10457_v25 }
 0x280   : > { %v1189_v29 = vadd.f32 %v1188_v28, %v10482_v23  ;;  %v9287_v31 = vpop.f32.mrb[9].mxu1 }
 0x282   : > { %v1427_v35 = vsel %vm1414_vm3, %v1189_v29, -inf }
 0x283   : > { %1428 = vmax.xlane.f32.xlu0 %v1427_v35  ;;  %v1262_v36 = vpop.f32.mrb[10].mxu1 }
 0x284   : > { %v1263_v38 = vadd.f32 %v1262_v36, %v10488_v33  ;;  %v9292_v41 = vpop.f32.mrb[11].mxu1 }
 0x286   : > { %v1430_v43 = vsel %vm1414_vm3, %v1263_v38, -inf }
 0x287   : > { %1431 = vmax.xlane.f32.xlu1 %v1430_v43  ;;  %v1336_v44 = vpop.f32.mrb[12].mxu1 }
 0x288   : > { %v1337_v46 = vadd.f32 %v1336_v44, %v10493_v42  ;;  %v9297_v14 = vpop.f32.mrb[13].mxu1 }
 0x28a   : > { %v1433_v15 = vsel %vm1414_vm3, %v1337_v46, -inf }
 0x28b   : > { %1434 = vmax.xlane.f32.xlu0 %v1433_v15  ;;  %v1410_v13 = vpop.f32.mrb[14].mxu1 }
 0x28c   : > { %v9302_v16 = vpop.f32.mrb[15].mxu1  ;;  %v1411_v28 = vadd.f32 %v1410_v13, %v10503_v26 }
 0x28e   : > { %v1436_v31 = vsel %vm1414_vm3, %v1411_v28, -inf }
 0x298   : > { %1890 = vrot.lane.b32.xlu1 %v10386_v62, %s10128_s18 }
 0x2a1   : > { %1813 = vrot.lane.b32.xlu0 %v10354_v56, %s10128_s18 }
 0x2bc   : > { %1437 = vmax.xlane.f32.xlu1 %v1436_v31 }
 0x300   : > { %v1417_v34 = vpop.xlane.xlu0 %1416 }
 0x301   : > { %v1439_v35 = vsub.f32 %v893_v30, %v1417_v34 }
 0x303   : > { %v1447_v36 = vmul.f32 1.442695, %v1439_v35 }
 0x304   : > { %v1420_v41 = vpop.xlane.xlu1 %1419 }
 0x305   : > { %9896 = vpow2.f32 %v1447_v36  ;;  %v1440_v43 = vsub.f32 %v967_v37, %v1420_v41 }
 0x307   : > { %v1449_v44 = vmul.f32 1.442695, %v1440_v43 }
 0x308   : > { %v1423_v14 = vpop.xlane.xlu0 %1422 }
 0x309   : > { %9898 = vpow2.f32 %v1449_v44  ;;  %v1441_v15 = vsub.f32 %v1041_v45, %v1423_v14 }
 0x30b   : > { %v1451_v16 = vmul.f32 1.442695, %v1441_v15 }
 0x30c   : > { %v1426_v24 = vpop.xlane.xlu1 %1425 }
 0x30d   : > { %9900 = vpow2.f32 %v1451_v16  ;;  %v1442_v20 = vsub.f32 %v1115_v19, %v1426_v24 }
 0x30f   : > { %v10507_v40 = vpop.eup %9896  ;;  %v1453_v13 = vmul.f32 1.442695, %v1442_v20 }
 0x310   : > { %v1429_v48 = vpop.xlane.xlu0 %1428  ;;  %v1463_v31 = vsel %vm1414_vm3, %v10507_v40, 0.0 }
 0x311   : > { %9902 = vpow2.f32 %v1453_v13  ;;  %v1443_v30 = vsub.f32 %v1189_v29, %v1429_v48  ;;  %1464 = vadd.xlane.f32.xlu0 %v1463_v31 }
 0x313   : > { %v10511_v34 = vpop.eup %9898  ;;  %v1455_v37 = vmul.f32 1.442695, %v1443_v30 }
 0x314   : > { %v1466_v45 = vsel %vm1414_vm3, %v10511_v34, 0.0  ;;  %v1432_v43 = vpop.xlane.xlu1 %1431 }
 0x315   : > { %9904 = vpow2.f32 %v1455_v37  ;;  %1467 = vadd.xlane.f32.xlu1 %v1466_v45  ;;  %v1444_v44 = vsub.f32 %v1263_v38, %v1432_v43 }
 0x317   : > { %v10515_v35 = vpop.eup %9900  ;;  %v1457_v15 = vmul.f32 1.442695, %v1444_v44 }
 0x318   : > { %v1469_v19 = vsel %vm1414_vm3, %v10515_v35, 0.0  ;;  %v1435_v14 = vpop.xlane.xlu0 %1434  ;;  %v10541_v38 = vpop.permute.xlu1 %1890 }
 0x319   : > { %1470 = vadd.xlane.f32.xlu0 %v1469_v19  ;;  %v1445_v16 = vsub.f32 %v1337_v46, %v1435_v14  ;;  %9906 = vpow2.f32 %v1457_v15 }
 0x31b   : > { %v10519_v36 = vpop.eup %9902  ;;  %v1459_v24 = vmul.f32 1.442695, %v1445_v16 }
 0x31c   : > { %v1472_v48 = vsel %vm1414_vm3, %v10519_v36, 0.0 }
 0x31d   : > { %1473 = vadd.xlane.f32.xlu1 %v1472_v48  ;;  %9908 = vpow2.f32 %v1459_v24 }
 0x31f   : > { %v10523_v29 = vpop.eup %9904 }
 0x320   : > { %v1475_v41 = vsel %vm1414_vm3, %v10523_v29, 0.0 }
 0x321   : > { %1476 = vadd.xlane.f32.xlu0 %v1475_v41  ;;  %v10557_v41 = vpop.permute.xlu0 %1813 }
 0x323   : > { %v10531_v20 = vpop.eup %9906 }
 0x324   : > { %v1478_v13 = vsel %vm1414_vm3, %v10531_v20, 0.0 }
 0x327   : > { %v10535_v31 = vpop.eup %9908 }
 0x328   : > { %v1481_v30 = vsel %vm1414_vm3, %v10535_v31, 0.0 }
 0x32e   : > { %2044 = vrot.lane.b32.xlu1 %v10408_v0, %s10128_s18 }
 0x337   : > { %1967 = vrot.lane.b32.xlu0 %v10367_v59, %s10128_s18 }
 0x349   : > { %v1438_v46 = vpop.xlane.xlu1 %1437 }
 0x34a   : > { %v1446_v37 = vsub.f32 %v1411_v28, %v1438_v46 }
 0x34c   : > { %v1461_v45 = vmul.f32 1.442695, %v1446_v37 }
 0x34e   : > { %9910 = vpow2.f32 %v1461_v45 }
 0x352   : > { %1479 = vadd.xlane.f32.xlu1 %v1478_v13  ;;  %v12058_v13 = vmov 0.0  }
 0x356   : > { %1482 = vadd.xlane.f32.xlu0 %v1481_v30 }
 0x358   : > { %v10551_v19 = vpop.eup %9910 }
 0x359   : > { %v1484_v48 = vsel %vm1414_vm3, %v10551_v19, 0.0 }
 0x363   : > { %2195 = vrot.lane.b32.xlu1 %v10345_v54, %s10130_s24 }
 0x36c   : > { %2121 = vrot.lane.b32.xlu0 %v10318_v49, %s10130_s24 }
 0x370   : > { %2269 = vrot.lane.b32.xlu0 %v10328_v52, %s10130_s24 }
 0x374   : > { %2417 = vrot.lane.b32.xlu0 %v10350_v55, %s10130_s24 }
 0x378   : > { %2565 = vrot.lane.b32.xlu0 %v10364_v58, %s10130_s24 }
 0x387   : > { %1485 = vadd.xlane.f32.xlu1 %v1484_v48 }
 0x398   : > { %2343 = vrot.lane.b32.xlu1 %v10379_v60, %s10130_s24 }
 0x39c   : > { %2491 = vrot.lane.b32.xlu1 %v10395_v63, %s10130_s24 }
 0x39e   : > { %v1465_v28 = vpop.xlane.xlu0 %1464 }
 0x39f   : > { %9912 = vrcp.f32 %v1465_v28 }
 0x3a0   : > { %2639 = vrot.lane.b32.xlu1 %v10417_v3, %s10130_s24 }
 0x3a2   : > { %v1468_v43 = vpop.xlane.xlu1 %1467 }
 0x3a3   : > { %9914 = vrcp.f32 %v1468_v43 }
 0x3a6   : > { %v1471_v44 = vpop.xlane.xlu0 %1470 }
 0x3a7   : > { %9916 = vrcp.f32 %v1471_v44 }
 0x3a9   : > { %v9913_v14 = vpop.eup %9912 }
 0x3aa   : > { %v1474_v15 = vpop.xlane.xlu1 %1473  ;;  %v1495_v16 = vmul.f32 %v9913_v14, %v10507_v40 }
 0x3ab   : > { %9918 = vrcp.f32 %v1474_v15 }
 0x3ac   : > { %9306 = vmatmul.mubr.msk.f32.vlgmr.msra.gmra.mrb[16].mxu1 %vm1505_vm4, %v1495_v16 }
 0x3ad   : > { %v9915_v24 = vpop.eup %9914  ;;  %9309 = vmatpush3.msk.msra.mxu1 %vm1509_vm2, %v10434_v7  ;;  %9310 = vmatprep.mubr.msk.f32.mxu1 %vm10127_vm0, %v12058_v13 }
 0x3ae   : > { %v1477_v30 = vpop.xlane.xlu0 %1476  ;;  %9313 = vmatprep.subr.mxu1 %v12058_v13  ;;  %v1496_v46 = vmul.f32 %v9915_v24, %v10511_v34 }
 0x3af   : > { %9920 = vrcp.f32 %v1477_v30 }
 0x3b0   : > { %9311 = vmatmul.mubr.msk.f32.vlgmr.msra.gmra.mrb[18].mxu1 %vm1505_vm4, %v1496_v46 }
 0x3b1   : > { %v9917_v37 = vpop.eup %9916  ;;  %9314 = vmatpush3.msk.msra.mxu1 %vm1509_vm2, %v10437_v8  ;;  %9315 = vmatprep.mubr.msk.f32.mxu1 %vm10127_vm0, %v12058_v13 }
 0x3b2   : > { %9323 = vmatprep.subr.mxu1 %v12058_v13  ;;  %v1497_v40 = vmul.f32 %v9917_v37, %v10515_v35  ;;  %v10592_v28 = vpop.permute.xlu0 %1967 }
 0x3b4   : > { %9316 = vmatmul.mubr.msk.f32.vlgmr.msra.gmra.mrb[20].mxu1 %vm1505_vm4, %v1497_v40 }
 0x3b5   : > { %v9919_v45 = vpop.eup %9918  ;;  %9324 = vmatpush3.msk.msra.mxu1 %vm1509_vm2, %v10557_v41  ;;  %9325 = vmatprep.mubr.msk.f32.mxu1 %vm10127_vm0, %v12058_v13 }
 0x3b6   : > { %v1498_v34 = vmul.f32 %v9919_v45, %v10519_v36  ;;  %9333 = vmatprep.subr.mxu1 %v12058_v13  ;;  %v10600_v36 = vpop.permute.xlu1 %2044 }
 0x3b8   : > { %9321 = vmatmul.mubr.msk.f32.vlgmr.msra.gmra.mrb[8].mxu0 %vm1505_vm4, %v1498_v34 }
 0x3b9   : > { %v9921_v48 = vpop.eup %9920  ;;  %9329 = vmatpush3.msk.msra.mxu0 %vm1509_vm2, %v10541_v38  ;;  %9330 = vmatprep.mubr.msk.f32.mxu0 %vm10127_vm0, %v12058_v13 }
 0x3ba   : > { %v1499_v35 = vmul.f32 %v9921_v48, %v10523_v29  ;;  %9338 = vmatprep.subr.mxu0 %v12058_v13 }
 0x3bc   : > { %9326 = vmatmul.mubr.msk.f32.vlgmr.msra.gmra.mrb[22].mxu1 %vm1505_vm4, %v1499_v35 }
 0x3bd   : > { %9334 = vmatpush3.msk.msra.mxu1 %vm1509_vm2, %v10592_v28  ;;  %9335 = vmatprep.mubr.msk.f32.mxu1 %vm10127_vm0, %v12058_v13 }
 0x3be   : > { %9343 = vmatprep.subr.mxu1 %v12058_v13 }
 0x3df   : > { %v1480_v43 = vpop.xlane.xlu1 %1479 }
 0x3e0   : > { %9922 = vrcp.f32 %v1480_v43 }
 0x3e3   : > { %v1483_v44 = vpop.xlane.xlu0 %1482  ;;  %v2196_v46 = vpop.permute.xlu1 %2195 }
 0x3e4   : > { %9924 = vrcp.f32 %v1483_v44 }
 0x3e7   : > { %v2122_v16 = vpop.permute.xlu0 %2121 }
 0x3ea   : > { %v9923_v29 = vpop.eup %9922 }
 0x3eb   : > { %v1500_v14 = vmul.f32 %v9923_v29, %v10531_v20  ;;  %v2270_v20 = vpop.permute.xlu0 %2269 }
 0x3ed   : > { %9331 = vmatmul.mubr.msk.f32.vlgmr.msra.gmra.mrb[10].mxu0 %vm1505_vm4, %v1500_v14 }
 0x3ee   : > { %v9925_v15 = vpop.eup %9924  ;;  %9339 = vmatpush3.msk.msra.mxu0 %vm1509_vm2, %v10600_v36  ;;  %9340 = vmatprep.mubr.msk.f32.mxu0 %vm10127_vm0, %v12058_v13 }
 0x3ef   : > { %v1501_v24 = vmul.f32 %v9925_v15, %v10535_v31  ;;  %9348 = vmatprep.subr.mxu0 %v12058_v13  ;;  %v2418_v31 = vpop.permute.xlu0 %2417 }
 0x3f1   : > { %9336 = vmatmul.mubr.msk.f32.vlgmr.msra.gmra.mrb[24].mxu1 %vm1505_vm4, %v1501_v24 }
 0x3f2   : > { %9344 = vmatpush3.xpose.msk.msra.mxu1 %vm821_vm1, %v10320_v50  ;;  %9345 = vmatprep.mubr.msk.f32.mxu1 %vm10127_vm0, %v12058_v13 }
 0x3f3   : > { %9353 = vmatprep.subr.mxu1 %v12058_v13  ;;  %v2566_v30 = vpop.permute.xlu0 %2565 }
 0x3f5   : > { %9346 = vmatmul.mubr.msk.f32.vlgmr.msra.gmra.mrb[26].mxu1 %vm821_vm1, %v2122_v16 }
 0x3f6   : > { %9354 = vmatpush3.xpose.msk.msra.mxu1 %vm821_vm1, %v10332_v53  ;;  %9355 = vmatprep.mubr.msk.f32.mxu1 %vm10127_vm0, %v12058_v13 }
 0x3f7   : > { %9363 = vmatprep.subr.mxu1 %v12058_v13 }
 0x3f9   : > { %9356 = vmatmul.mubr.msk.f32.vlgmr.msra.gmra.mrb[28].mxu1 %vm821_vm1, %v2270_v20 }
 0x3fa   : > { %9364 = vmatpush3.xpose.msk.msra.mxu1 %vm821_vm1, %v10354_v56  ;;  %9365 = vmatprep.mubr.msk.f32.mxu1 %vm10127_vm0, %v12058_v13 }
 0x3fb   : > { %9373 = vmatprep.subr.mxu1 %v12058_v13 }
 0x3fd   : > { %9366 = vmatmul.mubr.msk.f32.vlgmr.msra.gmra.mrb[30].mxu1 %vm821_vm1, %v2418_v31 }
 0x3fe   : > { %9374 = vmatpush3.xpose.msk.msra.mxu1 %vm821_vm1, %v10367_v59  ;;  %9375 = vmatprep.mubr.msk.f32.mxu1 %vm10127_vm0, %v12058_v13 }
 0x3ff   : > { %9383 = vmatprep.subr.mxu1 %v12058_v13 }
 0x401   : > { %9376 = vmatmul.mubr.msk.f32.vlgmr.msra.gmra.mrb[32].mxu1 %vm821_vm1, %v2566_v30 }
 0x402   : > { %9384 = vmatpush3.msk.msra.mxu1 %vm1509_vm2, %v10430_v6  ;;  %9385 = vmatprep.mubr.msk.f32.mxu1 %vm10127_vm0, %v12058_v13 }
 0x403   : > { %9393 = vmatprep.subr.mxu1 %v12058_v13 }
 0x414   : > { %v1486_v37 = vpop.xlane.xlu1 %1485 }
 0x415   : > { %9926 = vrcp.f32 %v1486_v37 }
 0x418   : > { %v2344_v6 = vpop.permute.xlu1 %2343 }
 0x41f   : > { %v9927_v40 = vpop.eup %9926 }
 0x420   : > { %v1502_v45 = vmul.f32 %v9927_v40, %v10551_v19  ;;  %v2492_v19 = vpop.permute.xlu1 %2491 }
 0x422   : > { %9341 = vmatmul.mubr.msk.f32.vlgmr.msra.gmra.mrb[12].mxu0 %vm1505_vm4, %v1502_v45 }
 0x423   : > { %9349 = vmatpush3.xpose.msk.msra.mxu0 %vm821_vm1, %v10324_v51  ;;  %9350 = vmatprep.mubr.msk.f32.mxu0 %vm10127_vm0, %v12058_v13 }
 0x424   : > { %9358 = vmatprep.subr.mxu0 %v12058_v13  ;;  %v2640_v34 = vpop.permute.xlu1 %2639 }
 0x426   : > { %9351 = vmatmul.mubr.msk.f32.vlgmr.msra.gmra.mrb[14].mxu0 %vm821_vm1, %v2196_v46 }
 0x427   : > { %9359 = vmatpush3.xpose.msk.msra.mxu0 %vm821_vm1, %v10358_v57  ;;  %9360 = vmatprep.mubr.msk.f32.mxu0 %vm10127_vm0, %v12058_v13 }
 0x428   : > { %9368 = vmatprep.subr.mxu0 %v12058_v13 }
 0x42a   : > { %9361 = vmatmul.mubr.msk.f32.vlgmr.msra.gmra.mrb[16].mxu0 %vm821_vm1, %v2344_v6 }
 0x42b   : > { %9369 = vmatpush3.xpose.msk.msra.mxu0 %vm821_vm1, %v10386_v62  ;;  %9370 = vmatprep.mubr.msk.f32.mxu0 %vm10127_vm0, %v12058_v13 }
 0x42c   : > { %9378 = vmatprep.subr.mxu0 %v12058_v13 }
 0x42e   : > { %9371 = vmatmul.mubr.msk.f32.vlgmr.msra.gmra.mrb[18].mxu0 %vm821_vm1, %v2492_v19 }
 0x42f   : > { %9379 = vmatpush3.xpose.msk.msra.mxu0 %vm821_vm1, %v10408_v0  ;;  %9380 = vmatprep.mubr.msk.f32.mxu0 %vm10127_vm0, %v12058_v13 }
 0x430   : > { %9388 = vmatprep.subr.mxu0 %v12058_v13 }
 0x432   : > { %9381 = vmatmul.mubr.msk.f32.vlgmr.msra.gmra.mrb[20].mxu0 %vm821_vm1, %v2640_v34 }
 0x433   : > { %9389 = vmatpush3.msk.msra.mxu0 %vm1509_vm2, %v10434_v7  ;;  %9390 = vmatprep.mubr.msk.f32.mxu0 %vm10127_vm0, %v12058_v13 }
 0x434   : > { %9398 = vmatprep.subr.mxu0 %v12058_v13 }
 0x47f   : > { %v10671_v48 = vpop.f32.mrb[16].mxu1 }
 0x480   : > { %v9307_v35 = vpop.f32.mrb[17].mxu1 }
 0x483   : > { %v10673_v43 = vpop.f32.mrb[18].mxu1 }
 0x484   : > { %v9312_v44 = vpop.f32.mrb[19].mxu1 }
 0x487   : > { %v10675_v29 = vpop.f32.mrb[20].mxu1 }
 0x488   : > { %v9317_v14 = vpop.f32.mrb[21].mxu1 }
 0x48b   : > { %v10677_v15 = vpop.f32.mrb[8].mxu0 }
 0x48c   : > { %12059 = vst [vmem:[#allocation13_spill] sm:$0xff] %v10677_v15  ;;  %v9322_v16 = vpop.f32.mrb[9].mxu0 }
 0x48f   : > { %v10679_v24 = vpop.f32.mrb[22].mxu1 }
 0x490   : > { %12060 = vst [vmem:[#allocation14_spill] sm:$0xff] %v10679_v24  ;;  %v9327_v7 = vpop.f32.mrb[23].mxu1 }
 0x4c0   : > { %v10681_v20 = vpop.f32.mrb[10].mxu0 }
 0x4c1   : > { %12061 = vst [vmem:[#allocation15_spill] sm:$0xff] %v10681_v20  ;;  %v9332_v31 = vpop.f32.mrb[11].mxu0 }
 0x4c4   : > { %v10683_v30 = vpop.f32.mrb[24].mxu1 }
 0x4c5   : > { %12062 = vst [vmem:[#allocation16_spill] sm:$0xff] %v10683_v30  ;;  %v9337_v46 = vpop.f32.mrb[25].mxu1 }
 0x4c8   : > { %v2191_v37 = vpop.f32.mrb[26].mxu1 }
 0x4c9   : > { %v2192_v40 = vadd.f32 %v2191_v37, %v10460_v27  ;;  %v9347_v45 = vpop.f32.mrb[27].mxu1 }
 0x4cb   : > { %v2713_v6 = vsel %vm1414_vm3, %v2192_v40, -inf }
 0x4cc   : > { %2714 = vmax.xlane.f32.xlu0 %v2713_v6  ;;  %v2339_v19 = vpop.f32.mrb[28].mxu1 }
 0x4cd   : > { %v2340_v34 = vadd.f32 %v2339_v19, %v10470_v39  ;;  %v9357_v35 = vpop.f32.mrb[29].mxu1 }
 0x4cf   : > { %v2719_v44 = vsel %vm1414_vm3, %v2340_v34, -inf }
 0x4d0   : > { %2720 = vmax.xlane.f32.xlu0 %v2719_v44  ;;  %v2487_v14 = vpop.f32.mrb[30].mxu1 }
 0x4d1   : > { %v9367_v16 = vpop.f32.mrb[31].mxu1  ;;  %v2488_v44 = vadd.f32 %v2487_v14, %v10482_v23 }
 0x4d4   : > { %v2635_v7 = vpop.f32.mrb[32].mxu1 }
 0x4d5   : > { %v9377_v31 = vpop.f32.mrb[33].mxu1  ;;  %v2636_v22 = vadd.f32 %v2635_v7, %v10493_v42 }
 0x4f5   : > { %v10689_v2 = vpop.f32.mrb[12].mxu0 }
 0x4f6   : > { %12063 = vst [vmem:[#allocation17_spill] sm:$0xff] %v10689_v2  ;;  %v9342_v46 = vpop.f32.mrb[13].mxu0 }
 0x4f9   : > { %v2265_v1 = vpop.f32.mrb[14].mxu0 }
 0x4fa   : > { %v2266_v37 = vadd.f32 %v2265_v1, %v10465_v32  ;;  %v9352_v45 = vpop.f32.mrb[15].mxu0 }
 0x4fb   : > { %v2725_v45 = vsel %vm1414_vm3, %v2488_v44, -inf }
 0x4fc   : > { %v2716_v6 = vsel %vm1414_vm3, %v2266_v37, -inf }
 0x4fd   : > { %2717 = vmax.xlane.f32.xlu1 %v2716_v6  ;;  %v2413_v21 = vpop.f32.mrb[16].mxu0 }
 0x4fe   : > { %v2414_v19 = vadd.f32 %v2413_v21, %v10476_v47  ;;  %v9362_v35 = vpop.f32.mrb[17].mxu0 }
 0x4ff   : > { %v2731_v35 = vsel %vm1414_vm3, %v2636_v22, -inf }
 0x500   : > { %v2722_v16 = vsel %vm1414_vm3, %v2414_v19, -inf }
 0x501   : > { %v2561_v10 = vpop.f32.mrb[18].mxu0  ;;  %2723 = vmax.xlane.f32.xlu0 %v2722_v16 }
 0x502   : > { %v2562_v31 = vadd.f32 %v2561_v10, %v10488_v33  ;;  %v9372_v46 = vpop.f32.mrb[19].mxu0 }
 0x504   : > { %v2728_v1 = vsel %vm1414_vm3, %v2562_v31, -inf }
 0x505   : > { %2729 = vmax.xlane.f32.xlu1 %v2728_v1  ;;  %v2709_v6 = vpop.f32.mrb[20].mxu0  ;;  %2726 = vmax.xlane.f32.xlu0 %v2725_v45 }
 0x506   : > { %v9382_v21 = vpop.f32.mrb[21].mxu0  ;;  %v10712_v10 = vadd.f32 %v2709_v6, %v10503_v26 }
 0x508   : > { %v2734_v14 = vsel %vm1414_vm3, %v10712_v10, -inf }
 0x509   : > { %2732 = vmax.xlane.f32.xlu0 %v2731_v35 }
 0x516   : > { %3465 = vrot.lane.b32.xlu1 %v10324_v51, %s10130_s24 }
 0x51a   : > { %3385 = vrot.lane.b32.xlu1 %v10318_v49, %s10128_s18 }
 0x51e   : > { %3463 = vrot.lane.b32.xlu1 %v10345_v54, %s10128_s18 }
 0x51f   : > { %3387 = vrot.lane.b32.xlu0 %v10320_v50, %s10130_s24 }
 0x523   : > { %3543 = vrot.lane.b32.xlu0 %v10332_v53, %s10130_s24 }
 0x542   : > { %2735 = vmax.xlane.f32.xlu1 %v2734_v14 }
 0x553   : > { %3621 = vrot.lane.b32.xlu1 %v10358_v57, %s10130_s24 }
 0x559   : > { %v2715_v7 = vpop.xlane.xlu0 %2714 }
 0x55a   : > { %v2737_v16 = vsub.f32 %v2192_v40, %v2715_v7 }
 0x55c   : > { %v2745_v46 = vmul.f32 1.442695, %v2737_v16 }
 0x55d   : > { %v2721_v1 = vpop.xlane.xlu0 %2720 }
 0x55e   : > { %9928 = vpow2.f32 %v2745_v46  ;;  %v2739_v45 = vsub.f32 %v2340_v34, %v2721_v1 }
 0x560   : > { %v2749_v21 = vmul.f32 1.442695, %v2739_v45 }
 0x562   : > { %9930 = vpow2.f32 %v2749_v21 }
 0x568   : > { %v10718_v35 = vpop.eup %9928 }
 0x569   : > { %v2761_v6 = vsel %vm1414_vm3, %v10718_v35, 0.0 }
 0x56a   : > { %2762 = vadd.xlane.f32.xlu0 %v2761_v6 }
 0x56c   : > { %v10722_v9 = vpop.eup %9930 }
 0x56d   : > { %v2767_v14 = vsel %vm1414_vm3, %v10722_v9, 0.0 }
 0x56e   : > { %2768 = vadd.xlane.f32.xlu0 %v2767_v14 }
 0x58a   : > { %v2718_v5 = vpop.xlane.xlu1 %2717 }
 0x58b   : > { %v2738_v40 = vsub.f32 %v2266_v37, %v2718_v5 }
 0x58d   : > { %v2747_v7 = vmul.f32 1.442695, %v2738_v40 }
 0x58e   : > { %v2724_v16 = vpop.xlane.xlu0 %2723 }
 0x58f   : > { %9932 = vpow2.f32 %v2747_v7  ;;  %v2740_v34 = vsub.f32 %v2414_v19, %v2724_v16 }
 0x591   : > { %v2751_v46 = vmul.f32 1.442695, %v2740_v34 }
 0x592   : > { %v2730_v1 = vpop.xlane.xlu1 %2729  ;;  %v2727_v45 = vpop.xlane.xlu0 %2726 }
 0x593   : > { %9934 = vpow2.f32 %v2751_v46  ;;  %v2742_v21 = vsub.f32 %v2562_v31, %v2730_v1  ;;  %v2741_v18 = vsub.f32 %v2488_v44, %v2727_v45 }
 0x595   : > { %v2755_v17 = vmul.f32 1.442695, %v2742_v21  ;;  %v2753_v6 = vmul.f32 1.442695, %v2741_v18 }
 0x596   : > { %v2733_v4 = vpop.xlane.xlu0 %2732  ;;  %v10750_v31 = vpop.permute.xlu1 %3465 }
 0x597   : > { %9936 = vpow2.f32 %v2755_v17  ;;  %v2743_v12 = vsub.f32 %v2636_v22, %v2733_v4 }
 0x598   : > { %9938 = vpow2.f32 %v2753_v6 }
 0x599   : > { %v10726_v30 = vpop.eup %9932  ;;  %v2757_v14 = vmul.f32 1.442695, %v2743_v12 }
 0x59a   : > { %v2764_v5 = vsel %vm1414_vm3, %v10726_v30, 0.0  ;;  %v10754_v40 = vpop.permute.xlu1 %3385  ;;  %v10771_v21 = vpop.permute.xlu0 %3387 }
 0x59b   : > { %9940 = vpow2.f32 %v2757_v14  ;;  %2765 = vadd.xlane.f32.xlu1 %v2764_v5 }
 0x59d   : > { %v10730_v37 = vpop.eup %9934 }
 0x59e   : > { %v2770_v19 = vsel %vm1414_vm3, %v10730_v37, 0.0  ;;  %v10760_v7 = vpop.permute.xlu1 %3463  ;;  %v10775_v6 = vpop.permute.xlu0 %3543 }
 0x59f   : > { %2771 = vadd.xlane.f32.xlu1 %v2770_v19 }
 0x5a1   : > { %v10734_v44 = vpop.eup %9936 }
 0x5a2   : > { %v10736_v18 = vpop.eup %9938  ;;  %v2776_v4 = vsel %vm1414_vm3, %v10734_v44, 0.0 }
 0x5a3   : > { %2777 = vadd.xlane.f32.xlu1 %v2776_v4  ;;  %v2773_v12 = vsel %vm1414_vm3, %v10736_v18, 0.0 }
 0x5a4   : > { %2774 = vadd.xlane.f32.xlu0 %v2773_v12 }
 0x5a5   : > { %v10742_v17 = vpop.eup %9940 }
 0x5a6   : > { %v2779_v22 = vsel %vm1414_vm3, %v10742_v17, 0.0 }
 0x5a8   : > { %2780 = vadd.xlane.f32.xlu0 %v2779_v22 }
 0x5b4   : > { %3619 = vrot.lane.b32.xlu1 %v10379_v60, %s10128_s18 }
 0x5be   : > { %3541 = vrot.lane.b32.xlu0 %v10328_v52, %s10128_s18 }
 0x5c2   : > { %3699 = vrot.lane.b32.xlu0 %v10354_v56, %s10130_s24 }
 0x5c6   : > { %3697 = vrot.lane.b32.xlu0 %v10350_v55, %s10128_s18 }
 0x5ca   : > { %3855 = vrot.lane.b32.xlu0 %v10367_v59, %s10130_s24 }
 0x5ce   : > { %3853 = vrot.lane.b32.xlu0 %v10364_v58, %s10128_s18 }
 0x5cf   : > { %v2736_v16 = vpop.xlane.xlu1 %2735 }
 0x5d0   : > { %v2744_v34 = vsub.f32 %v10712_v10, %v2736_v16 }
 0x5d2   : > { %v2759_v46 = vmul.f32 1.442695, %v2744_v34  ;;  %4097 = vrot.lane.b32.xlu0 %v10320_v50, %s10131_s25 }
 0x5d4   : > { %9942 = vpow2.f32 %v2759_v46 }
 0x5de   : > { %v10767_v1 = vpop.eup %9942 }
 0x5df   : > { %v2782_v45 = vsel %vm1414_vm3, %v10767_v1, 0.0 }
 0x5e0   : > { %2783 = vadd.xlane.f32.xlu1 %v2782_v45 }
 0x5f1   : > { %3777 = vrot.lane.b32.xlu1 %v10386_v62, %s10130_s24 }
 0x5f5   : > { %3775 = vrot.lane.b32.xlu1 %v10395_v63, %s10128_s18 }
 0x5f7   : > { %v2763_v10 = vpop.xlane.xlu0 %2762 }
 0x5f8   : > { %9944 = vrcp.f32 %v2763_v10 }
 0x5f9   : > { %3933 = vrot.lane.b32.xlu1 %v10408_v0, %s10130_s24 }
 0x5fb   : > { %v2769_v50 = vpop.xlane.xlu0 %2768 }
 0x5fc   : > { %9946 = vrcp.f32 %v2769_v50 }
 0x5fd   : > { %3931 = vrot.lane.b32.xlu1 %v10417_v3, %s10128_s18 }
 0x601   : > { %4174 = vrot.lane.b32.xlu1 %v10324_v51, %s10131_s25  ;;  %v10803_v51 = vpop.permute.xlu1 %3621 }
 0x602   : > { %v9945_v14 = vpop.eup %9944 }
 0x603   : > { %v2793_v5 = vmul.f32 %v9945_v14, %v10718_v35 }
 0x605   : > { %4251 = vrot.lane.b32.xlu1 %v10332_v53, %s10131_s25  ;;  %9386 = vmatmul.mubr.msk.f32.vlgmr.msra.gmra.mrb[34].mxu1 %vm1505_vm4, %v2793_v5 }
 0x606   : > { %v9947_v19 = vpop.eup %9946  ;;  %9394 = vmatpush3.msk.msra.mxu1 %vm1509_vm2, %v10437_v8  ;;  %9395 = vmatprep.mubr.msk.f32.mxu1 %vm10127_vm0, %v12058_v13 }
 0x607   : > { %9403 = vmatprep.subr.mxu1 %v12058_v13  ;;  %v2795_v4 = vmul.f32 %v9947_v19, %v10722_v9 }
 0x609   : > { %4328 = vrot.lane.b32.xlu1 %v10358_v57, %s10131_s25  ;;  %9396 = vmatmul.mubr.msk.f32.vlgmr.msra.gmra.mrb[36].mxu1 %vm1505_vm4, %v2795_v4 }
 0x60a   : > { %9404 = vmatpush3.msk.msra.mxu1 %vm1509_vm2, %v10557_v41  ;;  %9405 = vmatprep.mubr.msk.f32.mxu1 %vm10127_vm0, %v12058_v13 }
 0x60b   : > { %9413 = vmatprep.subr.mxu1 %v12058_v13 }
 0x628   : > { %v2766_v53 = vpop.xlane.xlu1 %2765 }
 0x629   : > { %9948 = vrcp.f32 %v2766_v53 }
 0x62c   : > { %v2772_v8 = vpop.xlane.xlu1 %2771 }
 0x62d   : > { %9950 = vrcp.f32 %v2772_v8 }
 0x630   : > { %v2778_v9 = vpop.xlane.xlu1 %2777 }
 0x631   : > { %9952 = vrcp.f32 %v2778_v9  ;;  %v2775_v35 = vpop.xlane.xlu0 %2774 }
 0x632   : > { %9954 = vrcp.f32 %v2775_v35 }
 0x633   : > { %v9949_v57 = vpop.eup %9948 }
 0x634   : > { %v2794_v12 = vmul.f32 %v9949_v57, %v10726_v30 }
 0x635   : > { %v2781_v22 = vpop.xlane.xlu0 %2780 }
 0x636   : > { %9956 = vrcp.f32 %v2781_v22  ;;  %9391 = vmatmul.mubr.msk.f32.vlgmr.msra.gmra.mrb[22].mxu0 %vm1505_vm4, %v2794_v12 }
 0x637   : > { %v9951_v41 = vpop.eup %9950  ;;  %9399 = vmatpush3.msk.msra.mxu0 %vm1509_vm2, %v10439_v11  ;;  %9400 = vmatprep.mubr.msk.f32.mxu0 %vm10127_vm0, %v12058_v13 }
 0x638   : > { %9408 = vmatprep.subr.mxu0 %v12058_v13  ;;  %v2796_v16 = vmul.f32 %v9951_v41, %v10730_v37 }
 0x639   : > { %v3542_v34 = vpop.permute.xlu0 %3541 }
 0x63a   : > { %9401 = vmatmul.mubr.msk.f32.vlgmr.msra.gmra.mrb[24].mxu0 %vm1505_vm4, %v2796_v16 }
 0x63b   : > { %v9953_v46 = vpop.eup %9952  ;;  %9409 = vmatpush3.msk.msra.mxu0 %vm1509_vm2, %v10541_v38  ;;  %9410 = vmatprep.mubr.msk.f32.mxu0 %vm10127_vm0, %v12058_v13 }
 0x63c   : > { %v9955_v30 = vpop.eup %9954  ;;  %9418 = vmatprep.subr.mxu0 %v12058_v13  ;;  %v2798_v11 = vmul.f32 %v9953_v46, %v10734_v44 }
 0x63d   : > { %v2797_v45 = vmul.f32 %v9955_v30, %v10736_v18  ;;  %v10821_v10 = vpop.permute.xlu0 %3699 }
 0x63e   : > { %9411 = vmatmul.mubr.msk.f32.vlgmr.msra.gmra.mrb[26].mxu0 %vm1505_vm4, %v2798_v11 }
 0x63f   : > { %9406 = vmatmul.mubr.msk.f32.vlgmr.msra.gmra.mrb[38].mxu1 %vm1505_vm4, %v2797_v45  ;;  %9419 = vmatpush3.msk.msra.mxu0 %vm1509_vm2, %v10600_v36 }
 0x640   : > { %v9957_v38 = vpop.eup %9956  ;;  %9414 = vmatpush3.msk.msra.mxu1 %vm1509_vm2, %v10592_v28  ;;  %9415 = vmatprep.mubr.msk.f32.mxu1 %vm10127_vm0, %v12058_v13 }
 0x641   : > { %v2799_v37 = vmul.f32 %v9957_v38, %v10742_v17  ;;  %9423 = vmatprep.subr.mxu1 %v12058_v13  ;;  %9420 = vmatprep.mubr.msk.f32.mxu0 %vm10127_vm0, %v12058_v13  ;;  %v3698_v44 = vpop.permute.xlu0 %3697  ;;  %v3620_v17 = vpop.permute.xlu1 %3619 }
 0x642   : > { %9428 = vmatprep.subr.mxu0 %v12058_v13 }
 0x643   : > { %9416 = vmatmul.mubr.msk.f32.vlgmr.msra.gmra.mrb[40].mxu1 %vm1505_vm4, %v2799_v37 }
 0x644   : > { %9425 = vmatprep.mubr.msk.f32.mxu1 %vm10127_vm0, %v12058_v13 }
 0x645   : > { %v10842_v28 = vpop.permute.xlu0 %3855 }
 0x647   : > { %9424 = vmatpush3.xpose.msk.msra.mxu1 %vm821_vm1, %v10771_v21 }
 0x648   : > { %9433 = vmatprep.subr.mxu1 %v12058_v13 }
 0x649   : > { %v3854_v36 = vpop.permute.xlu0 %3853 }
 0x64a   : > { %9426 = vmatmul.mubr.msk.f32.vlgmr.msra.gmra.mrb[42].mxu1 %vm821_vm1, %v10754_v40 }
 0x64b   : > { %9434 = vmatpush3.xpose.msk.msra.mxu1 %vm821_vm1, %v10775_v6  ;;  %9435 = vmatprep.mubr.msk.f32.mxu1 %vm10127_vm0, %v12058_v13 }
 0x64c   : > { %9443 = vmatprep.subr.mxu1 %v12058_v13 }
 0x64d   : > { %v10863_v18 = vpop.permute.xlu0 %4097 }
 0x64e   : > { %9436 = vmatmul.mubr.msk.f32.vlgmr.msra.gmra.mrb[44].mxu1 %vm821_vm1, %v3542_v34 }
 0x64f   : > { %9444 = vmatpush3.xpose.msk.msra.mxu1 %vm821_vm1, %v10821_v10  ;;  %9445 = vmatprep.mubr.msk.f32.mxu1 %vm10127_vm0, %v12058_v13 }
 0x650   : > { %9453 = vmatprep.subr.mxu1 %v12058_v13 }
 0x652   : > { %9446 = vmatmul.mubr.msk.f32.vlgmr.msra.gmra.mrb[46].mxu1 %vm821_vm1, %v3698_v44 }
 0x653   : > { %9454 = vmatpush3.xpose.msk.msra.mxu1 %vm821_vm1, %v10842_v28  ;;  %9455 = vmatprep.mubr.msk.f32.mxu1 %vm10127_vm0, %v12058_v13 }
 0x654   : > { %9463 = vmatprep.subr.mxu1 %v12058_v13 }
 0x656   : > { %9456 = vmatmul.mubr.msk.f32.vlgmr.msra.gmra.mrb[48].mxu1 %vm821_vm1, %v3854_v36 }
 0x657   : > { %9464 = vmatpush3.msk.msra.mxu1 %vm1509_vm2, %v10863_v18  ;;  %9465 = vmatprep.mubr.msk.f32.mxu1 %vm10127_vm0, %v12058_v13 }
 0x658   : > { %9473 = vmatprep.subr.mxu1 %v12058_v13 }
 0x66d   : > { %v2784_v40 = vpop.xlane.xlu1 %2783 }
 0x66e   : > { %9958 = vrcp.f32 %v2784_v40 }
 0x671   : > { %v10871_v50 = vpop.permute.xlu1 %3777 }
 0x675   : > { %v3776_v5 = vpop.permute.xlu1 %3775 }
 0x678   : > { %v9959_v14 = vpop.eup %9958 }
 0x679   : > { %v2800_v19 = vmul.f32 %v9959_v14, %v10767_v1  ;;  %v10880_v4 = vpop.permute.xlu1 %3933 }
 0x67b   : > { %9421 = vmatmul.mubr.msk.f32.vlgmr.msra.gmra.mrb[28].mxu0 %vm1505_vm4, %v2800_v19 }
 0x67c   : > { %9429 = vmatpush3.xpose.msk.msra.mxu0 %vm821_vm1, %v10750_v31  ;;  %9430 = vmatprep.mubr.msk.f32.mxu0 %vm10127_vm0, %v12058_v13 }
 0x67d   : > { %9438 = vmatprep.subr.mxu0 %v12058_v13  ;;  %v3932_v1 = vpop.permute.xlu1 %3931 }
 0x67f   : > { %9431 = vmatmul.mubr.msk.f32.vlgmr.msra.gmra.mrb[30].mxu0 %vm821_vm1, %v10760_v7 }
 0x680   : > { %9439 = vmatpush3.xpose.msk.msra.mxu0 %vm821_vm1, %v10803_v51  ;;  %9440 = vmatprep.mubr.msk.f32.mxu0 %vm10127_vm0, %v12058_v13 }
 0x681   : > { %9448 = vmatprep.subr.mxu0 %v12058_v13  ;;  %v10901_v7 = vpop.permute.xlu1 %4174 }
 0x683   : > { %9441 = vmatmul.mubr.msk.f32.vlgmr.msra.gmra.mrb[32].mxu0 %vm821_vm1, %v3620_v17 }
 0x684   : > { %9449 = vmatpush3.xpose.msk.msra.mxu0 %vm821_vm1, %v10871_v50  ;;  %9450 = vmatprep.mubr.msk.f32.mxu0 %vm10127_vm0, %v12058_v13 }
 0x685   : > { %9458 = vmatprep.subr.mxu0 %v12058_v13  ;;  %v10953_v24 = vpop.permute.xlu1 %4251 }
 0x687   : > { %9451 = vmatmul.mubr.msk.f32.vlgmr.msra.gmra.mrb[34].mxu0 %vm821_vm1, %v3776_v5 }
 0x688   : > { %9459 = vmatpush3.xpose.msk.msra.mxu0 %vm821_vm1, %v10880_v4  ;;  %9460 = vmatprep.mubr.msk.f32.mxu0 %vm10127_vm0, %v12058_v13 }
 0x689   : > { %9468 = vmatprep.subr.mxu0 %v12058_v13 }
 0x68b   : > { %9461 = vmatmul.mubr.msk.f32.vlgmr.msra.gmra.mrb[36].mxu0 %vm821_vm1, %v3932_v1 }
 0x68c   : > { %9469 = vmatpush3.msk.msra.mxu0 %vm1509_vm2, %v10901_v7  ;;  %9470 = vmatprep.mubr.msk.f32.mxu0 %vm10127_vm0, %v12058_v13 }
 0x68d   : > { %9478 = vmatprep.subr.mxu0 %v12058_v13 }
 0x6d8   : > { %v10909_v53 = vpop.f32.mrb[34].mxu1 }
 0x6d9   : > { %v9387_v8 = vpop.f32.mrb[35].mxu1 }
 0x6dc   : > { %v10911_v9 = vpop.f32.mrb[36].mxu1 }
 0x6dd   : > { %v9397_v35 = vpop.f32.mrb[37].mxu1 }
 0x709   : > { %v10913_v57 = vpop.f32.mrb[22].mxu0 }
 0x70a   : > { %v9392_v12 = vpop.f32.mrb[23].mxu0 }
 0x70d   : > { %v10915_v22 = vpop.f32.mrb[24].mxu0 }
 0x70e   : > { %v9402_v41 = vpop.f32.mrb[25].mxu0 }
 0x711   : > { %v10917_v16 = vpop.f32.mrb[26].mxu0 }
 0x712   : > { %v10919_v34 = vpop.f32.mrb[38].mxu1  ;;  %v9412_v46 = vpop.f32.mrb[27].mxu0 }
 0x713   : > { %v9407_v30 = vpop.f32.mrb[39].mxu1 }
 0x716   : > { %v10921_v11 = vpop.f32.mrb[40].mxu1 }
 0x717   : > { %v9417_v45 = vpop.f32.mrb[41].mxu1 }
 0x71d   : > { %v3459_v38 = vpop.f32.mrb[42].mxu1 }
 0x71e   : > { %v3460_v37 = vadd.f32 %v3459_v38, %v10460_v27  ;;  %v9427_v44 = vpop.f32.mrb[43].mxu1 }
 0x720   : > { %v4009_v36 = vsel %vm1414_vm3, %v3460_v37, -inf }
 0x721   : > { %4010 = vmax.xlane.f32.xlu0 %v4009_v36  ;;  %v3615_v17 = vpop.f32.mrb[44].mxu1 }
 0x722   : > { %v3616_v40 = vadd.f32 %v3615_v17, %v10470_v39  ;;  %v9437_v14 = vpop.f32.mrb[45].mxu1 }
 0x724   : > { %v4015_v5 = vsel %vm1414_vm3, %v3616_v40, -inf }
 0x725   : > { %4016 = vmax.xlane.f32.xlu0 %v4015_v5  ;;  %v3771_v19 = vpop.f32.mrb[46].mxu1 }
 0x726   : > { %v9447_v1 = vpop.f32.mrb[47].mxu1  ;;  %v3772_v14 = vadd.f32 %v3771_v19, %v10482_v23 }
 0x729   : > { %v3927_v8 = vpop.f32.mrb[48].mxu1 }
 0x72a   : > { %v9457_v35 = vpop.f32.mrb[49].mxu1  ;;  %v3928_v2 = vadd.f32 %v3927_v8, %v10493_v42 }
 0x74e   : > { %v10927_v12 = vpop.f32.mrb[28].mxu0 }
 0x74f   : > { %v9422_v41 = vpop.f32.mrb[29].mxu0 }
 0x752   : > { %v3537_v46 = vpop.f32.mrb[30].mxu0 }
 0x753   : > { %v3538_v30 = vadd.f32 %v3537_v46, %v10465_v32  ;;  %v9432_v45 = vpop.f32.mrb[31].mxu0 }
 0x754   : > { %v4021_v45 = vsel %vm1414_vm3, %v3772_v14, -inf }
 0x755   : > { %v4012_v38 = vsel %vm1414_vm3, %v3538_v30, -inf }
 0x756   : > { %4013 = vmax.xlane.f32.xlu1 %v4012_v38  ;;  %v3693_v44 = vpop.f32.mrb[32].mxu0 }
 0x757   : > { %v3694_v36 = vadd.f32 %v3693_v44, %v10476_v47  ;;  %v9442_v17 = vpop.f32.mrb[33].mxu0 }
 0x758   : > { %v4027_v17 = vsel %vm1414_vm3, %v3928_v2, -inf }
 0x759   : > { %v4018_v5 = vsel %vm1414_vm3, %v3694_v36, -inf }
 0x75a   : > { %v3849_v1 = vpop.f32.mrb[34].mxu0  ;;  %4019 = vmax.xlane.f32.xlu0 %v4018_v5 }
 0x75b   : > { %v3850_v35 = vadd.f32 %v3849_v1, %v10488_v33  ;;  %v9452_v41 = vpop.f32.mrb[35].mxu0 }
 0x75d   : > { %v4024_v46 = vsel %vm1414_vm3, %v3850_v35, -inf }
 0x75e   : > { %4025 = vmax.xlane.f32.xlu1 %v4024_v46  ;;  %v4005_v38 = vpop.f32.mrb[36].mxu0  ;;  %4022 = vmax.xlane.f32.xlu0 %v4021_v45 }
 0x75f   : > { %v9462_v44 = vpop.f32.mrb[37].mxu0  ;;  %v10944_v19 = vadd.f32 %v4005_v38, %v10503_v26 }
 0x761   : > { %v4030_v8 = vsel %vm1414_vm3, %v10944_v19, -inf }
 0x762   : > { %4028 = vmax.xlane.f32.xlu0 %v4027_v17 }
 0x76f   : > { %4482 = vrot.lane.b32.xlu1 %v10386_v62, %s10131_s25 }
 0x778   : > { %4405 = vrot.lane.b32.xlu0 %v10354_v56, %s10131_s25 }
 0x793   : > { %4031 = vmax.xlane.f32.xlu1 %v4030_v8  ;;  %v10955_v8 = vpop.permute.xlu1 %4328 }
 0x7ae   : > { %v4011_v5 = vpop.xlane.xlu0 %4010 }
 0x7af   : > { %v4033_v1 = vsub.f32 %v3460_v37, %v4011_v5 }
 0x7b1   : > { %v4041_v41 = vmul.f32 1.442695, %v4033_v1 }
 0x7b2   : > { %v4017_v46 = vpop.xlane.xlu0 %4016 }
 0x7b3   : > { %9960 = vpow2.f32 %v4041_v41  ;;  %v4035_v45 = vsub.f32 %v3616_v40, %v4017_v46 }
 0x7b5   : > { %v4045_v44 = vmul.f32 1.442695, %v4035_v45 }
 0x7b7   : > { %9962 = vpow2.f32 %v4045_v44 }
 0x7bd   : > { %v9961_v17 = vpop.eup %9960 }
 0x7be   : > { %v4057_v62 = vsel %vm1414_vm3, %v9961_v17, 0.0 }
 0x7bf   : > { %4058 = vadd.xlane.f32.xlu0 %v4057_v62 }
 0x7c1   : > { %v10949_v56 = vpop.eup %9962 }
 0x7c2   : > { %v4063_v38 = vsel %vm1414_vm3, %v10949_v56, 0.0 }
 0x7c3   : > { %4064 = vadd.xlane.f32.xlu0 %v4063_v38 }
 0x7e3   : > { %v4014_v37 = vpop.xlane.xlu1 %4013 }
 0x7e4   : > { %v4034_v5 = vsub.f32 %v3538_v30, %v4014_v37 }
 0x7e6   : > { %v4043_v1 = vmul.f32 1.442695, %v4034_v5 }
 0x7e7   : > { %v4020_v40 = vpop.xlane.xlu0 %4019 }
 0x7e8   : > { %9964 = vpow2.f32 %v4043_v1  ;;  %v4036_v41 = vsub.f32 %v3694_v36, %v4020_v40 }
 0x7ea   : > { %v4047_v46 = vmul.f32 1.442695, %v4036_v41 }
 0x7eb   : > { %v4023_v45 = vpop.xlane.xlu0 %4022 }
 0x7ec   : > { %9966 = vpow2.f32 %v4047_v46  ;;  %v4037_v44 = vsub.f32 %v3772_v14, %v4023_v45  ;;  %v4026_v14 = vpop.xlane.xlu1 %4025 }
 0x7ed   : > { %v4038_v5 = vsub.f32 %v3850_v35, %v4026_v14 }
 0x7ee   : > { %v4049_v62 = vmul.f32 1.442695, %v4037_v44 }
 0x7ef   : > { %v4029_v1 = vpop.xlane.xlu0 %4028  ;;  %v4051_v40 = vmul.f32 1.442695, %v4038_v5 }
 0x7f0   : > { %9968 = vpow2.f32 %v4049_v62  ;;  %v4039_v41 = vsub.f32 %v3928_v2, %v4029_v1 }
 0x7f1   : > { %9970 = vpow2.f32 %v4051_v40 }
 0x7f2   : > { %v10957_v20 = vpop.eup %9964  ;;  %v4053_v46 = vmul.f32 1.442695, %v4039_v41 }
 0x7f3   : > { %v4060_v38 = vsel %vm1414_vm3, %v10957_v20, 0.0  ;;  %v10985_v2 = vpop.permute.xlu0 %4405 }
 0x7f4   : > { %4061 = vadd.xlane.f32.xlu1 %v4060_v38  ;;  %9972 = vpow2.f32 %v4053_v46 }
 0x7f6   : > { %v10961_v15 = vpop.eup %9966 }
 0x7f7   : > { %v4066_v30 = vsel %vm1414_vm3, %v10961_v15, 0.0 }
 0x7f8   : > { %4067 = vadd.xlane.f32.xlu1 %v4066_v30 }
 0x7fa   : > { %v10965_v37 = vpop.eup %9968 }
 0x7fb   : > { %v4069_v36 = vsel %vm1414_vm3, %v10965_v37, 0.0  ;;  %v10973_v45 = vpop.eup %9970 }
 0x7fc   : > { %4070 = vadd.xlane.f32.xlu0 %v4069_v36  ;;  %v4072_v44 = vsel %vm1414_vm3, %v10973_v45, 0.0 }
 0x7fe   : > { %v10977_v62 = vpop.eup %9972 }
 0x809   : > { %4636 = vrot.lane.b32.xlu1 %v10408_v0, %s10131_s25  ;;  %v4075_v0 = vsel %vm1414_vm3, %v10977_v62, 0.0 }
 0x812   : > { %4559 = vrot.lane.b32.xlu0 %v10367_v59, %s10131_s25  ;;  %v10983_v59 = vpop.permute.xlu1 %4482 }
 0x820   : > { %v4032_v35 = vpop.xlane.xlu1 %4031 }
 0x821   : > { %v4040_v38 = vsub.f32 %v10944_v19, %v4032_v35 }
 0x823   : > { %v4055_v36 = vmul.f32 1.442695, %v4040_v38 }
 0x82d   : > { %4073 = vadd.xlane.f32.xlu1 %v4072_v44 }
 0x831   : > { %4076 = vadd.xlane.f32.xlu0 %v4075_v0 }
 0x83e   : > { %4787 = vrot.lane.b32.xlu1 %v10345_v54, %s10131_s25 }
 0x847   : > { %4713 = vrot.lane.b32.xlu0 %v10318_v49, %s10131_s25 }
 0x84b   : > { %4861 = vrot.lane.b32.xlu0 %v10328_v52, %s10131_s25 }
 0x84c   : > { %v4059_v30 = vpop.xlane.xlu0 %4058 }
 0x84d   : > { %9974 = vrcp.f32 %v4059_v30 }
 0x84f   : > { %5009 = vrot.lane.b32.xlu0 %v10350_v55, %s10131_s25 }
 0x850   : > { %v4065_v14 = vpop.xlane.xlu0 %4064 }
 0x851   : > { %9976 = vrcp.f32 %v4065_v14 }
 0x852   : > { %9978 = vpow2.f32 %v4055_v36 }
 0x853   : > { %5157 = vrot.lane.b32.xlu0 %v10364_v58, %s10131_s25 }
 0x857   : > { %v9975_v54 = vpop.eup %9974 }
 0x858   : > { %v4089_v49 = vmul.f32 %v9975_v54, %v9961_v17 }
 0x85a   : > { %9466 = vmatmul.mubr.msk.f32.vlgmr.msra.gmra.mrb[50].mxu1 %vm1505_vm4, %v4089_v49 }
 0x85b   : > { %v9977_v19 = vpop.eup %9976  ;;  %9474 = vmatpush3.msk.msra.mxu1 %vm1509_vm2, %v10953_v24  ;;  %9475 = vmatprep.mubr.msk.f32.mxu1 %vm10127_vm0, %v12058_v13 }
 0x85c   : > { %v4091_v52 = vmul.f32 %v9977_v19, %v10949_v56  ;;  %9483 = vmatprep.subr.mxu1 %v12058_v13  ;;  %v11003_v55 = vpop.eup %9978 }
 0x85d   : > { %v4078_v58 = vsel %vm1414_vm3, %v11003_v55, 0.0 }
 0x85e   : > { %9476 = vmatmul.mubr.msk.f32.vlgmr.msra.gmra.mrb[52].mxu1 %vm1505_vm4, %v4091_v52 }
 0x85f   : > { %9484 = vmatpush3.msk.msra.mxu1 %vm1509_vm2, %v10985_v2  ;;  %9485 = vmatprep.mubr.msk.f32.mxu1 %vm10127_vm0, %v12058_v13 }
 0x860   : > { %9493 = vmatprep.subr.mxu1 %v12058_v13 }
 0x862   : > { %4079 = vadd.xlane.f32.xlu1 %v4078_v58 }
 0x873   : > { %4935 = vrot.lane.b32.xlu1 %v10379_v60, %s10131_s25 }
 0x877   : > { %5083 = vrot.lane.b32.xlu1 %v10395_v63, %s10131_s25 }
 0x87b   : > { %5231 = vrot.lane.b32.xlu1 %v10417_v3, %s10131_s25 }
 0x881   : > { %v4062_v17 = vpop.xlane.xlu1 %4061 }
 0x882   : > { %9980 = vrcp.f32 %v4062_v17 }
 0x885   : > { %v4068_v56 = vpop.xlane.xlu1 %4067 }
 0x886   : > { %9982 = vrcp.f32 %v4068_v56 }
 0x889   : > { %v4071_v5 = vpop.xlane.xlu0 %4070 }
 0x88a   : > { %9984 = vrcp.f32 %v4071_v5 }
 0x88c   : > { %v9981_v1 = vpop.eup %9980 }
 0x88d   : > { %v4090_v40 = vmul.f32 %v9981_v1, %v10957_v20  ;;  %v11034_v20 = vpop.permute.xlu0 %4559 }
 0x88f   : > { %9471 = vmatmul.mubr.msk.f32.vlgmr.msra.gmra.mrb[38].mxu0 %vm1505_vm4, %v4090_v40 }
 0x890   : > { %v9983_v41 = vpop.eup %9982  ;;  %9479 = vmatpush3.msk.msra.mxu0 %vm1509_vm2, %v10955_v8  ;;  %9480 = vmatprep.mubr.msk.f32.mxu0 %vm10127_vm0, %v12058_v13 }
 0x891   : > { %9488 = vmatprep.subr.mxu0 %v12058_v13  ;;  %v4092_v60 = vmul.f32 %v9983_v41, %v10961_v15  ;;  %v11042_v15 = vpop.permute.xlu1 %4636 }
 0x893   : > { %9481 = vmatmul.mubr.msk.f32.vlgmr.msra.gmra.mrb[40].mxu0 %vm1505_vm4, %v4092_v60 }
 0x894   : > { %9489 = vmatpush3.msk.msra.mxu0 %vm1509_vm2, %v10983_v59  ;;  %9490 = vmatprep.mubr.msk.f32.mxu0 %vm10127_vm0, %v12058_v13  ;;  %v9985_v63 = vpop.eup %9984 }
 0x895   : > { %9498 = vmatprep.subr.mxu0 %v12058_v13  ;;  %v4093_v3 = vmul.f32 %v9985_v63, %v10965_v37 }
 0x897   : > { %9486 = vmatmul.mubr.msk.f32.vlgmr.msra.gmra.mrb[54].mxu1 %vm1505_vm4, %v4093_v3 }
 0x898   : > { %9494 = vmatpush3.msk.msra.mxu1 %vm1509_vm2, %v11034_v20  ;;  %9495 = vmatprep.mubr.msk.f32.mxu1 %vm10127_vm0, %v12058_v13 }
 0x899   : > { %9503 = vmatprep.subr.mxu1 %v12058_v13 }
 0x8ba   : > { %v4074_v46 = vpop.xlane.xlu1 %4073 }
 0x8bb   : > { %9986 = vrcp.f32 %v4074_v46 }
 0x8be   : > { %v4077_v44 = vpop.xlane.xlu0 %4076 }
 0x8bf   : > { %9988 = vrcp.f32 %v4077_v44 }
 0x8c2   : > { %v4714_v38 = vpop.permute.xlu0 %4713 }
 0x8c5   : > { %v9987_v0 = vpop.eup %9986 }
 0x8c6   : > { %v4094_v37 = vmul.f32 %v9987_v0, %v10973_v45  ;;  %v4862_v45 = vpop.permute.xlu0 %4861 }
 0x8c8   : > { %9491 = vmatmul.mubr.msk.f32.vlgmr.msra.gmra.mrb[42].mxu0 %vm1505_vm4, %v4094_v37 }
 0x8c9   : > { %9499 = vmatpush3.msk.msra.mxu0 %vm1509_vm2, %v11042_v15  ;;  %9500 = vmatprep.mubr.msk.f32.mxu0 %vm10127_vm0, %v12058_v13  ;;  %v9989_v35 = vpop.eup %9988 }
 0x8ca   : > { %9508 = vmatprep.subr.mxu0 %v12058_v13  ;;  %v4095_v30 = vmul.f32 %v9989_v35, %v10977_v62  ;;  %v5010_v62 = vpop.permute.xlu0 %5009 }
 0x8cc   : > { %9496 = vmatmul.mubr.msk.f32.vlgmr.msra.gmra.mrb[56].mxu1 %vm1505_vm4, %v4095_v30 }
 0x8cd   : > { %9504 = vmatpush3.xpose.msk.msra.mxu1 %vm821_vm1, %v10771_v21  ;;  %9505 = vmatprep.mubr.msk.f32.mxu1 %vm10127_vm0, %v12058_v13 }
 0x8ce   : > { %9513 = vmatprep.subr.mxu1 %v12058_v13  ;;  %v5158_v21 = vpop.permute.xlu0 %5157 }
 0x8d0   : > { %9506 = vmatmul.mubr.msk.f32.vlgmr.msra.gmra.mrb[58].mxu1 %vm821_vm1, %v4714_v38 }
 0x8d1   : > { %9514 = vmatpush3.xpose.msk.msra.mxu1 %vm821_vm1, %v10775_v6  ;;  %9515 = vmatprep.mubr.msk.f32.mxu1 %vm10127_vm0, %v12058_v13  ;;  %v4788_v6 = vpop.permute.xlu1 %4787 }
 0x8d2   : > { %9523 = vmatprep.subr.mxu1 %v12058_v13 }
 0x8d4   : > { %9516 = vmatmul.mubr.msk.f32.vlgmr.msra.gmra.mrb[60].mxu1 %vm821_vm1, %v4862_v45 }
 0x8d5   : > { %9524 = vmatpush3.xpose.msk.msra.mxu1 %vm821_vm1, %v10821_v10  ;;  %9525 = vmatprep.mubr.msk.f32.mxu1 %vm10127_vm0, %v12058_v13 }
 0x8d6   : > { %9533 = vmatprep.subr.mxu1 %v12058_v13 }
 0x8d8   : > { %9526 = vmatmul.mubr.msk.f32.vlgmr.msra.gmra.mrb[62].mxu1 %vm821_vm1, %v5010_v62 }
 0x8d9   : > { %9534 = vmatpush3.xpose.msk.msra.mxu1 %vm821_vm1, %v10842_v28  ;;  %9535 = vmatprep.mubr.msk.f32.mxu1 %vm10127_vm0, %v12058_v13 }
 0x8da   : > { %9543 = vmatprep.subr.mxu1 %v12058_v13 }
 0x8dc   : > { %9536 = vmatmul.mubr.msk.f32.vlgmr.msra.gmra.mrb[64].mxu1 %vm821_vm1, %v5158_v21 }
 0x8dd   : > { %9544 = vmatpush3.msk.msra.mxu1 %vm1509_vm2, %v10863_v18  ;;  %9545 = vmatprep.mubr.msk.f32.mxu1 %vm10127_vm0, %v12058_v13 }
 0x8de   : > { %9553 = vmatprep.subr.mxu1 %v12058_v13 }
 0x8ef   : > { %v4080_v10 = vpop.xlane.xlu1 %4079 }
 0x8f0   : > { %9990 = vrcp.f32 %v4080_v10 }
 0x8f3   : > { %v4936_v18 = vpop.permute.xlu1 %4935 }
 0x8f7   : > { %v5084_v14 = vpop.permute.xlu1 %5083 }
 0x8fa   : > { %v9991_v28 = vpop.eup %9990 }
 0x8fb   : > { %v4096_v36 = vmul.f32 %v9991_v28, %v11003_v55 }
 0x8fd   : > { %9501 = vmatmul.mubr.msk.f32.vlgmr.msra.gmra.mrb[44].mxu0 %vm1505_vm4, %v4096_v36 }
 0x8fe   : > { %9509 = vmatpush3.xpose.msk.msra.mxu0 %vm821_vm1, %v10750_v31  ;;  %9510 = vmatprep.mubr.msk.f32.mxu0 %vm10127_vm0, %v12058_v13  ;;  %v5232_v31 = vpop.permute.xlu1 %5231 }
 0x8ff   : > { %9518 = vmatprep.subr.mxu0 %v12058_v13 }
 0x901   : > { %9511 = vmatmul.mubr.msk.f32.vlgmr.msra.gmra.mrb[46].mxu0 %vm821_vm1, %v4788_v6 }
 0x902   : > { %9519 = vmatpush3.xpose.msk.msra.mxu0 %vm821_vm1, %v10803_v51  ;;  %9520 = vmatprep.mubr.msk.f32.mxu0 %vm10127_vm0, %v12058_v13 }
 0x903   : > { %9528 = vmatprep.subr.mxu0 %v12058_v13 }
 0x905   : > { %9521 = vmatmul.mubr.msk.f32.vlgmr.msra.gmra.mrb[48].mxu0 %vm821_vm1, %v4936_v18 }
 0x906   : > { %9529 = vmatpush3.xpose.msk.msra.mxu0 %vm821_vm1, %v10871_v50  ;;  %9530 = vmatprep.mubr.msk.f32.mxu0 %vm10127_vm0, %v12058_v13 }
 0x907   : > { %9538 = vmatprep.subr.mxu0 %v12058_v13 }
 0x909   : > { %9531 = vmatmul.mubr.msk.f32.vlgmr.msra.gmra.mrb[50].mxu0 %vm821_vm1, %v5084_v14 }
 0x90a   : > { %9539 = vmatpush3.xpose.msk.msra.mxu0 %vm821_vm1, %v10880_v4  ;;  %9540 = vmatprep.mubr.msk.f32.mxu0 %vm10127_vm0, %v12058_v13 }
 0x90b   : > { %9548 = vmatprep.subr.mxu0 %v12058_v13 }
 0x90d   : > { %9541 = vmatmul.mubr.msk.f32.vlgmr.msra.gmra.mrb[52].mxu0 %vm821_vm1, %v5232_v31 }
 0x90e   : > { %9549 = vmatpush3.msk.msra.mxu0 %vm1509_vm2, %v10901_v7  ;;  %9550 = vmatprep.mubr.msk.f32.mxu0 %vm10127_vm0, %v12058_v13 }
 0x90f   : > { %9558 = vmatprep.subr.mxu0 %v12058_v13 }
 0x92d   : > { %v11113_v51 = vpop.f32.mrb[50].mxu1 }
 0x92e   : > { %v9467_v50 = vpop.f32.mrb[51].mxu1 }
 0x931   : > { %v11115_v4 = vpop.f32.mrb[52].mxu1 }
 0x932   : > { %v9477_v54 = vpop.f32.mrb[53].mxu1 }
 0x962   : > { %v11117_v49 = vpop.f32.mrb[38].mxu0 }
 0x963   : > { %v9472_v19 = vpop.f32.mrb[39].mxu0 }
 0x966   : > { %v11119_v52 = vpop.f32.mrb[40].mxu0 }
 0x967   : > { %v9482_v55 = vpop.f32.mrb[41].mxu0 }
 0x96a   : > { %v11121_v58 = vpop.f32.mrb[54].mxu1 }
 0x96b   : > { %v9487_v7 = vpop.f32.mrb[55].mxu1 }
 0x99b   : > { %v11123_v17 = vpop.f32.mrb[42].mxu0 }
 0x99c   : > { %v9492_v56 = vpop.f32.mrb[43].mxu0 }
 0x99f   : > { %v11125_v5 = vpop.f32.mrb[56].mxu1 }
 0x9a0   : > { %v9497_v1 = vpop.f32.mrb[57].mxu1 }
 0x9a3   : > { %v4783_v40 = vpop.f32.mrb[58].mxu1 }
 0x9a4   : > { %v4784_v41 = vadd.f32 %v4783_v40, %v10460_v27  ;;  %v9507_v60 = vpop.f32.mrb[59].mxu1 }
 0x9a6   : > { %v5305_v63 = vsel %vm1414_vm3, %v4784_v41, -inf }
 0x9a7   : > { %5306 = vmax.xlane.f32.xlu0 %v5305_v63  ;;  %v4931_v3 = vpop.f32.mrb[60].mxu1 }
 0x9a8   : > { %v4932_v46 = vadd.f32 %v4931_v3, %v10470_v39  ;;  %v9517_v44 = vpop.f32.mrb[61].mxu1 }
 0x9aa   : > { %v5311_v0 = vsel %vm1414_vm3, %v4932_v46, -inf }
 0x9ab   : > { %5312 = vmax.xlane.f32.xlu0 %v5311_v0  ;;  %v5079_v37 = vpop.f32.mrb[62].mxu1 }
 0x9ac   : > { %v9527_v35 = vpop.f32.mrb[63].mxu1  ;;  %v5080_v18 = vadd.f32 %v5079_v37, %v10482_v23 }
 0x9ae   : > { %v5317_v55 = vsel %vm1414_vm3, %v5080_v18, -inf }
 0x9af   : > { %v5227_v38 = vpop.f32.mrb[64].mxu1 }
 0x9b0   : > { %v9537_v30 = vpop.f32.mrb[65].mxu1  ;;  %v5228_v19 = vadd.f32 %v5227_v38, %v10493_v42 }
 0x9b2   : > { %v5323_v1 = vsel %vm1414_vm3, %v5228_v19, -inf }
 0x9d0   : > { %v11131_v45 = vpop.f32.mrb[44].mxu0 }
 0x9d1   : > { %v9502_v62 = vpop.f32.mrb[45].mxu0 }
 0x9d4   : > { %v4857_v21 = vpop.f32.mrb[46].mxu0 }
 0x9d5   : > { %v4858_v27 = vadd.f32 %v4857_v21, %v10465_v32  ;;  %v9512_v6 = vpop.f32.mrb[47].mxu0 }
 0x9d7   : > { %v5308_v10 = vsel %vm1414_vm3, %v4858_v27, -inf }
 0x9d8   : > { %5309 = vmax.xlane.f32.xlu1 %v5308_v10  ;;  %v5005_v28 = vpop.f32.mrb[48].mxu0 }
 0x9d9   : > { %v5006_v39 = vadd.f32 %v5005_v28, %v10476_v47  ;;  %v9522_v36 = vpop.f32.mrb[49].mxu0 }
 0x9db   : > { %v5314_v14 = vsel %vm1414_vm3, %v5006_v39, -inf }
 0x9dc   : > { %v5153_v31 = vpop.f32.mrb[50].mxu0  ;;  %5315 = vmax.xlane.f32.xlu0 %v5314_v14 }
 0x9dd   : > { %v5154_v50 = vadd.f32 %v5153_v31, %v10488_v33  ;;  %v9532_v54 = vpop.f32.mrb[51].mxu0 }
 0x9df   : > { %v5320_v32 = vsel %vm1414_vm3, %v5154_v50, -inf }
 0x9e0   : > { %5321 = vmax.xlane.f32.xlu1 %v5320_v32  ;;  %v5301_v7 = vpop.f32.mrb[52].mxu0  ;;  %5318 = vmax.xlane.f32.xlu0 %v5317_v55 }
 0x9e1   : > { %v5302_v47 = vadd.f32 %v5301_v7, %v10503_v26  ;;  %v9542_v56 = vpop.f32.mrb[53].mxu0 }
 0x9e3   : > { %v5326_v23 = vsel %vm1414_vm3, %v5302_v47, -inf }
 0x9e4   : > { %5327 = vmax.xlane.f32.xlu1 %v5326_v23  ;;  %5324 = vmax.xlane.f32.xlu0 %v5323_v1 }
 0xa34   : > { %v5307_v33 = vpop.xlane.xlu0 %5306 }
 0xa35   : > { %v5329_v40 = vsub.f32 %v4784_v41, %v5307_v33 }
 0xa37   : > { %v5337_v60 = vmul.f32 1.442695, %v5329_v40 }
 0xa38   : > { %v5313_v42 = vpop.xlane.xlu0 %5312 }
 0xa39   : > { %9992 = vpow2.f32 %v5337_v60  ;;  %v5331_v63 = vsub.f32 %v4932_v46, %v5313_v42 }
 0xa3b   : > { %v5341_v3 = vmul.f32 1.442695, %v5331_v63 }
 0xa3d   : > { %9994 = vpow2.f32 %v5341_v3 }
 0xa43   : > { %v11145_v44 = vpop.eup %9992 }
 0xa44   : > { %v5353_v26 = vsel %vm1414_vm3, %v11145_v44, 0.0 }
 0xa45   : > { %5354 = vadd.xlane.f32.xlu0 %v5353_v26 }
 0xa47   : > { %v11149_v0 = vpop.eup %9994 }
 0xa48   : > { %v5359_v37 = vsel %vm1414_vm3, %v11149_v0, 0.0 }
 0xa49   : > { %5360 = vadd.xlane.f32.xlu0 %v5359_v37  ;;  %v9746_v37 = vld [vmem:[%s12023_s5 + $0x10] sm:$0xff]  }
 0xa65   : > { %v5310_v35 = vpop.xlane.xlu1 %5309 }
 0xa66   : > { %v5330_v41 = vsub.f32 %v4858_v27, %v5310_v35 }
 0xa68   : > { %v5339_v38 = vmul.f32 1.442695, %v5330_v41  ;;  %v9747_v41 = vld [vmem:[%s12023_s5 + $0x18] sm:$0xff]  }
 0xa69   : > { %v5316_v30 = vpop.xlane.xlu0 %5315 }
 0xa6a   : > { %9996 = vpow2.f32 %v5339_v38  ;;  %v5332_v46 = vsub.f32 %v5006_v39, %v5316_v30 }
 0xa6c   : > { %v5343_v62 = vmul.f32 1.442695, %v5332_v46 }
 0xa6d   : > { %v5322_v21 = vpop.xlane.xlu1 %5321  ;;  %v5319_v6 = vpop.xlane.xlu0 %5318 }
 0xa6e   : > { %9998 = vpow2.f32 %v5343_v62  ;;  %v5334_v10 = vsub.f32 %v5154_v50, %v5322_v21  ;;  %v5333_v28 = vsub.f32 %v5080_v18, %v5319_v6  ;;  %v9748_v62 = vld [vmem:[%s12023_s5 + $0x20] sm:$0xff]   ;;  %v9749_v21 = vld [vmem:[%s12023_s5 + $0x28] sm:$0xff]   ;;  %v9750_v6 = vld [vmem:[%s12023_s5 + $0x30] sm:$0xff]  }
 0xa70   : > { %v5347_v36 = vmul.f32 1.442695, %v5334_v10  ;;  %v5345_v14 = vmul.f32 1.442695, %v5333_v28 }
 0xa71   : > { %v5328_v31 = vpop.xlane.xlu1 %5327  ;;  %v5325_v54 = vpop.xlane.xlu0 %5324 }
 0xa72   : > { %10000 = vpow2.f32 %v5347_v36  ;;  %v5336_v32 = vsub.f32 %v5302_v47, %v5328_v31  ;;  %v5335_v55 = vsub.f32 %v5228_v19, %v5325_v54  ;;  %v9751_v36 = vld [vmem:[%s12023_s5 + $0x38] sm:$0xff]  }
 0xa73   : > { %10002 = vpow2.f32 %v5345_v14 }
 0xa74   : > { %v11153_v7 = vpop.eup %9996  ;;  %v5351_v27 = vmul.f32 1.442695, %v5336_v32  ;;  %v5349_v56 = vmul.f32 1.442695, %v5335_v55 }
 0xa75   : > { %v5356_v39 = vsel %vm1414_vm3, %v11153_v7, 0.0 }
 0xa76   : > { %10004 = vpow2.f32 %v5351_v27  ;;  %5357 = vadd.xlane.f32.xlu1 %v5356_v39 }
 0xa77   : > { %10006 = vpow2.f32 %v5349_v56 }
 0xa78   : > { %v11157_v50 = vpop.eup %9998 }
 0xa79   : > { %v5362_v18 = vsel %vm1414_vm3, %v11157_v50, 0.0 }
 0xa7a   : > { %5363 = vadd.xlane.f32.xlu1 %v5362_v18  ;;  %v10114_v18 = vld [vmem:[%s10448_s23] sm:$0xff] }
 0xa7c   : > { %v11161_v23 = vpop.eup %10000 }
 0xa7d   : > { %v11163_v19 = vpop.eup %10002  ;;  %v5368_v47 = vsel %vm1414_vm3, %v11161_v23, 0.0 }
 0xa7e   : > { %5369 = vadd.xlane.f32.xlu1 %v5368_v47  ;;  %v5365_v1 = vsel %vm1414_vm3, %v11163_v19, 0.0 }
 0xa7f   : > { %5366 = vadd.xlane.f32.xlu0 %v5365_v1 }
 0xa80   : > { %v11169_v33 = vpop.eup %10004 }
 0xa81   : > { %v11171_v40 = vpop.eup %10006  ;;  %v5374_v60 = vsel %vm1414_vm3, %v11169_v33, 0.0 }
 0xa82   : > { %5375 = vadd.xlane.f32.xlu1 %v5374_v60  ;;  %v5371_v42 = vsel %vm1414_vm3, %v11171_v40, 0.0 }
 0xa83   : > { %5372 = vadd.xlane.f32.xlu0 %v5371_v42  ;;  %v6283_v42 = vsub.s32 4, %v10284_v61 }
 0xa93   : > { %5987 = vrot.lane.b32.xlu1 %v10913_v57, %s10131_s25 }
 0xa97   : > { %5989 = vrot.lane.b32.xlu1 %v10911_v9, %s10131_s25 }
 0xa99   : > { %5985 = vrot.lane.b32.xlu0 %v10909_v53, %s10131_s25 }
 0xa9b   : > { %5991 = vrot.lane.b32.xlu1 %v10915_v22, %s10131_s25 }
 0xa9d   : > { %5993 = vrot.lane.b32.xlu0 %v10919_v34, %s10131_s25 }
 0xa9f   : > { %5995 = vrot.lane.b32.xlu1 %v10917_v16, %s10131_s25 }
 0xaa1   : > { %5997 = vrot.lane.b32.xlu0 %v10921_v11, %s10131_s25 }
 0xaa3   : > { %5999 = vrot.lane.b32.xlu1 %v10927_v12, %s10131_s25 }
 0xaa5   : > { %6017 = vrot.lane.b32.xlu0 %v11113_v51, %s10128_s18 }
 0xaa7   : > { %6019 = vrot.lane.b32.xlu1 %v11117_v49, %s10128_s18 }
 0xaa9   : > { %6021 = vrot.lane.b32.xlu0 %v11115_v4, %s10128_s18 }
 0xaab   : > { %6023 = vrot.lane.b32.xlu1 %v11119_v52, %s10128_s18 }
 0xaad   : > { %6025 = vrot.lane.b32.xlu0 %v11121_v58, %s10128_s18 }
 0xaaf   : > { %6027 = vrot.lane.b32.xlu1 %v11123_v17, %s10128_s18 }
 0xab1   : > { %6029 = vrot.lane.b32.xlu0 %v11125_v5, %s10128_s18 }
 0xab3   : > { %6031 = vrot.lane.b32.xlu1 %v11131_v45, %s10128_s18 }
 0xad2   : > { %v5355_v53 = vpop.xlane.xlu0 %5354 }
 0xad3   : > { %10008 = vrcp.f32 %v5355_v53  ;;  %v6284_v53 = vrot.slane %v10114_v18, %v6283_v42 }
 0xad6   : > { %v5361_v9 = vpop.xlane.xlu0 %5360 }
 0xad7   : > { %10010 = vrcp.f32 %v5361_v9  ;;  %v6290_v9 = vsub.s32 5, %v10284_v61 }
 0xadd   : > { %v10009_v57 = vpop.eup %10008 }
 0xade   : > { %v5385_v22 = vmul.f32 %v10009_v57, %v11145_v44  ;;  %v6291_v57 = vrot.slane %v10114_v18, %v6290_v9 }
 0xae0   : > { %9546 = vmatmul.mubr.msk.f32.vlgmr.msra.gmra.mrb[66].mxu1 %vm1505_vm4, %v5385_v22  ;;  %v6297_v22 = vsub.s32 6, %v10284_v61 }
 0xae1   : > { %v10011_v16 = vpop.eup %10010  ;;  %9554 = vmatpush3.msk.msra.mxu1 %vm1509_vm2, %v10953_v24  ;;  %9555 = vmatprep.mubr.msk.f32.mxu1 %vm10127_vm0, %v12058_v13 }
 0xae2   : > { %v5387_v34 = vmul.f32 %v10011_v16, %v11149_v0  ;;  %9563 = vmatprep.subr.mxu1 %v12058_v13  ;;  %v12064_v0 = vmov 0   ;;  %v6298_v16 = vrot.slane %v10114_v18, %v6297_v22 }
 0xae4   : > { %9556 = vmatmul.mubr.msk.f32.vlgmr.msra.gmra.mrb[68].mxu1 %vm1505_vm4, %v5387_v34  ;;  %v6250_v34 = vsel %vm1505_vm4, %v10114_v18, 0.0 }
 0xae5   : > { %9564 = vmatpush3.msk.msra.mxu1 %vm1509_vm2, %v10985_v2  ;;  %9565 = vmatprep.mubr.msk.f32.mxu1 %vm10127_vm0, %v12058_v13 }
 0xae6   : > { %9573 = vmatprep.subr.mxu1 %v12058_v13 }
 0xb03   : > { %v5358_v11 = vpop.xlane.xlu1 %5357 }
 0xb04   : > { %10012 = vrcp.f32 %v5358_v11  ;;  %v6304_v11 = vsub.s32 7, %v10284_v61 }
 0xb07   : > { %v5364_v24 = vpop.xlane.xlu1 %5363 }
 0xb08   : > { %10014 = vrcp.f32 %v5364_v24 }
 0xb0b   : > { %v5370_v12 = vpop.xlane.xlu1 %5369 }
 0xb0c   : > { %10016 = vrcp.f32 %v5370_v12  ;;  %v5367_v51 = vpop.xlane.xlu0 %5366  ;;  %v6305_v12 = vrot.slane %v10114_v18, %v6304_v11 }
 0xb0d   : > { %10018 = vrcp.f32 %v5367_v51 }
 0xb0e   : > { %v10013_v4 = vpop.eup %10012 }
 0xb0f   : > { %v5386_v49 = vmul.f32 %v10013_v4, %v11153_v7  ;;  %v5376_v52 = vpop.xlane.xlu1 %5375  ;;  %v6262_v7 = vsub.s32 1, %v10284_v61 }
 0xb10   : > { %10020 = vrcp.f32 %v5376_v52  ;;  %v5373_v58 = vpop.xlane.xlu0 %5372 }
 0xb11   : > { %10022 = vrcp.f32 %v5373_v58  ;;  %9551 = vmatmul.mubr.msk.f32.vlgmr.msra.gmra.mrb[54].mxu0 %vm1505_vm4, %v5386_v49 }
 0xb12   : > { %v10015_v2 = vpop.eup %10014  ;;  %9559 = vmatpush3.msk.msra.mxu0 %vm1509_vm2, %v10955_v8  ;;  %9560 = vmatprep.mubr.msk.f32.mxu0 %vm10127_vm0, %v12058_v13 }
 0xb13   : > { %v5388_v17 = vmul.f32 %v10015_v2, %v11157_v50  ;;  %9568 = vmatprep.subr.mxu0 %v12058_v13  ;;  %v5988_v24 = vpop.permute.xlu1 %5987 }
 0xb14   : > { %v5986_v4 = vpop.permute.xlu0 %5985 }
 0xb15   : > { %9561 = vmatmul.mubr.msk.f32.vlgmr.msra.gmra.mrb[56].mxu0 %vm1505_vm4, %v5388_v17 }
 0xb16   : > { %v10017_v5 = vpop.eup %10016  ;;  %9569 = vmatpush3.msk.msra.mxu0 %vm1509_vm2, %v10983_v59  ;;  %9570 = vmatprep.mubr.msk.f32.mxu0 %vm10127_vm0, %v12058_v13 }
 0xb17   : > { %v10019_v45 = vpop.eup %10018  ;;  %v5390_v63 = vmul.f32 %v10017_v5, %v11161_v23  ;;  %9578 = vmatprep.subr.mxu0 %v12058_v13  ;;  %v6263_v23 = vrot.slane %v10114_v18, %v6262_v7  ;;  %v5990_v51 = vpop.permute.xlu1 %5989 }
 0xb18   : > { %v5389_v8 = vmul.f32 %v10019_v45, %v11163_v19  ;;  %v6269_v19 = vsub.s32 2, %v10284_v61  ;;  %v5994_v52 = vpop.permute.xlu0 %5993 }
 0xb19   : > { %9571 = vmatmul.mubr.msk.f32.vlgmr.msra.gmra.mrb[58].mxu0 %vm1505_vm4, %v5390_v63 }
 0xb1a   : > { %v10021_v3 = vpop.eup %10020  ;;  %9566 = vmatmul.mubr.msk.f32.vlgmr.msra.gmra.mrb[70].mxu1 %vm1505_vm4, %v5389_v8  ;;  %9579 = vmatpush3.msk.msra.mxu0 %vm1509_vm2, %v11042_v15  ;;  %v9744_v15 = vld [vmem:[%s12023_s5] sm:$0xff]   ;;  %v6270_v1 = vrot.slane %v10114_v18, %v6269_v19  ;;  %v12068_v19 = vld [vmem:[#allocation17_spill] sm:$0xff] }
 0xb1b   : > { %v10023_v44 = vpop.eup %10022  ;;  %v5392_v59 = vmul.f32 %v10021_v3, %v11169_v33  ;;  %9574 = vmatpush3.msk.msra.mxu1 %vm1509_vm2, %v11034_v20  ;;  %9575 = vmatprep.mubr.msk.f32.mxu1 %vm10127_vm0, %v12058_v13  ;;  %v9745_v20 = vld [vmem:[%s12023_s5 + $0x8] sm:$0xff]   ;;  %v6256_v33 = vrot.slane %v10114_v18, %v10457_v25  ;;  %v5992_v49 = vpop.permute.xlu1 %5991 }
 0xb1c   : > { %v5391_v26 = vmul.f32 %v10023_v44, %v11171_v40  ;;  %9580 = vmatprep.mubr.msk.f32.mxu0 %vm10127_vm0, %v12058_v13  ;;  %9583 = vmatprep.subr.bf16.mxu1 %v9744_v15  ;;  %v6276_v40 = vsub.s32 3, %v10284_v61  ;;  %v5998_v2 = vpop.permute.xlu0 %5997  ;;  %v6074_v61 = vsel %vm821_vm1, %v10673_v43, %v5988_v24 }
 0xb1d   : > { %9581 = vmatmul.mubr.msk.f32.vlgmr.msra.gmra.mrb[60].mxu0 %vm1505_vm4, %v5392_v59 }
 0xb1e   : > { %9576 = vmatmul.mubr.msk.f32.vlgmr.msra.gmra.mrb[72].mxu1 %vm1505_vm4, %v5391_v26  ;;  %6718 = vmatprep.mubr.bf16.mxu0 %v12064_v0  ;;  %v6277_v60 = vrot.slane %v10114_v18, %v6276_v40 }
 0xb1f   : > { %9584 = vmatpush3.bf16.msra.mxu1 %v9744_v15  ;;  %v5996_v58 = vpop.permute.xlu1 %5995 }
 0xb20   : > { %9585 = vmatprep.subr.bf16.mxu1 %v9745_v20  ;;  %v6018_v5 = vpop.permute.xlu0 %6017 }
 0xb23   : > { %9586 = vmatpush3.bf16.msra.mxu1 %v9745_v20  ;;  %v6000_v17 = vpop.permute.xlu1 %5999  ;;  %v6073_v20 = vsel %vm821_vm1, %v10671_v48, %v5986_v4 }
 0xb24   : > { %9587 = vmatprep.subr.bf16.mxu1 %v9746_v37  ;;  %v6022_v63 = vpop.permute.xlu0 %6021 }
 0xb27   : > { %9588 = vmatpush3.bf16.msra.mxu1 %v9746_v37  ;;  %v6020_v45 = vpop.permute.xlu1 %6019  ;;  %v6082_v37 = vsel %vm6081_vm5, %v6073_v20, %v6018_v5 }
 0xb28   : > { %9589 = vmatprep.subr.bf16.mxu1 %v9747_v41  ;;  %v6026_v3 = vpop.permute.xlu0 %6025 }
 0xb2b   : > { %9590 = vmatpush3.bf16.msra.mxu1 %v9747_v41  ;;  %v6024_v8 = vpop.permute.xlu1 %6023 }
 0xb2c   : > { %9591 = vmatprep.subr.bf16.mxu1 %v9748_v62  ;;  %v6030_v59 = vpop.permute.xlu0 %6029 }
 0xb2f   : > { %9592 = vmatpush3.bf16.msra.mxu1 %v9748_v62  ;;  %v6028_v44 = vpop.permute.xlu1 %6027 }
 0xb30   : > { %9593 = vmatprep.subr.bf16.mxu1 %v9749_v21 }
 0xb33   : > { %9594 = vmatpush3.bf16.msra.mxu1 %v9749_v21  ;;  %v6032_v26 = vpop.permute.xlu1 %6031  ;;  %v6075_v21 = vsel %vm821_vm1, %v10675_v29, %v5990_v51 }
 0xb34   : > { %9595 = vmatprep.subr.bf16.mxu1 %v9750_v6 }
 0xb37   : > { %9596 = vmatpush3.bf16.msra.mxu1 %v9750_v6  ;;  %v12065_v6 = vld [vmem:[#allocation13_spill] sm:$0xff] }
 0xb38   : > { %9597 = vmatprep.subr.bf16.mxu1 %v9751_v36  ;;  %v6076_v43 = vsel %vm821_vm1, %v12065_v6, %v5992_v49  ;;  %v12073_v6 = vld [vmem:[#allocation8_spill] sm:$0xff] }
 0xb39   : > { %v6085_v48 = vsel %vm6081_vm5, %v6076_v43, %v6024_v8 }
 0xb3b   : > { %9598 = vmatpush3.bf16.msra.mxu1 %v9751_v36 }
 0xb3c   : > { %9603 = vmatprep.subr.bf16.mxu1 %v12058_v13 }
 0xbb3   : > { %v5462_v35 = vpop.f32.mrb[66].mxu1 }
 0xbb4   : > { %6049 = vrot.lane.b32.xlu0 %v5462_v35, %s10130_s24  ;;  %v9547_v38 = vpop.f32.mrb[67].mxu1  ;;  %v6083_v35 = vsel %vm6081_vm5, %v6074_v61, %v6020_v45 }
 0xbb7   : > { %v5608_v30 = vpop.f32.mrb[68].mxu1 }
 0xbb8   : > { %6053 = vrot.lane.b32.xlu0 %v5608_v30, %s10130_s24  ;;  %v9557_v46 = vpop.f32.mrb[69].mxu1 }
 0xbe4   : > { %v5535_v10 = vpop.f32.mrb[54].mxu0 }
 0xbe5   : > { %v9552_v28 = vpop.f32.mrb[55].mxu0  ;;  %6051 = vrot.lane.b32.xlu1 %v5535_v10, %s10130_s24  ;;  %v6084_v10 = vsel %vm6081_vm5, %v6075_v21, %v6022_v63 }
 0xbe8   : > { %v5681_v14 = vpop.f32.mrb[56].mxu0 }
 0xbe9   : > { %6055 = vrot.lane.b32.xlu1 %v5681_v14, %s10130_s24  ;;  %v9562_v31 = vpop.f32.mrb[57].mxu0 }
 0xbec   : > { %v5827_v54 = vpop.f32.mrb[58].mxu0 }
 0xbed   : > { %v5754_v32 = vpop.f32.mrb[70].mxu1  ;;  %6059 = vrot.lane.b32.xlu1 %v5827_v54, %s10130_s24  ;;  %v9572_v55 = vpop.f32.mrb[59].mxu0  ;;  %v12066_v54 = vld [vmem:[#allocation15_spill] sm:$0xff] }
 0xbee   : > { %6057 = vrot.lane.b32.xlu0 %v5754_v32, %s10130_s24  ;;  %v9567_v27 = vpop.f32.mrb[71].mxu1  ;;  %v6078_v32 = vsel %vm821_vm1, %v12066_v54, %v5996_v58  ;;  %v12067_v55 = vld [vmem:[#allocation14_spill] sm:$0xff] }
 0xbef   : > { %v6077_v7 = vsel %vm821_vm1, %v12067_v55, %v5994_v52  ;;  %v6087_v29 = vsel %vm6081_vm5, %v6078_v32, %v6028_v44 }
 0xbf0   : > { %v5973_v56 = vpop.f32.mrb[60].mxu0 }
 0xbf1   : > { %v5900_v39 = vpop.f32.mrb[72].mxu1  ;;  %6063 = vrot.lane.b32.xlu1 %v5973_v56, %s10130_s24  ;;  %v9582_v50 = vpop.f32.mrb[61].mxu0 }
 0xbf2   : > { %6061 = vrot.lane.b32.xlu0 %v5900_v39, %s10130_s24  ;;  %v9577_v47 = vpop.f32.mrb[73].mxu1  ;;  %v6086_v39 = vsel %vm6081_vm5, %v6077_v7, %v6026_v3 }
 0xbf3   : > { %v6080_v47 = vsel %vm821_vm1, %v12068_v19, %v6000_v17  ;;  %v12077_v19 = vld [vmem:[#allocation5_spill] sm:$0xff] }
 0xbf5   : > { %6265 = vbcast.lane.b32.xlu1 %v6263_v23, 256 }
 0xbf9   : > { %6272 = vbcast.lane.b32.xlu1 %v6270_v1, 256 }
 0xbfd   : > { %6258 = vbcast.lane.b32.xlu1 %v6256_v33, 256  ;;  %v12069_v33 = vld [vmem:[#allocation16_spill] sm:$0xff] }
 0xbfe   : > { %v6079_v40 = vsel %vm821_vm1, %v12069_v33, %v5998_v2 }
 0xc01   : > { %6279 = vbcast.lane.b32.xlu1 %v6277_v60, 256  ;;  %v6089_v60 = vsel %vm6081_vm5, %v6080_v47, %v6032_v26  ;;  %v12070_v26 = vld [vmem:[#allocation6_spill] sm:$0xff] }
 0xc05   : > { %6286 = vbcast.lane.b32.xlu1 %v6284_v53, 256  ;;  %v6088_v53 = vsel %vm6081_vm5, %v6079_v40, %v6030_v59 }
 0xc09   : > { %6293 = vbcast.lane.b32.xlu1 %v6291_v57, 256 }
 0xc0d   : > { %6300 = vbcast.lane.b32.xlu1 %v6298_v16, 256 }
 0xc11   : > { %6251 = vadd.xlane.f32.xlu0 %v6250_v34 }
 0xc26   : > { %v6050_v15 = vpop.permute.xlu0 %6049 }
 0xc27   : > { %6307 = vbcast.lane.b32.xlu0 %v6305_v12, 256  ;;  %v6091_v38 = vsel %vm6090_vm6, %v6082_v37, %v6050_v15  ;;  %v12071_v37 = vld [vmem:[#allocation2_spill] sm:$0xff] }
 0xc2a   : > { %v6054_v46 = vpop.permute.xlu0 %6053 }
 0xc2b   : > { %v6093_v36 = vsel %vm6090_vm6, %v6084_v10, %v6054_v46 }
 0xc57   : > { %v6052_v41 = vpop.permute.xlu1 %6051 }
 0xc58   : > { %v6092_v30 = vsel %vm6090_vm6, %v6083_v35, %v6052_v41 }
 0xc59   : > { %v6107_v62 = vcombine.low %v6091_v38, %v6092_v30  ;;  %v12072_v30 = vld [vmem:[#allocation7_spill] sm:$0xff] }
 0xc5b   : > { %v6056_v28 = vpop.permute.xlu1 %6055 }
 0xc5c   : > { %v6094_v14 = vsel %vm6090_vm6, %v6085_v48, %v6056_v28  ;;  %v12074_v48 = vld [vmem:[#allocation3_spill] sm:$0xff] }
 0xc5d   : > { %v6108_v31 = vcombine.low %v6093_v36, %v6094_v14 }
 0xc5f   : > { %v6060_v27 = vpop.permute.xlu1 %6059  ;;  %v6115_v56 = vpack.c.bf16 %v6108_v31, %v6107_v62  ;;  %v12075_v31 = vld [vmem:[#allocation4_spill] sm:$0xff] }
 0xc60   : > { %v6096_v50 = vsel %vm6090_vm6, %v6087_v29, %v6060_v27  ;;  %v6058_v18 = vpop.permute.xlu0 %6057  ;;  %v12076_v27 = vld [vmem:[#allocation9_spill] sm:$0xff] }
 0xc61   : > { %v6095_v23 = vsel %vm6090_vm6, %v6086_v39, %v6058_v18  ;;  %9599 = vmatprep.mubr.bf16.mxu1 %v6115_v56 }
 0xc62   : > { %v6109_v1 = vcombine.low %v6095_v23, %v6096_v50 }
 0xc63   : > { %v6064_v42 = vpop.permute.xlu1 %6063 }
 0xc64   : > { %v6098_v9 = vsel %vm6090_vm6, %v6089_v60, %v6064_v42  ;;  %v6062_v57 = vpop.permute.xlu0 %6061 }
 0xc65   : > { %v6097_v22 = vsel %vm6090_vm6, %v6088_v53, %v6062_v57 }
 0xc66   : > { %v6110_v16 = vcombine.low %v6097_v22, %v6098_v9 }
 0xc67   : > { %v6266_v11 = vpop.permute.xlu1 %6265 }
 0xc68   : > { %v6116_v34 = vpack.c.bf16 %v6110_v16, %v6109_v1 }
 0xc6a   : > { %9600 = vmatmul.mubr.bf16.vlgmr.msra.gmra.mrb[76].mxu1 %v6116_v34 }
 0xc6b   : > { %9619 = vmatprep.mubr.msk.bf16.mxu1 %vm10127_vm0, %v12058_v13  ;;  %v6273_v24 = vpop.permute.xlu1 %6272 }
 0xc6f   : > { %v6259_v12 = vpop.permute.xlu1 %6258 }
 0xc73   : > { %v6280_v51 = vpop.permute.xlu1 %6279 }
 0xc77   : > { %v6287_v49 = vpop.permute.xlu1 %6286 }
 0xc7b   : > { %v6294_v45 = vpop.permute.xlu1 %6293 }
 0xc7f   : > { %v6301_v38 = vpop.permute.xlu1 %6300 }
 0xc9e   : > { %v6252_v4 = vpop.xlane.xlu0 %6251 }
 0xc9f   : > { %v6373_v52 = vadd.f32 1e-10, %v6252_v4 }
 0xca1   : > { %v6380_v58 = vrot.slane %v6373_v52, 6  ;;  %v6375_v2 = vrot.slane %v6373_v52, 1  ;;  %v6376_v17 = vrot.slane %v6373_v52, 2  ;;  %10024 = vrcp.f32 %v6373_v52 }
 0xca2   : > { %v6377_v5 = vrot.slane %v6373_v52, 3  ;;  %v6378_v63 = vrot.slane %v6373_v52, 4  ;;  %v6379_v8 = vrot.slane %v6373_v52, 5  ;;  %v6381_v3 = vrot.slane %v6373_v52, 7  ;;  %v6308_v52 = vpop.permute.xlu0 %6307 }
 0xca3   : > { %10026 = vrcp.f32 %v6380_v58 }
 0xca4   : > { %10028 = vrcp.f32 %v6375_v2 }
 0xca5   : > { %10030 = vrcp.f32 %v6376_v17 }
 0xca6   : > { %10032 = vrcp.f32 %v6377_v5 }
 0xca7   : > { %10034 = vrcp.f32 %v6378_v63 }
 0xca8   : > { %10036 = vrcp.f32 %v6379_v8 }
 0xca9   : > { %10038 = vrcp.f32 %v6381_v3 }
 0xcab   : > { %v11351_v32 = vpop.eup %10024 }
 0xcad   : > { %v11359_v39 = vpop.eup %10026 }
 0xcae   : > { %v10029_v1 = vpop.eup %10028 }
 0xcaf   : > { %v10031_v53 = vpop.eup %10030 }
 0xcb0   : > { %v10033_v34 = vpop.eup %10032 }
 0xcb1   : > { %v10035_v58 = vpop.eup %10034 }
 0xd3d   : > { %v9601_v44 = vpop.f32.mrb[76].mxu1 }
 0xd3e   : > { %v6236_v59 = vcombine.high %v9601_v44, %v9601_v44  ;;  %v11332_v15 = vadd.f32 %v9601_v44, %v12070_v26  ;;  %v6215_v61 = vpop.f32.mrb[77].mxu1 }
 0xd3f   : > { %v6234_v20 = vcombine.high %v6215_v61, %v6215_v61  ;;  %v11335_v35 = vadd.f32 %v6215_v61, %v12071_v37  ;;  %v9602_v41 = vpop.f32.mrb[78].mxu1 }
 0xd40   : > { %v11338_v46 = vadd.f32 %v6236_v59, %v12072_v30  ;;  %v6313_v62 = vmul.f32 %v6287_v49, %v11332_v15  ;;  %v6237_v21 = vcombine.high %v9602_v41, %v9602_v41  ;;  %v11342_v43 = vadd.f32 %v9602_v41, %v12073_v6  ;;  %v6218_v10 = vpop.f32.mrb[79].mxu1 }
 0xd41   : > { %v11345_v28 = vadd.f32 %v6234_v20, %v12074_v48  ;;  %v6309_v36 = vmul.f32 %v6259_v12, %v11335_v35  ;;  %v6235_v14 = vcombine.high %v6218_v10, %v6218_v10  ;;  %v11349_v54 = vadd.f32 %v6218_v10, %v12075_v31 }
 0xd42   : > { %v6314_v55 = vmul.f32 %v6294_v45, %v11338_v46  ;;  %v6345_v7 = vsel %vm1509_vm2, %v6313_v62, 0.0  ;;  %v6315_v29 = vmul.f32 %v6301_v38, %v11342_v43  ;;  %v11357_v56 = vadd.f32 %v6237_v21, %v12076_v27  ;;  %v10037_v45 = vpop.eup %10036 }
 0xd43   : > { %v6346_v50 = vrot.slane %v6345_v7, 4  ;;  %v6310_v18 = vmul.f32 %v6266_v11, %v11345_v28  ;;  %v6317_v23 = vsel %vm1509_vm2, %v6309_v36, 0.0  ;;  %v11364_v47 = vadd.f32 %v6235_v14, %v12077_v19  ;;  %v10039_v59 = vpop.eup %10038 }
 0xd44   : > { %v6352_v33 = vsel %vm1509_vm2, %v6314_v55, 0.0  ;;  %v6318_v40 = vrot.slane %v6317_v23, 4  ;;  %v6311_v60 = vmul.f32 %v6273_v24, %v11349_v54  ;;  %v6359_v42 = vsel %vm1509_vm2, %v6315_v29, 0.0 }
 0xd45   : > { %v6347_v9 = vadd.f32 %v6346_v50, %v6345_v7  ;;  %v6353_v57 = vrot.slane %v6352_v33, 4  ;;  %v6324_v22 = vsel %vm1509_vm2, %v6310_v18, 0.0  ;;  %v6312_v16 = vmul.f32 %v6280_v51, %v11364_v47 }
 0xd46   : > { %v6319_v11 = vadd.f32 %v6318_v40, %v6317_v23  ;;  %v6325_v12 = vrot.slane %v6324_v22, 4  ;;  %v6331_v4 = vsel %vm1509_vm2, %v6311_v60, 0.0  ;;  %v6360_v49 = vrot.slane %v6359_v42, 4 }
 0xd47   : > { %v6348_v2 = vrot.slane %v6347_v9, 2  ;;  %v6354_v17 = vadd.f32 %v6353_v57, %v6352_v33  ;;  %v6332_v24 = vrot.slane %v6331_v4, 4  ;;  %v6338_v5 = vsel %vm1509_vm2, %v6312_v16, 0.0 }
 0xd48   : > { %v6320_v63 = vrot.slane %v6319_v11, 2  ;;  %v6326_v8 = vadd.f32 %v6325_v12, %v6324_v22  ;;  %v6339_v3 = vrot.slane %v6338_v5, 4  ;;  %v6361_v44 = vadd.f32 %v6360_v49, %v6359_v42 }
 0xd49   : > { %v6349_v51 = vadd.f32 %v6348_v2, %v6347_v9  ;;  %v6355_v26 = vrot.slane %v6354_v17, 2  ;;  %v6333_v61 = vadd.f32 %v6332_v24, %v6331_v4  ;;  %v6316_v20 = vmul.f32 %v6308_v52, %v11357_v56 }
 0xd4a   : > { %v6321_v37 = vadd.f32 %v6320_v63, %v6319_v11  ;;  %v6327_v41 = vrot.slane %v6326_v8, 2  ;;  %v6340_v38 = vadd.f32 %v6339_v3, %v6338_v5  ;;  %v6362_v30 = vrot.slane %v6361_v44, 2 }
 0xd4b   : > { %v6350_v62 = vrot.slane %v6349_v51, 1  ;;  %v6356_v21 = vadd.f32 %v6355_v26, %v6354_v17  ;;  %v6334_v6 = vrot.slane %v6333_v61, 2  ;;  %v6366_v10 = vsel %vm1509_vm2, %v6316_v20, 0.0 }
 0xd4c   : > { %v6322_v48 = vrot.slane %v6321_v37, 1  ;;  %v6328_v36 = vadd.f32 %v6327_v41, %v6326_v8  ;;  %v6341_v14 = vrot.slane %v6340_v38, 2  ;;  %v6363_v31 = vadd.f32 %v6362_v30, %v6361_v44 }
 0xd4d   : > { %v6351_v55 = vadd.f32 %v6350_v62, %v6349_v51  ;;  %v6357_v7 = vrot.slane %v6356_v21, 1  ;;  %v6335_v29 = vadd.f32 %v6334_v6, %v6333_v61  ;;  %v6367_v27 = vrot.slane %v6366_v10, 4 }
 0xd4e   : > { %v6323_v50 = vadd.f32 %v6322_v48, %v6321_v37  ;;  %v6329_v18 = vrot.slane %v6328_v36, 1  ;;  %v6342_v23 = vadd.f32 %v6341_v14, %v6340_v38  ;;  %v6364_v19 = vrot.slane %v6363_v31, 1  ;;  %v9754_v14 = vld [vmem:[%s12024_s6 + $0x4] ss:$12 sps:$4 sm:$0xff]  }
 0xd4f   : > { %v6358_v33 = vadd.f32 %v6357_v7, %v6356_v21  ;;  %v6336_v40 = vrot.slane %v6335_v29, 1  ;;  %v6368_v60 = vadd.f32 %v6367_v27, %v6366_v10  ;;  %v11375_v11 = vmul.f32 %v10035_v58, %v6351_v55  ;;  %v9758_v55 = vld [vmem:[%s12024_s6 + $0x1c] ss:$12 sps:$4 sm:$0xff]   ;;  %6686 = vmatprep.subr.bf16.mxu0 %v9754_v14  ;;  %v9759_v7 = vld [vmem:[%s12024_s6 + $0x20] ss:$12 sps:$4 sm:$0xff]  }
 0xd50   : > { %v6330_v42 = vadd.f32 %v6329_v18, %v6328_v36  ;;  %v6343_v9 = vrot.slane %v6342_v23, 1  ;;  %v6365_v57 = vadd.f32 %v6364_v19, %v6363_v31  ;;  %v11378_v4 = vmul.f32 %v11351_v32, %v6323_v50  ;;  %v9752_v36 = vld [vmem:[%s12024_s6] ss:$12 sps:$4 sm:$0xff]   ;;  %v9755_v31 = vld [vmem:[%s12024_s6 + $0x8] ss:$12 sps:$4 sm:$0xff]  }
 0xd51   : > { %v6337_v22 = vadd.f32 %v6336_v40, %v6335_v29  ;;  %v6369_v16 = vrot.slane %v6368_v60, 2  ;;  %v11382_v52 = vmul.f32 %v10037_v45, %v6358_v33  ;;  %9604 = vmatpush3.bf16.msra.mxu1 %v9755_v31  ;;  %6687 = vmatpush1.bf16.msra.mxu0 %v9752_v36  ;;  %v9756_v29 = vld [vmem:[%s12024_s6 + $0x18] ss:$12 sps:$4 sm:$0xff]   ;;  %v9762_v27 = vld [vmem:[%s12024_s6 + $0x34] ss:$12 sps:$4 sm:$0xff]  }
 0xd52   : > { %v6344_v12 = vadd.f32 %v6343_v9, %v6342_v23  ;;  %v11380_v49 = vmul.f32 %v10029_v1, %v6330_v42  ;;  %v11387_v17 = vmul.f32 %v11359_v39, %v6365_v57  ;;  %v6411_v1 = vmul.f32 %v11375_v11, %v11375_v11  ;;  %9605 = vmatprep.subr.bf16.mxu1 %v12058_v13  ;;  %v9763_v50 = vld [vmem:[%s12024_s6 + $0x38] ss:$12 sps:$4 sm:$0xff]   ;;  %v9760_v18 = vld [vmem:[%s12024_s6 + $0x30] ss:$12 sps:$4 sm:$0xff]   ;;  %v9764_v33 = vld [vmem:[%s12024_s6 + $0x48] ss:$12 sps:$4 sm:$0xff]  }
 0xd53   : > { %v11384_v2 = vmul.f32 %v10031_v53, %v6337_v22  ;;  %v6370_v24 = vadd.f32 %v6369_v16, %v6368_v60  ;;  %v6407_v53 = vmul.f32 %v11378_v4, %v11378_v4  ;;  %6688 = vmatprep.subr.bf16.mxu0 %v9758_v55  ;;  %v9766_v23 = vld [vmem:[%s12024_s6 + $0x4c] ss:$12 sps:$4 sm:$0xff]   ;;  %v9767_v19 = vld [vmem:[%s12024_s6 + $0x50] ss:$12 sps:$4 sm:$0xff]   ;;  %v9771_v60 = vld [vmem:[%s12024_s6 + $0x68] ss:$12 sps:$4 sm:$0xff]  }
 0xd54   : > { %v11389_v5 = vmul.f32 %v10033_v34, %v6344_v12  ;;  %v6408_v58 = vmul.f32 %v11380_v49, %v11380_v49  ;;  %v6412_v34 = vmul.f32 %v11382_v52, %v11382_v52  ;;  %v6413_v44 = vmul.f32 %v11387_v17, %v11387_v17  ;;  %v9770_v40 = vld [vmem:[%s12024_s6 + $0x64] ss:$12 sps:$4 sm:$0xff]   ;;  %v9768_v42 = vld [vmem:[%s12024_s6 + $0x60] ss:$12 sps:$4 sm:$0xff]   ;;  %v9774_v9 = vld [vmem:[%s12024_s6 + $0x7c] ss:$12 sps:$4 sm:$0xff]  }
 0xd55   : > { %v6409_v32 = vmul.f32 %v11384_v2, %v11384_v2  ;;  %v6371_v63 = vrot.slane %v6370_v24, 1  ;;  %v6432_v37 = vrot.slane %v6411_v1, 4  ;;  %9606 = vmatpush3.bf16.msra.mxu1 %v9759_v7  ;;  %6689 = vmatpush1.bf16.msra.mxu0 %v9756_v29  ;;  %v9775_v57 = vld [vmem:[%s12024_s6 + $0x80] ss:$12 sps:$4 sm:$0xff]   ;;  %v9772_v22 = vld [vmem:[%s12024_s6 + $0x78] ss:$12 sps:$4 sm:$0xff]  }
 0xd56   : > { %v6410_v39 = vmul.f32 %v11389_v5, %v11389_v5  ;;  %v6423_v45 = vrot.slane %v6408_v58, 7  ;;  %v6435_v38 = vrot.slane %v6412_v34, 3  ;;  %v6438_v21 = vrot.slane %v6413_v44, 2  ;;  %9607 = vmatprep.subr.bf16.mxu1 %v12058_v13  ;;  %6690 = vmatprep.subr.bf16.mxu0 %v9762_v27  ;;  %v9778_v16 = vld [vmem:[%s12024_s6 + $0x94] ss:$12 sps:$4 sm:$0xff]  }
 0xd57   : > { %v6426_v8 = vrot.slane %v6409_v32, 6  ;;  %v6372_v3 = vadd.f32 %v6371_v63, %v6370_v24  ;;  %v9779_v12 = vld [vmem:[%s12024_s6 + $0x98] ss:$12 sps:$4 sm:$0xff]   ;;  %v9776_v24 = vld [vmem:[%s12024_s6 + $0x90] ss:$12 sps:$4 sm:$0xff]  }
 0xd58   : > { %v6425_v51 = vsel %vm6424_vm7, %v6423_v45, %v6407_v53  ;;  %v6429_v26 = vrot.slane %v6410_v39, 5  ;;  %v9782_v58 = vld [vmem:[%s12024_s6 + $0xac] ss:$12 sps:$4 sm:$0xff]   ;;  %v9783_v32 = vld [vmem:[%s12024_s6 + $0xb0] ss:$12 sps:$4 sm:$0xff]  }
 0xd59   : > { %v11406_v61 = vmul.f32 %v10039_v59, %v6372_v3  ;;  %v6428_v20 = vsel %vm6427_vm8, %v6426_v8, %v6425_v51  ;;  %9608 = vmatpush3.bf16.msra.mxu1 %v9763_v50  ;;  %6691 = vmatpush1.bf16.msra.mxu0 %v9760_v18  ;;  %v9780_v63 = vld [vmem:[%s12024_s6 + $0xa8] ss:$12 sps:$4 sm:$0xff]   ;;  %v8918_v45 = vld [vmem:[%s12021_s3 + $0x1] ss:$0 sm:$0xff] }
 0xd5a   : > { %v6431_v41 = vsel %vm6430_vm9, %v6429_v26, %v6428_v20  ;;  %9609 = vmatprep.subr.bf16.mxu1 %v12058_v13  ;;  %6692 = vmatprep.subr.bf16.mxu0 %v9766_v23 }
 0xd5b   : > { %v6414_v30 = vmul.f32 %v11406_v61, %v11406_v61  ;;  %v6434_v62 = vsel %vm6433_vm10, %v6432_v37, %v6431_v41 }
 0xd5c   : > { %v6437_v6 = vsel %vm6436_vm11, %v6435_v38, %v6434_v62 }
 0xd5d   : > { %v6440_v59 = vsel %vm6439_vm12, %v6438_v21, %v6437_v6  ;;  %v6441_v10 = vrot.slane %v6414_v30, 1  ;;  %9610 = vmatpush3.bf16.msra.mxu1 %v9767_v19  ;;  %6693 = vmatpush1.bf16.msra.mxu0 %v9764_v33 }
 0xd5e   : > { %9611 = vmatprep.subr.bf16.mxu1 %v12058_v13  ;;  %6694 = vmatprep.subr.bf16.mxu0 %v9770_v40 }
 0xd5f   : > { %v6443_v48 = vsel %vm6442_vm13, %v6441_v10, %v6440_v59 }
 0xd60   : > { %6445 = vadd.xlane.f32.xlu1 %v6443_v48 }
 0xd61   : > { %9612 = vmatpush3.bf16.msra.mxu1 %v9771_v60  ;;  %6695 = vmatpush1.bf16.msra.mxu0 %v9768_v42 }
 0xd62   : > { %9613 = vmatprep.subr.bf16.mxu1 %v12058_v13  ;;  %6696 = vmatprep.subr.bf16.mxu0 %v9774_v9 }
 0xd65   : > { %9614 = vmatpush3.bf16.msra.mxu1 %v9775_v57  ;;  %6697 = vmatpush1.bf16.msra.mxu0 %v9772_v22 }
 0xd66   : > { %9615 = vmatprep.subr.bf16.mxu1 %v12058_v13  ;;  %6698 = vmatprep.subr.bf16.mxu0 %v9778_v16 }
 0xd69   : > { %9616 = vmatpush3.bf16.msra.mxu1 %v9779_v12  ;;  %6699 = vmatpush1.bf16.msra.mxu0 %v9776_v24 }
 0xd6a   : > { %9617 = vmatprep.subr.bf16.mxu1 %v12058_v13  ;;  %6700 = vmatprep.subr.bf16.mxu0 %v9782_v58 }
 0xd6d   : > { %9618 = vmatpush3.bf16.msra.mxu1 %v9783_v32  ;;  %6701 = vmatpush1.bf16.msra.mxu0 %v9780_v63 }
 0xd6e   : > { %9663 = vmatprep.subr.bf16.mxu1 %v12058_v13  ;;  %9623 = vmatprep.subr.mxu0 %v12058_v13 }
 0xded   : > { %v6446_v1 = vpop.xlane.xlu1 %6445 }
 0xdee   : > { %v6447_v53 = vmul.f32 0.0078125, %v6446_v1 }
 0xdf0   : > { %v6448_v39 = vadd.f32 1e-05, %v6447_v53 }
 0xdf2   : > { %10040 = vrsqrt.f32 %v6448_v39 }
 0xdfc   : > { %v10041_v34 = vpop.eup %10040 }
 0xdfd   : > { %v6451_v8 = vrot.slane %v10041_v34, 1  ;;  %v6452_v3 = vrot.slane %v10041_v34, 2  ;;  %v6453_v44 = vrot.slane %v10041_v34, 3  ;;  %v6454_v51 = vrot.slane %v10041_v34, 4 }
 0xdfe   : > { %v6455_v26 = vrot.slane %v10041_v34, 5  ;;  %v6456_v20 = vrot.slane %v10041_v34, 6  ;;  %v6457_v37 = vrot.slane %v10041_v34, 7  ;;  %v6466_v41 = vmul.f32 %v10041_v34, %v11378_v4 }
 0xdff   : > { %v6467_v38 = vmul.f32 %v6451_v8, %v11380_v49  ;;  %v6468_v30 = vmul.f32 %v6452_v3, %v11384_v2  ;;  %v6469_v62 = vmul.f32 %v6453_v44, %v11389_v5  ;;  %v6470_v21 = vmul.f32 %v6454_v51, %v11375_v11 }
 0xe00   : > { %v6471_v6 = vmul.f32 %v6455_v26, %v11382_v52  ;;  %v6472_v59 = vmul.f32 %v6456_v20, %v11387_v17  ;;  %v6473_v10 = vmul.f32 %v6457_v37, %v11406_v61  ;;  %v6478_v48 = vmul.f32 %v8918_v45, %v6466_v41 }
 0xe01   : > { %v6479_v36 = vmul.f32 %v8918_v45, %v6467_v38  ;;  %v6480_v14 = vmul.f32 %v8918_v45, %v6468_v30  ;;  %v6481_v31 = vmul.f32 %v8918_v45, %v6469_v62  ;;  %v6482_v55 = vmul.f32 %v8918_v45, %v6470_v21  ;;  %v11538_v30 = vld [vmem:[%s385_s22] ss:$0 sm:$0xff] }
 0xe02   : > { %v6483_v4 = vmul.f32 %v8918_v45, %v6471_v6  ;;  %v6484_v7 = vmul.f32 %v8918_v45, %v6472_v59  ;;  %v6485_v49 = vmul.f32 %v8918_v45, %v6473_v10  ;;  %v6486_v29 = vpack.c.bf16 %v6478_v48, %v6478_v48 }
 0xe03   : > { %v6487_v2 = vpack.c.bf16 %v6479_v36, %v6479_v36  ;;  %v6488_v27 = vpack.c.bf16 %v6480_v14, %v6480_v14  ;;  %v6489_v5 = vpack.c.bf16 %v6481_v31, %v6481_v31  ;;  %v6490_v50 = vpack.c.bf16 %v6482_v55, %v6482_v55 }
 0xe04   : > { %v6491_v11 = vpack.c.bf16 %v6483_v4, %v6483_v4  ;;  %v6492_v18 = vpack.c.bf16 %v6484_v7, %v6484_v7  ;;  %v6493_v52 = vpack.c.bf16 %v6485_v49, %v6485_v49  ;;  %v6534_v33 = vunpack.c.l.b16 %v6486_v29 }
 0xe05   : > { %v6535_v23 = vunpack.c.l.b16 %v6487_v2  ;;  %v6536_v17 = vunpack.c.l.b16 %v6488_v27  ;;  %v6537_v19 = vunpack.c.l.b16 %v6489_v5  ;;  %v6538_v61 = vunpack.c.l.b16 %v6490_v50 }
 0xe06   : > { %v6539_v40 = vunpack.c.l.b16 %v6491_v11  ;;  %v6540_v9 = vunpack.c.l.b16 %v6492_v18  ;;  %v6541_v57 = vunpack.c.l.b16 %v6493_v52 }
 0xe07   : > { %v6542_v60 = vrot.slane %v6535_v23, 7  ;;  %v6544_v42 = vrot.slane %v6536_v17, 6  ;;  %v6546_v16 = vrot.slane %v6537_v19, 5  ;;  %v6548_v24 = vrot.slane %v6538_v61, 4 }
 0xe08   : > { %v6550_v32 = vrot.slane %v6539_v40, 3  ;;  %v6552_v1 = vrot.slane %v6540_v9, 2  ;;  %v6554_v39 = vrot.slane %v6541_v57, 1 }
 0xe09   : > { %v6543_v22 = vsel %vm6424_vm7, %v6542_v60, %v6534_v33 }
 0xe0a   : > { %v6545_v12 = vsel %vm6427_vm8, %v6544_v42, %v6543_v22 }
 0xe0b   : > { %v6547_v58 = vsel %vm6430_vm9, %v6546_v16, %v6545_v12 }
 0xe0c   : > { %v6549_v63 = vsel %vm6433_vm10, %v6548_v24, %v6547_v58 }
 0xe0d   : > { %v6551_v53 = vsel %vm6436_vm11, %v6550_v32, %v6549_v63 }
 0xe0e   : > { %v6553_v34 = vsel %vm6439_vm12, %v6552_v1, %v6551_v53 }
 0xe0f   : > { %v6555_v45 = vsel %vm6442_vm13, %v6554_v39, %v6553_v34 }
 0xe10   : > { %v6556_v8 = vpack.c.b16 %v6555_v45, %v6555_v45 }
 0xe12   : > { %6719 = vmatmul.mubr.bf16.vlgmr.msra.gmra.mrb[64].mxu0 %v6556_v8  ;;  %9620 = vmatmul.mubr.bf16.vlgmr.msra.gmra.mrb[80].mxu1 %v6556_v8 }
 0xe13   : > { %9625 = vmatprep.mubr.msk.f32.mxu0 %vm10127_vm0, %v12058_v13  ;;  %9679 = vmatprep.mubr.msk.bf16.mxu1 %vm10127_vm0, %v12058_v13 }
 0xee5   : > { %v11519_v3 = vpop.f32.mrb[64].mxu0  ;;  %v11521_v44 = vpop.f32.mrb[80].mxu1 }
 0xee6   : > { %v11523_v51 = vpop.f32.mrb[65].mxu0  ;;  %v9621_v26 = vpop.f32.mrb[81].mxu1 }
 0xee7   : > { %v6724_v20 = vpop.f32.mrb[66].mxu0  ;;  %v6764_v37 = vpop.f32.mrb[82].mxu1  ;;  %9624 = vmatpush3.xpose.msk.msra.mxu0 %vm821_vm1, %v11523_v51 }
 0xee8   : > { %v6725_v41 = vpop.f32.mrb[67].mxu0  ;;  %v9622_v38 = vpop.f32.mrb[83].mxu1  ;;  %9628 = vmatprep.subr.mxu0 %v12058_v13 }
 0xeea   : > { %9626 = vmatmul.mubr.msk.f32.vlgmr.msra.gmra.mrb[62].mxu0 %vm821_vm1, %v11519_v3 }
 0xeeb   : > { %9629 = vmatpush3.msra.mxu0 %v11521_v44  ;;  %9630 = vmatprep.mubr.msk.f32.mxu0 %vm10127_vm0, %v12058_v13 }
 0xeec   : > { %9633 = vmatprep.subr.mxu0 %v12058_v13 }
 0xfbd   : > { %v6846_v62 = vpop.f32.mrb[62].mxu0 }
 0xfbe   : > { %v6847_v21 = vadd.f32 %v11538_v30, %v6846_v62  ;;  %v9627_v6 = vpop.f32.mrb[63].mxu0 }
 0xfc0   : > { %v6851_v59 = vsel %vm6850_vm14, %v6847_v21, -inf }
 0xfc1   : > { %6852 = vmax.xlane.f32.xlu0 %v6851_v59 }
 0xfd7   : > { %6935 = vrot.lane.b32.xlu0 %v11519_v3, %s10130_s24 }
0x104e   : > { %v6853_v10 = vpop.xlane.xlu0 %6852 }
0x104f   : > { %v6854_v48 = vsub.f32 %v6847_v21, %v6853_v10 }
0x1051   : > { %v6855_v36 = vmul.f32 1.442695, %v6854_v48 }
0x1052   : > { %v6936_v29 = vpop.permute.xlu0 %6935 }
0x1053   : > { %10042 = vpow2.f32 %v6855_v36 }
0x105d   : > { %v10043_v14 = vpop.eup %10042 }
0x105e   : > { %v6857_v31 = vsel %vm6850_vm14, %v10043_v14, 0.0 }
0x105f   : > { %6858 = vadd.xlane.f32.xlu1 %v6857_v31 }
0x1070   : > { %6937 = vrot.lane.b32.xlu1 %v11523_v51, %s10130_s24 }
0x10ec   : > { %v6859_v55 = vpop.xlane.xlu1 %6858 }
0x10ed   : > { %10044 = vrcp.f32 %v6859_v55 }
0x10f0   : > { %v6938_v49 = vpop.permute.xlu1 %6937 }
0x10f7   : > { %v10045_v4 = vpop.eup %10044 }
0x10f8   : > { %v6861_v7 = vmul.f32 %v10045_v4, %v10043_v14 }
0x10fa   : > { %9631 = vmatmul.mubr.msk.f32.vlgmr.msra.gmra.mrb[68].mxu0 %vm6850_vm14, %v6861_v7  ;;  %v9785_v7 = vld [vmem:[%s12025_s7 + $0x8] sm:$0xff]  }
0x10fb   : > { %9634 = vmatpush3.xpose.msk.msra.mxu0 %vm821_vm1, %v6938_v49  ;;  %9635 = vmatprep.mubr.msk.f32.mxu0 %vm10127_vm0, %v12058_v13  ;;  %v9786_v49 = vld [vmem:[%s12025_s7 + $0x10] sm:$0xff]  }
0x10fc   : > { %9638 = vmatprep.subr.mxu0 %v12058_v13 }
0x10fe   : > { %9636 = vmatmul.mubr.msk.f32.vlgmr.msra.gmra.mrb[70].mxu0 %vm821_vm1, %v6936_v29  ;;  %v9787_v29 = vld [vmem:[%s12025_s7 + $0x18] sm:$0xff]  }
0x10ff   : > { %9640 = vmatprep.mubr.msk.f32.mxu0 %vm10127_vm0, %v12058_v13 }
0x11cd   : > { %v11555_v2 = vpop.f32.mrb[68].mxu0 }
0x11ce   : > { %v9632_v27 = vpop.f32.mrb[69].mxu0 }
0x11cf   : > { %v9788_v27 = vld [vmem:[%s12025_s7 + $0x20] sm:$0xff]  }
0x11d1   : > { %v7009_v5 = vpop.f32.mrb[70].mxu0 }
0x11d2   : > { %v7010_v50 = vadd.f32 %v11538_v30, %v7009_v5  ;;  %v9637_v11 = vpop.f32.mrb[71].mxu0  ;;  %v9789_v5 = vld [vmem:[%s12025_s7 + $0x28] sm:$0xff]  }
0x11d3   : > { %v9791_v11 = vld [vmem:[%s12025_s7 + $0x38] sm:$0xff]  }
0x11d4   : > { %v7013_v18 = vsel %vm6850_vm14, %v7010_v50, -inf }
0x11d5   : > { %7014 = vmax.xlane.f32.xlu1 %v7013_v18 }
0x11e6   : > { %7025 = vrot.lane.b32.xlu1 %v11521_v44, %s10130_s24 }
0x11ea   : > { %7101 = vrot.lane.b32.xlu1 %v11519_v3, %s10128_s18 }
0x1262   : > { %v7015_v52 = vpop.xlane.xlu1 %7014 }
0x1263   : > { %v7016_v23 = vsub.f32 %v7010_v50, %v7015_v52  ;;  %v9790_v50 = vld [vmem:[%s12025_s7 + $0x30] sm:$0xff]  }
0x1265   : > { %v7017_v17 = vmul.f32 1.442695, %v7016_v23 }
0x1266   : > { %v7026_v19 = vpop.permute.xlu1 %7025 }
0x1267   : > { %10046 = vpow2.f32 %v7017_v17  ;;  %9639 = vmatpush3.msra.mxu0 %v7026_v19 }
0x1268   : > { %9643 = vmatprep.subr.mxu0 %v12058_v13 }
0x126a   : > { %v7102_v57 = vpop.permute.xlu1 %7101 }
0x1271   : > { %v10047_v61 = vpop.eup %10046 }
0x1272   : > { %v7019_v33 = vsel %vm6850_vm14, %v10047_v61, 0.0 }
0x1273   : > { %7020 = vadd.xlane.f32.xlu0 %v7019_v33 }
0x1289   : > { %7103 = vrot.lane.b32.xlu0 %v11523_v51, %s10128_s18 }
0x1300   : > { %v7021_v40 = vpop.xlane.xlu0 %7020 }
0x1301   : > { %10048 = vrcp.f32 %v7021_v40 }
0x1304   : > { %v7104_v9 = vpop.permute.xlu0 %7103 }
0x130b   : > { %v10049_v60 = vpop.eup %10048 }
0x130c   : > { %v7023_v42 = vmul.f32 %v10049_v60, %v10047_v61  ;;  %v9792_v60 = vld [vmem:[%s12026_s8] ss:$24 sps:$4 sm:$0xff]  }
0x130e   : > { %9641 = vmatmul.mubr.msk.f32.vlgmr.msra.gmra.mrb[72].mxu0 %vm6850_vm14, %v7023_v42  ;;  %v9794_v42 = vld [vmem:[%s12026_s8 + $0x4] ss:$24 sps:$4 sm:$0xff]  }
0x130f   : > { %9644 = vmatpush3.xpose.msk.msra.mxu0 %vm821_vm1, %v7104_v9  ;;  %9645 = vmatprep.mubr.msk.f32.mxu0 %vm10127_vm0, %v12058_v13  ;;  %v9797_v9 = vld [vmem:[%s12026_s8 + $0xc] ss:$24 sps:$4 sm:$0xff]  }
0x1310   : > { %9648 = vmatprep.subr.mxu0 %v12058_v13 }
0x1312   : > { %9646 = vmatmul.mubr.msk.f32.vlgmr.msra.gmra.mrb[74].mxu0 %vm821_vm1, %v7102_v57  ;;  %v9800_v57 = vld [vmem:[%s12026_s8 + $0x34] ss:$24 sps:$4 sm:$0xff]  }
0x1313   : > { %9650 = vmatprep.mubr.msk.f32.mxu0 %vm10127_vm0, %v12058_v13 }
0x13e1   : > { %v7097_v22 = vpop.f32.mrb[72].mxu0 }
0x13e2   : > { %v9642_v16 = vpop.f32.mrb[73].mxu0 }
0x13e3   : > { %v9798_v16 = vld [vmem:[%s12026_s8 + $0x30] ss:$24 sps:$4 sm:$0xff]  }
0x13e5   : > { %v7175_v12 = vpop.f32.mrb[74].mxu0 }
0x13e6   : > { %v7176_v24 = vadd.f32 %v11538_v30, %v7175_v12  ;;  %v9647_v58 = vpop.f32.mrb[75].mxu0  ;;  %v9801_v12 = vld [vmem:[%s12026_s8 + $0x38] ss:$24 sps:$4 sm:$0xff]  }
0x13e8   : > { %v7179_v32 = vsel %vm6850_vm14, %v7176_v24, -inf }
0x13e9   : > { %7180 = vmax.xlane.f32.xlu1 %v7179_v32  ;;  %v12078_v32 = vld [vmem:[#allocation12_spill] sm:$0xff] }
0x13fa   : > { %7190 = vrot.lane.b32.xlu1 %v11521_v44, %s10128_s18 }
0x13fe   : > { %7266 = vrot.lane.b32.xlu1 %v11519_v3, %s10131_s25 }
0x1476   : > { %v7181_v63 = vpop.xlane.xlu1 %7180 }
0x1477   : > { %v7182_v1 = vsub.f32 %v7176_v24, %v7181_v63 }
0x1479   : > { %v7183_v53 = vmul.f32 1.442695, %v7182_v1 }
0x147a   : > { %v7191_v39 = vpop.permute.xlu1 %7190 }
0x147b   : > { %10050 = vpow2.f32 %v7183_v53  ;;  %9649 = vmatpush3.msra.mxu0 %v7191_v39 }
0x147c   : > { %9653 = vmatprep.subr.mxu0 %v12058_v13 }
0x147e   : > { %v7267_v37 = vpop.permute.xlu1 %7266 }
0x1485   : > { %v10051_v34 = vpop.eup %10050 }
0x1486   : > { %v7185_v45 = vsel %vm6850_vm14, %v10051_v34, 0.0 }
0x1487   : > { %7186 = vadd.xlane.f32.xlu0 %v7185_v45 }
0x149d   : > { %7268 = vrot.lane.b32.xlu0 %v11523_v51, %s10131_s25 }
0x1514   : > { %v7187_v8 = vpop.xlane.xlu0 %7186 }
0x1515   : > { %10052 = vrcp.f32 %v7187_v8 }
0x1518   : > { %v7269_v3 = vpop.permute.xlu0 %7268 }
0x151f   : > { %v10053_v26 = vpop.eup %10052 }
0x1520   : > { %v7189_v20 = vmul.f32 %v10053_v26, %v10051_v34 }
0x1522   : > { %9651 = vmatmul.mubr.msk.f32.vlgmr.msra.gmra.mrb[76].mxu0 %vm6850_vm14, %v7189_v20 }
0x1523   : > { %9654 = vmatpush3.xpose.msk.msra.mxu0 %vm821_vm1, %v7269_v3  ;;  %9655 = vmatprep.mubr.msk.f32.mxu0 %vm10127_vm0, %v12058_v13 }
0x1524   : > { %9658 = vmatprep.subr.mxu0 %v12058_v13 }
0x1526   : > { %9656 = vmatmul.mubr.msk.f32.vlgmr.msra.gmra.mrb[78].mxu0 %vm821_vm1, %v7267_v37 }
0x1527   : > { %9660 = vmatprep.mubr.msk.f32.mxu0 %vm10127_vm0, %v12058_v13 }
0x15f5   : > { %v7262_v51 = vpop.f32.mrb[76].mxu0 }
0x15f6   : > { %v9652_v41 = vpop.f32.mrb[77].mxu0 }
0x15f9   : > { %v7340_v38 = vpop.f32.mrb[78].mxu0 }
0x15fa   : > { %v7341_v62 = vadd.f32 %v11538_v30, %v7340_v38  ;;  %v9657_v21 = vpop.f32.mrb[79].mxu0 }
0x15fc   : > { %v7344_v6 = vsel %vm6850_vm14, %v7341_v62, -inf }
0x15fd   : > { %7345 = vmax.xlane.f32.xlu1 %v7344_v6 }
0x160e   : > { %7355 = vrot.lane.b32.xlu1 %v11521_v44, %s10131_s25  ;;  %v9784_v44 = vld [vmem:[%s12025_s7] sm:$0xff]  }
0x160f   : > { %9664 = vmatpush3.bf16.msra.mxu1 %v9784_v44 }
0x1610   : > { %9665 = vmatprep.subr.bf16.mxu1 %v12058_v13 }
0x1612   : > { %7436 = vrot.lane.b32.xlu1 %v7262_v51, %s10128_s18 }
0x1613   : > { %9666 = vmatpush3.bf16.msra.mxu1 %v9785_v7 }
0x1614   : > { %9667 = vmatprep.subr.bf16.mxu1 %v12058_v13 }
0x1617   : > { %9668 = vmatpush3.bf16.msra.mxu1 %v9786_v49 }
0x1618   : > { %9669 = vmatprep.subr.bf16.mxu1 %v12058_v13 }
0x161b   : > { %9670 = vmatpush3.bf16.msra.mxu1 %v9787_v29 }
0x161c   : > { %9671 = vmatprep.subr.bf16.mxu1 %v12058_v13 }
0x161f   : > { %9672 = vmatpush3.bf16.msra.mxu1 %v9788_v27 }
0x1620   : > { %9673 = vmatprep.subr.bf16.mxu1 %v12058_v13 }
0x1623   : > { %9674 = vmatpush3.bf16.msra.mxu1 %v9789_v5 }
0x1624   : > { %9675 = vmatprep.subr.bf16.mxu1 %v12058_v13 }
0x1627   : > { %9676 = vmatpush3.bf16.msra.mxu1 %v9790_v50 }
0x1628   : > { %9677 = vmatprep.subr.bf16.mxu1 %v12058_v13 }
0x162b   : > { %9678 = vmatpush3.bf16.msra.mxu1 %v9791_v11 }
0x162c   : > { %8144 = vmatprep.subr.bf16.mxu1 %v9797_v9  ;;  %v9824_v9 = vld [vmem:[%s12026_s8 + $0xf4] ss:$24 sps:$4 sm:$0xff]  }
0x168a   : > { %v7346_v59 = vpop.xlane.xlu1 %7345 }
0x168b   : > { %v7347_v10 = vsub.f32 %v7341_v62, %v7346_v59 }
0x168d   : > { %v7348_v48 = vmul.f32 1.442695, %v7347_v10 }
0x168e   : > { %v7356_v36 = vpop.permute.xlu1 %7355 }
0x168f   : > { %10054 = vpow2.f32 %v7348_v48  ;;  %9659 = vmatpush3.msra.mxu0 %v7356_v36 }
0x1690   : > { %8091 = vmatprep.subr.bf16.mxu0 %v9794_v42  ;;  %v9821_v42 = vld [vmem:[%s12026_s8 + $0xcc] ss:$24 sps:$4 sm:$0xff]  }
0x1692   : > { %v7437_v17 = vpop.permute.xlu1 %7436 }
0x1699   : > { %v10055_v14 = vpop.eup %10054 }
0x169a   : > { %v7350_v31 = vsel %vm6850_vm14, %v10055_v14, 0.0 }
0x169b   : > { %7351 = vadd.xlane.f32.xlu0 %v7350_v31 }
0x16b1   : > { %7432 = vrot.lane.b32.xlu0 %v7097_v22, %s10131_s25  ;;  %v9803_v22 = vld [vmem:[%s12026_s8 + $0x3c] ss:$24 sps:$4 sm:$0xff]  }
0x1728   : > { %v7352_v30 = vpop.xlane.xlu0 %7351 }
0x1729   : > { %10056 = vrcp.f32 %v7352_v30 }
0x172c   : > { %v7433_v23 = vpop.permute.xlu0 %7432 }
0x172d   : > { %v7443_v19 = vsel %vm821_vm1, %v11555_v2, %v7433_v23  ;;  %v9795_v2 = vld [vmem:[%s12026_s8 + $0x8] ss:$24 sps:$4 sm:$0xff]   ;;  %v9809_v23 = vld [vmem:[%s12026_s8 + $0x6c] ss:$24 sps:$4 sm:$0xff]  }
0x172e   : > { %v7444_v61 = vsel %vm6081_vm5, %v7443_v19, %v7437_v17  ;;  %v9807_v17 = vld [vmem:[%s12026_s8 + $0x68] ss:$24 sps:$4 sm:$0xff]   ;;  %v9812_v19 = vld [vmem:[%s12026_s8 + $0x94] ss:$24 sps:$4 sm:$0xff]  }
0x1733   : > { %v10057_v55 = vpop.eup %10056 }
0x1734   : > { %v7354_v4 = vmul.f32 %v10057_v55, %v10055_v14 }
0x1736   : > { %9661 = vmatmul.mubr.msk.f32.vlgmr.msra.gmra.mrb[80].mxu0 %vm6850_vm14, %v7354_v4 }
0x1737   : > { %8123 = vmatprep.mubr.bf16.mxu0 %v12064_v0  ;;  %8092 = vmatpush1.bf16.msra.mxu0 %v9792_v60  ;;  %v9816_v60 = vld [vmem:[%s12026_s8 + $0xc0] ss:$24 sps:$4 sm:$0xff]  }
0x1738   : > { %8093 = vmatprep.subr.bf16.mxu0 %v9800_v57  ;;  %v9822_v57 = vld [vmem:[%s12026_s8 + $0xf0] ss:$24 sps:$4 sm:$0xff]  }
0x173b   : > { %8094 = vmatpush1.bf16.msra.mxu0 %v9798_v16  ;;  %v9825_v16 = vld [vmem:[%s12026_s8 + $0xf8] ss:$24 sps:$4 sm:$0xff]  }
0x1809   : > { %v7427_v18 = vpop.f32.mrb[80].mxu0 }
0x180a   : > { %7440 = vrot.lane.b32.xlu1 %v7427_v18, %s10130_s24  ;;  %v9662_v52 = vpop.f32.mrb[81].mxu0 }
0x180b   : > { %v9804_v52 = vld [vmem:[%s12026_s8 + $0x60] ss:$24 sps:$4 sm:$0xff]  }
0x187c   : > { %v7441_v33 = vpop.permute.xlu1 %7440 }
0x187d   : > { %v7445_v40 = vsel %vm6090_vm6, %v7444_v61, %v7441_v33  ;;  %v9810_v61 = vld [vmem:[%s12026_s8 + $0x90] ss:$24 sps:$4 sm:$0xff]   ;;  %v9815_v33 = vld [vmem:[%s12026_s8 + $0x9c] ss:$24 sps:$4 sm:$0xff]  }
0x187e   : > { %v7446_v13 = vpack.c.bf16 %v7445_v40, %v7445_v40  ;;  %v9813_v40 = vld [vmem:[%s12026_s8 + $0x98] ss:$24 sps:$4 sm:$0xff]  }
0x1880   : > { %9680 = vmatmul.mubr.bf16.vlgmr.msra.gmra.mrb[84].mxu1 %v7446_v13  ;;  %v9818_v13 = vld [vmem:[%s12026_s8 + $0xc4] ss:$24 sps:$4 sm:$0xff]  }
0x1881   : > { %8176 = vmatprep.mubr.bf16.mxu1 %v12064_v0  ;;  %8145 = vmatpush1.bf16.msra.mxu1 %v9795_v2  ;;  %v9819_v2 = vld [vmem:[%s12026_s8 + $0xc8] ss:$24 sps:$4 sm:$0xff]  }
0x1882   : > { %8146 = vmatprep.subr.bf16.mxu1 %v9803_v22  ;;  %v9827_v22 = vld [vmem:[%s12026_s8 + $0xfc] ss:$24 sps:$4 sm:$0xff]  }
0x1885   : > { %8147 = vmatpush1.bf16.msra.mxu1 %v9801_v12  ;;  %v9828_v12 = vld [vmem:[%s12026_s8 + $0x120] ss:$24 sps:$4 sm:$0xff]  }
0x1886   : > { %8148 = vmatprep.subr.bf16.mxu1 %v9809_v23 }
0x1889   : > { %8149 = vmatpush1.bf16.msra.mxu1 %v9807_v17 }
0x188a   : > { %8150 = vmatprep.subr.bf16.mxu1 %v9815_v33 }
0x188d   : > { %8151 = vmatpush1.bf16.msra.mxu1 %v9813_v40 }
0x188e   : > { %8152 = vmatprep.subr.bf16.mxu1 %v9821_v42 }
0x1891   : > { %8153 = vmatpush1.bf16.msra.mxu1 %v9819_v2 }
0x1892   : > { %8154 = vmatprep.subr.bf16.mxu1 %v9827_v22  ;;  %v9845_v22 = vld [vmem:[%s12026_s8 + $0x44] ss:$24 sps:$4 sm:$0xff]  }
0x1895   : > { %8155 = vmatpush1.bf16.msra.mxu1 %v9825_v16 }
0x1953   : > { %v7545_v24 = vpop.f32.mrb[84].mxu1 }
0x1954   : > { %v7552_v58 = vcombine.high %v7545_v24, %v7545_v24  ;;  %v7559_v63 = vrot.slane %v7545_v24, %v12078_v32  ;;  %v9681_v1 = vpop.f32.mrb[85].mxu1  ;;  %v9830_v24 = vld [vmem:[%s12026_s8 + $0x124] ss:$24 sps:$4 sm:$0xff]  }
0x1955   : > { %v7548_v53 = vpop.f32.mrb[86].mxu1  ;;  %v9839_v1 = vld [vmem:[%s12026_s8 + $0x15c] ss:$24 sps:$4 sm:$0xff]  }
0x1956   : > { %v7566_v39 = vrot.slane %v7552_v58, %v12078_v32  ;;  %v7567_v34 = vcombine.high %v7559_v63, %v7559_v63  ;;  %v7575_v45 = vrot.slane %v7559_v63, %v12078_v32  ;;  %v9682_v8 = vpop.f32.mrb[87].mxu1  ;;  %v9831_v58 = vld [vmem:[%s12026_s8 + $0x128] ss:$24 sps:$4 sm:$0xff]   ;;  %v9836_v63 = vld [vmem:[%s12026_s8 + $0x154] ss:$24 sps:$4 sm:$0xff]  }
0x1957   : > { %v9834_v53 = vld [vmem:[%s12026_s8 + $0x150] ss:$24 sps:$4 sm:$0xff]  }
0x1958   : > { %v7568_v26 = vcombine.high %v7566_v39, %v7566_v39  ;;  %v7582_v20 = vrot.slane %v7566_v39, %v12078_v32  ;;  %v7589_v3 = vrot.slane %v7567_v34, %v12078_v32  ;;  %v7597_v37 = vcombine.high %v7575_v45, %v7575_v45  ;;  %v9837_v39 = vld [vmem:[%s12026_s8 + $0x158] ss:$24 sps:$4 sm:$0xff]   ;;  %v9842_v34 = vld [vmem:[%s12026_s8 + $0x14] ss:$24 sps:$4 sm:$0xff]  }
0x1959   : > { %v7604_v51 = vrot.slane %v7575_v45, %v10457_v25 }
0x195a   : > { %v7596_v41 = vrot.slane %v7568_v26, %v12078_v32  ;;  %v7598_v38 = vcombine.high %v7582_v20, %v7582_v20  ;;  %v7599_v62 = vcombine.high %v7589_v3, %v7589_v3  ;;  %v7608_v21 = vrot.slane %v7589_v3, %v10457_v25  ;;  %v9833_v32 = vld [vmem:[%s12026_s8 + $0x12c] ss:$24 sps:$4 sm:$0xff]  }
0x195b   : > { %v7612_v6 = vrot.slane %v7597_v37, %v10457_v25  ;;  %v7620_v59 = vrot.slane %v7582_v20, %v10457_v25  ;;  %v11674_v10 = vadd.f32 %v7604_v51, %v11335_v35  ;;  %8156 = vmatprep.subr.bf16.mxu1 %v9833_v32  ;;  %v9843_v32 = vld [vmem:[%s12026_s8 + $0x40] ss:$24 sps:$4 sm:$0xff]  }
0x195c   : > { %v7600_v48 = vcombine.high %v7596_v41, %v7596_v41  ;;  %v7616_v36 = vrot.slane %v7599_v62, %v10457_v25  ;;  %v7624_v14 = vrot.slane %v7596_v41, %v10457_v25  ;;  %v7628_v31 = vrot.slane %v7598_v38, %v10457_v25  ;;  %8157 = vmatpush1.bf16.msra.mxu1 %v9831_v58 }
0x195d   : > { %v11680_v30 = vadd.f32 %v7608_v21, %v11345_v28  ;;  %v11683_v55 = vadd.f32 %v7612_v6, %v11349_v54  ;;  %v7650_v49 = vmul.f32 %v11674_v10, %v11674_v10  ;;  %v11700_v54 = vadd.f32 %v7620_v59, %v11332_v15  ;;  %8158 = vmatprep.subr.bf16.mxu1 %v9839_v1  ;;  %v8964_v59 = vld [vmem:[%s12021_s3 + $0x2] ss:$0 sm:$0xff] }
0x195e   : > { %v7632_v4 = vrot.slane %v7600_v48, %v10457_v25  ;;  %v11687_v44 = vadd.f32 %v7616_v36, %v11364_v47  ;;  %v11690_v35 = vadd.f32 %v7628_v31, %v11342_v43  ;;  %v11693_v7 = vadd.f32 %v7624_v14, %v11338_v46  ;;  %v12079_v14 = vld [vmem:[#allocation10_spill] sm:$0xff] }
0x195f   : > { %v7651_v28 = vmul.f32 %v11680_v30, %v11680_v30  ;;  %v7652_v25 = vmul.f32 %v11683_v55, %v11683_v55  ;;  %v7654_v11 = vmul.f32 %v11700_v54, %v11700_v54 }
0x1960   : > { %v7653_v47 = vmul.f32 %v11687_v44, %v11687_v44  ;;  %v11707_v43 = vadd.f32 %v7632_v4, %v11357_v56  ;;  %v7656_v27 = vmul.f32 %v11690_v35, %v11690_v35  ;;  %v7655_v15 = vmul.f32 %v11693_v7, %v11693_v7  ;;  %v9806_v56 = vld [vmem:[%s12026_s8 + $0x64] ss:$24 sps:$4 sm:$0xff]   ;;  %8159 = vmatpush1.bf16.msra.mxu1 %v9837_v39  ;;  %v12080_v4 = vld [vmem:[#allocation11_spill] sm:$0xff] }
0x1961   : > { %v7666_v46 = vcombine.low %v7650_v49, %v7651_v28  ;;  %8095 = vmatprep.subr.bf16.mxu0 %v9806_v56  ;;  %v7775_v28 = vcombine.high %v8964_v59, %v8964_v59  ;;  %v9846_v39 = vld [vmem:[%s12026_s8 + $0x70] ss:$24 sps:$4 sm:$0xff]  }
0x1962   : > { %v7667_v29 = vcombine.low %v7652_v25, %v7653_v47  ;;  %v7657_v5 = vmul.f32 %v11707_v43, %v11707_v43  ;;  %v7668_v18 = vcombine.low %v7654_v11, %v7655_v15  ;;  %8096 = vmatpush1.bf16.msra.mxu0 %v9804_v52 }
0x1963   : > { %7674 = vadd.xlane.f32.xlu1 %v7666_v46  ;;  %8097 = vmatprep.subr.bf16.mxu0 %v9812_v19 }
0x1964   : > { %7676 = vadd.xlane.f32.xlu0 %v7667_v29  ;;  %v7669_v50 = vcombine.low %v7656_v27, %v7657_v5 }
0x1966   : > { %8098 = vmatpush1.bf16.msra.mxu0 %v9810_v61 }
0x1967   : > { %7680 = vadd.xlane.f32.xlu1 %v7669_v50  ;;  %8099 = vmatprep.subr.bf16.mxu0 %v9818_v13 }
0x1968   : > { %7678 = vadd.xlane.f32.xlu0 %v7668_v18 }
0x196a   : > { %8100 = vmatpush1.bf16.msra.mxu0 %v9816_v60 }
0x196b   : > { %8101 = vmatprep.subr.bf16.mxu0 %v9824_v9  ;;  %v9840_v9 = vld [vmem:[%s12026_s8 + $0x10] ss:$24 sps:$4 sm:$0xff]  }
0x196e   : > { %8102 = vmatpush1.bf16.msra.mxu0 %v9822_v57 }
0x196f   : > { %8103 = vmatprep.subr.bf16.mxu0 %v9830_v24 }
0x1972   : > { %8104 = vmatpush1.bf16.msra.mxu0 %v9828_v12 }
0x1973   : > { %8105 = vmatprep.subr.bf16.mxu0 %v9836_v63  ;;  %v9848_v63 = vld [vmem:[%s12026_s8 + $0x74] ss:$24 sps:$4 sm:$0xff]  }
0x1976   : > { %8106 = vmatpush1.bf16.msra.mxu0 %v9834_v53 }
0x1977   : > { %8197 = vmatprep.subr.bf16.mxu0 %v9842_v34 }
0x19f0   : > { %v7675_v45 = vpop.xlane.xlu1 %7674 }
0x19f1   : > { %v7682_v8 = vmul.f32 0.0078125, %v7675_v45  ;;  %v7677_v26 = vpop.xlane.xlu0 %7676  ;;  %v9851_v45 = vld [vmem:[%s12026_s8 + $0xa4] ss:$24 sps:$4 sm:$0xff]  }
0x19f2   : > { %v7683_v20 = vmul.f32 0.0078125, %v7677_v26  ;;  %v9854_v26 = vld [vmem:[%s12026_s8 + $0xd4] ss:$24 sps:$4 sm:$0xff]  }
0x19f3   : > { %v7686_v3 = vadd.f32 1e-05, %v7682_v8  ;;  %v9849_v8 = vld [vmem:[%s12026_s8 + $0xa0] ss:$24 sps:$4 sm:$0xff]  }
0x19f4   : > { %v7687_v37 = vadd.f32 1e-05, %v7683_v20  ;;  %v7681_v51 = vpop.xlane.xlu1 %7680  ;;  %v9852_v20 = vld [vmem:[%s12026_s8 + $0xd0] ss:$24 sps:$4 sm:$0xff]  }
0x19f5   : > { %10058 = vrsqrt.f32 %v7686_v3  ;;  %v7685_v41 = vmul.f32 0.0078125, %v7681_v51  ;;  %v7679_v38 = vpop.xlane.xlu0 %7678  ;;  %v9857_v3 = vld [vmem:[%s12026_s8 + $0x104] ss:$24 sps:$4 sm:$0xff]   ;;  %v9860_v51 = vld [vmem:[%s12026_s8 + $0x134] ss:$24 sps:$4 sm:$0xff]  }
0x19f6   : > { %10060 = vrsqrt.f32 %v7687_v37  ;;  %v7684_v62 = vmul.f32 0.0078125, %v7679_v38  ;;  %v9855_v37 = vld [vmem:[%s12026_s8 + $0x100] ss:$24 sps:$4 sm:$0xff]   ;;  %v9863_v38 = vld [vmem:[%s12026_s8 + $0x164] ss:$24 sps:$4 sm:$0xff]  }
0x19f7   : > { %v7689_v21 = vadd.f32 1e-05, %v7685_v41  ;;  %v9858_v41 = vld [vmem:[%s12026_s8 + $0x130] ss:$24 sps:$4 sm:$0xff]  }
0x19f8   : > { %v7688_v6 = vadd.f32 1e-05, %v7684_v62  ;;  %v9861_v62 = vld [vmem:[%s12026_s8 + $0x160] ss:$24 sps:$4 sm:$0xff]  }
0x19f9   : > { %10062 = vrsqrt.f32 %v7689_v21  ;;  %v9864_v21 = vld [vmem:[%s12027_s9 + $0x40] sm:$0xff]  }
0x19fa   : > { %10064 = vrsqrt.f32 %v7688_v6  ;;  %v9865_v6 = vld [vmem:[%s12027_s9] sm:$0xff]   ;;  %9225 = vmatprep.subr.bf16.mxu1 %v9864_v21 }
0x19ff   : > { %v10059_v48 = vpop.eup %10058 }
0x1a00   : > { %v10061_v36 = vpop.eup %10060  ;;  %v7704_v31 = vrot.slane %v10059_v48, %v12079_v14  ;;  %v7711_v49 = vrot.slane %v10059_v48, %v12080_v4  ;;  %v9867_v48 = vld [vmem:[%s12027_s9 + $0x8] sm:$0xff]  }
0x1a01   : > { %v7718_v25 = vrot.slane %v10061_v36, %v12079_v14  ;;  %v7725_v47 = vrot.slane %v10061_v36, %v12080_v4  ;;  %v9869_v36 = vld [vmem:[%s12027_s9 + $0x80] sm:$0xff]  }
0x1a02   : > { %v7762_v46 = vmul.f32 %v7704_v31, %v11674_v10  ;;  %v7763_v29 = vmul.f32 %v7711_v49, %v11680_v30  ;;  %v9871_v31 = vld [vmem:[%s12027_s9 + $0x58] sm:$0xff]  }
0x1a03   : > { %v10063_v27 = vpop.eup %10062  ;;  %v7764_v5 = vmul.f32 %v7718_v25, %v11683_v55  ;;  %v7765_v15 = vmul.f32 %v7725_v47, %v11687_v44  ;;  %v9873_v49 = vld [vmem:[%s12027_s9 + $0x18] sm:$0xff]   ;;  %v9875_v25 = vld [vmem:[%s12027_s9 + $0x90] sm:$0xff]   ;;  %v9876_v47 = vld [vmem:[%s12027_s9 + $0x20] sm:$0xff]  }
0x1a04   : > { %v10065_v50 = vpop.eup %10064  ;;  %v7746_v11 = vrot.slane %v10063_v27, %v12079_v14  ;;  %v7753_v18 = vrot.slane %v10063_v27, %v12080_v4  ;;  %v7777_v56 = vmul.f32 %v8964_v59, %v7762_v46  ;;  %v7778_v52 = vmul.f32 %v7775_v28, %v7763_v29  ;;  %v9877_v46 = vld [vmem:[%s12027_s9 + $0x68] sm:$0xff]   ;;  %v9878_v29 = vld [vmem:[%s12027_s9 + $0x98] sm:$0xff]  }
0x1a05   : > { %v7732_v23 = vrot.slane %v10065_v50, %v12079_v14  ;;  %v7739_v17 = vrot.slane %v10065_v50, %v12080_v4  ;;  %v7779_v19 = vmul.f32 %v8964_v59, %v7764_v5  ;;  %v7780_v61 = vmul.f32 %v7775_v28, %v7765_v15  ;;  %v9870_v14 = vld [vmem:[%s12027_s9 + $0x10] sm:$0xff]   ;;  %v9872_v4 = vld [vmem:[%s12027_s9 + $0x88] sm:$0xff]   ;;  %v9881_v15 = vld [vmem:[%s12027_s9 + $0xa0] sm:$0xff]  }
0x1a06   : > { %v7793_v33 = vcombine.low %v7777_v56, %v7778_v52  ;;  %v7768_v40 = vmul.f32 %v7746_v11, %v11690_v35  ;;  %v7769_v2 = vmul.f32 %v7753_v18, %v11707_v43  ;;  %v9879_v27 = vld [vmem:[%s12027_s9 + $0x28] sm:$0xff]   ;;  %v9880_v5 = vld [vmem:[%s12027_s9 + $0x70] sm:$0xff]   ;;  %v9883_v11 = vld [vmem:[%s12027_s9 + $0x78] sm:$0xff]  }
0x1a07   : > { %v7794_v13 = vcombine.low %v7779_v19, %v7780_v61  ;;  %v7766_v60 = vmul.f32 %v7732_v23, %v11700_v54  ;;  %v7767_v42 = vmul.f32 %v7739_v17, %v11693_v7  ;;  %v9882_v50 = vld [vmem:[%s12027_s9 + $0x30] sm:$0xff]   ;;  %v9884_v18 = vld [vmem:[%s12027_s9 + $0xa8] sm:$0xff]   ;;  %v9885_v56 = vld [vmem:[%s12027_s9 + $0x38] sm:$0xff]  }
0x1a08   : > { %v7783_v24 = vmul.f32 %v8964_v59, %v7768_v40  ;;  %v7784_v58 = vmul.f32 %v7775_v28, %v7769_v2  ;;  %v9886_v52 = vld [vmem:[%s12027_s9 + $0xb0] sm:$0xff]   ;;  %v9887_v23 = vld [vmem:[%s12027_s9 + $0xb8] sm:$0xff]  }
0x1a09   : > { %v7801_v57 = vpack.c.bf16 %v7794_v13, %v7793_v33  ;;  %v7781_v16 = vmul.f32 %v8964_v59, %v7766_v60  ;;  %v7782_v12 = vmul.f32 %v7775_v28, %v7767_v42  ;;  %v9866_v59 = vld [vmem:[%s12027_s9 + $0x48] sm:$0xff]   ;;  %v9874_v28 = vld [vmem:[%s12027_s9 + $0x60] sm:$0xff]  }
0x1a0a   : > { %v7796_v53 = vcombine.low %v7783_v24, %v7784_v58 }
0x1a0b   : > { %8124 = vmatmul.mubr.bf16.vlgmr.msra.gmra.mrb[84].mxu0 %v7801_v57  ;;  %8177 = vmatmul.mubr.bf16.vlgmr.msra.gmra.mrb[88].mxu1 %v7801_v57  ;;  %v7795_v1 = vcombine.low %v7781_v16, %v7782_v12 }
0x1a0c   : > { %8198 = vmatpush1.bf16.msra.mxu0 %v9840_v9  ;;  %8133 = vmatprep.mubr.bf16.mxu0 %v12064_v0 }
0x1a0d   : > { %8199 = vmatprep.subr.bf16.mxu0 %v9845_v22  ;;  %8186 = vmatprep.mubr.bf16.mxu1 %v12064_v0  ;;  %v7802_v34 = vpack.c.bf16 %v7796_v53, %v7795_v1 }
0x1a0e   : > { %9226 = vmatpush3.bf16.msra.mxu1 %v9865_v6 }
0x1a0f   : > { %9227 = vmatprep.subr.bf16.mxu1 %v9866_v59 }
0x1a10   : > { %8200 = vmatpush1.bf16.msra.mxu0 %v9843_v32 }
0x1a11   : > { %8201 = vmatprep.subr.bf16.mxu0 %v9848_v63 }
0x1a12   : > { %9228 = vmatpush3.bf16.msra.mxu1 %v9867_v48 }
0x1a13   : > { %8134 = vmatmul.mubr.bf16.gmra.mrb[88].mxu0 %v7802_v34  ;;  %8187 = vmatmul.mubr.bf16.gmra.mrb[92].mxu1 %v7802_v34 }
0x1a14   : > { %8202 = vmatpush1.bf16.msra.mxu0 %v9846_v39  ;;  %8229 = vmatprep.mubr.bf16.mxu0 %v12064_v0 }
0x1a15   : > { %8203 = vmatprep.subr.bf16.mxu0 %v9851_v45 }
0x1a18   : > { %8204 = vmatpush1.bf16.msra.mxu0 %v9849_v8 }
0x1a19   : > { %8205 = vmatprep.subr.bf16.mxu0 %v9854_v26 }
0x1a1c   : > { %8206 = vmatpush1.bf16.msra.mxu0 %v9852_v20 }
0x1a1d   : > { %8207 = vmatprep.subr.bf16.mxu0 %v9857_v3 }
0x1a20   : > { %8208 = vmatpush1.bf16.msra.mxu0 %v9855_v37 }
0x1a21   : > { %8209 = vmatprep.subr.bf16.mxu0 %v9860_v51 }
0x1a24   : > { %8210 = vmatpush1.bf16.msra.mxu0 %v9858_v41 }
0x1a25   : > { %8211 = vmatprep.subr.bf16.mxu0 %v9863_v38 }
0x1a28   : > { %8212 = vmatpush1.bf16.msra.mxu0 %v9861_v62 }
0x1a29   : > { %9683 = vmatprep.subr.bf16.mxu0 %v9869_v36 }
0x1a2b   : > { %8230 = vmatmul.mubr.bf16.vlgmr.msra.gmra.mrb[92].mxu0 %v7801_v57 }
0x1a2c   : > { %8239 = vmatprep.mubr.bf16.mxu0 %v12064_v0  ;;  %v9868_v0 = vld [vmem:[%s12027_s9 + $0x50] sm:$0xff]   ;;  %9684 = vmatpush3.bf16.msra.mxu0 %v9869_v36 }
0x1a2d   : > { %9229 = vmatprep.subr.bf16.mxu1 %v9868_v0  ;;  %9685 = vmatprep.subr.bf16.mxu0 %v9872_v4 }
0x1a2e   : > { %9230 = vmatpush3.bf16.msra.mxu1 %v9870_v14 }
0x1a2f   : > { %9231 = vmatprep.subr.bf16.mxu1 %v9871_v31 }
0x1a30   : > { %9686 = vmatpush3.bf16.msra.mxu0 %v9872_v4 }
0x1a31   : > { %9687 = vmatprep.subr.bf16.mxu0 %v9875_v25 }
0x1a32   : > { %9232 = vmatpush3.bf16.msra.mxu1 %v9873_v49 }
0x1a33   : > { %8240 = vmatmul.mubr.bf16.gmra.mrb[96].mxu0 %v7802_v34  ;;  %9233 = vmatprep.subr.bf16.mxu1 %v9874_v28 }
0x1a34   : > { %9688 = vmatpush3.bf16.msra.mxu0 %v9875_v25 }
0x1a35   : > { %9689 = vmatprep.subr.bf16.mxu0 %v9878_v29 }
0x1a36   : > { %9234 = vmatpush3.bf16.msra.mxu1 %v9876_v47 }
0x1a37   : > { %9235 = vmatprep.subr.bf16.mxu1 %v9877_v46 }
0x1a38   : > { %9690 = vmatpush3.bf16.msra.mxu0 %v9878_v29 }
0x1a39   : > { %9691 = vmatprep.subr.bf16.mxu0 %v9881_v15 }
0x1a3a   : > { %9236 = vmatpush3.bf16.msra.mxu1 %v9879_v27 }
0x1a3b   : > { %9237 = vmatprep.subr.bf16.mxu1 %v9880_v5 }
0x1a3c   : > { %9692 = vmatpush3.bf16.msra.mxu0 %v9881_v15 }
0x1a3d   : > { %9693 = vmatprep.subr.bf16.mxu0 %v9884_v18 }
0x1a3e   : > { %9238 = vmatpush3.bf16.msra.mxu1 %v9882_v50 }
0x1a3f   : > { %9239 = vmatprep.subr.bf16.mxu1 %v9883_v11 }
0x1a40   : > { %9694 = vmatpush3.bf16.msra.mxu0 %v9884_v18 }
0x1a41   : > { %9695 = vmatprep.subr.bf16.mxu0 %v9886_v52 }
0x1a42   : > { %9240 = vmatpush3.bf16.msra.mxu1 %v9885_v56 }
0x1a44   : > { %9696 = vmatpush3.bf16.msra.mxu0 %v9886_v52 }
0x1a45   : > { %9697 = vmatprep.subr.bf16.mxu0 %v9887_v23 }
0x1a48   : > { %9698 = vmatpush3.bf16.msra.mxu0 %v9887_v23 }
0x1ade   : > { %v11932_v17 = vpop.f32.mrb[84].mxu0  ;;  %v11934_v19 = vpop.f32.mrb[88].mxu1 }
0x1adf   : > { %v9013_v61 = vmul.f32 -1.442695, %v11932_v17  ;;  %v9015_v33 = vmul.f32 -1.442695, %v11934_v19  ;;  %v11938_v40 = vpop.f32.mrb[85].mxu0  ;;  %v11940_v13 = vpop.f32.mrb[89].mxu1 }
0x1ae0   : > { %v9014_v60 = vmul.f32 -1.442695, %v11938_v40  ;;  %v11943_v42 = vpop.f32.mrb[86].mxu0  ;;  %v11945_v2 = vpop.f32.mrb[90].mxu1 }
0x1ae1   : > { %10066 = vpow2.f32 %v9013_v61  ;;  %v9016_v9 = vmul.f32 -1.442695, %v11943_v42  ;;  %v9018_v57 = vmul.f32 -1.442695, %v11945_v2  ;;  %v11949_v22 = vpop.f32.mrb[87].mxu0  ;;  %v11951_v16 = vpop.f32.mrb[91].mxu1 }
0x1ae2   : > { %10068 = vpow2.f32 %v9015_v33  ;;  %v9017_v12 = vmul.f32 -1.442695, %v11949_v22 }
0x1ae3   : > { %10070 = vpow2.f32 %v9014_v60 }
0x1ae4   : > { %10072 = vpow2.f32 %v9016_v9 }
0x1ae5   : > { %10074 = vpow2.f32 %v9018_v57 }
0x1ae6   : > { %10076 = vpow2.f32 %v9017_v12  ;;  %v11954_v24 = vpop.f32.mrb[88].mxu0  ;;  %v11956_v58 = vpop.f32.mrb[92].mxu1 }
0x1ae7   : > { %v9019_v32 = vmul.f32 -1.442695, %v11954_v24  ;;  %v9021_v63 = vmul.f32 -1.442695, %v11956_v58  ;;  %v11960_v1 = vpop.f32.mrb[89].mxu0  ;;  %v11962_v53 = vpop.f32.mrb[93].mxu1 }
0x1ae8   : > { %v9020_v39 = vmul.f32 -1.442695, %v11960_v1  ;;  %v11965_v34 = vpop.f32.mrb[90].mxu0  ;;  %v11967_v45 = vpop.f32.mrb[94].mxu1 }
0x1ae9   : > { %10078 = vpow2.f32 %v9019_v32  ;;  %v9022_v8 = vmul.f32 -1.442695, %v11965_v34  ;;  %v9024_v26 = vmul.f32 -1.442695, %v11967_v45  ;;  %v11971_v20 = vpop.f32.mrb[91].mxu0  ;;  %v11973_v3 = vpop.f32.mrb[95].mxu1 }
0x1aea   : > { %10080 = vpow2.f32 %v9021_v63  ;;  %v9023_v14 = vmul.f32 -1.442695, %v11971_v20 }
0x1aeb   : > { %v10067_v37 = vpop.eup %10066  ;;  %10082 = vpow2.f32 %v9020_v39 }
0x1aec   : > { %v10069_v51 = vpop.eup %10068  ;;  %v8286_v41 = vadd.f32 1.0, %v10067_v37  ;;  %10084 = vpow2.f32 %v9022_v8 }
0x1aed   : > { %v10071_v38 = vpop.eup %10070  ;;  %v8288_v62 = vadd.f32 1.0, %v10069_v51  ;;  %10086 = vpow2.f32 %v9024_v26 }
0x1aee   : > { %v10073_v21 = vpop.eup %10072  ;;  %10088 = vrcp.f32 %v8286_v41  ;;  %v8287_v6 = vadd.f32 1.0, %v10071_v38 }
0x1aef   : > { %v10075_v59 = vpop.eup %10074  ;;  %10090 = vrcp.f32 %v8288_v62  ;;  %v8289_v48 = vadd.f32 1.0, %v10073_v21 }
0x1af0   : > { %v10077_v0 = vpop.eup %10076  ;;  %10092 = vrcp.f32 %v8287_v6  ;;  %v8291_v36 = vadd.f32 1.0, %v10075_v59 }
0x1af1   : > { %10094 = vrcp.f32 %v8289_v48  ;;  %v8290_v31 = vadd.f32 1.0, %v10077_v0 }
0x1af2   : > { %10096 = vrcp.f32 %v8291_v36 }
0x1af3   : > { %v10079_v4 = vpop.eup %10078  ;;  %10098 = vrcp.f32 %v8290_v31 }
0x1af4   : > { %v10081_v49 = vpop.eup %10080  ;;  %v8292_v28 = vadd.f32 1.0, %v10079_v4  ;;  %10100 = vpow2.f32 %v9023_v14 }
0x1af5   : > { %v10083_v25 = vpop.eup %10082  ;;  %v8294_v47 = vadd.f32 1.0, %v10081_v49 }
0x1af6   : > { %v10085_v46 = vpop.eup %10084  ;;  %10102 = vrcp.f32 %v8292_v28  ;;  %v8293_v29 = vadd.f32 1.0, %v10083_v25 }
0x1af7   : > { %v10087_v27 = vpop.eup %10086  ;;  %10104 = vrcp.f32 %v8294_v47  ;;  %v8295_v5 = vadd.f32 1.0, %v10085_v46 }
0x1af8   : > { %v10089_v15 = vpop.eup %10088  ;;  %10106 = vrcp.f32 %v8293_v29  ;;  %v8297_v50 = vadd.f32 1.0, %v10087_v27 }
0x1af9   : > { %v10091_v11 = vpop.eup %10090  ;;  %v8322_v18 = vmul.f32 %v10089_v15, %v11932_v17  ;;  %10108 = vrcp.f32 %v8295_v5 }
0x1afa   : > { %v10093_v56 = vpop.eup %10092  ;;  %10110 = vrcp.f32 %v8297_v50  ;;  %v8324_v12 = vmul.f32 %v10091_v11, %v11934_v19 }
0x1afb   : > { %v10095_v52 = vpop.eup %10094  ;;  %v8334_v23 = vmul.f32 %v8322_v18, %v11940_v13  ;;  %v8323_v9 = vmul.f32 %v10093_v56, %v11938_v40 }
0x1afc   : > { %v10097_v61 = vpop.eup %10096  ;;  %v8325_v33 = vmul.f32 %v10095_v52, %v11943_v42 }
0x1afd   : > { %v10099_v60 = vpop.eup %10098  ;;  %v8327_v13 = vmul.f32 %v10097_v61, %v11945_v2 }
0x1afe   : > { %v10101_v57 = vpop.eup %10100  ;;  %v8337_v32 = vmul.f32 %v8325_v33, %v11951_v16  ;;  %v8231_v63 = vpop.f32.mrb[92].mxu0  ;;  %v8326_v17 = vmul.f32 %v10099_v60, %v11949_v22 }
0x1aff   : > { %v8296_v39 = vadd.f32 1.0, %v10101_v57  ;;  %v8335_v8 = vmul.f32 %v8323_v9, %v8231_v63  ;;  %v8233_v26 = vpop.f32.mrb[93].mxu0 }
0x1b00   : > { %v10103_v37 = vpop.eup %10102  ;;  %v8346_v51 = vpack.c.bf16 %v8337_v32, %v8334_v23  ;;  %v8336_v41 = vmul.f32 %v8324_v12, %v8233_v26  ;;  %v8235_v42 = vpop.f32.mrb[94].mxu0 }
0x1b01   : > { %v10105_v38 = vpop.eup %10104  ;;  %v8328_v40 = vmul.f32 %v10103_v37, %v11954_v24  ;;  %10112 = vrcp.f32 %v8296_v39  ;;  %v8338_v62 = vmul.f32 %v8326_v17, %v8235_v42  ;;  %v8237_v19 = vpop.f32.mrb[95].mxu0 }
0x1b02   : > { %v10107_v21 = vpop.eup %10106  ;;  %v8339_v16 = vmul.f32 %v8327_v13, %v8237_v19  ;;  %v8330_v14 = vmul.f32 %v10105_v38, %v11956_v58 }
0x1b03   : > { %v10109_v6 = vpop.eup %10108  ;;  %v8340_v22 = vmul.f32 %v8328_v40, %v11962_v53  ;;  %v8347_v59 = vpack.c.bf16 %v8338_v62, %v8335_v8  ;;  %v8329_v2 = vmul.f32 %v10107_v21, %v11960_v1 }
0x1b04   : > { %v8331_v48 = vmul.f32 %v10109_v6, %v11965_v34  ;;  %v8348_v0 = vpack.c.bf16 %v8339_v16, %v8336_v41  ;;  %v10111_v36 = vpop.eup %10110 }
0x1b05   : > { %8576 = vmatprep.mubr.bf16.mxu1 %v8347_v59  ;;  %v8333_v28 = vmul.f32 %v10111_v36, %v11967_v45 }
0x1b06   : > { %v8343_v24 = vmul.f32 %v8331_v48, %v11973_v3  ;;  %v8241_v31 = vpop.f32.mrb[96].mxu0  ;;  %8577 = vmatmul.mubr.bf16.vlgmr.msra.gmra.mrb[96].mxu1 %v8346_v51  ;;  %9699 = vmatprep.mubr.bf16.mxu0 %v8348_v0 }
0x1b07   : > { %v8341_v4 = vmul.f32 %v8329_v2, %v8241_v31  ;;  %v8243_v49 = vpop.f32.mrb[97].mxu0 }
0x1b08   : > { %v8349_v53 = vpack.c.bf16 %v8343_v24, %v8340_v22  ;;  %v8342_v25 = vmul.f32 %v8330_v14, %v8243_v49  ;;  %v8245_v47 = vpop.f32.mrb[98].mxu0 }
0x1b09   : > { %v8247_v34 = vpop.f32.mrb[99].mxu0 }
0x1b0a   : > { %v8345_v46 = vmul.f32 %v8333_v28, %v8247_v34 }
0x1b0b   : > { %v10113_v29 = vpop.eup %10112 }
0x1b0c   : > { %v8332_v1 = vmul.f32 %v10113_v29, %v11971_v20  ;;  %v8351_v27 = vpack.c.bf16 %v8345_v46, %v8342_v25 }
0x1b0e   : > { %v8344_v5 = vmul.f32 %v8332_v1, %v8245_v47  ;;  %9700 = vmatmul.mubr.bf16.vlgmr.msra.gmra.mrb[100].mxu0 %v8351_v27 }
0x1b10   : > { %v8350_v58 = vpack.c.bf16 %v8344_v5, %v8341_v4 }
0x1b12   : > { %8584 = vmatprep.mubr.bf16.mxu1 %v8350_v58 }
0x1b13   : > { %8585 = vmatmul.mubr.bf16.gmra.mrb[100].mxu1 %v8349_v53 }
0x1bd9   : > { %v9241_v3 = vpop.f32.mrb[96].mxu1 }
0x1bda   : > { %v9242_v15 = vpop.f32.mrb[97].mxu1 }
0x1bdb   : > { %v9243_v50 = vadd.f32 %v9242_v15, %v9241_v3  ;;  %v9244_v11 = vpop.f32.mrb[98].mxu1 }
0x1bdc   : > { %v9245_v45 = vpop.f32.mrb[99].mxu1 }
0x1bdd   : > { %v9246_v18 = vadd.f32 %v9245_v45, %v9244_v11 }
0x1be1   : > { %v9701_v56 = vpop.f32.mrb[100].mxu0 }
0x1be2   : > { %v8627_v52 = vpop.f32.mrb[101].mxu0 }
0x1be3   : > { %v8628_v23 = vadd.f32 %v9243_v50, %v8627_v52  ;;  %v9702_v61 = vpop.f32.mrb[102].mxu0 }
0x1be4   : > { %v8630_v33 = vpop.f32.mrb[103].mxu0 }
0x1be5   : > { %v8646_v60 = vcombine.high %v8628_v23, %v8628_v23  ;;  %v8654_v20 = vadd.f32 %v8628_v23, %v11674_v10  ;;  %v8631_v9 = vadd.f32 %v9246_v18, %v8630_v33 }
0x1be6   : > { %v9247_v57 = vpop.f32.mrb[100].mxu1 }
0x1be7   : > { %v9248_v12 = vpop.f32.mrb[101].mxu1  ;;  %v8655_v32 = vadd.f32 %v8646_v60, %v11680_v30  ;;  %v8662_v63 = vpack.c.bf16 %v8654_v20, %v8654_v20  ;;  %v8647_v17 = vcombine.high %v8631_v9, %v8631_v9  ;;  %v8656_v39 = vadd.f32 %v8631_v9, %v11683_v55 }
0x1be8   : > { %v9249_v10 = vadd.f32 %v9248_v12, %v9247_v57  ;;  %v9250_v8 = vpop.f32.mrb[102].mxu1 }
0x1be9   : > { %v8663_v26 = vpack.c.bf16 %v8655_v32, %v8655_v32  ;;  %8670 = vst [vmem:[%s11998_s16] sm:$0x3] %v8662_v63  ;;  %v9251_v37 = vpop.f32.mrb[103].mxu1  ;;  %v8657_v13 = vadd.f32 %v8647_v17, %v11687_v44  ;;  %v8664_v51 = vpack.c.bf16 %v8656_v39, %v8656_v39 }
0x1bea   : > { %v8636_v41 = vadd.f32 %v9701_v56, %v9249_v10  ;;  %v9252_v42 = vadd.f32 %v9251_v37, %v9250_v8 }
0x1beb   : > { %8671 = vst [vmem:[%s11998_s16 + $0x2] sm:$0x3] %v8663_v26  ;;  %v8665_v38 = vpack.c.bf16 %v8657_v13, %v8657_v13  ;;  %8672 = vst [vmem:[%s11998_s16 + $0x4] sm:$0x3] %v8664_v51 }
0x1bec   : > { %v8648_v30 = vcombine.high %v8636_v41, %v8636_v41  ;;  %v8658_v55 = vadd.f32 %v8636_v41, %v11700_v54  ;;  %v8639_v40 = vadd.f32 %v9702_v61, %v9252_v42 }
0x1bed   : > { %8673 = vst [vmem:[%s11998_s16 + $0x6] sm:$0x3] %v8665_v38 }
0x1bee   : > { %v8659_v62 = vadd.f32 %v8648_v30, %v11693_v7  ;;  %v8666_v19 = vpack.c.bf16 %v8658_v55, %v8658_v55  ;;  %v8649_v21 = vcombine.high %v8639_v40, %v8639_v40  ;;  %v8660_v44 = vadd.f32 %v8639_v40, %v11690_v35 }
0x1bf0   : > { %v8667_v16 = vpack.c.bf16 %v8659_v62, %v8659_v62  ;;  %8674 = vst [vmem:[%s11998_s16 + $0x8] sm:$0x3] %v8666_v19  ;;  %v8661_v6 = vadd.f32 %v8649_v21, %v11707_v43  ;;  %v8668_v22 = vpack.c.bf16 %v8660_v44, %v8660_v44 }
0x1bf2   : > { %8675 = vst [vmem:[%s11998_s16 + $0xa] sm:$0x3] %v8667_v16  ;;  %v8669_v59 = vpack.c.bf16 %v8661_v6, %v8661_v6  ;;  %8676 = vst [vmem:[%s11998_s16 + $0xc] sm:$0x3] %v8668_v22 }
0x1bf4   : > { %8677 = vst [vmem:[%s11998_s16 + $0xe] sm:$0x3] %v8669_v59 }
0x1bf5 PF: > { %s20_s13 = sadd.s32 1, %s10121_s13  }
0x1bf6   : > { %p17_p4 = scmp.ge.s32.totalorder %s20_s13, 4  }
0x1bf8   :  { %19 = sbr.rel (!%p17_p4) target bundleno = 1 (0x1), region = 96 }

// kernel: usm_forward.3
= control target key start
LH: loop header
LB: loop body
LE: loop exit
PB: predicated region body
PF: predicated region fallthrough
CT: control target
= control target key end

     0   :  { %15 = vsyncpa [#allocation3], 0  ;;  %s12246_s0 = inlined_call_operand.vmem [shape: bf16[2,8,4,128], index: 0, kind: input, shape index: {}]   ;;  %s12247_s1 = inlined_call_operand.vmem [shape: f32[2,8,4], index: 1, kind: input, shape index: {}]   ;;  %s12248_s2 = inlined_call_operand.vmem [shape: f32[2,1,8], index: 2, kind: input, shape index: {}]   ;;  %s12249_s3 = inlined_call_operand.vmem [shape: f32[3,128], index: 3, kind: input, shape index: {}]   ;;  %s12250_s4 = inlined_call_operand.vmem [shape: bf16[128,256], index: 4, kind: input, shape index: {}]   ;;  %s12251_s5 = inlined_call_operand.hbm [shape: bf16[128,128], index: 5, kind: input, shape index: {}]   ;;  %s12252_s6 = inlined_call_operand.hbm [shape: bf16[128,384], index: 6, kind: input, shape index: {}]   ;;  %s12253_s7 = inlined_call_operand.hbm [shape: bf16[128,128], index: 7, kind: input, shape index: {}]   ;;  %s12254_s8 = inlined_call_operand.vmem [shape: bf16[128,768], index: 8, kind: input, shape index: {}]   ;;  %s12255_s9 = inlined_call_operand.hbm [shape: bf16[384,128], index: 9, kind: input, shape index: {}]   ;;  %s12256_s10 = inlined_call_operand.vmem [shape: bf16[2,8,4,128], index: 10, kind: output, shape index: {}]  }
   0x1   :  { %16 = vsyncpa [#allocation5], 0 }
   0x2   :  { %17 = vsyncpa [#allocation8], 0  ;;  %s10472_s13 = smov 0  }
   0x3 LB: > { %s10400_s14 = smov [#allocation4]   ;;  %s10478_s16 = sadd.s32 4294967295, %s10398_s13   ;;  %s10398_s13 = sphi %s10472_s13, %s23_s13  }
   0x4   : > { %s310_s15 = sshll.u32 %s10400_s14, 4  ;;  %p8856_p0 = scmp.ge.s32.totalorder %s10398_s13, 1  ;;  %s10483_s15 = int_to_ptr.vmem [resolvable:$true] %s310_s15 }
   0x5   : > { %p279_p1 = scmp.lt.s32.totalorder %s10398_s13, 3  ;;  %p12257_p2 = scmp.eq.s32.totalorder %s10478_s16, 0 }
   0x6   : > { %s10401_s18 = smov [#allocation2]   ;;  %s10402_s21 = smov [#allocation6]  }
   0x7   : > { %p10485_p3 = pnand %p8856_p0, %p279_p1  ;;  %s297_s19 = sshll.u32 %s10401_s18, 4  ;;  %s10491_s19 = int_to_ptr.vmem [resolvable:$true] %s297_s19 }
   0x8   : > { %s10499_s22 = sshll.u32 %s10402_s21, 4  ;;  %s10268_s25 = scalar_lea.hbm %s12252_s6, 3072  ;;  %s324_s22 = int_to_ptr.vmem [resolvable:$true] %s10499_s22 }
   0x9   : > { %s12277_s17 = scalar_select %p10485_p3, 1, 0 }
   0xa   : > { %p9827_p4 = pneg %p10485_p3  ;;  %p10269_p6 = scmp.ne.s32.totalorder %s12252_s6, %s10268_s25 }
   0xb   : > { %p10275_p10 = scmp.lt.u32.totalorder %s10268_s25, %s12252_s6 }
   0xc   : > { %p10495_p5 = pnand %p12257_p2, %p9827_p4 }
   0xe   : > { %p10509_p7 = pneg %p10495_p5 }
  0x10   : > { %p10271_p8 = pnand %p10509_p7, %p10269_p6 }
  0x12   : > { %p10272_p9 = pneg %p10271_p8 }
  0x14   : > { %p10277_p11 = pnand %p10275_p10, %p10272_p9 }
  0x16   : > { %10280 = shalt.err (!%p10277_p11)
}
  0x17   : > { %s10281_s11 = scalar_lea.vmem %s10483_s15, 3072  ;;  %p10289_p1 = scmp.lt.s32.totalorder %s10483_s15, %s10483_s15 }
  0x18   : > { %p10282_p12 = scmp.ne.s32.totalorder %s10483_s15, %s10281_s11  ;;  %p10290_p4 = scmp.lt.s32.totalorder %s10281_s11, %s10281_s11 }
  0x1a   : > { %p10284_p13 = pnand %p10282_p12, %p10509_p7  ;;  %p10291_p6 = por %p10290_p4, %p10289_p1 }
  0x1c   : > { %p10285_p0 = pneg %p10284_p13 }
  0x1e   : > { %p10292_p8 = pnand %p10291_p6, %p10285_p0 }
  0x20   : > { %10295 = shalt.err (!%p10292_p8)
}
  0x21   : > { %s10403_s12 = smov 192   ;;  %s10404_s14 = smov 12  }
  0x22   : > { %9833 = dma.hbm_to_vmem [thread:$0]  (!%p10495_p5), %s12252_s6, 3072, %s10483_s15, [#allocation5], %s10403_s12, %s10403_s12, %s10404_s14  }
  0x23   : > { %s10296_s25 = scalar_lea.hbm %s12251_s5, 1024 }
  0x24   : > { %p10297_p9 = scmp.ne.s32.totalorder %s12251_s5, %s10296_s25  ;;  %p10303_p12 = scmp.lt.u32.totalorder %s10296_s25, %s12251_s5 }
  0x26   : > { %p10299_p10 = pnand %p10297_p9, %p10509_p7 }
  0x28   : > { %p10300_p11 = pneg %p10299_p10 }
  0x2a   : > { %p10305_p13 = pnand %p10303_p12, %p10300_p11 }
  0x2c   : > { %10308 = shalt.err (!%p10305_p13)
}
  0x2d   : > { %s10309_s15 = scalar_lea.vmem %s10491_s19, 1024  ;;  %p10317_p6 = scmp.lt.s32.totalorder %s10491_s19, %s10491_s19 }
  0x2e   : > { %p10310_p0 = scmp.ne.s32.totalorder %s10491_s19, %s10309_s15  ;;  %p10318_p8 = scmp.lt.s32.totalorder %s10309_s15, %s10309_s15 }
  0x30   : > { %p10312_p1 = pnand %p10310_p0, %p10509_p7  ;;  %p10319_p9 = por %p10318_p8, %p10317_p6 }
  0x32   : > { %p10313_p4 = pneg %p10312_p1 }
  0x34   : > { %p10320_p10 = pnand %p10319_p9, %p10313_p4 }
  0x36   : > { %10323 = shalt.err (!%p10320_p10)
}
  0x37   : > { %s10405_s11 = smov 64   ;;  %s10406_s12 = smov 4  }
  0x38   : > { %9830 = dma.hbm_to_vmem [thread:$0]  (!%p10495_p5), %s12251_s5, 1024, %s10491_s19, [#allocation3], %s10405_s11, %s10405_s11, %s10406_s12  }
  0x39   : > { %s10407_s21 = smov [#allocation7]   ;;  %s10324_s26 = scalar_lea.hbm %s12253_s7, 1024 }
  0x3a   : > { %s339_s23 = sshll.u32 %s10407_s21, 4  ;;  %p10325_p11 = scmp.ne.s32.totalorder %s12253_s7, %s10324_s26  ;;  %s340_s23 = int_to_ptr.vmem [resolvable:$true] %s339_s23 }
  0x3b   : > { %p10331_p0 = scmp.lt.u32.totalorder %s10324_s26, %s12253_s7 }
  0x3c   : > { %p10327_p12 = pnand %p10325_p11, %p10509_p7 }
  0x3e   : > { %p10328_p13 = pneg %p10327_p12 }
  0x40   : > { %p10333_p1 = pnand %p10331_p0, %p10328_p13 }
  0x42   : > { %10336 = shalt.err (!%p10333_p1)
}
  0x43   : > { %s10337_s19 = scalar_lea.vmem %s324_s22, 1024  ;;  %p10345_p9 = scmp.lt.s32.totalorder %s324_s22, %s324_s22 }
  0x44   : > { %p10338_p4 = scmp.ne.s32.totalorder %s324_s22, %s10337_s19  ;;  %p10346_p10 = scmp.lt.s32.totalorder %s10337_s19, %s10337_s19 }
  0x46   : > { %p10340_p6 = pnand %p10338_p4, %p10509_p7  ;;  %p10347_p2 = por %p10346_p10, %p10345_p9 }
  0x48   : > { %p10341_p8 = pneg %p10340_p6 }
  0x4a   : > { %p10348_p3 = pnand %p10347_p2, %p10341_p8 }
  0x4c   : > { %10351 = shalt.err (!%p10348_p3)
}
  0x4d   : > { %9836 = dma.hbm_to_vmem [thread:$0]  (!%p10495_p5), %s12253_s7, 1024, %s324_s22, [#allocation5], %s10405_s11, %s10405_s11, %s10406_s12  }
  0x4e   : > { %s10352_s25 = scalar_lea.hbm %s12255_s9, 3072 }
  0x4f   : > { %p10353_p2 = scmp.ne.s32.totalorder %s12255_s9, %s10352_s25  ;;  %p10359_p12 = scmp.lt.u32.totalorder %s10352_s25, %s12255_s9 }
  0x51   : > { %p10355_p3 = pnand %p10353_p2, %p10509_p7 }
  0x53   : > { %p10356_p11 = pneg %p10355_p3 }
  0x55   : > { %p10361_p13 = pnand %p10359_p12, %p10356_p11 }
  0x57   : > { %10364 = shalt.err (!%p10361_p13)
}
  0x58   : > { %s10365_s15 = scalar_lea.vmem %s340_s23, 3072  ;;  %p10373_p6 = scmp.lt.s32.totalorder %s340_s23, %s340_s23 }
  0x59   : > { %p10366_p0 = scmp.ne.s32.totalorder %s340_s23, %s10365_s15  ;;  %p10374_p8 = scmp.lt.s32.totalorder %s10365_s15, %s10365_s15 }
  0x5b   : > { %p10368_p1 = pnand %p10366_p0, %p10509_p7  ;;  %p10375_p9 = por %p10374_p8, %p10373_p6 }
  0x5d   : > { %p10369_p4 = pneg %p10368_p1 }
  0x5f   : > { %p10376_p10 = pnand %p10375_p9, %p10369_p4 }
  0x61   : > { %10379 = shalt.err (!%p10376_p10)
}
  0x62   : > { %9839 = dma.hbm_to_vmem [thread:$0]  (!%p10495_p5), %s12255_s9, 3072, %s340_s23, [#allocation8], %s10405_s11, %s10405_s11, %s10406_s12  }
  0x63   : > { %p12280_p2 = scmp.ne.s32.totalorder %s12277_s17, 0 }
  0x65   : > { %376 = sbr.rel (%p12280_p2) target bundleno = 7262 (0x1c5e), region = 60 }
  0x6c   : > { %p12281_p7 = scmp.eq.s32.totalorder %s10478_s16, 0 }
  0x6e   : > { %10385 = dma.done.wait (%p12281_p7), [#allocation3], 1024   ;;  %p12282_p3 = pmov %p12281_p7 }
  0x70   : > { %10387 = vsyncadd (%p12282_p3), [#allocation3], 4294966272  ;;  %p12283_p11 = pmov %p12282_p3 }
  0x71   : > { %p12284_p12 = pmov %p12282_p3 }
  0x72   : > { %10389 = dma.done.wait (%p12283_p11), [#allocation5], 4096  }
  0x73   : > { %10391 = vsyncadd (%p12284_p12), [#allocation5], 4294963200  ;;  %p12285_p13 = pmov %p12282_p3 }
  0x74   : > { %p12286_p5 = pmov %p12282_p3 }
  0x75   : > { %10393 = dma.done.wait (%p12285_p13), [#allocation8], 3072  }
  0x76   : > { %10395 = vsyncadd (%p12286_p5), [#allocation8], 4294964224  ;;  %p433_p0 = scmp.lt.s32.totalorder %s10478_s16, 1  ;;  %v9873_v17 = vld [vmem:[%s12250_s4 + $0x4] ss:$8 sps:$4 sm:$0xff]   ;;  %v12259_v40 = vmov 0   ;;  %v475_v51 = vlaneseq }
  0x77   : > { %v9875_v22 = vld [vmem:[%s12250_s4] ss:$8 sps:$4 sm:$0xff]   ;;  %771 = vmatprep.subr.bf16.mxu0 %v9873_v17  ;;  %v9876_v30 = vld [vmem:[%s12250_s4 + $0x14] ss:$8 sps:$4 sm:$0xff]   ;;  %v9878_v31 = vld [vmem:[%s12250_s4 + $0x10] ss:$8 sps:$4 sm:$0xff]   ;;  %803 = vmatprep.mubr.bf16.mxu0 %v12259_v40 }
  0x78   : > { %s12322_s16 = smov (!%p433_p0, %s10478_s16), 1  ;;  %772 = vmatpush1.bf16.msra.mxu0 %v9875_v22  ;;  %v9879_v32 = vld [vmem:[%s12250_s4 + $0x24] ss:$8 sps:$4 sm:$0xff]   ;;  %v9881_v33 = vld [vmem:[%s12250_s4 + $0x20] ss:$8 sps:$4 sm:$0xff]   ;;  %v10704_v61 = vshrl.u32 %v475_v51, 7 }
  0x79   : > { %s9159_s17 = sshll.u32 %s12322_s16, 4  ;;  %773 = vmatprep.subr.bf16.mxu0 %v9876_v30  ;;  %v9882_v34 = vld [vmem:[%s12250_s4 + $0x34] ss:$8 sps:$4 sm:$0xff]   ;;  %v9884_v35 = vld [vmem:[%s12250_s4 + $0x30] ss:$8 sps:$4 sm:$0xff]   ;;  %vm10412_vm0 = vmmov 0   ;;  %s444_s15 = scalar_lea.vmem %s12248_s2, %s12322_s16 }
  0x7a   : > { %s437_s11 = scalar_lea.vmem %s12246_s0, %s9159_s17  ;;  %v9885_v36 = vld [vmem:[%s12250_s4 + $0x44] ss:$8 sps:$4 sm:$0xff]   ;;  %v9887_v37 = vld [vmem:[%s12250_s4 + $0x40] ss:$8 sps:$4 sm:$0xff]   ;;  %v9888_v38 = vld [vmem:[%s12250_s4 + $0x54] ss:$8 sps:$4 sm:$0xff]   ;;  %s12226_s30 = scalar_lea.vmem %s12256_s10, %s9159_s17 }
  0x7b   : > { %v451_v0 = vld [vmem:[%s437_s11] sm:$0x3]  ;;  %v452_v1 = vld [vmem:[%s437_s11 + $0x2] sm:$0x3]  ;;  %v453_v4 = vld [vmem:[%s437_s11 + $0x4] sm:$0x3] }
  0x7c   : > { %v10623_v2 = vunpack.c.l.bf16 %v451_v0  ;;  %v10625_v3 = vunpack.c.l.bf16 %v452_v1  ;;  %v454_v5 = vld [vmem:[%s437_s11 + $0x6] sm:$0x3]  ;;  %v455_v6 = vld [vmem:[%s437_s11 + $0x8] sm:$0x3]  ;;  %v10627_v7 = vunpack.c.l.bf16 %v453_v4  ;;  %v456_v9 = vld [vmem:[%s437_s11 + $0xa] sm:$0x3]  ;;  %774 = vmatpush1.bf16.msra.mxu0 %v9878_v31 }
  0x7d   : > { %v10629_v8 = vunpack.c.l.bf16 %v454_v5  ;;  %v10631_v10 = vunpack.c.l.bf16 %v455_v6  ;;  %v457_v11 = vld [vmem:[%s437_s11 + $0xc] sm:$0x3]  ;;  %v458_v12 = vld [vmem:[%s437_s11 + $0xe] sm:$0x3]  ;;  %v10637_v15 = vunpack.c.l.bf16 %v456_v9  ;;  %775 = vmatprep.subr.bf16.mxu0 %v9879_v32  ;;  %v9890_v39 = vld [vmem:[%s12250_s4 + $0x50] ss:$8 sps:$4 sm:$0xff]  }
  0x7e   : > { %12287 = vst [vmem:[#allocation12_spill] sm:$0xff] %v10623_v2  ;;  %12288 = vst [vmem:[#allocation13_spill] sm:$0xff] %v10625_v3  ;;  %v521_v13 = vmul.f32 %v10623_v2, %v10623_v2  ;;  %v522_v14 = vmul.f32 %v10625_v3, %v10625_v3  ;;  %v10639_v16 = vunpack.c.l.bf16 %v457_v11  ;;  %v523_v18 = vmul.f32 %v10627_v7, %v10627_v7  ;;  %v9891_v41 = vld [vmem:[%s12250_s4 + $0x64] ss:$8 sps:$4 sm:$0xff]   ;;  %v9893_v42 = vld [vmem:[%s12250_s4 + $0x60] ss:$8 sps:$4 sm:$0xff]  }
  0x7f   : > { %12289 = vst [vmem:[#allocation14_spill] sm:$0xff] %v10627_v7  ;;  %12290 = vst [vmem:[#allocation15_spill] sm:$0xff] %v10629_v8  ;;  %v524_v19 = vmul.f32 %v10629_v8, %v10629_v8  ;;  %v525_v20 = vmul.f32 %v10631_v10, %v10631_v10  ;;  %v10650_v21 = vunpack.c.l.bf16 %v458_v12  ;;  %v526_v24 = vmul.f32 %v10637_v15, %v10637_v15  ;;  %v9894_v43 = vld [vmem:[%s12250_s4 + $0x74] ss:$8 sps:$4 sm:$0xff]   ;;  %v9896_v44 = vld [vmem:[%s12250_s4 + $0x70] ss:$8 sps:$4 sm:$0xff]  }
  0x80   : > { %12291 = vst [vmem:[#allocation16_spill] sm:$0xff] %v10631_v10  ;;  %12292 = vst [vmem:[#allocation17_spill] sm:$0xff] %v10637_v15  ;;  %v537_v23 = vcombine.low %v521_v13, %v522_v14  ;;  %v527_v25 = vmul.f32 %v10639_v16, %v10639_v16  ;;  %776 = vmatpush1.bf16.msra.mxu0 %v9881_v33  ;;  %v10409_v52 = vmov 839922192   ;;  %v10410_v54 = vmov 1985246804  }
  0x81   : > { %12293 = vst [vmem:[#allocation18_spill] sm:$0xff] %v10639_v16  ;;  %12294 = vst [vmem:[#allocation19_spill] sm:$0xff] %v10650_v21  ;;  %v528_v26 = vmul.f32 %v10650_v21, %v10650_v21  ;;  %v538_v27 = vcombine.low %v523_v18, %v524_v19  ;;  %v539_v28 = vcombine.low %v525_v20, %v526_v24  ;;  %777 = vmatprep.subr.bf16.mxu0 %v9882_v34  ;;  %v8873_v5 = vld [vmem:[%s12249_s3] ss:$0 sm:$0xff]  ;;  %vm880_vm1 = vcmask 261120   ;;  %s10413_s12 = smov 64  }
  0x82   : > { %545 = vadd.xlane.f32.xlu0 %v537_v23  ;;  %v571_v53 = vunpack.c.l.s4 %v10409_v52  ;;  %v578_v55 = vunpack.c.l.s4 %v10410_v54  ;;  %v647_v13 = vcombine.high %v8873_v5, %v8873_v5  ;;  %vm1568_vm2 = vcmask 1043456   ;;  %s8869_s23 = sshll.u32 %s12322_s16, 3  ;;  %s10415_s24 = smov 96  }
  0x83   : > { %549 = vadd.xlane.f32.xlu1 %v539_v28  ;;  %v540_v29 = vcombine.low %v527_v25, %v528_v26  ;;  %s10868_s21 = scalar_lea.vmem %s12247_s1, %s8869_s23  ;;  %vm1473_vm3 = vcmask 27648   ;;  %vm1564_vm4 = vcmask 31744   ;;  %s10416_s25 = smov 32   ;;  %vm6140_vm5 = vcmask 523264  }
  0x84   : > { %778 = vmatpush1.bf16.msra.mxu0 %v9884_v35  ;;  %v572_v62 = vunpack.c.0.s8 %v571_v53  ;;  %v579_v63 = vunpack.c.0.s8 %v578_v55  ;;  %vm6149_vm6 = vcmask 785408   ;;  %vm6483_vm7 = vcmask 1041409  }
  0x85   : > { %779 = vmatprep.subr.bf16.mxu0 %v9885_v36  ;;  %vm6486_vm8 = vcmask 1042434   ;;  %vm6489_vm9 = vcmask 1043459   ;;  %vm6492_vm10 = vcmask 1044484   ;;  %vm6495_vm11 = vcmask 1045509  }
  0x86   : > { %547 = vadd.xlane.f32.xlu0 %v538_v27  ;;  %v10707_v1 = vsub.s32 %v572_v62, %v10704_v61  ;;  %v10710_v4 = vsub.s32 %v579_v63, %v10704_v61  ;;  %vm6498_vm12 = vcmask 1046534   ;;  %vm6501_vm13 = vcmask 1047559  }
  0x87   : > { %551 = vadd.xlane.f32.xlu1 %v540_v29  ;;  %vm6909_vm14 = vcmask 64512  }
  0x88   : > { %780 = vmatpush1.bf16.msra.mxu0 %v9887_v37  ;;  %12295 = vst [vmem:[#allocation20_spill] sm:$0xff] %v10707_v1  ;;  %12296 = vst [vmem:[#allocation21_spill] sm:$0xff] %v10710_v4 }
  0x89   : > { %781 = vmatprep.subr.bf16.mxu0 %v9888_v38 }
  0x8c   : > { %782 = vmatpush1.bf16.msra.mxu0 %v9890_v39 }
  0x8d   : > { %783 = vmatprep.subr.bf16.mxu0 %v9891_v41 }
  0x90   : > { %784 = vmatpush1.bf16.msra.mxu0 %v9893_v42 }
  0x91   : > { %785 = vmatprep.subr.bf16.mxu0 %v9894_v43 }
  0x94   : > { %786 = vmatpush1.bf16.msra.mxu0 %v9896_v44 }
 0x10f   : > { %v546_v45 = vpop.xlane.xlu0 %545 }
 0x110   : > { %v554_v46 = vmul.f32 0.0078125, %v546_v45  ;;  %v550_v47 = vpop.xlane.xlu1 %549 }
 0x111   : > { %v556_v49 = vmul.f32 0.0078125, %v550_v47 }
 0x112   : > { %v558_v48 = vadd.f32 1e-05, %v554_v46 }
 0x113   : > { %v548_v50 = vpop.xlane.xlu0 %547  ;;  %v560_v57 = vadd.f32 1e-05, %v556_v49 }
 0x114   : > { %10041 = vrsqrt.f32 %v558_v48  ;;  %v555_v56 = vmul.f32 0.0078125, %v548_v50  ;;  %v552_v58 = vpop.xlane.xlu1 %551  ;;  %v12261_v48 = vmov 0.0  }
 0x115   : > { %10043 = vrsqrt.f32 %v560_v57  ;;  %v557_v60 = vmul.f32 0.0078125, %v552_v58  ;;  %9371 = vmatprep.subr.mxu1 %v12261_v48  ;;  %9426 = vmatprep.subr.mxu0 %v12261_v48 }
 0x116   : > { %v559_v59 = vadd.f32 1e-05, %v555_v56  ;;  %9373 = vmatprep.mubr.msk.f32.mxu1 %vm10412_vm0, %v12261_v48 }
 0x117   : > { %v561_v0 = vadd.f32 1e-05, %v557_v60 }
 0x118   : > { %10045 = vrsqrt.f32 %v559_v59 }
 0x119   : > { %10047 = vrsqrt.f32 %v561_v0 }
 0x11e   : > { %v10042_v6 = vpop.eup %10041 }
 0x11f   : > { %v576_v9 = vrot.slane %v10042_v6, %v10707_v1  ;;  %v583_v11 = vrot.slane %v10042_v6, %v10710_v4  ;;  %v10044_v12 = vpop.eup %10043 }
 0x120   : > { %v604_v18 = vrot.slane %v10044_v12, %v10707_v1  ;;  %v611_v19 = vrot.slane %v10044_v12, %v10710_v4 }
 0x121   : > { %v634_v14 = vmul.f32 %v576_v9, %v10623_v2  ;;  %v635_v17 = vmul.f32 %v583_v11, %v10625_v3 }
 0x122   : > { %v10046_v20 = vpop.eup %10045  ;;  %v638_v27 = vmul.f32 %v604_v18, %v10631_v10  ;;  %v639_v31 = vmul.f32 %v611_v19, %v10637_v15 }
 0x123   : > { %v590_v22 = vrot.slane %v10046_v20, %v10707_v1  ;;  %v597_v23 = vrot.slane %v10046_v20, %v10710_v4  ;;  %v10048_v24 = vpop.eup %10047  ;;  %v649_v25 = vmul.f32 %v8873_v5, %v634_v14  ;;  %v650_v26 = vmul.f32 %v647_v13, %v635_v17  ;;  %v467_v17 = vld [vmem:[%s10868_s21] sm:$0xff] }
 0x124   : > { %v618_v30 = vrot.slane %v10048_v24, %v10707_v1  ;;  %v625_v32 = vrot.slane %v10048_v24, %v10710_v4  ;;  %v653_v39 = vmul.f32 %v8873_v5, %v638_v27  ;;  %v654_v41 = vmul.f32 %v647_v13, %v639_v31 }
 0x125   : > { %v636_v28 = vmul.f32 %v590_v22, %v10627_v7  ;;  %v637_v29 = vmul.f32 %v597_v23, %v10629_v8  ;;  %v665_v36 = vcombine.low %v649_v25, %v650_v26  ;;  %v8872_v18 = vadd.f32 -1.0, %v467_v17 }
 0x126   : > { %v640_v35 = vmul.f32 %v618_v30, %v10639_v16  ;;  %v641_v37 = vmul.f32 %v625_v32, %v10650_v21  ;;  %v667_v45 = vcombine.low %v653_v39, %v654_v41  ;;  %v10877_v25 = vsub.s32 0, %v10704_v61 }
 0x127   : > { %v651_v33 = vmul.f32 %v8873_v5, %v636_v28  ;;  %v652_v34 = vmul.f32 %v647_v13, %v637_v29  ;;  %v469_v20 = vmul.f32 1e+09, %v8872_v18 }
 0x128   : > { %v655_v42 = vmul.f32 %v8873_v5, %v640_v35  ;;  %v656_v43 = vmul.f32 %v647_v13, %v641_v37  ;;  %v10414_v13 = vmov 1966171168  }
 0x129   : > { %v666_v38 = vcombine.low %v651_v33, %v652_v34  ;;  %v473_v14 = vunpack.c.l.s4 %v10414_v13  ;;  %v471_v34 = vcombine.high %v469_v20, %v469_v20 }
 0x12a   : > { %v668_v46 = vcombine.low %v655_v42, %v656_v43 }
 0x12b   : > { %v673_v44 = vpack.c.bf16 %v666_v38, %v665_v36  ;;  %v474_v19 = vunpack.c.0.s8 %v473_v14 }
 0x12c   : > { %v674_v47 = vpack.c.bf16 %v668_v46, %v667_v45 }
 0x12d   : > { %804 = vmatmul.mubr.bf16.vlgmr.msra.gmra.mrb[0].mxu0 %v673_v44  ;;  %v10872_v22 = vsub.s32 %v474_v19, %v10704_v61 }
 0x12e   : > { %813 = vmatprep.mubr.bf16.mxu0 %v12259_v40 }
 0x12f   : > { %12297 = vst [vmem:[#allocation22_spill] sm:$0xff] %v10872_v22  ;;  %v478_v23 = vrot.slane %v469_v20, %v10872_v22  ;;  %v485_v42 = vrot.slane %v471_v34, %v10872_v22 }
 0x131   : > { %v494_v24 = vrot.slane %v478_v23, %v10872_v22  ;;  %v486_v26 = vcombine.high %v478_v23, %v478_v23  ;;  %v501_v13 = vrot.slane %v485_v42, %v10872_v22  ;;  %v487_v14 = vcombine.high %v485_v42, %v485_v42 }
 0x133   : > { %v10880_v27 = vrot.slane %v494_v24, %v10877_v25  ;;  %v508_v28 = vrot.slane %v486_v26, %v10872_v22  ;;  %v516_v33 = vcombine.high %v494_v24, %v494_v24  ;;  %v10902_v23 = vrot.slane %v501_v13, %v10877_v25 }
 0x134   : > { %v515_v24 = vrot.slane %v487_v14, %v10872_v22  ;;  %v517_v34 = vcombine.high %v501_v13, %v501_v13 }
 0x135   : > { %814 = vmatmul.mubr.bf16.gmra.mrb[4].mxu0 %v674_v47  ;;  %v10885_v32 = vrot.slane %v508_v28, %v10877_v25  ;;  %v10890_v39 = vrot.slane %v516_v33, %v10877_v25  ;;  %v518_v41 = vcombine.high %v508_v28, %v508_v28 }
 0x136   : > { %9428 = vmatprep.mubr.msk.f32.mxu0 %vm10412_vm0, %v12261_v48  ;;  %v10908_v33 = vrot.slane %v515_v24, %v10877_v25  ;;  %v10913_v42 = vrot.slane %v517_v34, %v10877_v25 }
 0x137   : > { %v10896_v47 = vrot.slane %v518_v41, %v10877_v25 }
 0x200   : > { %v10738_v49 = vpop.f32.mrb[0].mxu0 }
 0x201   : > { %v10740_v50 = vpop.f32.mrb[1].mxu0  ;;  %v10765_v54 = vcombine.high %v10738_v49, %v10738_v49 }
 0x202   : > { %v10744_v51 = vcombine.high %v10740_v50, %v10740_v50  ;;  %1562 = vrot.lane.b32.xlu0 %v10740_v50, %s10413_s12  ;;  %v10748_v52 = vpop.f32.mrb[2].mxu0  ;;  %9372 = vmatpush3.xpose.msk.msra.mxu1 %vm880_vm1, %v10740_v50 }
 0x203   : > { %v10752_v53 = vpop.f32.mrb[3].mxu0  ;;  %9376 = vmatprep.subr.mxu1 %v12261_v48  ;;  %v10799_v60 = vcombine.high %v10748_v52, %v10748_v52 }
 0x204   : > { %1641 = vrot.lane.b32.xlu1 %v10744_v51, %s10413_s12  ;;  %v10778_v57 = vcombine.high %v10752_v53, %v10752_v53 }
 0x205   : > { %9374 = vmatmul.mubr.msk.f32.vlgmr.msra.gmra.mrb[0].mxu1 %vm880_vm1, %v10738_v49 }
 0x206   : > { %9377 = vmatpush3.xpose.msk.msra.mxu1 %vm880_vm1, %v10744_v51  ;;  %9378 = vmatprep.mubr.msk.f32.mxu1 %vm10412_vm0, %v12261_v48 }
 0x207   : > { %9381 = vmatprep.subr.mxu1 %v12261_v48 }
 0x208   : > { %1718 = vrot.lane.b32.xlu1 %v10752_v53, %s10413_s12  ;;  %v10770_v55 = vpop.f32.mrb[4].mxu0 }
 0x209   : > { %9379 = vmatmul.mubr.msk.f32.vlgmr.msra.gmra.mrb[2].mxu1 %vm880_vm1, %v10765_v54  ;;  %v10774_v56 = vpop.f32.mrb[5].mxu0  ;;  %v10815_v63 = vcombine.high %v10770_v55, %v10770_v55 }
 0x20a   : > { %9382 = vmatpush3.xpose.msk.msra.mxu1 %vm880_vm1, %v10752_v53  ;;  %9383 = vmatprep.mubr.msk.f32.mxu1 %vm10412_vm0, %v12261_v48  ;;  %v10784_v58 = vpop.f32.mrb[6].mxu0  ;;  %v10806_v62 = vcombine.high %v10774_v56, %v10774_v56 }
 0x20b   : > { %9386 = vmatprep.subr.mxu1 %v12261_v48  ;;  %v10787_v59 = vpop.f32.mrb[7].mxu0  ;;  %v10837_v5 = vcombine.high %v10784_v58, %v10784_v58 }
 0x20c   : > { %1795 = vrot.lane.b32.xlu1 %v10778_v57, %s10413_s12  ;;  %v10828_v0 = vcombine.high %v10787_v59, %v10787_v59 }
 0x20d   : > { %9384 = vmatmul.mubr.msk.f32.vlgmr.msra.gmra.mrb[4].mxu1 %vm880_vm1, %v10748_v52 }
 0x20e   : > { %9387 = vmatpush3.xpose.msk.msra.mxu1 %vm880_vm1, %v10778_v57  ;;  %9388 = vmatprep.mubr.msk.f32.mxu1 %vm10412_vm0, %v12261_v48 }
 0x20f   : > { %9391 = vmatprep.subr.mxu1 %v12261_v48 }
 0x211   : > { %9389 = vmatmul.mubr.msk.f32.vlgmr.msra.gmra.mrb[6].mxu1 %vm880_vm1, %v10799_v60 }
 0x212   : > { %9392 = vmatpush3.xpose.msk.msra.mxu1 %vm880_vm1, %v10774_v56  ;;  %9393 = vmatprep.mubr.msk.f32.mxu1 %vm10412_vm0, %v12261_v48 }
 0x213   : > { %9396 = vmatprep.subr.mxu1 %v12261_v48 }
 0x215   : > { %9394 = vmatmul.mubr.msk.f32.vlgmr.msra.gmra.mrb[8].mxu1 %vm880_vm1, %v10770_v55 }
 0x216   : > { %9397 = vmatpush3.xpose.msk.msra.mxu1 %vm880_vm1, %v10806_v62  ;;  %9398 = vmatprep.mubr.msk.f32.mxu1 %vm10412_vm0, %v12261_v48 }
 0x217   : > { %9401 = vmatprep.subr.mxu1 %v12261_v48 }
 0x219   : > { %9399 = vmatmul.mubr.msk.f32.vlgmr.msra.gmra.mrb[10].mxu1 %vm880_vm1, %v10815_v63 }
 0x21a   : > { %9402 = vmatpush3.xpose.msk.msra.mxu1 %vm880_vm1, %v10787_v59  ;;  %9403 = vmatprep.mubr.msk.f32.mxu1 %vm10412_vm0, %v12261_v48 }
 0x21b   : > { %9406 = vmatprep.subr.mxu1 %v12261_v48 }
 0x21d   : > { %9404 = vmatmul.mubr.msk.f32.vlgmr.msra.gmra.mrb[12].mxu1 %vm880_vm1, %v10784_v58 }
 0x21e   : > { %9407 = vmatpush3.xpose.msk.msra.mxu1 %vm880_vm1, %v10828_v0  ;;  %9408 = vmatprep.mubr.msk.f32.mxu1 %vm10412_vm0, %v12261_v48 }
 0x21f   : > { %9411 = vmatprep.subr.mxu1 %v12261_v48 }
 0x221   : > { %9409 = vmatmul.mubr.msk.f32.vlgmr.msra.gmra.mrb[14].mxu1 %vm880_vm1, %v10837_v5 }
 0x222   : > { %9413 = vmatprep.mubr.msk.f32.mxu1 %vm10412_vm0, %v12261_v48 }
 0x274   : > { %v10850_v6 = vpop.permute.xlu0 %1562 }
 0x275   : > { %9412 = vmatpush3.msk.msra.mxu1 %vm1568_vm2, %v10850_v6 }
 0x276   : > { %v10854_v9 = vpop.permute.xlu1 %1641  ;;  %9416 = vmatprep.subr.mxu1 %v12261_v48 }
 0x27a   : > { %v10857_v11 = vpop.permute.xlu1 %1718 }
 0x27e   : > { %v10859_v12 = vpop.permute.xlu1 %1795 }
 0x27f   : > { %9427 = vmatpush3.msk.msra.mxu0 %vm1568_vm2, %v10859_v12 }
 0x280   : > { %9436 = vmatprep.subr.mxu0 %v12261_v48 }
 0x2d8   : > { %v951_v29 = vpop.f32.mrb[0].mxu1 }
 0x2d9   : > { %v952_v30 = vadd.f32 %v951_v29, %v10880_v27  ;;  %v9375_v31 = vpop.f32.mrb[1].mxu1 }
 0x2db   : > { %v1474_v35 = vsel %vm1473_vm3, %v952_v30, -inf }
 0x2dc   : > { %1475 = vmax.xlane.f32.xlu0 %v1474_v35  ;;  %v1025_v36 = vpop.f32.mrb[2].mxu1 }
 0x2dd   : > { %v1026_v37 = vadd.f32 %v1025_v36, %v10885_v32  ;;  %v9380_v38 = vpop.f32.mrb[3].mxu1 }
 0x2df   : > { %v1477_v43 = vsel %vm1473_vm3, %v1026_v37, -inf }
 0x2e0   : > { %v1099_v44 = vpop.f32.mrb[4].mxu1  ;;  %1478 = vmax.xlane.f32.xlu1 %v1477_v43 }
 0x2e1   : > { %v1100_v45 = vadd.f32 %v1099_v44, %v10890_v39  ;;  %v9385_v46 = vpop.f32.mrb[5].mxu1 }
 0x2e3   : > { %v1480_v17 = vsel %vm1473_vm3, %v1100_v45, -inf }
 0x2e4   : > { %1481 = vmax.xlane.f32.xlu0 %v1480_v17  ;;  %v1173_v18 = vpop.f32.mrb[6].mxu1 }
 0x2e5   : > { %v1174_v19 = vadd.f32 %v1173_v18, %v10896_v47  ;;  %v9390_v20 = vpop.f32.mrb[7].mxu1 }
 0x2e6   : > { %v519_v20 = vcombine.high %v515_v24, %v515_v24 }
 0x2e7   : > { %v1483_v26 = vsel %vm1473_vm3, %v1174_v19, -inf }
 0x2e8   : > { %1484 = vmax.xlane.f32.xlu1 %v1483_v26  ;;  %v1247_v28 = vpop.f32.mrb[8].mxu1  ;;  %v10923_v26 = vrot.slane %v519_v20, %v10877_v25 }
 0x2e9   : > { %v1248_v29 = vadd.f32 %v1247_v28, %v10902_v23  ;;  %v9395_v31 = vpop.f32.mrb[9].mxu1 }
 0x2eb   : > { %v1486_v35 = vsel %vm1473_vm3, %v1248_v29, -inf }
 0x2ec   : > { %1487 = vmax.xlane.f32.xlu0 %v1486_v35  ;;  %v1321_v36 = vpop.f32.mrb[10].mxu1 }
 0x2ed   : > { %v1322_v38 = vadd.f32 %v1321_v36, %v10908_v33  ;;  %v9400_v41 = vpop.f32.mrb[11].mxu1 }
 0x2ef   : > { %v1489_v43 = vsel %vm1473_vm3, %v1322_v38, -inf }
 0x2f0   : > { %1490 = vmax.xlane.f32.xlu1 %v1489_v43  ;;  %v1395_v44 = vpop.f32.mrb[12].mxu1 }
 0x2f1   : > { %v1396_v46 = vadd.f32 %v1395_v44, %v10913_v42  ;;  %v9405_v14 = vpop.f32.mrb[13].mxu1 }
 0x2f3   : > { %v1492_v17 = vsel %vm1473_vm3, %v1396_v46, -inf }
 0x2f4   : > { %1493 = vmax.xlane.f32.xlu0 %v1492_v17  ;;  %v1469_v13 = vpop.f32.mrb[14].mxu1 }
 0x2f5   : > { %v9410_v18 = vpop.f32.mrb[15].mxu1  ;;  %v1470_v28 = vadd.f32 %v1469_v13, %v10923_v26 }
 0x2f7   : > { %v1495_v31 = vsel %vm1473_vm3, %v1470_v28, -inf }
 0x301   : > { %1949 = vrot.lane.b32.xlu1 %v10806_v62, %s10413_s12 }
 0x30a   : > { %1872 = vrot.lane.b32.xlu0 %v10774_v56, %s10413_s12 }
 0x325   : > { %1496 = vmax.xlane.f32.xlu1 %v1495_v31 }
 0x369   : > { %v1476_v34 = vpop.xlane.xlu0 %1475 }
 0x36a   : > { %v1498_v35 = vsub.f32 %v952_v30, %v1476_v34 }
 0x36c   : > { %v1506_v36 = vmul.f32 1.442695, %v1498_v35 }
 0x36d   : > { %v1479_v41 = vpop.xlane.xlu1 %1478 }
 0x36e   : > { %10049 = vpow2.f32 %v1506_v36  ;;  %v1499_v43 = vsub.f32 %v1026_v37, %v1479_v41 }
 0x370   : > { %v1508_v44 = vmul.f32 1.442695, %v1499_v43 }
 0x371   : > { %v1482_v14 = vpop.xlane.xlu0 %1481 }
 0x372   : > { %10051 = vpow2.f32 %v1508_v44  ;;  %v1500_v17 = vsub.f32 %v1100_v45, %v1482_v14 }
 0x374   : > { %v1510_v18 = vmul.f32 1.442695, %v1500_v17 }
 0x375   : > { %v1485_v24 = vpop.xlane.xlu1 %1484 }
 0x376   : > { %10053 = vpow2.f32 %v1510_v18  ;;  %v1501_v20 = vsub.f32 %v1174_v19, %v1485_v24 }
 0x378   : > { %v10927_v40 = vpop.eup %10049  ;;  %v1512_v13 = vmul.f32 1.442695, %v1501_v20 }
 0x379   : > { %v1488_v48 = vpop.xlane.xlu0 %1487  ;;  %v1522_v31 = vsel %vm1473_vm3, %v10927_v40, 0.0 }
 0x37a   : > { %10055 = vpow2.f32 %v1512_v13  ;;  %v1502_v30 = vsub.f32 %v1248_v29, %v1488_v48  ;;  %1523 = vadd.xlane.f32.xlu0 %v1522_v31 }
 0x37c   : > { %v10931_v34 = vpop.eup %10051  ;;  %v1514_v37 = vmul.f32 1.442695, %v1502_v30 }
 0x37d   : > { %v1525_v45 = vsel %vm1473_vm3, %v10931_v34, 0.0  ;;  %v1491_v43 = vpop.xlane.xlu1 %1490 }
 0x37e   : > { %10057 = vpow2.f32 %v1514_v37  ;;  %1526 = vadd.xlane.f32.xlu1 %v1525_v45  ;;  %v1503_v44 = vsub.f32 %v1322_v38, %v1491_v43 }
 0x380   : > { %v10935_v35 = vpop.eup %10053  ;;  %v1516_v17 = vmul.f32 1.442695, %v1503_v44 }
 0x381   : > { %v1528_v19 = vsel %vm1473_vm3, %v10935_v35, 0.0  ;;  %v1494_v14 = vpop.xlane.xlu0 %1493  ;;  %v10961_v38 = vpop.permute.xlu1 %1949 }
 0x382   : > { %1529 = vadd.xlane.f32.xlu0 %v1528_v19  ;;  %v1504_v18 = vsub.f32 %v1396_v46, %v1494_v14  ;;  %10059 = vpow2.f32 %v1516_v17 }
 0x384   : > { %v10939_v36 = vpop.eup %10055  ;;  %v1518_v24 = vmul.f32 1.442695, %v1504_v18 }
 0x385   : > { %v1531_v48 = vsel %vm1473_vm3, %v10939_v36, 0.0 }
 0x386   : > { %1532 = vadd.xlane.f32.xlu1 %v1531_v48  ;;  %10061 = vpow2.f32 %v1518_v24 }
 0x388   : > { %v10943_v29 = vpop.eup %10057 }
 0x389   : > { %v1534_v41 = vsel %vm1473_vm3, %v10943_v29, 0.0 }
 0x38a   : > { %1535 = vadd.xlane.f32.xlu0 %v1534_v41  ;;  %v10977_v41 = vpop.permute.xlu0 %1872 }
 0x38c   : > { %v10951_v20 = vpop.eup %10059 }
 0x38d   : > { %v1537_v13 = vsel %vm1473_vm3, %v10951_v20, 0.0 }
 0x390   : > { %v10955_v31 = vpop.eup %10061 }
 0x391   : > { %v1540_v30 = vsel %vm1473_vm3, %v10955_v31, 0.0 }
 0x397   : > { %2103 = vrot.lane.b32.xlu1 %v10828_v0, %s10413_s12 }
 0x3a0   : > { %2026 = vrot.lane.b32.xlu0 %v10787_v59, %s10413_s12 }
 0x3b2   : > { %v1497_v46 = vpop.xlane.xlu1 %1496 }
 0x3b3   : > { %v1505_v37 = vsub.f32 %v1470_v28, %v1497_v46 }
 0x3b5   : > { %v1520_v45 = vmul.f32 1.442695, %v1505_v37 }
 0x3b7   : > { %10063 = vpow2.f32 %v1520_v45 }
 0x3bb   : > { %1538 = vadd.xlane.f32.xlu1 %v1537_v13  ;;  %v12298_v13 = vmov 0.0  }
 0x3bf   : > { %1541 = vadd.xlane.f32.xlu0 %v1540_v30 }
 0x3c1   : > { %v10971_v19 = vpop.eup %10063 }
 0x3c2   : > { %v1543_v48 = vsel %vm1473_vm3, %v10971_v19, 0.0 }
 0x3cc   : > { %2254 = vrot.lane.b32.xlu1 %v10765_v54, %s10415_s24 }
 0x3d5   : > { %2180 = vrot.lane.b32.xlu0 %v10738_v49, %s10415_s24 }
 0x3d9   : > { %2328 = vrot.lane.b32.xlu0 %v10748_v52, %s10415_s24 }
 0x3dd   : > { %2476 = vrot.lane.b32.xlu0 %v10770_v55, %s10415_s24 }
 0x3e1   : > { %2624 = vrot.lane.b32.xlu0 %v10784_v58, %s10415_s24 }
 0x3f0   : > { %1544 = vadd.xlane.f32.xlu1 %v1543_v48 }
 0x401   : > { %2402 = vrot.lane.b32.xlu1 %v10799_v60, %s10415_s24 }
 0x405   : > { %2550 = vrot.lane.b32.xlu1 %v10815_v63, %s10415_s24 }
 0x407   : > { %v1524_v28 = vpop.xlane.xlu0 %1523 }
 0x408   : > { %10065 = vrcp.f32 %v1524_v28 }
 0x409   : > { %2698 = vrot.lane.b32.xlu1 %v10837_v5, %s10415_s24 }
 0x40b   : > { %v1527_v43 = vpop.xlane.xlu1 %1526 }
 0x40c   : > { %10067 = vrcp.f32 %v1527_v43 }
 0x40f   : > { %v1530_v44 = vpop.xlane.xlu0 %1529 }
 0x410   : > { %10069 = vrcp.f32 %v1530_v44 }
 0x412   : > { %v10066_v14 = vpop.eup %10065 }
 0x413   : > { %v1533_v17 = vpop.xlane.xlu1 %1532  ;;  %v1554_v18 = vmul.f32 %v10066_v14, %v10927_v40 }
 0x414   : > { %10071 = vrcp.f32 %v1533_v17 }
 0x415   : > { %9414 = vmatmul.mubr.msk.f32.vlgmr.msra.gmra.mrb[16].mxu1 %vm1564_vm4, %v1554_v18 }
 0x416   : > { %v10068_v24 = vpop.eup %10067  ;;  %9417 = vmatpush3.msk.msra.mxu1 %vm1568_vm2, %v10854_v9  ;;  %9418 = vmatprep.mubr.msk.f32.mxu1 %vm10412_vm0, %v12298_v13 }
 0x417   : > { %v1536_v30 = vpop.xlane.xlu0 %1535  ;;  %9421 = vmatprep.subr.mxu1 %v12298_v13  ;;  %v1555_v46 = vmul.f32 %v10068_v24, %v10931_v34 }
 0x418   : > { %10073 = vrcp.f32 %v1536_v30 }
 0x419   : > { %9419 = vmatmul.mubr.msk.f32.vlgmr.msra.gmra.mrb[18].mxu1 %vm1564_vm4, %v1555_v46 }
 0x41a   : > { %v10070_v37 = vpop.eup %10069  ;;  %9422 = vmatpush3.msk.msra.mxu1 %vm1568_vm2, %v10857_v11  ;;  %9423 = vmatprep.mubr.msk.f32.mxu1 %vm10412_vm0, %v12298_v13 }
 0x41b   : > { %9431 = vmatprep.subr.mxu1 %v12298_v13  ;;  %v1556_v40 = vmul.f32 %v10070_v37, %v10935_v35  ;;  %v11012_v28 = vpop.permute.xlu0 %2026 }
 0x41d   : > { %9424 = vmatmul.mubr.msk.f32.vlgmr.msra.gmra.mrb[20].mxu1 %vm1564_vm4, %v1556_v40 }
 0x41e   : > { %v10072_v45 = vpop.eup %10071  ;;  %9432 = vmatpush3.msk.msra.mxu1 %vm1568_vm2, %v10977_v41  ;;  %9433 = vmatprep.mubr.msk.f32.mxu1 %vm10412_vm0, %v12298_v13 }
 0x41f   : > { %v1557_v34 = vmul.f32 %v10072_v45, %v10939_v36  ;;  %9441 = vmatprep.subr.mxu1 %v12298_v13  ;;  %v11020_v36 = vpop.permute.xlu1 %2103 }
 0x421   : > { %9429 = vmatmul.mubr.msk.f32.vlgmr.msra.gmra.mrb[8].mxu0 %vm1564_vm4, %v1557_v34 }
 0x422   : > { %v10074_v48 = vpop.eup %10073  ;;  %9437 = vmatpush3.msk.msra.mxu0 %vm1568_vm2, %v10961_v38  ;;  %9438 = vmatprep.mubr.msk.f32.mxu0 %vm10412_vm0, %v12298_v13 }
 0x423   : > { %v1558_v35 = vmul.f32 %v10074_v48, %v10943_v29  ;;  %9446 = vmatprep.subr.mxu0 %v12298_v13 }
 0x425   : > { %9434 = vmatmul.mubr.msk.f32.vlgmr.msra.gmra.mrb[22].mxu1 %vm1564_vm4, %v1558_v35 }
 0x426   : > { %9442 = vmatpush3.msk.msra.mxu1 %vm1568_vm2, %v11012_v28  ;;  %9443 = vmatprep.mubr.msk.f32.mxu1 %vm10412_vm0, %v12298_v13 }
 0x427   : > { %9451 = vmatprep.subr.mxu1 %v12298_v13 }
 0x448   : > { %v1539_v43 = vpop.xlane.xlu1 %1538 }
 0x449   : > { %10075 = vrcp.f32 %v1539_v43 }
 0x44c   : > { %v1542_v44 = vpop.xlane.xlu0 %1541  ;;  %v2255_v46 = vpop.permute.xlu1 %2254 }
 0x44d   : > { %10077 = vrcp.f32 %v1542_v44 }
 0x450   : > { %v2181_v18 = vpop.permute.xlu0 %2180 }
 0x453   : > { %v10076_v29 = vpop.eup %10075 }
 0x454   : > { %v1559_v14 = vmul.f32 %v10076_v29, %v10951_v20  ;;  %v2329_v20 = vpop.permute.xlu0 %2328 }
 0x456   : > { %9439 = vmatmul.mubr.msk.f32.vlgmr.msra.gmra.mrb[10].mxu0 %vm1564_vm4, %v1559_v14 }
 0x457   : > { %v10078_v17 = vpop.eup %10077  ;;  %9447 = vmatpush3.msk.msra.mxu0 %vm1568_vm2, %v11020_v36  ;;  %9448 = vmatprep.mubr.msk.f32.mxu0 %vm10412_vm0, %v12298_v13 }
 0x458   : > { %v1560_v24 = vmul.f32 %v10078_v17, %v10955_v31  ;;  %9456 = vmatprep.subr.mxu0 %v12298_v13  ;;  %v2477_v31 = vpop.permute.xlu0 %2476 }
 0x45a   : > { %9444 = vmatmul.mubr.msk.f32.vlgmr.msra.gmra.mrb[24].mxu1 %vm1564_vm4, %v1560_v24 }
 0x45b   : > { %9452 = vmatpush3.xpose.msk.msra.mxu1 %vm880_vm1, %v10740_v50  ;;  %9453 = vmatprep.mubr.msk.f32.mxu1 %vm10412_vm0, %v12298_v13 }
 0x45c   : > { %9461 = vmatprep.subr.mxu1 %v12298_v13  ;;  %v2625_v30 = vpop.permute.xlu0 %2624 }
 0x45e   : > { %9454 = vmatmul.mubr.msk.f32.vlgmr.msra.gmra.mrb[26].mxu1 %vm880_vm1, %v2181_v18 }
 0x45f   : > { %9462 = vmatpush3.xpose.msk.msra.mxu1 %vm880_vm1, %v10752_v53  ;;  %9463 = vmatprep.mubr.msk.f32.mxu1 %vm10412_vm0, %v12298_v13 }
 0x460   : > { %9471 = vmatprep.subr.mxu1 %v12298_v13 }
 0x462   : > { %9464 = vmatmul.mubr.msk.f32.vlgmr.msra.gmra.mrb[28].mxu1 %vm880_vm1, %v2329_v20 }
 0x463   : > { %9472 = vmatpush3.xpose.msk.msra.mxu1 %vm880_vm1, %v10774_v56  ;;  %9473 = vmatprep.mubr.msk.f32.mxu1 %vm10412_vm0, %v12298_v13 }
 0x464   : > { %9481 = vmatprep.subr.mxu1 %v12298_v13 }
 0x466   : > { %9474 = vmatmul.mubr.msk.f32.vlgmr.msra.gmra.mrb[30].mxu1 %vm880_vm1, %v2477_v31 }
 0x467   : > { %9482 = vmatpush3.xpose.msk.msra.mxu1 %vm880_vm1, %v10787_v59  ;;  %9483 = vmatprep.mubr.msk.f32.mxu1 %vm10412_vm0, %v12298_v13 }
 0x468   : > { %9491 = vmatprep.subr.mxu1 %v12298_v13 }
 0x46a   : > { %9484 = vmatmul.mubr.msk.f32.vlgmr.msra.gmra.mrb[32].mxu1 %vm880_vm1, %v2625_v30 }
 0x46b   : > { %9492 = vmatpush3.msk.msra.mxu1 %vm1568_vm2, %v10850_v6  ;;  %9493 = vmatprep.mubr.msk.f32.mxu1 %vm10412_vm0, %v12298_v13 }
 0x46c   : > { %9501 = vmatprep.subr.mxu1 %v12298_v13 }
 0x47d   : > { %v1545_v37 = vpop.xlane.xlu1 %1544 }
 0x47e   : > { %10079 = vrcp.f32 %v1545_v37 }
 0x481   : > { %v2403_v6 = vpop.permute.xlu1 %2402 }
 0x488   : > { %v10080_v40 = vpop.eup %10079 }
 0x489   : > { %v1561_v45 = vmul.f32 %v10080_v40, %v10971_v19  ;;  %v2551_v19 = vpop.permute.xlu1 %2550 }
 0x48b   : > { %9449 = vmatmul.mubr.msk.f32.vlgmr.msra.gmra.mrb[12].mxu0 %vm1564_vm4, %v1561_v45 }
 0x48c   : > { %9457 = vmatpush3.xpose.msk.msra.mxu0 %vm880_vm1, %v10744_v51  ;;  %9458 = vmatprep.mubr.msk.f32.mxu0 %vm10412_vm0, %v12298_v13 }
 0x48d   : > { %9466 = vmatprep.subr.mxu0 %v12298_v13  ;;  %v2699_v34 = vpop.permute.xlu1 %2698 }
 0x48f   : > { %9459 = vmatmul.mubr.msk.f32.vlgmr.msra.gmra.mrb[14].mxu0 %vm880_vm1, %v2255_v46 }
 0x490   : > { %9467 = vmatpush3.xpose.msk.msra.mxu0 %vm880_vm1, %v10778_v57  ;;  %9468 = vmatprep.mubr.msk.f32.mxu0 %vm10412_vm0, %v12298_v13 }
 0x491   : > { %9476 = vmatprep.subr.mxu0 %v12298_v13 }
 0x493   : > { %9469 = vmatmul.mubr.msk.f32.vlgmr.msra.gmra.mrb[16].mxu0 %vm880_vm1, %v2403_v6 }
 0x494   : > { %9477 = vmatpush3.xpose.msk.msra.mxu0 %vm880_vm1, %v10806_v62  ;;  %9478 = vmatprep.mubr.msk.f32.mxu0 %vm10412_vm0, %v12298_v13 }
 0x495   : > { %9486 = vmatprep.subr.mxu0 %v12298_v13 }
 0x497   : > { %9479 = vmatmul.mubr.msk.f32.vlgmr.msra.gmra.mrb[18].mxu0 %vm880_vm1, %v2551_v19 }
 0x498   : > { %9487 = vmatpush3.xpose.msk.msra.mxu0 %vm880_vm1, %v10828_v0  ;;  %9488 = vmatprep.mubr.msk.f32.mxu0 %vm10412_vm0, %v12298_v13 }
 0x499   : > { %9496 = vmatprep.subr.mxu0 %v12298_v13 }
 0x49b   : > { %9489 = vmatmul.mubr.msk.f32.vlgmr.msra.gmra.mrb[20].mxu0 %vm880_vm1, %v2699_v34 }
 0x49c   : > { %9497 = vmatpush3.msk.msra.mxu0 %vm1568_vm2, %v10854_v9  ;;  %9498 = vmatprep.mubr.msk.f32.mxu0 %vm10412_vm0, %v12298_v13 }
 0x49d   : > { %9506 = vmatprep.subr.mxu0 %v12298_v13 }
 0x4e8   : > { %v11091_v48 = vpop.f32.mrb[16].mxu1 }
 0x4e9   : > { %v9415_v35 = vpop.f32.mrb[17].mxu1 }
 0x4ec   : > { %v11093_v43 = vpop.f32.mrb[18].mxu1 }
 0x4ed   : > { %v9420_v44 = vpop.f32.mrb[19].mxu1 }
 0x4f0   : > { %v11095_v29 = vpop.f32.mrb[20].mxu1 }
 0x4f1   : > { %v9425_v14 = vpop.f32.mrb[21].mxu1 }
 0x4f4   : > { %v11097_v17 = vpop.f32.mrb[8].mxu0 }
 0x4f5   : > { %12299 = vst [vmem:[#allocation23_spill] sm:$0xff] %v11097_v17  ;;  %v9430_v18 = vpop.f32.mrb[9].mxu0 }
 0x4f8   : > { %v11099_v24 = vpop.f32.mrb[22].mxu1 }
 0x4f9   : > { %12300 = vst [vmem:[#allocation24_spill] sm:$0xff] %v11099_v24  ;;  %v9435_v9 = vpop.f32.mrb[23].mxu1 }
 0x529   : > { %v11101_v20 = vpop.f32.mrb[10].mxu0 }
 0x52a   : > { %12301 = vst [vmem:[#allocation25_spill] sm:$0xff] %v11101_v20  ;;  %v9440_v31 = vpop.f32.mrb[11].mxu0 }
 0x52d   : > { %v11103_v30 = vpop.f32.mrb[24].mxu1 }
 0x52e   : > { %12302 = vst [vmem:[#allocation26_spill] sm:$0xff] %v11103_v30  ;;  %v9445_v46 = vpop.f32.mrb[25].mxu1 }
 0x531   : > { %v2250_v37 = vpop.f32.mrb[26].mxu1 }
 0x532   : > { %v2251_v40 = vadd.f32 %v2250_v37, %v10880_v27  ;;  %v9455_v45 = vpop.f32.mrb[27].mxu1 }
 0x534   : > { %v2772_v6 = vsel %vm1473_vm3, %v2251_v40, -inf }
 0x535   : > { %2773 = vmax.xlane.f32.xlu0 %v2772_v6  ;;  %v2398_v19 = vpop.f32.mrb[28].mxu1 }
 0x536   : > { %v2399_v34 = vadd.f32 %v2398_v19, %v10890_v39  ;;  %v9465_v35 = vpop.f32.mrb[29].mxu1 }
 0x538   : > { %v2778_v44 = vsel %vm1473_vm3, %v2399_v34, -inf }
 0x539   : > { %2779 = vmax.xlane.f32.xlu0 %v2778_v44  ;;  %v2546_v14 = vpop.f32.mrb[30].mxu1 }
 0x53a   : > { %v9475_v18 = vpop.f32.mrb[31].mxu1  ;;  %v2547_v44 = vadd.f32 %v2546_v14, %v10902_v23 }
 0x53d   : > { %v2694_v9 = vpop.f32.mrb[32].mxu1 }
 0x53e   : > { %v9485_v31 = vpop.f32.mrb[33].mxu1  ;;  %v2695_v21 = vadd.f32 %v2694_v9, %v10913_v42 }
 0x55e   : > { %v11109_v4 = vpop.f32.mrb[12].mxu0 }
 0x55f   : > { %12303 = vst [vmem:[#allocation27_spill] sm:$0xff] %v11109_v4  ;;  %v9450_v46 = vpop.f32.mrb[13].mxu0 }
 0x562   : > { %v2324_v1 = vpop.f32.mrb[14].mxu0 }
 0x563   : > { %v2325_v37 = vadd.f32 %v2324_v1, %v10885_v32  ;;  %v9460_v45 = vpop.f32.mrb[15].mxu0 }
 0x564   : > { %v2784_v45 = vsel %vm1473_vm3, %v2547_v44, -inf }
 0x565   : > { %v2775_v6 = vsel %vm1473_vm3, %v2325_v37, -inf }
 0x566   : > { %2776 = vmax.xlane.f32.xlu1 %v2775_v6  ;;  %v2472_v22 = vpop.f32.mrb[16].mxu0 }
 0x567   : > { %v2473_v19 = vadd.f32 %v2472_v22, %v10896_v47  ;;  %v9470_v35 = vpop.f32.mrb[17].mxu0 }
 0x568   : > { %v2790_v35 = vsel %vm1473_vm3, %v2695_v21, -inf }
 0x569   : > { %v2781_v18 = vsel %vm1473_vm3, %v2473_v19, -inf }
 0x56a   : > { %v2620_v8 = vpop.f32.mrb[18].mxu0  ;;  %2782 = vmax.xlane.f32.xlu0 %v2781_v18 }
 0x56b   : > { %v2621_v31 = vadd.f32 %v2620_v8, %v10908_v33  ;;  %v9480_v46 = vpop.f32.mrb[19].mxu0 }
 0x56d   : > { %v2787_v1 = vsel %vm1473_vm3, %v2621_v31, -inf }
 0x56e   : > { %2788 = vmax.xlane.f32.xlu1 %v2787_v1  ;;  %v2768_v6 = vpop.f32.mrb[20].mxu0  ;;  %2785 = vmax.xlane.f32.xlu0 %v2784_v45 }
 0x56f   : > { %v9490_v22 = vpop.f32.mrb[21].mxu0  ;;  %v11132_v8 = vadd.f32 %v2768_v6, %v10923_v26 }
 0x571   : > { %v2793_v14 = vsel %vm1473_vm3, %v11132_v8, -inf }
 0x572   : > { %2791 = vmax.xlane.f32.xlu0 %v2790_v35 }
 0x57f   : > { %3524 = vrot.lane.b32.xlu1 %v10744_v51, %s10415_s24 }
 0x583   : > { %3444 = vrot.lane.b32.xlu1 %v10738_v49, %s10413_s12 }
 0x587   : > { %3522 = vrot.lane.b32.xlu1 %v10765_v54, %s10413_s12 }
 0x588   : > { %3446 = vrot.lane.b32.xlu0 %v10740_v50, %s10415_s24 }
 0x58c   : > { %3602 = vrot.lane.b32.xlu0 %v10752_v53, %s10415_s24 }
 0x5ab   : > { %2794 = vmax.xlane.f32.xlu1 %v2793_v14 }
 0x5bc   : > { %3680 = vrot.lane.b32.xlu1 %v10778_v57, %s10415_s24 }
 0x5c2   : > { %v2774_v9 = vpop.xlane.xlu0 %2773 }
 0x5c3   : > { %v2796_v18 = vsub.f32 %v2251_v40, %v2774_v9 }
 0x5c5   : > { %v2804_v46 = vmul.f32 1.442695, %v2796_v18 }
 0x5c6   : > { %v2780_v1 = vpop.xlane.xlu0 %2779 }
 0x5c7   : > { %10081 = vpow2.f32 %v2804_v46  ;;  %v2798_v45 = vsub.f32 %v2399_v34, %v2780_v1 }
 0x5c9   : > { %v2808_v22 = vmul.f32 1.442695, %v2798_v45 }
 0x5cb   : > { %10083 = vpow2.f32 %v2808_v22 }
 0x5d1   : > { %v11138_v35 = vpop.eup %10081 }
 0x5d2   : > { %v2820_v6 = vsel %vm1473_vm3, %v11138_v35, 0.0 }
 0x5d3   : > { %2821 = vadd.xlane.f32.xlu0 %v2820_v6 }
 0x5d5   : > { %v11142_v7 = vpop.eup %10083 }
 0x5d6   : > { %v2826_v14 = vsel %vm1473_vm3, %v11142_v7, 0.0 }
 0x5d7   : > { %2827 = vadd.xlane.f32.xlu0 %v2826_v14 }
 0x5f3   : > { %v2777_v3 = vpop.xlane.xlu1 %2776 }
 0x5f4   : > { %v2797_v40 = vsub.f32 %v2325_v37, %v2777_v3 }
 0x5f6   : > { %v2806_v9 = vmul.f32 1.442695, %v2797_v40 }
 0x5f7   : > { %v2783_v18 = vpop.xlane.xlu0 %2782 }
 0x5f8   : > { %10085 = vpow2.f32 %v2806_v9  ;;  %v2799_v34 = vsub.f32 %v2473_v19, %v2783_v18 }
 0x5fa   : > { %v2810_v46 = vmul.f32 1.442695, %v2799_v34 }
 0x5fb   : > { %v2789_v1 = vpop.xlane.xlu1 %2788  ;;  %v2786_v45 = vpop.xlane.xlu0 %2785 }
 0x5fc   : > { %10087 = vpow2.f32 %v2810_v46  ;;  %v2801_v22 = vsub.f32 %v2621_v31, %v2789_v1  ;;  %v2800_v16 = vsub.f32 %v2547_v44, %v2786_v45 }
 0x5fe   : > { %v2814_v15 = vmul.f32 1.442695, %v2801_v22  ;;  %v2812_v6 = vmul.f32 1.442695, %v2800_v16 }
 0x5ff   : > { %v2792_v2 = vpop.xlane.xlu0 %2791  ;;  %v11170_v31 = vpop.permute.xlu1 %3524 }
 0x600   : > { %10089 = vpow2.f32 %v2814_v15  ;;  %v2802_v10 = vsub.f32 %v2695_v21, %v2792_v2 }
 0x601   : > { %10091 = vpow2.f32 %v2812_v6 }
 0x602   : > { %v11146_v30 = vpop.eup %10085  ;;  %v2816_v14 = vmul.f32 1.442695, %v2802_v10 }
 0x603   : > { %v2823_v3 = vsel %vm1473_vm3, %v11146_v30, 0.0  ;;  %v11174_v40 = vpop.permute.xlu1 %3444  ;;  %v11191_v22 = vpop.permute.xlu0 %3446 }
 0x604   : > { %10093 = vpow2.f32 %v2816_v14  ;;  %2824 = vadd.xlane.f32.xlu1 %v2823_v3 }
 0x606   : > { %v11150_v37 = vpop.eup %10087 }
 0x607   : > { %v2829_v19 = vsel %vm1473_vm3, %v11150_v37, 0.0  ;;  %v11180_v9 = vpop.permute.xlu1 %3522  ;;  %v11195_v6 = vpop.permute.xlu0 %3602 }
 0x608   : > { %2830 = vadd.xlane.f32.xlu1 %v2829_v19 }
 0x60a   : > { %v11154_v44 = vpop.eup %10089 }
 0x60b   : > { %v11156_v16 = vpop.eup %10091  ;;  %v2835_v2 = vsel %vm1473_vm3, %v11154_v44, 0.0 }
 0x60c   : > { %2836 = vadd.xlane.f32.xlu1 %v2835_v2  ;;  %v2832_v10 = vsel %vm1473_vm3, %v11156_v16, 0.0 }
 0x60d   : > { %2833 = vadd.xlane.f32.xlu0 %v2832_v10 }
 0x60e   : > { %v11162_v15 = vpop.eup %10093 }
 0x60f   : > { %v2838_v21 = vsel %vm1473_vm3, %v11162_v15, 0.0 }
 0x611   : > { %2839 = vadd.xlane.f32.xlu0 %v2838_v21 }
 0x61d   : > { %3678 = vrot.lane.b32.xlu1 %v10799_v60, %s10413_s12 }
 0x627   : > { %3600 = vrot.lane.b32.xlu0 %v10748_v52, %s10413_s12 }
 0x62b   : > { %3758 = vrot.lane.b32.xlu0 %v10774_v56, %s10415_s24 }
 0x62f   : > { %3756 = vrot.lane.b32.xlu0 %v10770_v55, %s10413_s12 }
 0x633   : > { %3914 = vrot.lane.b32.xlu0 %v10787_v59, %s10415_s24 }
 0x637   : > { %3912 = vrot.lane.b32.xlu0 %v10784_v58, %s10413_s12 }
 0x638   : > { %v2795_v18 = vpop.xlane.xlu1 %2794 }
 0x639   : > { %v2803_v34 = vsub.f32 %v11132_v8, %v2795_v18 }
 0x63b   : > { %v2818_v46 = vmul.f32 1.442695, %v2803_v34  ;;  %4156 = vrot.lane.b32.xlu0 %v10740_v50, %s10416_s25 }
 0x63d   : > { %10095 = vpow2.f32 %v2818_v46 }
 0x647   : > { %v11187_v1 = vpop.eup %10095 }
 0x648   : > { %v2841_v45 = vsel %vm1473_vm3, %v11187_v1, 0.0 }
 0x649   : > { %2842 = vadd.xlane.f32.xlu1 %v2841_v45 }
 0x65a   : > { %3836 = vrot.lane.b32.xlu1 %v10806_v62, %s10415_s24 }
 0x65e   : > { %3834 = vrot.lane.b32.xlu1 %v10815_v63, %s10413_s12 }
 0x660   : > { %v2822_v8 = vpop.xlane.xlu0 %2821 }
 0x661   : > { %10097 = vrcp.f32 %v2822_v8 }
 0x662   : > { %3992 = vrot.lane.b32.xlu1 %v10828_v0, %s10415_s24 }
 0x664   : > { %v2828_v50 = vpop.xlane.xlu0 %2827 }
 0x665   : > { %10099 = vrcp.f32 %v2828_v50 }
 0x666   : > { %3990 = vrot.lane.b32.xlu1 %v10837_v5, %s10413_s12 }
 0x66a   : > { %4233 = vrot.lane.b32.xlu1 %v10744_v51, %s10416_s25  ;;  %v11223_v51 = vpop.permute.xlu1 %3680 }
 0x66b   : > { %v10098_v14 = vpop.eup %10097 }
 0x66c   : > { %v2852_v3 = vmul.f32 %v10098_v14, %v11138_v35 }
 0x66e   : > { %4310 = vrot.lane.b32.xlu1 %v10752_v53, %s10416_s25  ;;  %9494 = vmatmul.mubr.msk.f32.vlgmr.msra.gmra.mrb[34].mxu1 %vm1564_vm4, %v2852_v3 }
 0x66f   : > { %v10100_v19 = vpop.eup %10099  ;;  %9502 = vmatpush3.msk.msra.mxu1 %vm1568_vm2, %v10857_v11  ;;  %9503 = vmatprep.mubr.msk.f32.mxu1 %vm10412_vm0, %v12298_v13 }
 0x670   : > { %9511 = vmatprep.subr.mxu1 %v12298_v13  ;;  %v2854_v2 = vmul.f32 %v10100_v19, %v11142_v7 }
 0x672   : > { %4387 = vrot.lane.b32.xlu1 %v10778_v57, %s10416_s25  ;;  %9504 = vmatmul.mubr.msk.f32.vlgmr.msra.gmra.mrb[36].mxu1 %vm1564_vm4, %v2854_v2 }
 0x673   : > { %9512 = vmatpush3.msk.msra.mxu1 %vm1568_vm2, %v10977_v41  ;;  %9513 = vmatprep.mubr.msk.f32.mxu1 %vm10412_vm0, %v12298_v13 }
 0x674   : > { %9521 = vmatprep.subr.mxu1 %v12298_v13 }
 0x691   : > { %v2825_v53 = vpop.xlane.xlu1 %2824 }
 0x692   : > { %10101 = vrcp.f32 %v2825_v53 }
 0x695   : > { %v2831_v11 = vpop.xlane.xlu1 %2830 }
 0x696   : > { %10103 = vrcp.f32 %v2831_v11 }
 0x699   : > { %v2837_v7 = vpop.xlane.xlu1 %2836 }
 0x69a   : > { %10105 = vrcp.f32 %v2837_v7  ;;  %v2834_v35 = vpop.xlane.xlu0 %2833 }
 0x69b   : > { %10107 = vrcp.f32 %v2834_v35 }
 0x69c   : > { %v10102_v57 = vpop.eup %10101 }
 0x69d   : > { %v2853_v10 = vmul.f32 %v10102_v57, %v11146_v30 }
 0x69e   : > { %v2840_v21 = vpop.xlane.xlu0 %2839 }
 0x69f   : > { %10109 = vrcp.f32 %v2840_v21  ;;  %9499 = vmatmul.mubr.msk.f32.vlgmr.msra.gmra.mrb[22].mxu0 %vm1564_vm4, %v2853_v10 }
 0x6a0   : > { %v10104_v41 = vpop.eup %10103  ;;  %9507 = vmatpush3.msk.msra.mxu0 %vm1568_vm2, %v10859_v12  ;;  %9508 = vmatprep.mubr.msk.f32.mxu0 %vm10412_vm0, %v12298_v13 }
 0x6a1   : > { %9516 = vmatprep.subr.mxu0 %v12298_v13  ;;  %v2855_v18 = vmul.f32 %v10104_v41, %v11150_v37 }
 0x6a2   : > { %v3601_v34 = vpop.permute.xlu0 %3600 }
 0x6a3   : > { %9509 = vmatmul.mubr.msk.f32.vlgmr.msra.gmra.mrb[24].mxu0 %vm1564_vm4, %v2855_v18 }
 0x6a4   : > { %v10106_v46 = vpop.eup %10105  ;;  %9517 = vmatpush3.msk.msra.mxu0 %vm1568_vm2, %v10961_v38  ;;  %9518 = vmatprep.mubr.msk.f32.mxu0 %vm10412_vm0, %v12298_v13 }
 0x6a5   : > { %v10108_v30 = vpop.eup %10107  ;;  %9526 = vmatprep.subr.mxu0 %v12298_v13  ;;  %v2857_v12 = vmul.f32 %v10106_v46, %v11154_v44 }
 0x6a6   : > { %v2856_v45 = vmul.f32 %v10108_v30, %v11156_v16  ;;  %v11241_v8 = vpop.permute.xlu0 %3758 }
 0x6a7   : > { %9519 = vmatmul.mubr.msk.f32.vlgmr.msra.gmra.mrb[26].mxu0 %vm1564_vm4, %v2857_v12 }
 0x6a8   : > { %9514 = vmatmul.mubr.msk.f32.vlgmr.msra.gmra.mrb[38].mxu1 %vm1564_vm4, %v2856_v45  ;;  %9527 = vmatpush3.msk.msra.mxu0 %vm1568_vm2, %v11020_v36 }
 0x6a9   : > { %v10110_v38 = vpop.eup %10109  ;;  %9522 = vmatpush3.msk.msra.mxu1 %vm1568_vm2, %v11012_v28  ;;  %9523 = vmatprep.mubr.msk.f32.mxu1 %vm10412_vm0, %v12298_v13 }
 0x6aa   : > { %v2858_v37 = vmul.f32 %v10110_v38, %v11162_v15  ;;  %9531 = vmatprep.subr.mxu1 %v12298_v13  ;;  %9528 = vmatprep.mubr.msk.f32.mxu0 %vm10412_vm0, %v12298_v13  ;;  %v3757_v44 = vpop.permute.xlu0 %3756  ;;  %v3679_v15 = vpop.permute.xlu1 %3678 }
 0x6ab   : > { %9536 = vmatprep.subr.mxu0 %v12298_v13 }
 0x6ac   : > { %9524 = vmatmul.mubr.msk.f32.vlgmr.msra.gmra.mrb[40].mxu1 %vm1564_vm4, %v2858_v37 }
 0x6ad   : > { %9533 = vmatprep.mubr.msk.f32.mxu1 %vm10412_vm0, %v12298_v13 }
 0x6ae   : > { %v11262_v28 = vpop.permute.xlu0 %3914 }
 0x6b0   : > { %9532 = vmatpush3.xpose.msk.msra.mxu1 %vm880_vm1, %v11191_v22 }
 0x6b1   : > { %9541 = vmatprep.subr.mxu1 %v12298_v13 }
 0x6b2   : > { %v3913_v36 = vpop.permute.xlu0 %3912 }
 0x6b3   : > { %9534 = vmatmul.mubr.msk.f32.vlgmr.msra.gmra.mrb[42].mxu1 %vm880_vm1, %v11174_v40 }
 0x6b4   : > { %9542 = vmatpush3.xpose.msk.msra.mxu1 %vm880_vm1, %v11195_v6  ;;  %9543 = vmatprep.mubr.msk.f32.mxu1 %vm10412_vm0, %v12298_v13 }
 0x6b5   : > { %9551 = vmatprep.subr.mxu1 %v12298_v13 }
 0x6b6   : > { %v11283_v16 = vpop.permute.xlu0 %4156 }
 0x6b7   : > { %9544 = vmatmul.mubr.msk.f32.vlgmr.msra.gmra.mrb[44].mxu1 %vm880_vm1, %v3601_v34 }
 0x6b8   : > { %9552 = vmatpush3.xpose.msk.msra.mxu1 %vm880_vm1, %v11241_v8  ;;  %9553 = vmatprep.mubr.msk.f32.mxu1 %vm10412_vm0, %v12298_v13 }
 0x6b9   : > { %9561 = vmatprep.subr.mxu1 %v12298_v13 }
 0x6bb   : > { %9554 = vmatmul.mubr.msk.f32.vlgmr.msra.gmra.mrb[46].mxu1 %vm880_vm1, %v3757_v44 }
 0x6bc   : > { %9562 = vmatpush3.xpose.msk.msra.mxu1 %vm880_vm1, %v11262_v28  ;;  %9563 = vmatprep.mubr.msk.f32.mxu1 %vm10412_vm0, %v12298_v13 }
 0x6bd   : > { %9571 = vmatprep.subr.mxu1 %v12298_v13 }
 0x6bf   : > { %9564 = vmatmul.mubr.msk.f32.vlgmr.msra.gmra.mrb[48].mxu1 %vm880_vm1, %v3913_v36 }
 0x6c0   : > { %9572 = vmatpush3.msk.msra.mxu1 %vm1568_vm2, %v11283_v16  ;;  %9573 = vmatprep.mubr.msk.f32.mxu1 %vm10412_vm0, %v12298_v13 }
 0x6c1   : > { %9581 = vmatprep.subr.mxu1 %v12298_v13 }
 0x6d6   : > { %v2843_v40 = vpop.xlane.xlu1 %2842 }
 0x6d7   : > { %10111 = vrcp.f32 %v2843_v40 }
 0x6da   : > { %v11291_v50 = vpop.permute.xlu1 %3836 }
 0x6de   : > { %v3835_v3 = vpop.permute.xlu1 %3834 }
 0x6e1   : > { %v10112_v14 = vpop.eup %10111 }
 0x6e2   : > { %v2859_v19 = vmul.f32 %v10112_v14, %v11187_v1  ;;  %v11300_v2 = vpop.permute.xlu1 %3992 }
 0x6e4   : > { %9529 = vmatmul.mubr.msk.f32.vlgmr.msra.gmra.mrb[28].mxu0 %vm1564_vm4, %v2859_v19 }
 0x6e5   : > { %9537 = vmatpush3.xpose.msk.msra.mxu0 %vm880_vm1, %v11170_v31  ;;  %9538 = vmatprep.mubr.msk.f32.mxu0 %vm10412_vm0, %v12298_v13 }
 0x6e6   : > { %9546 = vmatprep.subr.mxu0 %v12298_v13  ;;  %v3991_v1 = vpop.permute.xlu1 %3990 }
 0x6e8   : > { %9539 = vmatmul.mubr.msk.f32.vlgmr.msra.gmra.mrb[30].mxu0 %vm880_vm1, %v11180_v9 }
 0x6e9   : > { %9547 = vmatpush3.xpose.msk.msra.mxu0 %vm880_vm1, %v11223_v51  ;;  %9548 = vmatprep.mubr.msk.f32.mxu0 %vm10412_vm0, %v12298_v13 }
 0x6ea   : > { %9556 = vmatprep.subr.mxu0 %v12298_v13  ;;  %v11321_v9 = vpop.permute.xlu1 %4233 }
 0x6ec   : > { %9549 = vmatmul.mubr.msk.f32.vlgmr.msra.gmra.mrb[32].mxu0 %vm880_vm1, %v3679_v15 }
 0x6ed   : > { %9557 = vmatpush3.xpose.msk.msra.mxu0 %vm880_vm1, %v11291_v50  ;;  %9558 = vmatprep.mubr.msk.f32.mxu0 %vm10412_vm0, %v12298_v13 }
 0x6ee   : > { %9566 = vmatprep.subr.mxu0 %v12298_v13  ;;  %v11373_v24 = vpop.permute.xlu1 %4310 }
 0x6f0   : > { %9559 = vmatmul.mubr.msk.f32.vlgmr.msra.gmra.mrb[34].mxu0 %vm880_vm1, %v3835_v3 }
 0x6f1   : > { %9567 = vmatpush3.xpose.msk.msra.mxu0 %vm880_vm1, %v11300_v2  ;;  %9568 = vmatprep.mubr.msk.f32.mxu0 %vm10412_vm0, %v12298_v13 }
 0x6f2   : > { %9576 = vmatprep.subr.mxu0 %v12298_v13 }
 0x6f4   : > { %9569 = vmatmul.mubr.msk.f32.vlgmr.msra.gmra.mrb[36].mxu0 %vm880_vm1, %v3991_v1 }
 0x6f5   : > { %9577 = vmatpush3.msk.msra.mxu0 %vm1568_vm2, %v11321_v9  ;;  %9578 = vmatprep.mubr.msk.f32.mxu0 %vm10412_vm0, %v12298_v13 }
 0x6f6   : > { %9586 = vmatprep.subr.mxu0 %v12298_v13 }
 0x741   : > { %v11329_v53 = vpop.f32.mrb[34].mxu1 }
 0x742   : > { %v9495_v11 = vpop.f32.mrb[35].mxu1 }
 0x745   : > { %v11331_v7 = vpop.f32.mrb[36].mxu1 }
 0x746   : > { %v9505_v35 = vpop.f32.mrb[37].mxu1 }
 0x772   : > { %v11333_v57 = vpop.f32.mrb[22].mxu0 }
 0x773   : > { %v9500_v10 = vpop.f32.mrb[23].mxu0 }
 0x776   : > { %v11335_v21 = vpop.f32.mrb[24].mxu0 }
 0x777   : > { %v9510_v41 = vpop.f32.mrb[25].mxu0 }
 0x77a   : > { %v11337_v18 = vpop.f32.mrb[26].mxu0 }
 0x77b   : > { %v11339_v34 = vpop.f32.mrb[38].mxu1  ;;  %v9520_v46 = vpop.f32.mrb[27].mxu0 }
 0x77c   : > { %v9515_v30 = vpop.f32.mrb[39].mxu1 }
 0x77f   : > { %v11341_v12 = vpop.f32.mrb[40].mxu1 }
 0x780   : > { %v9525_v45 = vpop.f32.mrb[41].mxu1 }
 0x786   : > { %v3518_v38 = vpop.f32.mrb[42].mxu1 }
 0x787   : > { %v3519_v37 = vadd.f32 %v3518_v38, %v10880_v27  ;;  %v9535_v44 = vpop.f32.mrb[43].mxu1 }
 0x789   : > { %v4068_v36 = vsel %vm1473_vm3, %v3519_v37, -inf }
 0x78a   : > { %4069 = vmax.xlane.f32.xlu0 %v4068_v36  ;;  %v3674_v15 = vpop.f32.mrb[44].mxu1 }
 0x78b   : > { %v3675_v40 = vadd.f32 %v3674_v15, %v10890_v39  ;;  %v9545_v14 = vpop.f32.mrb[45].mxu1 }
 0x78d   : > { %v4074_v3 = vsel %vm1473_vm3, %v3675_v40, -inf }
 0x78e   : > { %4075 = vmax.xlane.f32.xlu0 %v4074_v3  ;;  %v3830_v19 = vpop.f32.mrb[46].mxu1 }
 0x78f   : > { %v9555_v1 = vpop.f32.mrb[47].mxu1  ;;  %v3831_v14 = vadd.f32 %v3830_v19, %v10902_v23 }
 0x792   : > { %v3986_v11 = vpop.f32.mrb[48].mxu1 }
 0x793   : > { %v9565_v35 = vpop.f32.mrb[49].mxu1  ;;  %v3987_v4 = vadd.f32 %v3986_v11, %v10913_v42 }
 0x7b7   : > { %v11347_v10 = vpop.f32.mrb[28].mxu0 }
 0x7b8   : > { %v9530_v41 = vpop.f32.mrb[29].mxu0 }
 0x7bb   : > { %v3596_v46 = vpop.f32.mrb[30].mxu0 }
 0x7bc   : > { %v3597_v30 = vadd.f32 %v3596_v46, %v10885_v32  ;;  %v9540_v45 = vpop.f32.mrb[31].mxu0 }
 0x7bd   : > { %v4080_v45 = vsel %vm1473_vm3, %v3831_v14, -inf }
 0x7be   : > { %v4071_v38 = vsel %vm1473_vm3, %v3597_v30, -inf }
 0x7bf   : > { %4072 = vmax.xlane.f32.xlu1 %v4071_v38  ;;  %v3752_v44 = vpop.f32.mrb[32].mxu0 }
 0x7c0   : > { %v3753_v36 = vadd.f32 %v3752_v44, %v10896_v47  ;;  %v9550_v15 = vpop.f32.mrb[33].mxu0 }
 0x7c1   : > { %v4086_v15 = vsel %vm1473_vm3, %v3987_v4, -inf }
 0x7c2   : > { %v4077_v3 = vsel %vm1473_vm3, %v3753_v36, -inf }
 0x7c3   : > { %v3908_v1 = vpop.f32.mrb[34].mxu0  ;;  %4078 = vmax.xlane.f32.xlu0 %v4077_v3 }
 0x7c4   : > { %v3909_v35 = vadd.f32 %v3908_v1, %v10908_v33  ;;  %v9560_v41 = vpop.f32.mrb[35].mxu0 }
 0x7c6   : > { %v4083_v46 = vsel %vm1473_vm3, %v3909_v35, -inf }
 0x7c7   : > { %4084 = vmax.xlane.f32.xlu1 %v4083_v46  ;;  %v4064_v38 = vpop.f32.mrb[36].mxu0  ;;  %4081 = vmax.xlane.f32.xlu0 %v4080_v45 }
 0x7c8   : > { %v9570_v44 = vpop.f32.mrb[37].mxu0  ;;  %v11364_v19 = vadd.f32 %v4064_v38, %v10923_v26 }
 0x7ca   : > { %v4089_v11 = vsel %vm1473_vm3, %v11364_v19, -inf }
 0x7cb   : > { %4087 = vmax.xlane.f32.xlu0 %v4086_v15 }
 0x7d8   : > { %4541 = vrot.lane.b32.xlu1 %v10806_v62, %s10416_s25 }
 0x7e1   : > { %4464 = vrot.lane.b32.xlu0 %v10774_v56, %s10416_s25 }
 0x7fc   : > { %4090 = vmax.xlane.f32.xlu1 %v4089_v11  ;;  %v11375_v11 = vpop.permute.xlu1 %4387 }
 0x817   : > { %v4070_v3 = vpop.xlane.xlu0 %4069 }
 0x818   : > { %v4092_v1 = vsub.f32 %v3519_v37, %v4070_v3 }
 0x81a   : > { %v4100_v41 = vmul.f32 1.442695, %v4092_v1 }
 0x81b   : > { %v4076_v46 = vpop.xlane.xlu0 %4075 }
 0x81c   : > { %10113 = vpow2.f32 %v4100_v41  ;;  %v4094_v45 = vsub.f32 %v3675_v40, %v4076_v46 }
 0x81e   : > { %v4104_v44 = vmul.f32 1.442695, %v4094_v45 }
 0x820   : > { %10115 = vpow2.f32 %v4104_v44 }
 0x826   : > { %v10114_v15 = vpop.eup %10113 }
 0x827   : > { %v4116_v62 = vsel %vm1473_vm3, %v10114_v15, 0.0 }
 0x828   : > { %4117 = vadd.xlane.f32.xlu0 %v4116_v62 }
 0x82a   : > { %v11369_v56 = vpop.eup %10115 }
 0x82b   : > { %v4122_v38 = vsel %vm1473_vm3, %v11369_v56, 0.0 }
 0x82c   : > { %4123 = vadd.xlane.f32.xlu0 %v4122_v38 }
 0x84c   : > { %v4073_v37 = vpop.xlane.xlu1 %4072 }
 0x84d   : > { %v4093_v3 = vsub.f32 %v3597_v30, %v4073_v37 }
 0x84f   : > { %v4102_v1 = vmul.f32 1.442695, %v4093_v3 }
 0x850   : > { %v4079_v40 = vpop.xlane.xlu0 %4078 }
 0x851   : > { %10117 = vpow2.f32 %v4102_v1  ;;  %v4095_v41 = vsub.f32 %v3753_v36, %v4079_v40 }
 0x853   : > { %v4106_v46 = vmul.f32 1.442695, %v4095_v41 }
 0x854   : > { %v4082_v45 = vpop.xlane.xlu0 %4081 }
 0x855   : > { %10119 = vpow2.f32 %v4106_v46  ;;  %v4096_v44 = vsub.f32 %v3831_v14, %v4082_v45  ;;  %v4085_v14 = vpop.xlane.xlu1 %4084 }
 0x856   : > { %v4097_v3 = vsub.f32 %v3909_v35, %v4085_v14 }
 0x857   : > { %v4108_v62 = vmul.f32 1.442695, %v4096_v44 }
 0x858   : > { %v4088_v1 = vpop.xlane.xlu0 %4087  ;;  %v4110_v40 = vmul.f32 1.442695, %v4097_v3 }
 0x859   : > { %10121 = vpow2.f32 %v4108_v62  ;;  %v4098_v41 = vsub.f32 %v3987_v4, %v4088_v1 }
 0x85a   : > { %10123 = vpow2.f32 %v4110_v40 }
 0x85b   : > { %v11377_v20 = vpop.eup %10117  ;;  %v4112_v46 = vmul.f32 1.442695, %v4098_v41 }
 0x85c   : > { %v4119_v38 = vsel %vm1473_vm3, %v11377_v20, 0.0  ;;  %v11405_v4 = vpop.permute.xlu0 %4464 }
 0x85d   : > { %4120 = vadd.xlane.f32.xlu1 %v4119_v38  ;;  %10125 = vpow2.f32 %v4112_v46 }
 0x85f   : > { %v11381_v17 = vpop.eup %10119 }
 0x860   : > { %v4125_v30 = vsel %vm1473_vm3, %v11381_v17, 0.0 }
 0x861   : > { %4126 = vadd.xlane.f32.xlu1 %v4125_v30 }
 0x863   : > { %v11385_v37 = vpop.eup %10121 }
 0x864   : > { %v4128_v36 = vsel %vm1473_vm3, %v11385_v37, 0.0  ;;  %v11393_v45 = vpop.eup %10123 }
 0x865   : > { %4129 = vadd.xlane.f32.xlu0 %v4128_v36  ;;  %v4131_v44 = vsel %vm1473_vm3, %v11393_v45, 0.0 }
 0x867   : > { %v11397_v62 = vpop.eup %10125 }
 0x872   : > { %4695 = vrot.lane.b32.xlu1 %v10828_v0, %s10416_s25  ;;  %v4134_v0 = vsel %vm1473_vm3, %v11397_v62, 0.0 }
 0x87b   : > { %4618 = vrot.lane.b32.xlu0 %v10787_v59, %s10416_s25  ;;  %v11403_v59 = vpop.permute.xlu1 %4541 }
 0x889   : > { %v4091_v35 = vpop.xlane.xlu1 %4090 }
 0x88a   : > { %v4099_v38 = vsub.f32 %v11364_v19, %v4091_v35 }
 0x88c   : > { %v4114_v36 = vmul.f32 1.442695, %v4099_v38 }
 0x896   : > { %4132 = vadd.xlane.f32.xlu1 %v4131_v44 }
 0x89a   : > { %4135 = vadd.xlane.f32.xlu0 %v4134_v0 }
 0x8a7   : > { %4846 = vrot.lane.b32.xlu1 %v10765_v54, %s10416_s25 }
 0x8b0   : > { %4772 = vrot.lane.b32.xlu0 %v10738_v49, %s10416_s25 }
 0x8b4   : > { %4920 = vrot.lane.b32.xlu0 %v10748_v52, %s10416_s25 }
 0x8b5   : > { %v4118_v30 = vpop.xlane.xlu0 %4117 }
 0x8b6   : > { %10127 = vrcp.f32 %v4118_v30 }
 0x8b8   : > { %5068 = vrot.lane.b32.xlu0 %v10770_v55, %s10416_s25 }
 0x8b9   : > { %v4124_v14 = vpop.xlane.xlu0 %4123 }
 0x8ba   : > { %10129 = vrcp.f32 %v4124_v14 }
 0x8bb   : > { %10131 = vpow2.f32 %v4114_v36 }
 0x8bc   : > { %5216 = vrot.lane.b32.xlu0 %v10784_v58, %s10416_s25 }
 0x8c0   : > { %v10128_v54 = vpop.eup %10127 }
 0x8c1   : > { %v4148_v49 = vmul.f32 %v10128_v54, %v10114_v15 }
 0x8c3   : > { %9574 = vmatmul.mubr.msk.f32.vlgmr.msra.gmra.mrb[50].mxu1 %vm1564_vm4, %v4148_v49 }
 0x8c4   : > { %v10130_v19 = vpop.eup %10129  ;;  %9582 = vmatpush3.msk.msra.mxu1 %vm1568_vm2, %v11373_v24  ;;  %9583 = vmatprep.mubr.msk.f32.mxu1 %vm10412_vm0, %v12298_v13 }
 0x8c5   : > { %v4150_v52 = vmul.f32 %v10130_v19, %v11369_v56  ;;  %9591 = vmatprep.subr.mxu1 %v12298_v13  ;;  %v11423_v55 = vpop.eup %10131 }
 0x8c6   : > { %v4137_v58 = vsel %vm1473_vm3, %v11423_v55, 0.0 }
 0x8c7   : > { %9584 = vmatmul.mubr.msk.f32.vlgmr.msra.gmra.mrb[52].mxu1 %vm1564_vm4, %v4150_v52 }
 0x8c8   : > { %9592 = vmatpush3.msk.msra.mxu1 %vm1568_vm2, %v11405_v4  ;;  %9593 = vmatprep.mubr.msk.f32.mxu1 %vm10412_vm0, %v12298_v13 }
 0x8c9   : > { %9601 = vmatprep.subr.mxu1 %v12298_v13 }
 0x8cb   : > { %4138 = vadd.xlane.f32.xlu1 %v4137_v58 }
 0x8dc   : > { %4994 = vrot.lane.b32.xlu1 %v10799_v60, %s10416_s25 }
 0x8e0   : > { %5142 = vrot.lane.b32.xlu1 %v10815_v63, %s10416_s25 }
 0x8e4   : > { %5290 = vrot.lane.b32.xlu1 %v10837_v5, %s10416_s25 }
 0x8ea   : > { %v4121_v15 = vpop.xlane.xlu1 %4120 }
 0x8eb   : > { %10133 = vrcp.f32 %v4121_v15 }
 0x8ee   : > { %v4127_v56 = vpop.xlane.xlu1 %4126 }
 0x8ef   : > { %10135 = vrcp.f32 %v4127_v56 }
 0x8f2   : > { %v4130_v3 = vpop.xlane.xlu0 %4129 }
 0x8f3   : > { %10137 = vrcp.f32 %v4130_v3 }
 0x8f5   : > { %v10134_v1 = vpop.eup %10133 }
 0x8f6   : > { %v4149_v40 = vmul.f32 %v10134_v1, %v11377_v20  ;;  %v11454_v20 = vpop.permute.xlu0 %4618 }
 0x8f8   : > { %9579 = vmatmul.mubr.msk.f32.vlgmr.msra.gmra.mrb[38].mxu0 %vm1564_vm4, %v4149_v40 }
 0x8f9   : > { %v10136_v41 = vpop.eup %10135  ;;  %9587 = vmatpush3.msk.msra.mxu0 %vm1568_vm2, %v11375_v11  ;;  %9588 = vmatprep.mubr.msk.f32.mxu0 %vm10412_vm0, %v12298_v13 }
 0x8fa   : > { %9596 = vmatprep.subr.mxu0 %v12298_v13  ;;  %v4151_v60 = vmul.f32 %v10136_v41, %v11381_v17  ;;  %v11462_v17 = vpop.permute.xlu1 %4695 }
 0x8fc   : > { %9589 = vmatmul.mubr.msk.f32.vlgmr.msra.gmra.mrb[40].mxu0 %vm1564_vm4, %v4151_v60 }
 0x8fd   : > { %9597 = vmatpush3.msk.msra.mxu0 %vm1568_vm2, %v11403_v59  ;;  %9598 = vmatprep.mubr.msk.f32.mxu0 %vm10412_vm0, %v12298_v13  ;;  %v10138_v63 = vpop.eup %10137 }
 0x8fe   : > { %9606 = vmatprep.subr.mxu0 %v12298_v13  ;;  %v4152_v5 = vmul.f32 %v10138_v63, %v11385_v37 }
 0x900   : > { %9594 = vmatmul.mubr.msk.f32.vlgmr.msra.gmra.mrb[54].mxu1 %vm1564_vm4, %v4152_v5 }
 0x901   : > { %9602 = vmatpush3.msk.msra.mxu1 %vm1568_vm2, %v11454_v20  ;;  %9603 = vmatprep.mubr.msk.f32.mxu1 %vm10412_vm0, %v12298_v13 }
 0x902   : > { %9611 = vmatprep.subr.mxu1 %v12298_v13 }
 0x923   : > { %v4133_v46 = vpop.xlane.xlu1 %4132 }
 0x924   : > { %10139 = vrcp.f32 %v4133_v46 }
 0x927   : > { %v4136_v44 = vpop.xlane.xlu0 %4135 }
 0x928   : > { %10141 = vrcp.f32 %v4136_v44 }
 0x92b   : > { %v4773_v38 = vpop.permute.xlu0 %4772 }
 0x92e   : > { %v10140_v0 = vpop.eup %10139 }
 0x92f   : > { %v4153_v37 = vmul.f32 %v10140_v0, %v11393_v45  ;;  %v4921_v45 = vpop.permute.xlu0 %4920 }
 0x931   : > { %9599 = vmatmul.mubr.msk.f32.vlgmr.msra.gmra.mrb[42].mxu0 %vm1564_vm4, %v4153_v37 }
 0x932   : > { %9607 = vmatpush3.msk.msra.mxu0 %vm1568_vm2, %v11462_v17  ;;  %9608 = vmatprep.mubr.msk.f32.mxu0 %vm10412_vm0, %v12298_v13  ;;  %v10142_v35 = vpop.eup %10141 }
 0x933   : > { %9616 = vmatprep.subr.mxu0 %v12298_v13  ;;  %v4154_v30 = vmul.f32 %v10142_v35, %v11397_v62  ;;  %v5069_v62 = vpop.permute.xlu0 %5068 }
 0x935   : > { %9604 = vmatmul.mubr.msk.f32.vlgmr.msra.gmra.mrb[56].mxu1 %vm1564_vm4, %v4154_v30 }
 0x936   : > { %9612 = vmatpush3.xpose.msk.msra.mxu1 %vm880_vm1, %v11191_v22  ;;  %9613 = vmatprep.mubr.msk.f32.mxu1 %vm10412_vm0, %v12298_v13 }
 0x937   : > { %9621 = vmatprep.subr.mxu1 %v12298_v13  ;;  %v5217_v22 = vpop.permute.xlu0 %5216 }
 0x939   : > { %9614 = vmatmul.mubr.msk.f32.vlgmr.msra.gmra.mrb[58].mxu1 %vm880_vm1, %v4773_v38 }
 0x93a   : > { %9622 = vmatpush3.xpose.msk.msra.mxu1 %vm880_vm1, %v11195_v6  ;;  %9623 = vmatprep.mubr.msk.f32.mxu1 %vm10412_vm0, %v12298_v13  ;;  %v4847_v6 = vpop.permute.xlu1 %4846 }
 0x93b   : > { %9631 = vmatprep.subr.mxu1 %v12298_v13 }
 0x93d   : > { %9624 = vmatmul.mubr.msk.f32.vlgmr.msra.gmra.mrb[60].mxu1 %vm880_vm1, %v4921_v45 }
 0x93e   : > { %9632 = vmatpush3.xpose.msk.msra.mxu1 %vm880_vm1, %v11241_v8  ;;  %9633 = vmatprep.mubr.msk.f32.mxu1 %vm10412_vm0, %v12298_v13 }
 0x93f   : > { %9641 = vmatprep.subr.mxu1 %v12298_v13 }
 0x941   : > { %9634 = vmatmul.mubr.msk.f32.vlgmr.msra.gmra.mrb[62].mxu1 %vm880_vm1, %v5069_v62 }
 0x942   : > { %9642 = vmatpush3.xpose.msk.msra.mxu1 %vm880_vm1, %v11262_v28  ;;  %9643 = vmatprep.mubr.msk.f32.mxu1 %vm10412_vm0, %v12298_v13 }
 0x943   : > { %9651 = vmatprep.subr.mxu1 %v12298_v13 }
 0x945   : > { %9644 = vmatmul.mubr.msk.f32.vlgmr.msra.gmra.mrb[64].mxu1 %vm880_vm1, %v5217_v22 }
 0x946   : > { %9652 = vmatpush3.msk.msra.mxu1 %vm1568_vm2, %v11283_v16  ;;  %9653 = vmatprep.mubr.msk.f32.mxu1 %vm10412_vm0, %v12298_v13 }
 0x947   : > { %9661 = vmatprep.subr.mxu1 %v12298_v13 }
 0x958   : > { %v4139_v8 = vpop.xlane.xlu1 %4138 }
 0x959   : > { %10143 = vrcp.f32 %v4139_v8 }
 0x95c   : > { %v4995_v16 = vpop.permute.xlu1 %4994 }
 0x960   : > { %v5143_v14 = vpop.permute.xlu1 %5142 }
 0x963   : > { %v10144_v28 = vpop.eup %10143 }
 0x964   : > { %v4155_v36 = vmul.f32 %v10144_v28, %v11423_v55 }
 0x966   : > { %9609 = vmatmul.mubr.msk.f32.vlgmr.msra.gmra.mrb[44].mxu0 %vm1564_vm4, %v4155_v36 }
 0x967   : > { %9617 = vmatpush3.xpose.msk.msra.mxu0 %vm880_vm1, %v11170_v31  ;;  %9618 = vmatprep.mubr.msk.f32.mxu0 %vm10412_vm0, %v12298_v13  ;;  %v5291_v31 = vpop.permute.xlu1 %5290 }
 0x968   : > { %9626 = vmatprep.subr.mxu0 %v12298_v13 }
 0x96a   : > { %9619 = vmatmul.mubr.msk.f32.vlgmr.msra.gmra.mrb[46].mxu0 %vm880_vm1, %v4847_v6 }
 0x96b   : > { %9627 = vmatpush3.xpose.msk.msra.mxu0 %vm880_vm1, %v11223_v51  ;;  %9628 = vmatprep.mubr.msk.f32.mxu0 %vm10412_vm0, %v12298_v13 }
 0x96c   : > { %9636 = vmatprep.subr.mxu0 %v12298_v13 }
 0x96e   : > { %9629 = vmatmul.mubr.msk.f32.vlgmr.msra.gmra.mrb[48].mxu0 %vm880_vm1, %v4995_v16 }
 0x96f   : > { %9637 = vmatpush3.xpose.msk.msra.mxu0 %vm880_vm1, %v11291_v50  ;;  %9638 = vmatprep.mubr.msk.f32.mxu0 %vm10412_vm0, %v12298_v13 }
 0x970   : > { %9646 = vmatprep.subr.mxu0 %v12298_v13 }
 0x972   : > { %9639 = vmatmul.mubr.msk.f32.vlgmr.msra.gmra.mrb[50].mxu0 %vm880_vm1, %v5143_v14 }
 0x973   : > { %9647 = vmatpush3.xpose.msk.msra.mxu0 %vm880_vm1, %v11300_v2  ;;  %9648 = vmatprep.mubr.msk.f32.mxu0 %vm10412_vm0, %v12298_v13 }
 0x974   : > { %9656 = vmatprep.subr.mxu0 %v12298_v13 }
 0x976   : > { %9649 = vmatmul.mubr.msk.f32.vlgmr.msra.gmra.mrb[52].mxu0 %vm880_vm1, %v5291_v31 }
 0x977   : > { %9657 = vmatpush3.msk.msra.mxu0 %vm1568_vm2, %v11321_v9  ;;  %9658 = vmatprep.mubr.msk.f32.mxu0 %vm10412_vm0, %v12298_v13 }
 0x978   : > { %9666 = vmatprep.subr.mxu0 %v12298_v13 }
 0x996   : > { %v11533_v51 = vpop.f32.mrb[50].mxu1 }
 0x997   : > { %v9575_v50 = vpop.f32.mrb[51].mxu1 }
 0x99a   : > { %v11535_v2 = vpop.f32.mrb[52].mxu1 }
 0x99b   : > { %v9585_v54 = vpop.f32.mrb[53].mxu1 }
 0x9cb   : > { %v11537_v49 = vpop.f32.mrb[38].mxu0 }
 0x9cc   : > { %v9580_v19 = vpop.f32.mrb[39].mxu0 }
 0x9cf   : > { %v11539_v52 = vpop.f32.mrb[40].mxu0 }
 0x9d0   : > { %v9590_v55 = vpop.f32.mrb[41].mxu0 }
 0x9d3   : > { %v11541_v58 = vpop.f32.mrb[54].mxu1 }
 0x9d4   : > { %v9595_v9 = vpop.f32.mrb[55].mxu1 }
 0xa04   : > { %v11543_v15 = vpop.f32.mrb[42].mxu0 }
 0xa05   : > { %v9600_v56 = vpop.f32.mrb[43].mxu0 }
 0xa08   : > { %v11545_v3 = vpop.f32.mrb[56].mxu1 }
 0xa09   : > { %v9605_v1 = vpop.f32.mrb[57].mxu1 }
 0xa0c   : > { %v4842_v40 = vpop.f32.mrb[58].mxu1 }
 0xa0d   : > { %v4843_v41 = vadd.f32 %v4842_v40, %v10880_v27  ;;  %v9615_v60 = vpop.f32.mrb[59].mxu1 }
 0xa0f   : > { %v5364_v63 = vsel %vm1473_vm3, %v4843_v41, -inf }
 0xa10   : > { %5365 = vmax.xlane.f32.xlu0 %v5364_v63  ;;  %v4990_v5 = vpop.f32.mrb[60].mxu1 }
 0xa11   : > { %v4991_v46 = vadd.f32 %v4990_v5, %v10890_v39  ;;  %v9625_v44 = vpop.f32.mrb[61].mxu1 }
 0xa13   : > { %v5370_v0 = vsel %vm1473_vm3, %v4991_v46, -inf }
 0xa14   : > { %5371 = vmax.xlane.f32.xlu0 %v5370_v0  ;;  %v5138_v37 = vpop.f32.mrb[62].mxu1 }
 0xa15   : > { %v9635_v35 = vpop.f32.mrb[63].mxu1  ;;  %v5139_v16 = vadd.f32 %v5138_v37, %v10902_v23 }
 0xa17   : > { %v5376_v55 = vsel %vm1473_vm3, %v5139_v16, -inf }
 0xa18   : > { %v5286_v38 = vpop.f32.mrb[64].mxu1 }
 0xa19   : > { %v9645_v30 = vpop.f32.mrb[65].mxu1  ;;  %v5287_v19 = vadd.f32 %v5286_v38, %v10913_v42 }
 0xa1b   : > { %v5382_v1 = vsel %vm1473_vm3, %v5287_v19, -inf }
 0xa39   : > { %v11551_v45 = vpop.f32.mrb[44].mxu0 }
 0xa3a   : > { %v9610_v62 = vpop.f32.mrb[45].mxu0 }
 0xa3d   : > { %v4916_v22 = vpop.f32.mrb[46].mxu0 }
 0xa3e   : > { %v4917_v27 = vadd.f32 %v4916_v22, %v10885_v32  ;;  %v9620_v6 = vpop.f32.mrb[47].mxu0 }
 0xa40   : > { %v5367_v8 = vsel %vm1473_vm3, %v4917_v27, -inf }
 0xa41   : > { %5368 = vmax.xlane.f32.xlu1 %v5367_v8  ;;  %v5064_v28 = vpop.f32.mrb[48].mxu0 }
 0xa42   : > { %v5065_v39 = vadd.f32 %v5064_v28, %v10896_v47  ;;  %v9630_v36 = vpop.f32.mrb[49].mxu0 }
 0xa44   : > { %v5373_v14 = vsel %vm1473_vm3, %v5065_v39, -inf }
 0xa45   : > { %v5212_v31 = vpop.f32.mrb[50].mxu0  ;;  %5374 = vmax.xlane.f32.xlu0 %v5373_v14 }
 0xa46   : > { %v5213_v50 = vadd.f32 %v5212_v31, %v10908_v33  ;;  %v9640_v54 = vpop.f32.mrb[51].mxu0 }
 0xa48   : > { %v5379_v32 = vsel %vm1473_vm3, %v5213_v50, -inf }
 0xa49   : > { %5380 = vmax.xlane.f32.xlu1 %v5379_v32  ;;  %v5360_v9 = vpop.f32.mrb[52].mxu0  ;;  %5377 = vmax.xlane.f32.xlu0 %v5376_v55 }
 0xa4a   : > { %v5361_v47 = vadd.f32 %v5360_v9, %v10923_v26  ;;  %v9650_v56 = vpop.f32.mrb[53].mxu0 }
 0xa4c   : > { %v5385_v23 = vsel %vm1473_vm3, %v5361_v47, -inf }
 0xa4d   : > { %5386 = vmax.xlane.f32.xlu1 %v5385_v23  ;;  %5383 = vmax.xlane.f32.xlu0 %v5382_v1 }
 0xa9d   : > { %v5366_v33 = vpop.xlane.xlu0 %5365 }
 0xa9e   : > { %v5388_v40 = vsub.f32 %v4843_v41, %v5366_v33 }
 0xaa0   : > { %v5396_v60 = vmul.f32 1.442695, %v5388_v40 }
 0xaa1   : > { %v5372_v42 = vpop.xlane.xlu0 %5371 }
 0xaa2   : > { %10145 = vpow2.f32 %v5396_v60  ;;  %v5390_v63 = vsub.f32 %v4991_v46, %v5372_v42 }
 0xaa4   : > { %v5400_v5 = vmul.f32 1.442695, %v5390_v63 }
 0xaa6   : > { %10147 = vpow2.f32 %v5400_v5 }
 0xaac   : > { %v11565_v44 = vpop.eup %10145 }
 0xaad   : > { %v5412_v26 = vsel %vm1473_vm3, %v11565_v44, 0.0 }
 0xaae   : > { %5413 = vadd.xlane.f32.xlu0 %v5412_v26 }
 0xab0   : > { %v11569_v0 = vpop.eup %10147 }
 0xab1   : > { %v5418_v37 = vsel %vm1473_vm3, %v11569_v0, 0.0 }
 0xab2   : > { %5419 = vadd.xlane.f32.xlu0 %v5418_v37  ;;  %v9898_v37 = vld [vmem:[#allocation2 + $0x8] sm:$0xff]  }
 0xace   : > { %v5369_v35 = vpop.xlane.xlu1 %5368 }
 0xacf   : > { %v5389_v41 = vsub.f32 %v4917_v27, %v5369_v35 }
 0xad1   : > { %v5398_v38 = vmul.f32 1.442695, %v5389_v41  ;;  %v9900_v41 = vld [vmem:[#allocation2 + $0x18] sm:$0xff]  }
 0xad2   : > { %v5375_v30 = vpop.xlane.xlu0 %5374 }
 0xad3   : > { %10149 = vpow2.f32 %v5398_v38  ;;  %v5391_v46 = vsub.f32 %v5065_v39, %v5375_v30 }
 0xad5   : > { %v5402_v62 = vmul.f32 1.442695, %v5391_v46 }
 0xad6   : > { %v5381_v22 = vpop.xlane.xlu1 %5380  ;;  %v5378_v6 = vpop.xlane.xlu0 %5377 }
 0xad7   : > { %10151 = vpow2.f32 %v5402_v62  ;;  %v5393_v8 = vsub.f32 %v5213_v50, %v5381_v22  ;;  %v5392_v28 = vsub.f32 %v5139_v16, %v5378_v6  ;;  %v9901_v62 = vld [vmem:[#allocation2 + $0x20] sm:$0xff]   ;;  %v9902_v22 = vld [vmem:[#allocation2 + $0x28] sm:$0xff]   ;;  %v9903_v6 = vld [vmem:[#allocation2 + $0x30] sm:$0xff]  }
 0xad9   : > { %v5406_v36 = vmul.f32 1.442695, %v5393_v8  ;;  %v5404_v14 = vmul.f32 1.442695, %v5392_v28 }
 0xada   : > { %v5387_v31 = vpop.xlane.xlu1 %5386  ;;  %v5384_v54 = vpop.xlane.xlu0 %5383 }
 0xadb   : > { %10153 = vpow2.f32 %v5406_v36  ;;  %v5395_v32 = vsub.f32 %v5361_v47, %v5387_v31  ;;  %v5394_v55 = vsub.f32 %v5287_v19, %v5384_v54  ;;  %v9904_v36 = vld [vmem:[#allocation2 + $0x38] sm:$0xff]  }
 0xadc   : > { %10155 = vpow2.f32 %v5404_v14 }
 0xadd   : > { %v11573_v9 = vpop.eup %10149  ;;  %v5410_v27 = vmul.f32 1.442695, %v5395_v32  ;;  %v5408_v56 = vmul.f32 1.442695, %v5394_v55 }
 0xade   : > { %v5415_v39 = vsel %vm1473_vm3, %v11573_v9, 0.0 }
 0xadf   : > { %10157 = vpow2.f32 %v5410_v27  ;;  %5416 = vadd.xlane.f32.xlu1 %v5415_v39 }
 0xae0   : > { %10159 = vpow2.f32 %v5408_v56 }
 0xae1   : > { %v11577_v50 = vpop.eup %10151 }
 0xae2   : > { %v5421_v16 = vsel %vm1473_vm3, %v11577_v50, 0.0 }
 0xae3   : > { %5422 = vadd.xlane.f32.xlu1 %v5421_v16  ;;  %v10267_v16 = vld [vmem:[%s10868_s21] sm:$0xff] }
 0xae5   : > { %v11581_v23 = vpop.eup %10153 }
 0xae6   : > { %v11583_v19 = vpop.eup %10155  ;;  %v5427_v47 = vsel %vm1473_vm3, %v11581_v23, 0.0 }
 0xae7   : > { %5428 = vadd.xlane.f32.xlu1 %v5427_v47  ;;  %v5424_v1 = vsel %vm1473_vm3, %v11583_v19, 0.0 }
 0xae8   : > { %5425 = vadd.xlane.f32.xlu0 %v5424_v1 }
 0xae9   : > { %v11589_v33 = vpop.eup %10157 }
 0xaea   : > { %v11591_v40 = vpop.eup %10159  ;;  %v5433_v60 = vsel %vm1473_vm3, %v11589_v33, 0.0 }
 0xaeb   : > { %5434 = vadd.xlane.f32.xlu1 %v5433_v60  ;;  %v5430_v42 = vsel %vm1473_vm3, %v11591_v40, 0.0 }
 0xaec   : > { %5431 = vadd.xlane.f32.xlu0 %v5430_v42  ;;  %v6342_v42 = vsub.s32 4, %v10704_v61 }
 0xafc   : > { %6046 = vrot.lane.b32.xlu1 %v11333_v57, %s10416_s25 }
 0xb00   : > { %6048 = vrot.lane.b32.xlu1 %v11331_v7, %s10416_s25 }
 0xb02   : > { %6044 = vrot.lane.b32.xlu0 %v11329_v53, %s10416_s25 }
 0xb04   : > { %6050 = vrot.lane.b32.xlu1 %v11335_v21, %s10416_s25 }
 0xb06   : > { %6052 = vrot.lane.b32.xlu0 %v11339_v34, %s10416_s25 }
 0xb08   : > { %6054 = vrot.lane.b32.xlu1 %v11337_v18, %s10416_s25 }
 0xb0a   : > { %6056 = vrot.lane.b32.xlu0 %v11341_v12, %s10416_s25 }
 0xb0c   : > { %6058 = vrot.lane.b32.xlu1 %v11347_v10, %s10416_s25 }
 0xb0e   : > { %6076 = vrot.lane.b32.xlu0 %v11533_v51, %s10413_s12 }
 0xb10   : > { %6078 = vrot.lane.b32.xlu1 %v11537_v49, %s10413_s12 }
 0xb12   : > { %6080 = vrot.lane.b32.xlu0 %v11535_v2, %s10413_s12 }
 0xb14   : > { %6082 = vrot.lane.b32.xlu1 %v11539_v52, %s10413_s12 }
 0xb16   : > { %6084 = vrot.lane.b32.xlu0 %v11541_v58, %s10413_s12 }
 0xb18   : > { %6086 = vrot.lane.b32.xlu1 %v11543_v15, %s10413_s12 }
 0xb1a   : > { %6088 = vrot.lane.b32.xlu0 %v11545_v3, %s10413_s12 }
 0xb1c   : > { %6090 = vrot.lane.b32.xlu1 %v11551_v45, %s10413_s12 }
 0xb3b   : > { %v5414_v53 = vpop.xlane.xlu0 %5413 }
 0xb3c   : > { %10161 = vrcp.f32 %v5414_v53  ;;  %v6343_v53 = vrot.slane %v10267_v16, %v6342_v42 }
 0xb3f   : > { %v5420_v7 = vpop.xlane.xlu0 %5419 }
 0xb40   : > { %10163 = vrcp.f32 %v5420_v7  ;;  %v6349_v7 = vsub.s32 5, %v10704_v61 }
 0xb46   : > { %v10162_v57 = vpop.eup %10161 }
 0xb47   : > { %v5444_v21 = vmul.f32 %v10162_v57, %v11565_v44  ;;  %v6350_v57 = vrot.slane %v10267_v16, %v6349_v7 }
 0xb49   : > { %9654 = vmatmul.mubr.msk.f32.vlgmr.msra.gmra.mrb[66].mxu1 %vm1564_vm4, %v5444_v21  ;;  %v6356_v21 = vsub.s32 6, %v10704_v61 }
 0xb4a   : > { %v10164_v18 = vpop.eup %10163  ;;  %9662 = vmatpush3.msk.msra.mxu1 %vm1568_vm2, %v11373_v24  ;;  %9663 = vmatprep.mubr.msk.f32.mxu1 %vm10412_vm0, %v12298_v13 }
 0xb4b   : > { %v5446_v34 = vmul.f32 %v10164_v18, %v11569_v0  ;;  %9671 = vmatprep.subr.mxu1 %v12298_v13  ;;  %v12304_v0 = vmov 0   ;;  %v6357_v18 = vrot.slane %v10267_v16, %v6356_v21 }
 0xb4d   : > { %9664 = vmatmul.mubr.msk.f32.vlgmr.msra.gmra.mrb[68].mxu1 %vm1564_vm4, %v5446_v34  ;;  %v6309_v34 = vsel %vm1564_vm4, %v10267_v16, 0.0 }
 0xb4e   : > { %9672 = vmatpush3.msk.msra.mxu1 %vm1568_vm2, %v11405_v4  ;;  %9673 = vmatprep.mubr.msk.f32.mxu1 %vm10412_vm0, %v12298_v13 }
 0xb4f   : > { %9681 = vmatprep.subr.mxu1 %v12298_v13 }
 0xb6c   : > { %v5417_v12 = vpop.xlane.xlu1 %5416 }
 0xb6d   : > { %10165 = vrcp.f32 %v5417_v12  ;;  %v6363_v12 = vsub.s32 7, %v10704_v61 }
 0xb70   : > { %v5423_v24 = vpop.xlane.xlu1 %5422 }
 0xb71   : > { %10167 = vrcp.f32 %v5423_v24 }
 0xb74   : > { %v5429_v10 = vpop.xlane.xlu1 %5428 }
 0xb75   : > { %10169 = vrcp.f32 %v5429_v10  ;;  %v5426_v51 = vpop.xlane.xlu0 %5425  ;;  %v6364_v10 = vrot.slane %v10267_v16, %v6363_v12 }
 0xb76   : > { %10171 = vrcp.f32 %v5426_v51 }
 0xb77   : > { %v10166_v2 = vpop.eup %10165 }
 0xb78   : > { %v5445_v49 = vmul.f32 %v10166_v2, %v11573_v9  ;;  %v5435_v52 = vpop.xlane.xlu1 %5434  ;;  %v6321_v9 = vsub.s32 1, %v10704_v61 }
 0xb79   : > { %10173 = vrcp.f32 %v5435_v52  ;;  %v5432_v58 = vpop.xlane.xlu0 %5431 }
 0xb7a   : > { %10175 = vrcp.f32 %v5432_v58  ;;  %9659 = vmatmul.mubr.msk.f32.vlgmr.msra.gmra.mrb[54].mxu0 %vm1564_vm4, %v5445_v49 }
 0xb7b   : > { %v10168_v4 = vpop.eup %10167  ;;  %9667 = vmatpush3.msk.msra.mxu0 %vm1568_vm2, %v11375_v11  ;;  %9668 = vmatprep.mubr.msk.f32.mxu0 %vm10412_vm0, %v12298_v13 }
 0xb7c   : > { %v5447_v15 = vmul.f32 %v10168_v4, %v11577_v50  ;;  %9676 = vmatprep.subr.mxu0 %v12298_v13  ;;  %v6047_v24 = vpop.permute.xlu1 %6046 }
 0xb7d   : > { %v6045_v2 = vpop.permute.xlu0 %6044 }
 0xb7e   : > { %9669 = vmatmul.mubr.msk.f32.vlgmr.msra.gmra.mrb[56].mxu0 %vm1564_vm4, %v5447_v15 }
 0xb7f   : > { %v10170_v3 = vpop.eup %10169  ;;  %9677 = vmatpush3.msk.msra.mxu0 %vm1568_vm2, %v11403_v59  ;;  %9678 = vmatprep.mubr.msk.f32.mxu0 %vm10412_vm0, %v12298_v13 }
 0xb80   : > { %v10172_v45 = vpop.eup %10171  ;;  %v5449_v63 = vmul.f32 %v10170_v3, %v11581_v23  ;;  %9686 = vmatprep.subr.mxu0 %v12298_v13  ;;  %v6322_v23 = vrot.slane %v10267_v16, %v6321_v9  ;;  %v6049_v51 = vpop.permute.xlu1 %6048 }
 0xb81   : > { %v5448_v11 = vmul.f32 %v10172_v45, %v11583_v19  ;;  %v6328_v19 = vsub.s32 2, %v10704_v61  ;;  %v6053_v52 = vpop.permute.xlu0 %6052 }
 0xb82   : > { %9679 = vmatmul.mubr.msk.f32.vlgmr.msra.gmra.mrb[58].mxu0 %vm1564_vm4, %v5449_v63 }
 0xb83   : > { %v10174_v5 = vpop.eup %10173  ;;  %9674 = vmatmul.mubr.msk.f32.vlgmr.msra.gmra.mrb[70].mxu1 %vm1564_vm4, %v5448_v11  ;;  %9687 = vmatpush3.msk.msra.mxu0 %vm1568_vm2, %v11462_v17  ;;  %v9897_v17 = vld [vmem:[#allocation2] sm:$0xff]   ;;  %v6329_v1 = vrot.slane %v10267_v16, %v6328_v19  ;;  %v12308_v19 = vld [vmem:[#allocation27_spill] sm:$0xff] }
 0xb84   : > { %v10176_v44 = vpop.eup %10175  ;;  %v5451_v59 = vmul.f32 %v10174_v5, %v11589_v33  ;;  %9682 = vmatpush3.msk.msra.mxu1 %vm1568_vm2, %v11454_v20  ;;  %9683 = vmatprep.mubr.msk.f32.mxu1 %vm10412_vm0, %v12298_v13  ;;  %v9899_v20 = vld [vmem:[#allocation2 + $0x10] sm:$0xff]   ;;  %v6315_v33 = vrot.slane %v10267_v16, %v10877_v25  ;;  %v6051_v49 = vpop.permute.xlu1 %6050 }
 0xb85   : > { %v5450_v26 = vmul.f32 %v10176_v44, %v11591_v40  ;;  %9688 = vmatprep.mubr.msk.f32.mxu0 %vm10412_vm0, %v12298_v13  ;;  %9691 = vmatprep.subr.bf16.mxu1 %v9897_v17  ;;  %v6335_v40 = vsub.s32 3, %v10704_v61  ;;  %v6057_v4 = vpop.permute.xlu0 %6056  ;;  %v6133_v61 = vsel %vm880_vm1, %v11093_v43, %v6047_v24 }
 0xb86   : > { %9689 = vmatmul.mubr.msk.f32.vlgmr.msra.gmra.mrb[60].mxu0 %vm1564_vm4, %v5451_v59 }
 0xb87   : > { %9684 = vmatmul.mubr.msk.f32.vlgmr.msra.gmra.mrb[72].mxu1 %vm1564_vm4, %v5450_v26  ;;  %6777 = vmatprep.mubr.bf16.mxu0 %v12304_v0  ;;  %v6336_v60 = vrot.slane %v10267_v16, %v6335_v40 }
 0xb88   : > { %9692 = vmatpush3.bf16.msra.mxu1 %v9897_v17  ;;  %v6055_v58 = vpop.permute.xlu1 %6054 }
 0xb89   : > { %9693 = vmatprep.subr.bf16.mxu1 %v9898_v37  ;;  %v6077_v3 = vpop.permute.xlu0 %6076 }
 0xb8c   : > { %9694 = vmatpush3.bf16.msra.mxu1 %v9898_v37  ;;  %v6059_v15 = vpop.permute.xlu1 %6058  ;;  %v6132_v37 = vsel %vm880_vm1, %v11091_v48, %v6045_v2 }
 0xb8d   : > { %9695 = vmatprep.subr.bf16.mxu1 %v9899_v20  ;;  %v6081_v63 = vpop.permute.xlu0 %6080 }
 0xb90   : > { %9696 = vmatpush3.bf16.msra.mxu1 %v9899_v20  ;;  %v6079_v45 = vpop.permute.xlu1 %6078  ;;  %v6141_v20 = vsel %vm6140_vm5, %v6132_v37, %v6077_v3 }
 0xb91   : > { %9697 = vmatprep.subr.bf16.mxu1 %v9900_v41  ;;  %v6085_v5 = vpop.permute.xlu0 %6084 }
 0xb94   : > { %9698 = vmatpush3.bf16.msra.mxu1 %v9900_v41  ;;  %v6083_v11 = vpop.permute.xlu1 %6082 }
 0xb95   : > { %9699 = vmatprep.subr.bf16.mxu1 %v9901_v62  ;;  %v6089_v59 = vpop.permute.xlu0 %6088 }
 0xb98   : > { %9700 = vmatpush3.bf16.msra.mxu1 %v9901_v62  ;;  %v6087_v44 = vpop.permute.xlu1 %6086 }
 0xb99   : > { %9701 = vmatprep.subr.bf16.mxu1 %v9902_v22 }
 0xb9c   : > { %9702 = vmatpush3.bf16.msra.mxu1 %v9902_v22  ;;  %v6091_v26 = vpop.permute.xlu1 %6090  ;;  %v6134_v22 = vsel %vm880_vm1, %v11095_v29, %v6049_v51 }
 0xb9d   : > { %9703 = vmatprep.subr.bf16.mxu1 %v9903_v6 }
 0xba0   : > { %9704 = vmatpush3.bf16.msra.mxu1 %v9903_v6  ;;  %v12305_v6 = vld [vmem:[#allocation23_spill] sm:$0xff] }
 0xba1   : > { %9705 = vmatprep.subr.bf16.mxu1 %v9904_v36  ;;  %v6135_v43 = vsel %vm880_vm1, %v12305_v6, %v6051_v49  ;;  %v12313_v6 = vld [vmem:[#allocation18_spill] sm:$0xff] }
 0xba2   : > { %v6144_v48 = vsel %vm6140_vm5, %v6135_v43, %v6083_v11 }
 0xba4   : > { %9706 = vmatpush3.bf16.msra.mxu1 %v9904_v36 }
 0xba5   : > { %9711 = vmatprep.subr.bf16.mxu1 %v12298_v13 }
 0xc1c   : > { %v5521_v35 = vpop.f32.mrb[66].mxu1 }
 0xc1d   : > { %6108 = vrot.lane.b32.xlu0 %v5521_v35, %s10415_s24  ;;  %v9655_v38 = vpop.f32.mrb[67].mxu1  ;;  %v6142_v35 = vsel %vm6140_vm5, %v6133_v61, %v6079_v45 }
 0xc20   : > { %v5667_v30 = vpop.f32.mrb[68].mxu1 }
 0xc21   : > { %6112 = vrot.lane.b32.xlu0 %v5667_v30, %s10415_s24  ;;  %v9665_v46 = vpop.f32.mrb[69].mxu1 }
 0xc4d   : > { %v5594_v8 = vpop.f32.mrb[54].mxu0 }
 0xc4e   : > { %v9660_v28 = vpop.f32.mrb[55].mxu0  ;;  %6110 = vrot.lane.b32.xlu1 %v5594_v8, %s10415_s24  ;;  %v6143_v8 = vsel %vm6140_vm5, %v6134_v22, %v6081_v63 }
 0xc51   : > { %v5740_v14 = vpop.f32.mrb[56].mxu0 }
 0xc52   : > { %6114 = vrot.lane.b32.xlu1 %v5740_v14, %s10415_s24  ;;  %v9670_v31 = vpop.f32.mrb[57].mxu0 }
 0xc55   : > { %v5886_v54 = vpop.f32.mrb[58].mxu0 }
 0xc56   : > { %v5813_v32 = vpop.f32.mrb[70].mxu1  ;;  %6118 = vrot.lane.b32.xlu1 %v5886_v54, %s10415_s24  ;;  %v9680_v55 = vpop.f32.mrb[59].mxu0  ;;  %v12306_v54 = vld [vmem:[#allocation25_spill] sm:$0xff] }
 0xc57   : > { %6116 = vrot.lane.b32.xlu0 %v5813_v32, %s10415_s24  ;;  %v9675_v27 = vpop.f32.mrb[71].mxu1  ;;  %v6137_v32 = vsel %vm880_vm1, %v12306_v54, %v6055_v58  ;;  %v12307_v55 = vld [vmem:[#allocation24_spill] sm:$0xff] }
 0xc58   : > { %v6136_v9 = vsel %vm880_vm1, %v12307_v55, %v6053_v52  ;;  %v6146_v29 = vsel %vm6140_vm5, %v6137_v32, %v6087_v44 }
 0xc59   : > { %v6032_v56 = vpop.f32.mrb[60].mxu0 }
 0xc5a   : > { %v5959_v39 = vpop.f32.mrb[72].mxu1  ;;  %6122 = vrot.lane.b32.xlu1 %v6032_v56, %s10415_s24  ;;  %v9690_v50 = vpop.f32.mrb[61].mxu0 }
 0xc5b   : > { %6120 = vrot.lane.b32.xlu0 %v5959_v39, %s10415_s24  ;;  %v9685_v47 = vpop.f32.mrb[73].mxu1  ;;  %v6145_v39 = vsel %vm6140_vm5, %v6136_v9, %v6085_v5 }
 0xc5c   : > { %v6139_v47 = vsel %vm880_vm1, %v12308_v19, %v6059_v15  ;;  %v12317_v19 = vld [vmem:[#allocation15_spill] sm:$0xff] }
 0xc5e   : > { %6324 = vbcast.lane.b32.xlu1 %v6322_v23, 256 }
 0xc62   : > { %6331 = vbcast.lane.b32.xlu1 %v6329_v1, 256 }
 0xc66   : > { %6317 = vbcast.lane.b32.xlu1 %v6315_v33, 256  ;;  %v12309_v33 = vld [vmem:[#allocation26_spill] sm:$0xff] }
 0xc67   : > { %v6138_v40 = vsel %vm880_vm1, %v12309_v33, %v6057_v4 }
 0xc6a   : > { %6338 = vbcast.lane.b32.xlu1 %v6336_v60, 256  ;;  %v6148_v60 = vsel %vm6140_vm5, %v6139_v47, %v6091_v26  ;;  %v12310_v26 = vld [vmem:[#allocation16_spill] sm:$0xff] }
 0xc6e   : > { %6345 = vbcast.lane.b32.xlu1 %v6343_v53, 256  ;;  %v6147_v53 = vsel %vm6140_vm5, %v6138_v40, %v6089_v59 }
 0xc72   : > { %6352 = vbcast.lane.b32.xlu1 %v6350_v57, 256 }
 0xc76   : > { %6359 = vbcast.lane.b32.xlu1 %v6357_v18, 256 }
 0xc7a   : > { %6310 = vadd.xlane.f32.xlu0 %v6309_v34 }
 0xc8f   : > { %v6109_v17 = vpop.permute.xlu0 %6108 }
 0xc90   : > { %6366 = vbcast.lane.b32.xlu0 %v6364_v10, 256  ;;  %v6150_v38 = vsel %vm6149_vm6, %v6141_v20, %v6109_v17  ;;  %v12311_v20 = vld [vmem:[#allocation12_spill] sm:$0xff] }
 0xc93   : > { %v6113_v46 = vpop.permute.xlu0 %6112 }
 0xc94   : > { %v6152_v36 = vsel %vm6149_vm6, %v6143_v8, %v6113_v46 }
 0xcc0   : > { %v6111_v41 = vpop.permute.xlu1 %6110 }
 0xcc1   : > { %v6151_v30 = vsel %vm6149_vm6, %v6142_v35, %v6111_v41 }
 0xcc2   : > { %v6166_v62 = vcombine.low %v6150_v38, %v6151_v30  ;;  %v12312_v30 = vld [vmem:[#allocation17_spill] sm:$0xff] }
 0xcc4   : > { %v6115_v28 = vpop.permute.xlu1 %6114 }
 0xcc5   : > { %v6153_v14 = vsel %vm6149_vm6, %v6144_v48, %v6115_v28  ;;  %v12314_v48 = vld [vmem:[#allocation13_spill] sm:$0xff] }
 0xcc6   : > { %v6167_v31 = vcombine.low %v6152_v36, %v6153_v14 }
 0xcc8   : > { %v6119_v27 = vpop.permute.xlu1 %6118  ;;  %v6174_v56 = vpack.c.bf16 %v6167_v31, %v6166_v62  ;;  %v12315_v31 = vld [vmem:[#allocation14_spill] sm:$0xff] }
 0xcc9   : > { %v6155_v50 = vsel %vm6149_vm6, %v6146_v29, %v6119_v27  ;;  %v6117_v16 = vpop.permute.xlu0 %6116  ;;  %v12316_v27 = vld [vmem:[#allocation19_spill] sm:$0xff] }
 0xcca   : > { %v6154_v23 = vsel %vm6149_vm6, %v6145_v39, %v6117_v16  ;;  %9707 = vmatprep.mubr.bf16.mxu1 %v6174_v56 }
 0xccb   : > { %v6168_v1 = vcombine.low %v6154_v23, %v6155_v50 }
 0xccc   : > { %v6123_v42 = vpop.permute.xlu1 %6122 }
 0xccd   : > { %v6157_v7 = vsel %vm6149_vm6, %v6148_v60, %v6123_v42  ;;  %v6121_v57 = vpop.permute.xlu0 %6120 }
 0xcce   : > { %v6156_v21 = vsel %vm6149_vm6, %v6147_v53, %v6121_v57 }
 0xccf   : > { %v6169_v18 = vcombine.low %v6156_v21, %v6157_v7 }
 0xcd0   : > { %v6325_v12 = vpop.permute.xlu1 %6324 }
 0xcd1   : > { %v6175_v34 = vpack.c.bf16 %v6169_v18, %v6168_v1 }
 0xcd3   : > { %9708 = vmatmul.mubr.bf16.vlgmr.msra.gmra.mrb[76].mxu1 %v6175_v34 }
 0xcd4   : > { %9727 = vmatprep.mubr.msk.bf16.mxu1 %vm10412_vm0, %v12298_v13  ;;  %v6332_v24 = vpop.permute.xlu1 %6331 }
 0xcd8   : > { %v6318_v10 = vpop.permute.xlu1 %6317 }
 0xcdc   : > { %v6339_v51 = vpop.permute.xlu1 %6338 }
 0xce0   : > { %v6346_v49 = vpop.permute.xlu1 %6345 }
 0xce4   : > { %v6353_v45 = vpop.permute.xlu1 %6352 }
 0xce8   : > { %v6360_v38 = vpop.permute.xlu1 %6359 }
 0xd07   : > { %v6311_v2 = vpop.xlane.xlu0 %6310 }
 0xd08   : > { %v6432_v52 = vadd.f32 1e-10, %v6311_v2 }
 0xd0a   : > { %v6439_v58 = vrot.slane %v6432_v52, 6  ;;  %v6434_v4 = vrot.slane %v6432_v52, 1  ;;  %v6435_v15 = vrot.slane %v6432_v52, 2  ;;  %10177 = vrcp.f32 %v6432_v52 }
 0xd0b   : > { %v6436_v3 = vrot.slane %v6432_v52, 3  ;;  %v6437_v63 = vrot.slane %v6432_v52, 4  ;;  %v6438_v11 = vrot.slane %v6432_v52, 5  ;;  %v6440_v5 = vrot.slane %v6432_v52, 7  ;;  %v6367_v52 = vpop.permute.xlu0 %6366 }
 0xd0c   : > { %10179 = vrcp.f32 %v6439_v58 }
 0xd0d   : > { %10181 = vrcp.f32 %v6434_v4 }
 0xd0e   : > { %10183 = vrcp.f32 %v6435_v15 }
 0xd0f   : > { %10185 = vrcp.f32 %v6436_v3 }
 0xd10   : > { %10187 = vrcp.f32 %v6437_v63 }
 0xd11   : > { %10189 = vrcp.f32 %v6438_v11 }
 0xd12   : > { %10191 = vrcp.f32 %v6440_v5 }
 0xd14   : > { %v11747_v32 = vpop.eup %10177 }
 0xd16   : > { %v11755_v39 = vpop.eup %10179 }
 0xd17   : > { %v10182_v1 = vpop.eup %10181 }
 0xd18   : > { %v10184_v53 = vpop.eup %10183 }
 0xd19   : > { %v10186_v34 = vpop.eup %10185 }
 0xd1a   : > { %v10188_v58 = vpop.eup %10187 }
 0xda6   : > { %v9709_v44 = vpop.f32.mrb[76].mxu1 }
 0xda7   : > { %v6295_v59 = vcombine.high %v9709_v44, %v9709_v44  ;;  %v11728_v17 = vadd.f32 %v9709_v44, %v12310_v26  ;;  %v6274_v61 = vpop.f32.mrb[77].mxu1 }
 0xda8   : > { %v6293_v37 = vcombine.high %v6274_v61, %v6274_v61  ;;  %v11731_v35 = vadd.f32 %v6274_v61, %v12311_v20  ;;  %v9710_v41 = vpop.f32.mrb[78].mxu1 }
 0xda9   : > { %v11734_v46 = vadd.f32 %v6295_v59, %v12312_v30  ;;  %v6372_v62 = vmul.f32 %v6346_v49, %v11728_v17  ;;  %v6296_v22 = vcombine.high %v9710_v41, %v9710_v41  ;;  %v11738_v43 = vadd.f32 %v9710_v41, %v12313_v6  ;;  %v6277_v8 = vpop.f32.mrb[79].mxu1 }
 0xdaa   : > { %v11741_v28 = vadd.f32 %v6293_v37, %v12314_v48  ;;  %v6368_v36 = vmul.f32 %v6318_v10, %v11731_v35  ;;  %v6294_v14 = vcombine.high %v6277_v8, %v6277_v8  ;;  %v11745_v54 = vadd.f32 %v6277_v8, %v12315_v31 }
 0xdab   : > { %v6373_v55 = vmul.f32 %v6353_v45, %v11734_v46  ;;  %v6404_v9 = vsel %vm1568_vm2, %v6372_v62, 0.0  ;;  %v6374_v29 = vmul.f32 %v6360_v38, %v11738_v43  ;;  %v11753_v56 = vadd.f32 %v6296_v22, %v12316_v27  ;;  %v10190_v45 = vpop.eup %10189 }
 0xdac   : > { %v6405_v50 = vrot.slane %v6404_v9, 4  ;;  %v6369_v16 = vmul.f32 %v6325_v12, %v11741_v28  ;;  %v6376_v23 = vsel %vm1568_vm2, %v6368_v36, 0.0  ;;  %v11760_v47 = vadd.f32 %v6294_v14, %v12317_v19  ;;  %v10192_v59 = vpop.eup %10191 }
 0xdad   : > { %v6411_v33 = vsel %vm1568_vm2, %v6373_v55, 0.0  ;;  %v6377_v40 = vrot.slane %v6376_v23, 4  ;;  %v6370_v60 = vmul.f32 %v6332_v24, %v11745_v54  ;;  %v6418_v42 = vsel %vm1568_vm2, %v6374_v29, 0.0 }
 0xdae   : > { %v6406_v7 = vadd.f32 %v6405_v50, %v6404_v9  ;;  %v6412_v57 = vrot.slane %v6411_v33, 4  ;;  %v6383_v21 = vsel %vm1568_vm2, %v6369_v16, 0.0  ;;  %v6371_v18 = vmul.f32 %v6339_v51, %v11760_v47 }
 0xdaf   : > { %v6378_v12 = vadd.f32 %v6377_v40, %v6376_v23  ;;  %v6384_v10 = vrot.slane %v6383_v21, 4  ;;  %v6390_v2 = vsel %vm1568_vm2, %v6370_v60, 0.0  ;;  %v6419_v49 = vrot.slane %v6418_v42, 4 }
 0xdb0   : > { %v6407_v4 = vrot.slane %v6406_v7, 2  ;;  %v6413_v15 = vadd.f32 %v6412_v57, %v6411_v33  ;;  %v6391_v24 = vrot.slane %v6390_v2, 4  ;;  %v6397_v3 = vsel %vm1568_vm2, %v6371_v18, 0.0 }
 0xdb1   : > { %v6379_v63 = vrot.slane %v6378_v12, 2  ;;  %v6385_v11 = vadd.f32 %v6384_v10, %v6383_v21  ;;  %v6398_v5 = vrot.slane %v6397_v3, 4  ;;  %v6420_v44 = vadd.f32 %v6419_v49, %v6418_v42 }
 0xdb2   : > { %v6408_v51 = vadd.f32 %v6407_v4, %v6406_v7  ;;  %v6414_v26 = vrot.slane %v6413_v15, 2  ;;  %v6392_v61 = vadd.f32 %v6391_v24, %v6390_v2  ;;  %v6375_v37 = vmul.f32 %v6367_v52, %v11753_v56 }
 0xdb3   : > { %v6380_v20 = vadd.f32 %v6379_v63, %v6378_v12  ;;  %v6386_v41 = vrot.slane %v6385_v11, 2  ;;  %v6399_v38 = vadd.f32 %v6398_v5, %v6397_v3  ;;  %v6421_v30 = vrot.slane %v6420_v44, 2 }
 0xdb4   : > { %v6409_v62 = vrot.slane %v6408_v51, 1  ;;  %v6415_v22 = vadd.f32 %v6414_v26, %v6413_v15  ;;  %v6393_v6 = vrot.slane %v6392_v61, 2  ;;  %v6425_v8 = vsel %vm1568_vm2, %v6375_v37, 0.0 }
 0xdb5   : > { %v6381_v48 = vrot.slane %v6380_v20, 1  ;;  %v6387_v36 = vadd.f32 %v6386_v41, %v6385_v11  ;;  %v6400_v14 = vrot.slane %v6399_v38, 2  ;;  %v6422_v31 = vadd.f32 %v6421_v30, %v6420_v44 }
 0xdb6   : > { %v6410_v55 = vadd.f32 %v6409_v62, %v6408_v51  ;;  %v6416_v9 = vrot.slane %v6415_v22, 1  ;;  %v6394_v29 = vadd.f32 %v6393_v6, %v6392_v61  ;;  %v6426_v27 = vrot.slane %v6425_v8, 4 }
 0xdb7   : > { %v6382_v50 = vadd.f32 %v6381_v48, %v6380_v20  ;;  %v6388_v16 = vrot.slane %v6387_v36, 1  ;;  %v6401_v23 = vadd.f32 %v6400_v14, %v6399_v38  ;;  %v6423_v19 = vrot.slane %v6422_v31, 1  ;;  %v9907_v14 = vld [vmem:[#allocation4 + $0x4] ss:$12 sps:$4 sm:$0xff]  }
 0xdb8   : > { %v6417_v33 = vadd.f32 %v6416_v9, %v6415_v22  ;;  %v6395_v40 = vrot.slane %v6394_v29, 1  ;;  %v6427_v60 = vadd.f32 %v6426_v27, %v6425_v8  ;;  %v11771_v12 = vmul.f32 %v10188_v58, %v6410_v55  ;;  %v9911_v55 = vld [vmem:[#allocation4 + $0x1c] ss:$12 sps:$4 sm:$0xff]   ;;  %6745 = vmatprep.subr.bf16.mxu0 %v9907_v14  ;;  %v9912_v9 = vld [vmem:[#allocation4 + $0x20] ss:$12 sps:$4 sm:$0xff]  }
 0xdb9   : > { %v6389_v42 = vadd.f32 %v6388_v16, %v6387_v36  ;;  %v6402_v7 = vrot.slane %v6401_v23, 1  ;;  %v6424_v57 = vadd.f32 %v6423_v19, %v6422_v31  ;;  %v11774_v2 = vmul.f32 %v11747_v32, %v6382_v50  ;;  %v9905_v36 = vld [vmem:[#allocation4] ss:$12 sps:$4 sm:$0xff]   ;;  %v9908_v31 = vld [vmem:[#allocation4 + $0x8] ss:$12 sps:$4 sm:$0xff]  }
 0xdba   : > { %v6396_v21 = vadd.f32 %v6395_v40, %v6394_v29  ;;  %v6428_v18 = vrot.slane %v6427_v60, 2  ;;  %v11778_v52 = vmul.f32 %v10190_v45, %v6417_v33  ;;  %9712 = vmatpush3.bf16.msra.mxu1 %v9908_v31  ;;  %6746 = vmatpush1.bf16.msra.mxu0 %v9905_v36  ;;  %v9909_v29 = vld [vmem:[#allocation4 + $0x18] ss:$12 sps:$4 sm:$0xff]   ;;  %v9915_v27 = vld [vmem:[#allocation4 + $0x34] ss:$12 sps:$4 sm:$0xff]  }
 0xdbb   : > { %v6403_v10 = vadd.f32 %v6402_v7, %v6401_v23  ;;  %v11776_v49 = vmul.f32 %v10182_v1, %v6389_v42  ;;  %v11783_v15 = vmul.f32 %v11755_v39, %v6424_v57  ;;  %v6470_v1 = vmul.f32 %v11771_v12, %v11771_v12  ;;  %9713 = vmatprep.subr.bf16.mxu1 %v12298_v13  ;;  %v9916_v50 = vld [vmem:[#allocation4 + $0x38] ss:$12 sps:$4 sm:$0xff]   ;;  %v9913_v16 = vld [vmem:[#allocation4 + $0x30] ss:$12 sps:$4 sm:$0xff]   ;;  %v9917_v33 = vld [vmem:[#allocation4 + $0x48] ss:$12 sps:$4 sm:$0xff]  }
 0xdbc   : > { %v11780_v4 = vmul.f32 %v10184_v53, %v6396_v21  ;;  %v6429_v24 = vadd.f32 %v6428_v18, %v6427_v60  ;;  %v6466_v53 = vmul.f32 %v11774_v2, %v11774_v2  ;;  %6747 = vmatprep.subr.bf16.mxu0 %v9911_v55  ;;  %v9919_v23 = vld [vmem:[#allocation4 + $0x4c] ss:$12 sps:$4 sm:$0xff]   ;;  %v9920_v19 = vld [vmem:[#allocation4 + $0x50] ss:$12 sps:$4 sm:$0xff]   ;;  %v9924_v60 = vld [vmem:[#allocation4 + $0x68] ss:$12 sps:$4 sm:$0xff]  }
 0xdbd   : > { %v11785_v3 = vmul.f32 %v10186_v34, %v6403_v10  ;;  %v6467_v58 = vmul.f32 %v11776_v49, %v11776_v49  ;;  %v6471_v34 = vmul.f32 %v11778_v52, %v11778_v52  ;;  %v6472_v44 = vmul.f32 %v11783_v15, %v11783_v15  ;;  %v9923_v40 = vld [vmem:[#allocation4 + $0x64] ss:$12 sps:$4 sm:$0xff]   ;;  %v9921_v42 = vld [vmem:[#allocation4 + $0x60] ss:$12 sps:$4 sm:$0xff]   ;;  %v9927_v7 = vld [vmem:[#allocation4 + $0x7c] ss:$12 sps:$4 sm:$0xff]  }
 0xdbe   : > { %v6468_v32 = vmul.f32 %v11780_v4, %v11780_v4  ;;  %v6430_v63 = vrot.slane %v6429_v24, 1  ;;  %v6491_v20 = vrot.slane %v6470_v1, 4  ;;  %9714 = vmatpush3.bf16.msra.mxu1 %v9912_v9  ;;  %6748 = vmatpush1.bf16.msra.mxu0 %v9909_v29  ;;  %v9928_v57 = vld [vmem:[#allocation4 + $0x80] ss:$12 sps:$4 sm:$0xff]   ;;  %v9925_v21 = vld [vmem:[#allocation4 + $0x78] ss:$12 sps:$4 sm:$0xff]  }
 0xdbf   : > { %v6469_v39 = vmul.f32 %v11785_v3, %v11785_v3  ;;  %v6482_v45 = vrot.slane %v6467_v58, 7  ;;  %v6494_v38 = vrot.slane %v6471_v34, 3  ;;  %v6497_v22 = vrot.slane %v6472_v44, 2  ;;  %9715 = vmatprep.subr.bf16.mxu1 %v12298_v13  ;;  %6749 = vmatprep.subr.bf16.mxu0 %v9915_v27  ;;  %v9931_v18 = vld [vmem:[#allocation4 + $0x94] ss:$12 sps:$4 sm:$0xff]  }
 0xdc0   : > { %v6485_v11 = vrot.slane %v6468_v32, 6  ;;  %v6431_v5 = vadd.f32 %v6430_v63, %v6429_v24  ;;  %v9932_v10 = vld [vmem:[#allocation4 + $0x98] ss:$12 sps:$4 sm:$0xff]   ;;  %v9929_v24 = vld [vmem:[#allocation4 + $0x90] ss:$12 sps:$4 sm:$0xff]  }
 0xdc1   : > { %v6484_v51 = vsel %vm6483_vm7, %v6482_v45, %v6466_v53  ;;  %v6488_v26 = vrot.slane %v6469_v39, 5  ;;  %v9935_v58 = vld [vmem:[#allocation4 + $0xac] ss:$12 sps:$4 sm:$0xff]   ;;  %v9936_v32 = vld [vmem:[#allocation4 + $0xb0] ss:$12 sps:$4 sm:$0xff]  }
 0xdc2   : > { %v11802_v61 = vmul.f32 %v10192_v59, %v6431_v5  ;;  %v6487_v37 = vsel %vm6486_vm8, %v6485_v11, %v6484_v51  ;;  %9716 = vmatpush3.bf16.msra.mxu1 %v9916_v50  ;;  %6750 = vmatpush1.bf16.msra.mxu0 %v9913_v16  ;;  %v9933_v63 = vld [vmem:[#allocation4 + $0xa8] ss:$12 sps:$4 sm:$0xff]   ;;  %v9026_v45 = vld [vmem:[%s12249_s3 + $0x1] ss:$0 sm:$0xff] }
 0xdc3   : > { %v6490_v41 = vsel %vm6489_vm9, %v6488_v26, %v6487_v37  ;;  %9717 = vmatprep.subr.bf16.mxu1 %v12298_v13  ;;  %6751 = vmatprep.subr.bf16.mxu0 %v9919_v23 }
 0xdc4   : > { %v6473_v30 = vmul.f32 %v11802_v61, %v11802_v61  ;;  %v6493_v62 = vsel %vm6492_vm10, %v6491_v20, %v6490_v41 }
 0xdc5   : > { %v6496_v6 = vsel %vm6495_vm11, %v6494_v38, %v6493_v62 }
 0xdc6   : > { %v6499_v59 = vsel %vm6498_vm12, %v6497_v22, %v6496_v6  ;;  %v6500_v8 = vrot.slane %v6473_v30, 1  ;;  %9718 = vmatpush3.bf16.msra.mxu1 %v9920_v19  ;;  %6752 = vmatpush1.bf16.msra.mxu0 %v9917_v33 }
 0xdc7   : > { %9719 = vmatprep.subr.bf16.mxu1 %v12298_v13  ;;  %6753 = vmatprep.subr.bf16.mxu0 %v9923_v40 }
 0xdc8   : > { %v6502_v48 = vsel %vm6501_vm13, %v6500_v8, %v6499_v59 }
 0xdc9   : > { %6504 = vadd.xlane.f32.xlu1 %v6502_v48 }
 0xdca   : > { %9720 = vmatpush3.bf16.msra.mxu1 %v9924_v60  ;;  %6754 = vmatpush1.bf16.msra.mxu0 %v9921_v42 }
 0xdcb   : > { %9721 = vmatprep.subr.bf16.mxu1 %v12298_v13  ;;  %6755 = vmatprep.subr.bf16.mxu0 %v9927_v7 }
 0xdce   : > { %9722 = vmatpush3.bf16.msra.mxu1 %v9928_v57  ;;  %6756 = vmatpush1.bf16.msra.mxu0 %v9925_v21 }
 0xdcf   : > { %9723 = vmatprep.subr.bf16.mxu1 %v12298_v13  ;;  %6757 = vmatprep.subr.bf16.mxu0 %v9931_v18 }
 0xdd2   : > { %9724 = vmatpush3.bf16.msra.mxu1 %v9932_v10  ;;  %6758 = vmatpush1.bf16.msra.mxu0 %v9929_v24 }
 0xdd3   : > { %9725 = vmatprep.subr.bf16.mxu1 %v12298_v13  ;;  %6759 = vmatprep.subr.bf16.mxu0 %v9935_v58 }
 0xdd6   : > { %9726 = vmatpush3.bf16.msra.mxu1 %v9936_v32  ;;  %6760 = vmatpush1.bf16.msra.mxu0 %v9933_v63 }
 0xdd7   : > { %9771 = vmatprep.subr.bf16.mxu1 %v12298_v13  ;;  %9731 = vmatprep.subr.mxu0 %v12298_v13 }
 0xe56   : > { %v6505_v1 = vpop.xlane.xlu1 %6504 }
 0xe57   : > { %v6506_v53 = vmul.f32 0.0078125, %v6505_v1 }
 0xe59   : > { %v6507_v39 = vadd.f32 1e-05, %v6506_v53 }
 0xe5b   : > { %10193 = vrsqrt.f32 %v6507_v39 }
 0xe65   : > { %v10194_v34 = vpop.eup %10193 }
 0xe66   : > { %v6510_v11 = vrot.slane %v10194_v34, 1  ;;  %v6511_v5 = vrot.slane %v10194_v34, 2  ;;  %v6512_v44 = vrot.slane %v10194_v34, 3  ;;  %v6513_v51 = vrot.slane %v10194_v34, 4 }
 0xe67   : > { %v6514_v26 = vrot.slane %v10194_v34, 5  ;;  %v6515_v37 = vrot.slane %v10194_v34, 6  ;;  %v6516_v20 = vrot.slane %v10194_v34, 7  ;;  %v6525_v41 = vmul.f32 %v10194_v34, %v11774_v2 }
 0xe68   : > { %v6526_v38 = vmul.f32 %v6510_v11, %v11776_v49  ;;  %v6527_v30 = vmul.f32 %v6511_v5, %v11780_v4  ;;  %v6528_v62 = vmul.f32 %v6512_v44, %v11785_v3  ;;  %v6529_v22 = vmul.f32 %v6513_v51, %v11771_v12 }
 0xe69   : > { %v6530_v6 = vmul.f32 %v6514_v26, %v11778_v52  ;;  %v6531_v59 = vmul.f32 %v6515_v37, %v11783_v15  ;;  %v6532_v8 = vmul.f32 %v6516_v20, %v11802_v61  ;;  %v6537_v48 = vmul.f32 %v9026_v45, %v6525_v41 }
 0xe6a   : > { %v6538_v36 = vmul.f32 %v9026_v45, %v6526_v38  ;;  %v6539_v14 = vmul.f32 %v9026_v45, %v6527_v30  ;;  %v6540_v31 = vmul.f32 %v9026_v45, %v6528_v62  ;;  %v6541_v55 = vmul.f32 %v9026_v45, %v6529_v22  ;;  %v11862_v30 = vld [vmem:[%s444_s15] ss:$0 sm:$0xff] }
 0xe6b   : > { %v6542_v2 = vmul.f32 %v9026_v45, %v6530_v6  ;;  %v6543_v9 = vmul.f32 %v9026_v45, %v6531_v59  ;;  %v6544_v49 = vmul.f32 %v9026_v45, %v6532_v8  ;;  %v6545_v29 = vpack.c.bf16 %v6537_v48, %v6537_v48 }
 0xe6c   : > { %v6546_v4 = vpack.c.bf16 %v6538_v36, %v6538_v36  ;;  %v6547_v27 = vpack.c.bf16 %v6539_v14, %v6539_v14  ;;  %v6548_v3 = vpack.c.bf16 %v6540_v31, %v6540_v31  ;;  %v6549_v50 = vpack.c.bf16 %v6541_v55, %v6541_v55 }
 0xe6d   : > { %v6550_v12 = vpack.c.bf16 %v6542_v2, %v6542_v2  ;;  %v6551_v16 = vpack.c.bf16 %v6543_v9, %v6543_v9  ;;  %v6552_v52 = vpack.c.bf16 %v6544_v49, %v6544_v49  ;;  %v6593_v33 = vunpack.c.l.b16 %v6545_v29 }
 0xe6e   : > { %v6594_v23 = vunpack.c.l.b16 %v6546_v4  ;;  %v6595_v15 = vunpack.c.l.b16 %v6547_v27  ;;  %v6596_v19 = vunpack.c.l.b16 %v6548_v3  ;;  %v6597_v61 = vunpack.c.l.b16 %v6549_v50 }
 0xe6f   : > { %v6598_v40 = vunpack.c.l.b16 %v6550_v12  ;;  %v6599_v7 = vunpack.c.l.b16 %v6551_v16  ;;  %v6600_v57 = vunpack.c.l.b16 %v6552_v52 }
 0xe70   : > { %v6601_v60 = vrot.slane %v6594_v23, 7  ;;  %v6603_v42 = vrot.slane %v6595_v15, 6  ;;  %v6605_v18 = vrot.slane %v6596_v19, 5  ;;  %v6607_v24 = vrot.slane %v6597_v61, 4 }
 0xe71   : > { %v6609_v32 = vrot.slane %v6598_v40, 3  ;;  %v6611_v1 = vrot.slane %v6599_v7, 2  ;;  %v6613_v39 = vrot.slane %v6600_v57, 1 }
 0xe72   : > { %v6602_v21 = vsel %vm6483_vm7, %v6601_v60, %v6593_v33 }
 0xe73   : > { %v6604_v10 = vsel %vm6486_vm8, %v6603_v42, %v6602_v21 }
 0xe74   : > { %v6606_v58 = vsel %vm6489_vm9, %v6605_v18, %v6604_v10 }
 0xe75   : > { %v6608_v63 = vsel %vm6492_vm10, %v6607_v24, %v6606_v58 }
 0xe76   : > { %v6610_v53 = vsel %vm6495_vm11, %v6609_v32, %v6608_v63 }
 0xe77   : > { %v6612_v34 = vsel %vm6498_vm12, %v6611_v1, %v6610_v53 }
 0xe78   : > { %v6614_v45 = vsel %vm6501_vm13, %v6613_v39, %v6612_v34 }
 0xe79   : > { %v6615_v11 = vpack.c.b16 %v6614_v45, %v6614_v45 }
 0xe7b   : > { %6778 = vmatmul.mubr.bf16.vlgmr.msra.gmra.mrb[64].mxu0 %v6615_v11  ;;  %9728 = vmatmul.mubr.bf16.vlgmr.msra.gmra.mrb[80].mxu1 %v6615_v11 }
 0xe7c   : > { %9733 = vmatprep.mubr.msk.f32.mxu0 %vm10412_vm0, %v12298_v13  ;;  %9787 = vmatprep.mubr.msk.bf16.mxu1 %vm10412_vm0, %v12298_v13 }
 0xf4e   : > { %v11843_v5 = vpop.f32.mrb[64].mxu0  ;;  %v11845_v44 = vpop.f32.mrb[80].mxu1 }
 0xf4f   : > { %v11847_v51 = vpop.f32.mrb[65].mxu0  ;;  %v9729_v26 = vpop.f32.mrb[81].mxu1 }
 0xf50   : > { %v6783_v37 = vpop.f32.mrb[66].mxu0  ;;  %v6823_v20 = vpop.f32.mrb[82].mxu1  ;;  %9732 = vmatpush3.xpose.msk.msra.mxu0 %vm880_vm1, %v11847_v51 }
 0xf51   : > { %v6784_v41 = vpop.f32.mrb[67].mxu0  ;;  %v9730_v38 = vpop.f32.mrb[83].mxu1  ;;  %9736 = vmatprep.subr.mxu0 %v12298_v13 }
 0xf53   : > { %9734 = vmatmul.mubr.msk.f32.vlgmr.msra.gmra.mrb[62].mxu0 %vm880_vm1, %v11843_v5 }
 0xf54   : > { %9737 = vmatpush3.msra.mxu0 %v11845_v44  ;;  %9738 = vmatprep.mubr.msk.f32.mxu0 %vm10412_vm0, %v12298_v13 }
 0xf55   : > { %9741 = vmatprep.subr.mxu0 %v12298_v13 }
0x1026   : > { %v6905_v62 = vpop.f32.mrb[62].mxu0 }
0x1027   : > { %v6906_v22 = vadd.f32 %v11862_v30, %v6905_v62  ;;  %v9735_v6 = vpop.f32.mrb[63].mxu0 }
0x1029   : > { %v6910_v59 = vsel %vm6909_vm14, %v6906_v22, -inf }
0x102a   : > { %6911 = vmax.xlane.f32.xlu0 %v6910_v59 }
0x1040   : > { %6994 = vrot.lane.b32.xlu0 %v11843_v5, %s10415_s24 }
0x10b7   : > { %v6912_v8 = vpop.xlane.xlu0 %6911 }
0x10b8   : > { %v6913_v48 = vsub.f32 %v6906_v22, %v6912_v8 }
0x10ba   : > { %v6914_v36 = vmul.f32 1.442695, %v6913_v48 }
0x10bb   : > { %v6995_v29 = vpop.permute.xlu0 %6994 }
0x10bc   : > { %10195 = vpow2.f32 %v6914_v36 }
0x10c6   : > { %v10196_v14 = vpop.eup %10195 }
0x10c7   : > { %v6916_v31 = vsel %vm6909_vm14, %v10196_v14, 0.0 }
0x10c8   : > { %6917 = vadd.xlane.f32.xlu1 %v6916_v31 }
0x10d9   : > { %6996 = vrot.lane.b32.xlu1 %v11847_v51, %s10415_s24 }
0x1155   : > { %v6918_v55 = vpop.xlane.xlu1 %6917 }
0x1156   : > { %10197 = vrcp.f32 %v6918_v55 }
0x1159   : > { %v6997_v49 = vpop.permute.xlu1 %6996 }
0x1160   : > { %v10198_v2 = vpop.eup %10197 }
0x1161   : > { %v6920_v9 = vmul.f32 %v10198_v2, %v10196_v14 }
0x1163   : > { %9739 = vmatmul.mubr.msk.f32.vlgmr.msra.gmra.mrb[68].mxu0 %vm6909_vm14, %v6920_v9  ;;  %v9938_v9 = vld [vmem:[#allocation6 + $0x8] sm:$0xff]  }
0x1164   : > { %9742 = vmatpush3.xpose.msk.msra.mxu0 %vm880_vm1, %v6997_v49  ;;  %9743 = vmatprep.mubr.msk.f32.mxu0 %vm10412_vm0, %v12298_v13  ;;  %v9939_v49 = vld [vmem:[#allocation6 + $0x10] sm:$0xff]  }
0x1165   : > { %9746 = vmatprep.subr.mxu0 %v12298_v13 }
0x1167   : > { %9744 = vmatmul.mubr.msk.f32.vlgmr.msra.gmra.mrb[70].mxu0 %vm880_vm1, %v6995_v29  ;;  %v9940_v29 = vld [vmem:[#allocation6 + $0x18] sm:$0xff]  }
0x1168   : > { %9748 = vmatprep.mubr.msk.f32.mxu0 %vm10412_vm0, %v12298_v13 }
0x1236   : > { %v11879_v4 = vpop.f32.mrb[68].mxu0 }
0x1237   : > { %v9740_v27 = vpop.f32.mrb[69].mxu0 }
0x1238   : > { %v9941_v27 = vld [vmem:[#allocation6 + $0x20] sm:$0xff]  }
0x123a   : > { %v7068_v3 = vpop.f32.mrb[70].mxu0 }
0x123b   : > { %v7069_v50 = vadd.f32 %v11862_v30, %v7068_v3  ;;  %v9745_v12 = vpop.f32.mrb[71].mxu0  ;;  %v9942_v3 = vld [vmem:[#allocation6 + $0x28] sm:$0xff]  }
0x123c   : > { %v9944_v12 = vld [vmem:[#allocation6 + $0x38] sm:$0xff]  }
0x123d   : > { %v7072_v16 = vsel %vm6909_vm14, %v7069_v50, -inf }
0x123e   : > { %7073 = vmax.xlane.f32.xlu1 %v7072_v16 }
0x124f   : > { %7084 = vrot.lane.b32.xlu1 %v11845_v44, %s10415_s24 }
0x1253   : > { %7160 = vrot.lane.b32.xlu1 %v11843_v5, %s10413_s12 }
0x12cb   : > { %v7074_v52 = vpop.xlane.xlu1 %7073 }
0x12cc   : > { %v7075_v23 = vsub.f32 %v7069_v50, %v7074_v52  ;;  %v9943_v50 = vld [vmem:[#allocation6 + $0x30] sm:$0xff]  }
0x12ce   : > { %v7076_v15 = vmul.f32 1.442695, %v7075_v23 }
0x12cf   : > { %v7085_v19 = vpop.permute.xlu1 %7084 }
0x12d0   : > { %10199 = vpow2.f32 %v7076_v15  ;;  %9747 = vmatpush3.msra.mxu0 %v7085_v19 }
0x12d1   : > { %9751 = vmatprep.subr.mxu0 %v12298_v13 }
0x12d3   : > { %v7161_v57 = vpop.permute.xlu1 %7160 }
0x12da   : > { %v10200_v61 = vpop.eup %10199 }
0x12db   : > { %v7078_v33 = vsel %vm6909_vm14, %v10200_v61, 0.0 }
0x12dc   : > { %7079 = vadd.xlane.f32.xlu0 %v7078_v33 }
0x12f2   : > { %7162 = vrot.lane.b32.xlu0 %v11847_v51, %s10413_s12 }
0x1369   : > { %v7080_v40 = vpop.xlane.xlu0 %7079 }
0x136a   : > { %10201 = vrcp.f32 %v7080_v40 }
0x136d   : > { %v7163_v7 = vpop.permute.xlu0 %7162 }
0x1374   : > { %v10202_v60 = vpop.eup %10201 }
0x1375   : > { %v7082_v42 = vmul.f32 %v10202_v60, %v10200_v61 }
0x1377   : > { %9749 = vmatmul.mubr.msk.f32.vlgmr.msra.gmra.mrb[72].mxu0 %vm6909_vm14, %v7082_v42  ;;  %v9947_v42 = vld [vmem:[%s12254_s8 + $0x4] ss:$24 sps:$4 sm:$0xff]  }
0x1378   : > { %9752 = vmatpush3.xpose.msk.msra.mxu0 %vm880_vm1, %v7163_v7  ;;  %9753 = vmatprep.mubr.msk.f32.mxu0 %vm10412_vm0, %v12298_v13  ;;  %v9950_v7 = vld [vmem:[%s12254_s8 + $0xc] ss:$24 sps:$4 sm:$0xff]  }
0x1379   : > { %9756 = vmatprep.subr.mxu0 %v12298_v13 }
0x137b   : > { %9754 = vmatmul.mubr.msk.f32.vlgmr.msra.gmra.mrb[74].mxu0 %vm880_vm1, %v7161_v57  ;;  %v9953_v57 = vld [vmem:[%s12254_s8 + $0x34] ss:$24 sps:$4 sm:$0xff]  }
0x137c   : > { %9758 = vmatprep.mubr.msk.f32.mxu0 %vm10412_vm0, %v12298_v13 }
0x144a   : > { %v7156_v21 = vpop.f32.mrb[72].mxu0 }
0x144b   : > { %v9750_v18 = vpop.f32.mrb[73].mxu0 }
0x144c   : > { %v9951_v18 = vld [vmem:[%s12254_s8 + $0x30] ss:$24 sps:$4 sm:$0xff]  }
0x144e   : > { %v7234_v10 = vpop.f32.mrb[74].mxu0 }
0x144f   : > { %v7235_v24 = vadd.f32 %v11862_v30, %v7234_v10  ;;  %v9755_v58 = vpop.f32.mrb[75].mxu0  ;;  %v9954_v10 = vld [vmem:[%s12254_s8 + $0x38] ss:$24 sps:$4 sm:$0xff]  }
0x1451   : > { %v7238_v32 = vsel %vm6909_vm14, %v7235_v24, -inf }
0x1452   : > { %7239 = vmax.xlane.f32.xlu1 %v7238_v32  ;;  %v12318_v32 = vld [vmem:[#allocation22_spill] sm:$0xff] }
0x1463   : > { %7249 = vrot.lane.b32.xlu1 %v11845_v44, %s10413_s12 }
0x1467   : > { %7325 = vrot.lane.b32.xlu1 %v11843_v5, %s10416_s25 }
0x14df   : > { %v7240_v63 = vpop.xlane.xlu1 %7239 }
0x14e0   : > { %v7241_v1 = vsub.f32 %v7235_v24, %v7240_v63 }
0x14e2   : > { %v7242_v53 = vmul.f32 1.442695, %v7241_v1 }
0x14e3   : > { %v7250_v39 = vpop.permute.xlu1 %7249 }
0x14e4   : > { %10203 = vpow2.f32 %v7242_v53  ;;  %9757 = vmatpush3.msra.mxu0 %v7250_v39 }
0x14e5   : > { %9761 = vmatprep.subr.mxu0 %v12298_v13 }
0x14e7   : > { %v7326_v20 = vpop.permute.xlu1 %7325 }
0x14ee   : > { %v10204_v34 = vpop.eup %10203 }
0x14ef   : > { %v7244_v45 = vsel %vm6909_vm14, %v10204_v34, 0.0 }
0x14f0   : > { %7245 = vadd.xlane.f32.xlu0 %v7244_v45 }
0x1506   : > { %7327 = vrot.lane.b32.xlu0 %v11847_v51, %s10416_s25 }
0x157d   : > { %v7246_v11 = vpop.xlane.xlu0 %7245 }
0x157e   : > { %10205 = vrcp.f32 %v7246_v11 }
0x1581   : > { %v7328_v5 = vpop.permute.xlu0 %7327 }
0x1588   : > { %v10206_v26 = vpop.eup %10205 }
0x1589   : > { %v7248_v37 = vmul.f32 %v10206_v26, %v10204_v34 }
0x158b   : > { %9759 = vmatmul.mubr.msk.f32.vlgmr.msra.gmra.mrb[76].mxu0 %vm6909_vm14, %v7248_v37 }
0x158c   : > { %9762 = vmatpush3.xpose.msk.msra.mxu0 %vm880_vm1, %v7328_v5  ;;  %9763 = vmatprep.mubr.msk.f32.mxu0 %vm10412_vm0, %v12298_v13 }
0x158d   : > { %9766 = vmatprep.subr.mxu0 %v12298_v13 }
0x158f   : > { %9764 = vmatmul.mubr.msk.f32.vlgmr.msra.gmra.mrb[78].mxu0 %vm880_vm1, %v7326_v20 }
0x1590   : > { %9768 = vmatprep.mubr.msk.f32.mxu0 %vm10412_vm0, %v12298_v13 }
0x165e   : > { %v7321_v51 = vpop.f32.mrb[76].mxu0 }
0x165f   : > { %v9760_v41 = vpop.f32.mrb[77].mxu0 }
0x1662   : > { %v7399_v38 = vpop.f32.mrb[78].mxu0 }
0x1663   : > { %v7400_v62 = vadd.f32 %v11862_v30, %v7399_v38  ;;  %v9765_v22 = vpop.f32.mrb[79].mxu0 }
0x1665   : > { %v7403_v6 = vsel %vm6909_vm14, %v7400_v62, -inf }
0x1666   : > { %7404 = vmax.xlane.f32.xlu1 %v7403_v6 }
0x1677   : > { %7414 = vrot.lane.b32.xlu1 %v11845_v44, %s10416_s25  ;;  %v9937_v44 = vld [vmem:[#allocation6] sm:$0xff]  }
0x1678   : > { %9772 = vmatpush3.bf16.msra.mxu1 %v9937_v44 }
0x1679   : > { %9773 = vmatprep.subr.bf16.mxu1 %v12298_v13 }
0x167b   : > { %7495 = vrot.lane.b32.xlu1 %v7321_v51, %s10413_s12 }
0x167c   : > { %9774 = vmatpush3.bf16.msra.mxu1 %v9938_v9 }
0x167d   : > { %9775 = vmatprep.subr.bf16.mxu1 %v12298_v13 }
0x1680   : > { %9776 = vmatpush3.bf16.msra.mxu1 %v9939_v49 }
0x1681   : > { %9777 = vmatprep.subr.bf16.mxu1 %v12298_v13 }
0x1684   : > { %9778 = vmatpush3.bf16.msra.mxu1 %v9940_v29 }
0x1685   : > { %9779 = vmatprep.subr.bf16.mxu1 %v12298_v13 }
0x1688   : > { %9780 = vmatpush3.bf16.msra.mxu1 %v9941_v27 }
0x1689   : > { %9781 = vmatprep.subr.bf16.mxu1 %v12298_v13 }
0x168c   : > { %9782 = vmatpush3.bf16.msra.mxu1 %v9942_v3 }
0x168d   : > { %9783 = vmatprep.subr.bf16.mxu1 %v12298_v13 }
0x1690   : > { %9784 = vmatpush3.bf16.msra.mxu1 %v9943_v50 }
0x1691   : > { %9785 = vmatprep.subr.bf16.mxu1 %v12298_v13  ;;  %v9945_v13 = vld [vmem:[%s12254_s8] ss:$24 sps:$4 sm:$0xff]  }
0x1694   : > { %9786 = vmatpush3.bf16.msra.mxu1 %v9944_v12 }
0x1695   : > { %8203 = vmatprep.subr.bf16.mxu1 %v9950_v7  ;;  %v9977_v7 = vld [vmem:[%s12254_s8 + $0xf4] ss:$24 sps:$4 sm:$0xff]  }
0x16f3   : > { %v7405_v59 = vpop.xlane.xlu1 %7404 }
0x16f4   : > { %v7406_v8 = vsub.f32 %v7400_v62, %v7405_v59 }
0x16f6   : > { %v7407_v48 = vmul.f32 1.442695, %v7406_v8 }
0x16f7   : > { %v7415_v36 = vpop.permute.xlu1 %7414 }
0x16f8   : > { %10207 = vpow2.f32 %v7407_v48  ;;  %9767 = vmatpush3.msra.mxu0 %v7415_v36 }
0x16f9   : > { %8150 = vmatprep.subr.bf16.mxu0 %v9947_v42  ;;  %v9974_v42 = vld [vmem:[%s12254_s8 + $0xcc] ss:$24 sps:$4 sm:$0xff]  }
0x16fb   : > { %v7496_v15 = vpop.permute.xlu1 %7495 }
0x1702   : > { %v10208_v14 = vpop.eup %10207 }
0x1703   : > { %v7409_v31 = vsel %vm6909_vm14, %v10208_v14, 0.0 }
0x1704   : > { %7410 = vadd.xlane.f32.xlu0 %v7409_v31 }
0x171a   : > { %7491 = vrot.lane.b32.xlu0 %v7156_v21, %s10416_s25  ;;  %v9956_v21 = vld [vmem:[%s12254_s8 + $0x3c] ss:$24 sps:$4 sm:$0xff]  }
0x1791   : > { %v7411_v30 = vpop.xlane.xlu0 %7410 }
0x1792   : > { %10209 = vrcp.f32 %v7411_v30 }
0x1795   : > { %v7492_v23 = vpop.permute.xlu0 %7491 }
0x1796   : > { %v7502_v19 = vsel %vm880_vm1, %v11879_v4, %v7492_v23  ;;  %v9948_v4 = vld [vmem:[%s12254_s8 + $0x8] ss:$24 sps:$4 sm:$0xff]   ;;  %v9962_v23 = vld [vmem:[%s12254_s8 + $0x6c] ss:$24 sps:$4 sm:$0xff]  }
0x1797   : > { %v7503_v61 = vsel %vm6140_vm5, %v7502_v19, %v7496_v15  ;;  %v9960_v15 = vld [vmem:[%s12254_s8 + $0x68] ss:$24 sps:$4 sm:$0xff]   ;;  %v9965_v19 = vld [vmem:[%s12254_s8 + $0x94] ss:$24 sps:$4 sm:$0xff]  }
0x179c   : > { %v10210_v55 = vpop.eup %10209 }
0x179d   : > { %v7413_v2 = vmul.f32 %v10210_v55, %v10208_v14 }
0x179f   : > { %9769 = vmatmul.mubr.msk.f32.vlgmr.msra.gmra.mrb[80].mxu0 %vm6909_vm14, %v7413_v2 }
0x17a0   : > { %8182 = vmatprep.mubr.bf16.mxu0 %v12304_v0  ;;  %8151 = vmatpush1.bf16.msra.mxu0 %v9945_v13  ;;  %v9969_v13 = vld [vmem:[%s12254_s8 + $0xc0] ss:$24 sps:$4 sm:$0xff]  }
0x17a1   : > { %8152 = vmatprep.subr.bf16.mxu0 %v9953_v57  ;;  %v9975_v57 = vld [vmem:[%s12254_s8 + $0xf0] ss:$24 sps:$4 sm:$0xff]  }
0x17a4   : > { %8153 = vmatpush1.bf16.msra.mxu0 %v9951_v18  ;;  %v9978_v18 = vld [vmem:[%s12254_s8 + $0xf8] ss:$24 sps:$4 sm:$0xff]  }
0x1872   : > { %v7486_v16 = vpop.f32.mrb[80].mxu0 }
0x1873   : > { %7499 = vrot.lane.b32.xlu1 %v7486_v16, %s10415_s24  ;;  %v9770_v52 = vpop.f32.mrb[81].mxu0 }
0x1874   : > { %v9957_v52 = vld [vmem:[%s12254_s8 + $0x60] ss:$24 sps:$4 sm:$0xff]  }
0x18e5   : > { %v7500_v33 = vpop.permute.xlu1 %7499 }
0x18e6   : > { %v7504_v40 = vsel %vm6149_vm6, %v7503_v61, %v7500_v33  ;;  %v9963_v61 = vld [vmem:[%s12254_s8 + $0x90] ss:$24 sps:$4 sm:$0xff]   ;;  %v9968_v33 = vld [vmem:[%s12254_s8 + $0x9c] ss:$24 sps:$4 sm:$0xff]  }
0x18e7   : > { %v7505_v60 = vpack.c.bf16 %v7504_v40, %v7504_v40  ;;  %v9966_v40 = vld [vmem:[%s12254_s8 + $0x98] ss:$24 sps:$4 sm:$0xff]  }
0x18e9   : > { %9788 = vmatmul.mubr.bf16.vlgmr.msra.gmra.mrb[84].mxu1 %v7505_v60  ;;  %v9971_v60 = vld [vmem:[%s12254_s8 + $0xc4] ss:$24 sps:$4 sm:$0xff]  }
0x18ea   : > { %8235 = vmatprep.mubr.bf16.mxu1 %v12304_v0  ;;  %8204 = vmatpush1.bf16.msra.mxu1 %v9948_v4  ;;  %v9972_v4 = vld [vmem:[%s12254_s8 + $0xc8] ss:$24 sps:$4 sm:$0xff]  }
0x18eb   : > { %8205 = vmatprep.subr.bf16.mxu1 %v9956_v21  ;;  %v9980_v21 = vld [vmem:[%s12254_s8 + $0xfc] ss:$24 sps:$4 sm:$0xff]  }
0x18ee   : > { %8206 = vmatpush1.bf16.msra.mxu1 %v9954_v10  ;;  %v9981_v10 = vld [vmem:[%s12254_s8 + $0x120] ss:$24 sps:$4 sm:$0xff]  }
0x18ef   : > { %8207 = vmatprep.subr.bf16.mxu1 %v9962_v23 }
0x18f2   : > { %8208 = vmatpush1.bf16.msra.mxu1 %v9960_v15 }
0x18f3   : > { %8209 = vmatprep.subr.bf16.mxu1 %v9968_v33 }
0x18f6   : > { %8210 = vmatpush1.bf16.msra.mxu1 %v9966_v40 }
0x18f7   : > { %8211 = vmatprep.subr.bf16.mxu1 %v9974_v42 }
0x18fa   : > { %8212 = vmatpush1.bf16.msra.mxu1 %v9972_v4 }
0x18fb   : > { %8213 = vmatprep.subr.bf16.mxu1 %v9980_v21  ;;  %v9998_v21 = vld [vmem:[%s12254_s8 + $0x44] ss:$24 sps:$4 sm:$0xff]  }
0x18fe   : > { %8214 = vmatpush1.bf16.msra.mxu1 %v9978_v18 }
0x19bc   : > { %v7604_v24 = vpop.f32.mrb[84].mxu1 }
0x19bd   : > { %v7611_v58 = vcombine.high %v7604_v24, %v7604_v24  ;;  %v7618_v63 = vrot.slane %v7604_v24, %v12318_v32  ;;  %v9789_v1 = vpop.f32.mrb[85].mxu1  ;;  %v9983_v24 = vld [vmem:[%s12254_s8 + $0x124] ss:$24 sps:$4 sm:$0xff]  }
0x19be   : > { %v7607_v53 = vpop.f32.mrb[86].mxu1  ;;  %v9992_v1 = vld [vmem:[%s12254_s8 + $0x15c] ss:$24 sps:$4 sm:$0xff]  }
0x19bf   : > { %v7625_v39 = vrot.slane %v7611_v58, %v12318_v32  ;;  %v7626_v34 = vcombine.high %v7618_v63, %v7618_v63  ;;  %v7634_v45 = vrot.slane %v7618_v63, %v12318_v32  ;;  %v9790_v11 = vpop.f32.mrb[87].mxu1  ;;  %v9984_v58 = vld [vmem:[%s12254_s8 + $0x128] ss:$24 sps:$4 sm:$0xff]   ;;  %v9989_v63 = vld [vmem:[%s12254_s8 + $0x154] ss:$24 sps:$4 sm:$0xff]  }
0x19c0   : > { %v9987_v53 = vld [vmem:[%s12254_s8 + $0x150] ss:$24 sps:$4 sm:$0xff]  }
0x19c1   : > { %v7627_v26 = vcombine.high %v7625_v39, %v7625_v39  ;;  %v7641_v37 = vrot.slane %v7625_v39, %v12318_v32  ;;  %v7648_v5 = vrot.slane %v7626_v34, %v12318_v32  ;;  %v7656_v20 = vcombine.high %v7634_v45, %v7634_v45  ;;  %v9990_v39 = vld [vmem:[%s12254_s8 + $0x158] ss:$24 sps:$4 sm:$0xff]   ;;  %v9995_v34 = vld [vmem:[%s12254_s8 + $0x14] ss:$24 sps:$4 sm:$0xff]  }
0x19c2   : > { %v7663_v51 = vrot.slane %v7634_v45, %v10877_v25 }
0x19c3   : > { %v7655_v41 = vrot.slane %v7627_v26, %v12318_v32  ;;  %v7657_v38 = vcombine.high %v7641_v37, %v7641_v37  ;;  %v7658_v62 = vcombine.high %v7648_v5, %v7648_v5  ;;  %v7667_v22 = vrot.slane %v7648_v5, %v10877_v25  ;;  %v9986_v32 = vld [vmem:[%s12254_s8 + $0x12c] ss:$24 sps:$4 sm:$0xff]  }
0x19c4   : > { %v7671_v6 = vrot.slane %v7656_v20, %v10877_v25  ;;  %v7679_v59 = vrot.slane %v7641_v37, %v10877_v25  ;;  %v11974_v8 = vadd.f32 %v7663_v51, %v11731_v35  ;;  %8215 = vmatprep.subr.bf16.mxu1 %v9986_v32  ;;  %v9996_v32 = vld [vmem:[%s12254_s8 + $0x40] ss:$24 sps:$4 sm:$0xff]  }
0x19c5   : > { %v7659_v48 = vcombine.high %v7655_v41, %v7655_v41  ;;  %v7675_v36 = vrot.slane %v7658_v62, %v10877_v25  ;;  %v7683_v14 = vrot.slane %v7655_v41, %v10877_v25  ;;  %v7687_v31 = vrot.slane %v7657_v38, %v10877_v25  ;;  %8216 = vmatpush1.bf16.msra.mxu1 %v9984_v58 }
0x19c6   : > { %v11980_v30 = vadd.f32 %v7667_v22, %v11741_v28  ;;  %v11983_v55 = vadd.f32 %v7671_v6, %v11745_v54  ;;  %v7709_v49 = vmul.f32 %v11974_v8, %v11974_v8  ;;  %v12000_v54 = vadd.f32 %v7679_v59, %v11728_v17  ;;  %8217 = vmatprep.subr.bf16.mxu1 %v9992_v1  ;;  %v9072_v59 = vld [vmem:[%s12249_s3 + $0x2] ss:$0 sm:$0xff] }
0x19c7   : > { %v7691_v2 = vrot.slane %v7659_v48, %v10877_v25  ;;  %v11987_v44 = vadd.f32 %v7675_v36, %v11760_v47  ;;  %v11990_v35 = vadd.f32 %v7687_v31, %v11738_v43  ;;  %v11993_v9 = vadd.f32 %v7683_v14, %v11734_v46  ;;  %v12319_v14 = vld [vmem:[#allocation20_spill] sm:$0xff] }
0x19c8   : > { %v7710_v28 = vmul.f32 %v11980_v30, %v11980_v30  ;;  %v7711_v25 = vmul.f32 %v11983_v55, %v11983_v55  ;;  %v7713_v12 = vmul.f32 %v12000_v54, %v12000_v54 }
0x19c9   : > { %v7712_v47 = vmul.f32 %v11987_v44, %v11987_v44  ;;  %v12007_v43 = vadd.f32 %v7691_v2, %v11753_v56  ;;  %v7715_v27 = vmul.f32 %v11990_v35, %v11990_v35  ;;  %v7714_v17 = vmul.f32 %v11993_v9, %v11993_v9  ;;  %v9959_v56 = vld [vmem:[%s12254_s8 + $0x64] ss:$24 sps:$4 sm:$0xff]   ;;  %8218 = vmatpush1.bf16.msra.mxu1 %v9990_v39  ;;  %v12320_v2 = vld [vmem:[#allocation21_spill] sm:$0xff] }
0x19ca   : > { %v7725_v46 = vcombine.low %v7709_v49, %v7710_v28  ;;  %8154 = vmatprep.subr.bf16.mxu0 %v9959_v56  ;;  %v7834_v28 = vcombine.high %v9072_v59, %v9072_v59  ;;  %v9999_v39 = vld [vmem:[%s12254_s8 + $0x70] ss:$24 sps:$4 sm:$0xff]  }
0x19cb   : > { %v7726_v29 = vcombine.low %v7711_v25, %v7712_v47  ;;  %v7716_v3 = vmul.f32 %v12007_v43, %v12007_v43  ;;  %v7727_v16 = vcombine.low %v7713_v12, %v7714_v17  ;;  %8155 = vmatpush1.bf16.msra.mxu0 %v9957_v52 }
0x19cc   : > { %7733 = vadd.xlane.f32.xlu1 %v7725_v46  ;;  %8156 = vmatprep.subr.bf16.mxu0 %v9965_v19 }
0x19cd   : > { %7735 = vadd.xlane.f32.xlu0 %v7726_v29  ;;  %v7728_v50 = vcombine.low %v7715_v27, %v7716_v3 }
0x19cf   : > { %8157 = vmatpush1.bf16.msra.mxu0 %v9963_v61 }
0x19d0   : > { %7739 = vadd.xlane.f32.xlu1 %v7728_v50  ;;  %8158 = vmatprep.subr.bf16.mxu0 %v9971_v60 }
0x19d1   : > { %7737 = vadd.xlane.f32.xlu0 %v7727_v16 }
0x19d3   : > { %8159 = vmatpush1.bf16.msra.mxu0 %v9969_v13 }
0x19d4   : > { %8160 = vmatprep.subr.bf16.mxu0 %v9977_v7  ;;  %v9993_v7 = vld [vmem:[%s12254_s8 + $0x10] ss:$24 sps:$4 sm:$0xff]  }
0x19d7   : > { %8161 = vmatpush1.bf16.msra.mxu0 %v9975_v57 }
0x19d8   : > { %8162 = vmatprep.subr.bf16.mxu0 %v9983_v24 }
0x19db   : > { %8163 = vmatpush1.bf16.msra.mxu0 %v9981_v10 }
0x19dc   : > { %8164 = vmatprep.subr.bf16.mxu0 %v9989_v63  ;;  %v10001_v63 = vld [vmem:[%s12254_s8 + $0x74] ss:$24 sps:$4 sm:$0xff]  }
0x19df   : > { %8165 = vmatpush1.bf16.msra.mxu0 %v9987_v53 }
0x19e0   : > { %8256 = vmatprep.subr.bf16.mxu0 %v9995_v34 }
0x1a59   : > { %v7734_v45 = vpop.xlane.xlu1 %7733 }
0x1a5a   : > { %v7741_v11 = vmul.f32 0.0078125, %v7734_v45  ;;  %v7736_v26 = vpop.xlane.xlu0 %7735  ;;  %v10004_v45 = vld [vmem:[%s12254_s8 + $0xa4] ss:$24 sps:$4 sm:$0xff]  }
0x1a5b   : > { %v7742_v37 = vmul.f32 0.0078125, %v7736_v26  ;;  %v10007_v26 = vld [vmem:[%s12254_s8 + $0xd4] ss:$24 sps:$4 sm:$0xff]  }
0x1a5c   : > { %v7745_v5 = vadd.f32 1e-05, %v7741_v11  ;;  %v10002_v11 = vld [vmem:[%s12254_s8 + $0xa0] ss:$24 sps:$4 sm:$0xff]  }
0x1a5d   : > { %v7746_v20 = vadd.f32 1e-05, %v7742_v37  ;;  %v7740_v51 = vpop.xlane.xlu1 %7739  ;;  %v10005_v37 = vld [vmem:[%s12254_s8 + $0xd0] ss:$24 sps:$4 sm:$0xff]  }
0x1a5e   : > { %10211 = vrsqrt.f32 %v7745_v5  ;;  %v7744_v41 = vmul.f32 0.0078125, %v7740_v51  ;;  %v7738_v38 = vpop.xlane.xlu0 %7737  ;;  %v10010_v5 = vld [vmem:[%s12254_s8 + $0x104] ss:$24 sps:$4 sm:$0xff]   ;;  %v10013_v51 = vld [vmem:[%s12254_s8 + $0x134] ss:$24 sps:$4 sm:$0xff]  }
0x1a5f   : > { %10213 = vrsqrt.f32 %v7746_v20  ;;  %v7743_v62 = vmul.f32 0.0078125, %v7738_v38  ;;  %v10008_v20 = vld [vmem:[%s12254_s8 + $0x100] ss:$24 sps:$4 sm:$0xff]   ;;  %v10016_v38 = vld [vmem:[%s12254_s8 + $0x164] ss:$24 sps:$4 sm:$0xff]  }
0x1a60   : > { %v7748_v22 = vadd.f32 1e-05, %v7744_v41  ;;  %v10011_v41 = vld [vmem:[%s12254_s8 + $0x130] ss:$24 sps:$4 sm:$0xff]  }
0x1a61   : > { %v7747_v6 = vadd.f32 1e-05, %v7743_v62  ;;  %v10014_v62 = vld [vmem:[%s12254_s8 + $0x160] ss:$24 sps:$4 sm:$0xff]  }
0x1a62   : > { %10215 = vrsqrt.f32 %v7748_v22  ;;  %v10017_v22 = vld [vmem:[#allocation7 + $0x40] sm:$0xff]  }
0x1a63   : > { %10217 = vrsqrt.f32 %v7747_v6  ;;  %v10018_v6 = vld [vmem:[#allocation7] sm:$0xff]   ;;  %9333 = vmatprep.subr.bf16.mxu1 %v10017_v22 }
0x1a68   : > { %v10212_v48 = vpop.eup %10211 }
0x1a69   : > { %v10214_v36 = vpop.eup %10213  ;;  %v7763_v31 = vrot.slane %v10212_v48, %v12319_v14  ;;  %v7770_v49 = vrot.slane %v10212_v48, %v12320_v2  ;;  %v10020_v48 = vld [vmem:[#allocation7 + $0x8] sm:$0xff]  }
0x1a6a   : > { %v7777_v25 = vrot.slane %v10214_v36, %v12319_v14  ;;  %v7784_v47 = vrot.slane %v10214_v36, %v12320_v2  ;;  %v10021_v36 = vld [vmem:[#allocation7 + $0x50] sm:$0xff]  }
0x1a6b   : > { %v7821_v46 = vmul.f32 %v7763_v31, %v11974_v8  ;;  %v7822_v29 = vmul.f32 %v7770_v49, %v11980_v30  ;;  %v10023_v31 = vld [vmem:[#allocation7 + $0x10] sm:$0xff]   ;;  %v10025_v49 = vld [vmem:[#allocation7 + $0x88] sm:$0xff]  }
0x1a6c   : > { %v10216_v27 = vpop.eup %10215  ;;  %v7823_v3 = vmul.f32 %v7777_v25, %v11983_v55  ;;  %v7824_v17 = vmul.f32 %v7784_v47, %v11987_v44  ;;  %v10028_v25 = vld [vmem:[#allocation7 + $0x90] sm:$0xff]   ;;  %v10029_v47 = vld [vmem:[#allocation7 + $0x20] sm:$0xff]  }
0x1a6d   : > { %v10218_v50 = vpop.eup %10217  ;;  %v7805_v12 = vrot.slane %v10216_v27, %v12319_v14  ;;  %v7812_v16 = vrot.slane %v10216_v27, %v12320_v2  ;;  %v7836_v56 = vmul.f32 %v9072_v59, %v7821_v46  ;;  %v7837_v52 = vmul.f32 %v7834_v28, %v7822_v29  ;;  %v10030_v46 = vld [vmem:[#allocation7 + $0x68] sm:$0xff]   ;;  %v10031_v29 = vld [vmem:[#allocation7 + $0x98] sm:$0xff]  }
0x1a6e   : > { %v7791_v23 = vrot.slane %v10218_v50, %v12319_v14  ;;  %v7798_v15 = vrot.slane %v10218_v50, %v12320_v2  ;;  %v7838_v19 = vmul.f32 %v9072_v59, %v7823_v3  ;;  %v7839_v61 = vmul.f32 %v7834_v28, %v7824_v17  ;;  %v10022_v14 = vld [vmem:[#allocation7 + $0x80] sm:$0xff]   ;;  %v10024_v2 = vld [vmem:[#allocation7 + $0x58] sm:$0xff]   ;;  %v10032_v27 = vld [vmem:[#allocation7 + $0x28] sm:$0xff]  }
0x1a6f   : > { %v7852_v33 = vcombine.low %v7836_v56, %v7837_v52  ;;  %v7827_v40 = vmul.f32 %v7805_v12, %v11990_v35  ;;  %v7828_v4 = vmul.f32 %v7812_v16, %v12007_v43  ;;  %v10033_v3 = vld [vmem:[#allocation7 + $0x70] sm:$0xff]   ;;  %v10034_v17 = vld [vmem:[#allocation7 + $0xa0] sm:$0xff]   ;;  %v10036_v12 = vld [vmem:[#allocation7 + $0x78] sm:$0xff]  }
0x1a70   : > { %v7853_v60 = vcombine.low %v7838_v19, %v7839_v61  ;;  %v7825_v13 = vmul.f32 %v7791_v23, %v12000_v54  ;;  %v7826_v42 = vmul.f32 %v7798_v15, %v11993_v9  ;;  %v10035_v50 = vld [vmem:[#allocation7 + $0x30] sm:$0xff]   ;;  %v10037_v16 = vld [vmem:[#allocation7 + $0xa8] sm:$0xff]   ;;  %v10038_v56 = vld [vmem:[#allocation7 + $0x38] sm:$0xff]  }
0x1a71   : > { %v7842_v24 = vmul.f32 %v9072_v59, %v7827_v40  ;;  %v7843_v58 = vmul.f32 %v7834_v28, %v7828_v4  ;;  %v10039_v52 = vld [vmem:[#allocation7 + $0xb0] sm:$0xff]   ;;  %v10040_v23 = vld [vmem:[#allocation7 + $0xb8] sm:$0xff]  }
0x1a72   : > { %v7860_v57 = vpack.c.bf16 %v7853_v60, %v7852_v33  ;;  %v7840_v18 = vmul.f32 %v9072_v59, %v7825_v13  ;;  %v7841_v10 = vmul.f32 %v7834_v28, %v7826_v42  ;;  %v10019_v59 = vld [vmem:[#allocation7 + $0x48] sm:$0xff]   ;;  %v10026_v28 = vld [vmem:[#allocation7 + $0x18] sm:$0xff]  }
0x1a73   : > { %v7855_v53 = vcombine.low %v7842_v24, %v7843_v58 }
0x1a74   : > { %8183 = vmatmul.mubr.bf16.vlgmr.msra.gmra.mrb[84].mxu0 %v7860_v57  ;;  %8236 = vmatmul.mubr.bf16.vlgmr.msra.gmra.mrb[88].mxu1 %v7860_v57  ;;  %v7854_v1 = vcombine.low %v7840_v18, %v7841_v10 }
0x1a75   : > { %8257 = vmatpush1.bf16.msra.mxu0 %v9993_v7  ;;  %8192 = vmatprep.mubr.bf16.mxu0 %v12304_v0 }
0x1a76   : > { %8258 = vmatprep.subr.bf16.mxu0 %v9998_v21  ;;  %8245 = vmatprep.mubr.bf16.mxu1 %v12304_v0  ;;  %v7861_v34 = vpack.c.bf16 %v7855_v53, %v7854_v1 }
0x1a77   : > { %9334 = vmatpush3.bf16.msra.mxu1 %v10018_v6 }
0x1a78   : > { %9335 = vmatprep.subr.bf16.mxu1 %v10019_v59 }
0x1a79   : > { %8259 = vmatpush1.bf16.msra.mxu0 %v9996_v32 }
0x1a7a   : > { %8260 = vmatprep.subr.bf16.mxu0 %v10001_v63 }
0x1a7b   : > { %9336 = vmatpush3.bf16.msra.mxu1 %v10020_v48 }
0x1a7c   : > { %8193 = vmatmul.mubr.bf16.gmra.mrb[88].mxu0 %v7861_v34  ;;  %8246 = vmatmul.mubr.bf16.gmra.mrb[92].mxu1 %v7861_v34 }
0x1a7d   : > { %8261 = vmatpush1.bf16.msra.mxu0 %v9999_v39  ;;  %8288 = vmatprep.mubr.bf16.mxu0 %v12304_v0 }
0x1a7e   : > { %8262 = vmatprep.subr.bf16.mxu0 %v10004_v45  ;;  %9337 = vmatprep.subr.bf16.mxu1 %v10021_v36 }
0x1a7f   : > { %9338 = vmatpush3.bf16.msra.mxu1 %v10023_v31 }
0x1a80   : > { %9339 = vmatprep.subr.bf16.mxu1 %v10024_v2 }
0x1a81   : > { %8263 = vmatpush1.bf16.msra.mxu0 %v10002_v11 }
0x1a82   : > { %8264 = vmatprep.subr.bf16.mxu0 %v10007_v26 }
0x1a83   : > { %9340 = vmatpush3.bf16.msra.mxu1 %v10026_v28 }
0x1a85   : > { %8265 = vmatpush1.bf16.msra.mxu0 %v10005_v37 }
0x1a86   : > { %8266 = vmatprep.subr.bf16.mxu0 %v10010_v5 }
0x1a89   : > { %8267 = vmatpush1.bf16.msra.mxu0 %v10008_v20 }
0x1a8a   : > { %8268 = vmatprep.subr.bf16.mxu0 %v10013_v51 }
0x1a8d   : > { %8269 = vmatpush1.bf16.msra.mxu0 %v10011_v41 }
0x1a8e   : > { %8270 = vmatprep.subr.bf16.mxu0 %v10016_v38 }
0x1a91   : > { %8271 = vmatpush1.bf16.msra.mxu0 %v10014_v62 }
0x1a92   : > { %9791 = vmatprep.subr.bf16.mxu0 %v10022_v14 }
0x1a94   : > { %8289 = vmatmul.mubr.bf16.vlgmr.msra.gmra.mrb[92].mxu0 %v7860_v57 }
0x1a95   : > { %8298 = vmatprep.mubr.bf16.mxu0 %v12304_v0  ;;  %9792 = vmatpush3.bf16.msra.mxu0 %v10022_v14  ;;  %v10027_v0 = vld [vmem:[#allocation7 + $0x60] sm:$0xff]  }
0x1a96   : > { %9793 = vmatprep.subr.bf16.mxu0 %v10025_v49  ;;  %9341 = vmatprep.subr.bf16.mxu1 %v10027_v0 }
0x1a97   : > { %9342 = vmatpush3.bf16.msra.mxu1 %v10029_v47 }
0x1a98   : > { %9343 = vmatprep.subr.bf16.mxu1 %v10030_v46 }
0x1a99   : > { %9794 = vmatpush3.bf16.msra.mxu0 %v10025_v49 }
0x1a9a   : > { %9795 = vmatprep.subr.bf16.mxu0 %v10028_v25 }
0x1a9b   : > { %9344 = vmatpush3.bf16.msra.mxu1 %v10032_v27 }
0x1a9c   : > { %8299 = vmatmul.mubr.bf16.gmra.mrb[96].mxu0 %v7861_v34  ;;  %9345 = vmatprep.subr.bf16.mxu1 %v10033_v3 }
0x1a9d   : > { %9796 = vmatpush3.bf16.msra.mxu0 %v10028_v25 }
0x1a9e   : > { %9797 = vmatprep.subr.bf16.mxu0 %v10031_v29 }
0x1a9f   : > { %9346 = vmatpush3.bf16.msra.mxu1 %v10035_v50 }
0x1aa0   : > { %9347 = vmatprep.subr.bf16.mxu1 %v10036_v12 }
0x1aa1   : > { %9798 = vmatpush3.bf16.msra.mxu0 %v10031_v29 }
0x1aa2   : > { %9799 = vmatprep.subr.bf16.mxu0 %v10034_v17 }
0x1aa3   : > { %9348 = vmatpush3.bf16.msra.mxu1 %v10038_v56 }
0x1aa5   : > { %9800 = vmatpush3.bf16.msra.mxu0 %v10034_v17 }
0x1aa6   : > { %9801 = vmatprep.subr.bf16.mxu0 %v10037_v16 }
0x1aa9   : > { %9802 = vmatpush3.bf16.msra.mxu0 %v10037_v16 }
0x1aaa   : > { %9803 = vmatprep.subr.bf16.mxu0 %v10039_v52 }
0x1aad   : > { %9804 = vmatpush3.bf16.msra.mxu0 %v10039_v52 }
0x1aae   : > { %9805 = vmatprep.subr.bf16.mxu0 %v10040_v23 }
0x1ab1   : > { %9806 = vmatpush3.bf16.msra.mxu0 %v10040_v23 }
0x1b47   : > { %v12160_v15 = vpop.f32.mrb[84].mxu0  ;;  %v12162_v19 = vpop.f32.mrb[88].mxu1 }
0x1b48   : > { %v9121_v61 = vmul.f32 -1.442695, %v12160_v15  ;;  %v9123_v33 = vmul.f32 -1.442695, %v12162_v19  ;;  %v12166_v40 = vpop.f32.mrb[85].mxu0  ;;  %v12168_v60 = vpop.f32.mrb[89].mxu1 }
0x1b49   : > { %v9122_v13 = vmul.f32 -1.442695, %v12166_v40  ;;  %v12171_v42 = vpop.f32.mrb[86].mxu0  ;;  %v12173_v4 = vpop.f32.mrb[90].mxu1 }
0x1b4a   : > { %10219 = vpow2.f32 %v9121_v61  ;;  %v9124_v7 = vmul.f32 -1.442695, %v12171_v42  ;;  %v9126_v57 = vmul.f32 -1.442695, %v12173_v4  ;;  %v12177_v21 = vpop.f32.mrb[87].mxu0  ;;  %v12179_v18 = vpop.f32.mrb[91].mxu1 }
0x1b4b   : > { %10221 = vpow2.f32 %v9123_v33  ;;  %v9125_v10 = vmul.f32 -1.442695, %v12177_v21 }
0x1b4c   : > { %10223 = vpow2.f32 %v9122_v13 }
0x1b4d   : > { %10225 = vpow2.f32 %v9124_v7 }
0x1b4e   : > { %10227 = vpow2.f32 %v9126_v57 }
0x1b4f   : > { %10229 = vpow2.f32 %v9125_v10  ;;  %v12182_v24 = vpop.f32.mrb[88].mxu0  ;;  %v12184_v58 = vpop.f32.mrb[92].mxu1 }
0x1b50   : > { %v9127_v32 = vmul.f32 -1.442695, %v12182_v24  ;;  %v9129_v63 = vmul.f32 -1.442695, %v12184_v58  ;;  %v12188_v1 = vpop.f32.mrb[89].mxu0  ;;  %v12190_v53 = vpop.f32.mrb[93].mxu1 }
0x1b51   : > { %v9128_v39 = vmul.f32 -1.442695, %v12188_v1  ;;  %v12193_v34 = vpop.f32.mrb[90].mxu0  ;;  %v12195_v45 = vpop.f32.mrb[94].mxu1 }
0x1b52   : > { %10231 = vpow2.f32 %v9127_v32  ;;  %v9130_v11 = vmul.f32 -1.442695, %v12193_v34  ;;  %v9132_v26 = vmul.f32 -1.442695, %v12195_v45  ;;  %v12199_v37 = vpop.f32.mrb[91].mxu0  ;;  %v12201_v5 = vpop.f32.mrb[95].mxu1 }
0x1b53   : > { %10233 = vpow2.f32 %v9129_v63  ;;  %v9131_v31 = vmul.f32 -1.442695, %v12199_v37 }
0x1b54   : > { %v10220_v20 = vpop.eup %10219  ;;  %10235 = vpow2.f32 %v9128_v39 }
0x1b55   : > { %v10222_v51 = vpop.eup %10221  ;;  %v8345_v41 = vadd.f32 1.0, %v10220_v20  ;;  %10237 = vpow2.f32 %v9130_v11 }
0x1b56   : > { %v10224_v38 = vpop.eup %10223  ;;  %v8347_v62 = vadd.f32 1.0, %v10222_v51  ;;  %10239 = vpow2.f32 %v9132_v26 }
0x1b57   : > { %v10226_v22 = vpop.eup %10225  ;;  %10241 = vrcp.f32 %v8345_v41  ;;  %v8346_v6 = vadd.f32 1.0, %v10224_v38 }
0x1b58   : > { %v10228_v59 = vpop.eup %10227  ;;  %10243 = vrcp.f32 %v8347_v62  ;;  %v8348_v48 = vadd.f32 1.0, %v10226_v22 }
0x1b59   : > { %v10230_v36 = vpop.eup %10229  ;;  %10245 = vrcp.f32 %v8346_v6  ;;  %v8350_v14 = vadd.f32 1.0, %v10228_v59 }
0x1b5a   : > { %10247 = vrcp.f32 %v8348_v48  ;;  %v8349_v2 = vadd.f32 1.0, %v10230_v36 }
0x1b5b   : > { %10249 = vrcp.f32 %v8350_v14 }
0x1b5c   : > { %v10232_v49 = vpop.eup %10231  ;;  %10251 = vrcp.f32 %v8349_v2 }
0x1b5d   : > { %v10234_v28 = vpop.eup %10233  ;;  %v8351_v0 = vadd.f32 1.0, %v10232_v49  ;;  %10253 = vpow2.f32 %v9131_v31 }
0x1b5e   : > { %v10236_v25 = vpop.eup %10235  ;;  %v8353_v47 = vadd.f32 1.0, %v10234_v28 }
0x1b5f   : > { %v10238_v46 = vpop.eup %10237  ;;  %10255 = vrcp.f32 %v8351_v0  ;;  %v8352_v29 = vadd.f32 1.0, %v10236_v25 }
0x1b60   : > { %v10240_v27 = vpop.eup %10239  ;;  %10257 = vrcp.f32 %v8353_v47  ;;  %v8354_v3 = vadd.f32 1.0, %v10238_v46 }
0x1b61   : > { %v10242_v17 = vpop.eup %10241  ;;  %10259 = vrcp.f32 %v8352_v29  ;;  %v8356_v50 = vadd.f32 1.0, %v10240_v27 }
0x1b62   : > { %v10244_v12 = vpop.eup %10243  ;;  %v8381_v16 = vmul.f32 %v10242_v17, %v12160_v15  ;;  %10261 = vrcp.f32 %v8354_v3 }
0x1b63   : > { %v10246_v56 = vpop.eup %10245  ;;  %10263 = vrcp.f32 %v8356_v50  ;;  %v8383_v10 = vmul.f32 %v10244_v12, %v12162_v19 }
0x1b64   : > { %v10248_v52 = vpop.eup %10247  ;;  %v8393_v23 = vmul.f32 %v8381_v16, %v12168_v60  ;;  %v8382_v7 = vmul.f32 %v10246_v56, %v12166_v40 }
0x1b65   : > { %v10250_v61 = vpop.eup %10249  ;;  %v8384_v33 = vmul.f32 %v10248_v52, %v12171_v42 }
0x1b66   : > { %v10252_v13 = vpop.eup %10251  ;;  %v8386_v60 = vmul.f32 %v10250_v61, %v12173_v4 }
0x1b67   : > { %v10254_v57 = vpop.eup %10253  ;;  %v8396_v32 = vmul.f32 %v8384_v33, %v12179_v18  ;;  %v8290_v63 = vpop.f32.mrb[92].mxu0  ;;  %v8385_v15 = vmul.f32 %v10252_v13, %v12177_v21 }
0x1b68   : > { %v8355_v39 = vadd.f32 1.0, %v10254_v57  ;;  %v8394_v11 = vmul.f32 %v8382_v7, %v8290_v63  ;;  %v8292_v26 = vpop.f32.mrb[93].mxu0 }
0x1b69   : > { %v10256_v20 = vpop.eup %10255  ;;  %v8405_v51 = vpack.c.bf16 %v8396_v32, %v8393_v23  ;;  %v8395_v41 = vmul.f32 %v8383_v10, %v8292_v26  ;;  %v8294_v42 = vpop.f32.mrb[94].mxu0 }
0x1b6a   : > { %v10258_v38 = vpop.eup %10257  ;;  %v8387_v40 = vmul.f32 %v10256_v20, %v12182_v24  ;;  %10265 = vrcp.f32 %v8355_v39  ;;  %v8397_v62 = vmul.f32 %v8385_v15, %v8294_v42  ;;  %v8296_v19 = vpop.f32.mrb[95].mxu0 }
0x1b6b   : > { %v10260_v22 = vpop.eup %10259  ;;  %v8398_v18 = vmul.f32 %v8386_v60, %v8296_v19  ;;  %v8389_v31 = vmul.f32 %v10258_v38, %v12184_v58 }
0x1b6c   : > { %v10262_v6 = vpop.eup %10261  ;;  %v8399_v21 = vmul.f32 %v8387_v40, %v12190_v53  ;;  %v8406_v59 = vpack.c.bf16 %v8397_v62, %v8394_v11  ;;  %v8388_v4 = vmul.f32 %v10260_v22, %v12188_v1 }
0x1b6d   : > { %v8390_v48 = vmul.f32 %v10262_v6, %v12193_v34  ;;  %v8407_v36 = vpack.c.bf16 %v8398_v18, %v8395_v41  ;;  %v10264_v14 = vpop.eup %10263 }
0x1b6e   : > { %8635 = vmatprep.mubr.bf16.mxu1 %v8406_v59  ;;  %v8392_v0 = vmul.f32 %v10264_v14, %v12195_v45 }
0x1b6f   : > { %v8402_v24 = vmul.f32 %v8390_v48, %v12201_v5  ;;  %v8300_v2 = vpop.f32.mrb[96].mxu0  ;;  %8636 = vmatmul.mubr.bf16.vlgmr.msra.gmra.mrb[96].mxu1 %v8405_v51  ;;  %9807 = vmatprep.mubr.bf16.mxu0 %v8407_v36 }
0x1b70   : > { %v8400_v49 = vmul.f32 %v8388_v4, %v8300_v2  ;;  %v8302_v28 = vpop.f32.mrb[97].mxu0 }
0x1b71   : > { %v8408_v53 = vpack.c.bf16 %v8402_v24, %v8399_v21  ;;  %v8401_v25 = vmul.f32 %v8389_v31, %v8302_v28  ;;  %v8304_v47 = vpop.f32.mrb[98].mxu0 }
0x1b72   : > { %v8306_v34 = vpop.f32.mrb[99].mxu0 }
0x1b73   : > { %v8404_v46 = vmul.f32 %v8392_v0, %v8306_v34 }
0x1b74   : > { %v10266_v29 = vpop.eup %10265 }
0x1b75   : > { %v8391_v1 = vmul.f32 %v10266_v29, %v12199_v37  ;;  %v8410_v27 = vpack.c.bf16 %v8404_v46, %v8401_v25 }
0x1b77   : > { %v8403_v3 = vmul.f32 %v8391_v1, %v8304_v47  ;;  %9808 = vmatmul.mubr.bf16.vlgmr.msra.gmra.mrb[100].mxu0 %v8410_v27 }
0x1b79   : > { %v8409_v58 = vpack.c.bf16 %v8403_v3, %v8400_v49 }
0x1b7b   : > { %8643 = vmatprep.mubr.bf16.mxu1 %v8409_v58 }
0x1b7c   : > { %8644 = vmatmul.mubr.bf16.gmra.mrb[100].mxu1 %v8408_v53 }
0x1c42   : > { %v9349_v5 = vpop.f32.mrb[96].mxu1 }
0x1c43   : > { %v9350_v17 = vpop.f32.mrb[97].mxu1 }
0x1c44   : > { %v9351_v50 = vadd.f32 %v9350_v17, %v9349_v5  ;;  %v9352_v12 = vpop.f32.mrb[98].mxu1 }
0x1c45   : > { %v9353_v45 = vpop.f32.mrb[99].mxu1 }
0x1c46   : > { %v9354_v16 = vadd.f32 %v9353_v45, %v9352_v12 }
0x1c4a   : > { %v9809_v56 = vpop.f32.mrb[100].mxu0 }
0x1c4b   : > { %v8686_v52 = vpop.f32.mrb[101].mxu0 }
0x1c4c   : > { %v8687_v23 = vadd.f32 %v9351_v50, %v8686_v52  ;;  %v9810_v61 = vpop.f32.mrb[102].mxu0 }
0x1c4d   : > { %v8689_v33 = vpop.f32.mrb[103].mxu0 }
0x1c4e   : > { %v8705_v13 = vcombine.high %v8687_v23, %v8687_v23  ;;  %v8713_v37 = vadd.f32 %v8687_v23, %v11974_v8  ;;  %v8690_v7 = vadd.f32 %v9354_v16, %v8689_v33 }
0x1c4f   : > { %v9355_v57 = vpop.f32.mrb[100].mxu1 }
0x1c50   : > { %v9356_v10 = vpop.f32.mrb[101].mxu1  ;;  %v8714_v32 = vadd.f32 %v8705_v13, %v11980_v30  ;;  %v8721_v63 = vpack.c.bf16 %v8713_v37, %v8713_v37  ;;  %v8706_v15 = vcombine.high %v8690_v7, %v8690_v7  ;;  %v8715_v39 = vadd.f32 %v8690_v7, %v11983_v55 }
0x1c51   : > { %v9357_v8 = vadd.f32 %v9356_v10, %v9355_v57  ;;  %v9358_v11 = vpop.f32.mrb[102].mxu1 }
0x1c52   : > { %v8722_v26 = vpack.c.bf16 %v8714_v32, %v8714_v32  ;;  %8729 = vst [vmem:[%s12226_s30] sm:$0x3] %v8721_v63  ;;  %v9359_v20 = vpop.f32.mrb[103].mxu1  ;;  %v8716_v60 = vadd.f32 %v8706_v15, %v11987_v44  ;;  %v8723_v51 = vpack.c.bf16 %v8715_v39, %v8715_v39 }
0x1c53   : > { %v8695_v41 = vadd.f32 %v9809_v56, %v9357_v8  ;;  %v9360_v42 = vadd.f32 %v9359_v20, %v9358_v11 }
0x1c54   : > { %8730 = vst [vmem:[%s12226_s30 + $0x2] sm:$0x3] %v8722_v26  ;;  %v8724_v38 = vpack.c.bf16 %v8716_v60, %v8716_v60  ;;  %8731 = vst [vmem:[%s12226_s30 + $0x4] sm:$0x3] %v8723_v51 }
0x1c55   : > { %v8707_v30 = vcombine.high %v8695_v41, %v8695_v41  ;;  %v8717_v55 = vadd.f32 %v8695_v41, %v12000_v54  ;;  %v8698_v40 = vadd.f32 %v9810_v61, %v9360_v42 }
0x1c56   : > { %8732 = vst [vmem:[%s12226_s30 + $0x6] sm:$0x3] %v8724_v38 }
0x1c57   : > { %v8718_v62 = vadd.f32 %v8707_v30, %v11993_v9  ;;  %v8725_v19 = vpack.c.bf16 %v8717_v55, %v8717_v55  ;;  %v8708_v22 = vcombine.high %v8698_v40, %v8698_v40  ;;  %v8719_v44 = vadd.f32 %v8698_v40, %v11990_v35 }
0x1c59   : > { %v8726_v18 = vpack.c.bf16 %v8718_v62, %v8718_v62  ;;  %8733 = vst [vmem:[%s12226_s30 + $0x8] sm:$0x3] %v8725_v19  ;;  %v8720_v6 = vadd.f32 %v8708_v22, %v12007_v43  ;;  %v8727_v21 = vpack.c.bf16 %v8719_v44, %v8719_v44 }
0x1c5b   : > { %8734 = vst [vmem:[%s12226_s30 + $0xa] sm:$0x3] %v8726_v18  ;;  %v8728_v59 = vpack.c.bf16 %v8720_v6, %v8720_v6  ;;  %8735 = vst [vmem:[%s12226_s30 + $0xc] sm:$0x3] %v8727_v21 }
0x1c5d   : > { %8736 = vst [vmem:[%s12226_s30 + $0xe] sm:$0x3] %v8728_v59 }
0x1c5e PF: > { %s23_s13 = sadd.s32 1, %s10398_s13  }
0x1c5f   : > { %p20_p1 = scmp.ge.s32.totalorder %s23_s13, 4  }
0x1c61   :  { %22 = sbr.rel (!%p20_p1) target bundleno = 3 (0x3), region = 113 }
0x1c68   :  { %8758 = vsyncpa [#allocation3], 1 }
0x1c69   :  { %8760 = vsyncpa [#allocation3 + $0x1], 1 }
0x1c6a   :  { %8761 = vsyncpa [#allocation5], 1 }
0x1c6b   :  { %8762 = vsyncpa [#allocation8], 1 }

</bundles_post_ra>
